<compile_context>
chip_gen: v5e
topology: v5e:2x2
jax: 0.10.0
libtpu: 0.0.40
codegen_flags: <defaults>
</compile_context>

<pallas_src>
import functools

import jax
import jax.numpy as jnp
from jax.experimental import pallas as pl
from jax.experimental.pallas import tpu as pltpu


# ----------------------------- Pallas kernels --------------------------------

def _upconv_kernel(a_ref, w_ref, b_ref, o_ref):
    """(tm, Cin) @ (Cin, 4*Cout) on the MXU (bf16 operands, f32 acc) + fused bias."""
    acc = jnp.dot(a_ref[...], w_ref[...], preferred_element_type=jnp.float32)
    o_ref[...] = (acc + b_ref[...]).astype(o_ref.dtype)


def _stage_kernel(x_ref, w1_ref, sh1_ref, w2_ref, sh2_ref, mask_ref,
                  o_ref, h1p_ref, *, wp8, hband):
    """Fused DoubleConv for one image (one grid step per batch element).

    x_ref is the zero-padded, row-major-flattened NHWC concat([skip, up]) slab of
    shape ((H+4)*wp8, 2*Cin): H padded by (2,2) (conv halo + guard row), W padded
    on the left by 1 and on the right up to wp8 = round_up(W+2, 8).  A 3x3 conv is
    then 9 shifted contiguous row-slices, each one (hband, 2*Cin) x (2*Cin, Cmid)
    MXU dot.  conv1's output never touches HBM: it is re-staged (masked, bf16)
    into a zero-halo VMEM scratch and consumed by conv2.
    """
    c_mid = w1_ref.shape[2]
    c_out = w2_ref.shape[2]

    # ---- conv1 (on concat[skip, up]) + BN1 + ReLU ---------------------------
    # TODO(synk): pre-materialize the dw in {-1,0,+1} shifted slab copies (pltpu.roll)
    # so all 9 tap loads are sublane-aligned; today only the dw==1 column is.
    acc = jnp.zeros((hband, c_mid), jnp.float32)
    for dh in range(3):
        for dw in range(3):
            s = (dh + 1) * wp8 + dw - 1                      # static offsets
            acc += jnp.dot(x_ref[s:s + hband, :], w1_ref[dh * 3 + dw],
                           preferred_element_type=jnp.float32)
    # The mask is load-bearing here: conv2 reads the W-halo columns of h1.
    h1 = jnp.maximum(acc + sh1_ref[...], 0.0) * mask_ref[...]

    # ---- stage h1 into a bf16 zero-halo VMEM scratch for conv2 --------------
    # Only the 2*wp8 guard/halo rows at each end are zeroed; doing it every step
    # (instead of once) keeps this correct when the batch axis is core-sharded,
    # and it is only 4*wp8 rows of store traffic.
    z = jnp.zeros((2 * wp8, c_mid), h1p_ref.dtype)
    h1p_ref[0:2 * wp8, :] = z
    h1p_ref[hband + 2 * wp8:hband + 4 * wp8, :] = z
    h1p_ref[2 * wp8:2 * wp8 + hband, :] = h1.astype(h1p_ref.dtype)  # aligned store

    # ---- conv2 + BN2 + ReLU ---------------------------------------------------
    acc2 = jnp.zeros((hband, c_out), jnp.float32)
    for dh in range(3):
        for dw in range(3):
            s = (dh + 1) * wp8 + dw - 1
            acc2 += jnp.dot(h1p_ref[s:s + hband, :], w2_ref[dh * 3 + dw],
                            preferred_element_type=jnp.float32)
    # No output-side mask: the wrapper strips the W-halo columns.
    o_ref[...] = jnp.maximum(acc2 + sh2_ref[...], 0.0).astype(o_ref.dtype)


# ------------------------------ layer wrappers --------------------------------

def _round_up(x, m):
    return -(-x // m) * m


def _pick_tm(m, cap=512):
    """Row tile for the upconv GEMM: multiple of 8, <=cap, >=2 grid steps when possible."""
    if m <= 8:
        return 8
    return min(cap, _round_up(-(-m // 2), 8))


def upconv2x2(x_nhwc, w, b):
    """PyTorch ConvTranspose2d(Cin, Cout, kernel_size=2, stride=2) in NHWC, bf16 out.

    x_nhwc: (B, H, W, Cin); w: (Cin, Cout, 2, 2); b: (Cout,).
    Returns (B, 2H, 2W, Cout) bfloat16.
    """
    B, H, W, Cin = x_nhwc.shape
    Cout = w.shape[1]
    n4 = 4 * Cout
    m = B * H * W
    tm = _pick_tm(m)
    mp = _round_up(m, tm)

    a = x_nhwc.reshape(m, Cin).astype(jnp.bfloat16)
    if mp != m:
        a = jnp.pad(a, ((0, mp - m), (0, 0)))
    # column order (kh, kw, cf) so the pixel-shuffle below is a plain reshape/transpose
    wm = jnp.transpose(w, (0, 2, 3, 1)).reshape(Cin, n4).astype(jnp.bfloat16)
    bias = jnp.tile(b, 4).reshape(1, n4).astype(jnp.float32)

    out = pl.pallas_call(
        _upconv_kernel,
        out_shape=jax.ShapeDtypeStruct((mp, n4), jnp.bfloat16),
        grid_spec=pltpu.PrefetchScalarGridSpec(
            num_scalar_prefetch=0,
            grid=(mp // tm,),
            in_specs=[
                pl.BlockSpec((tm, Cin), lambda i: (i, 0)),   # A row tiles (pipelined)
                pl.BlockSpec((Cin, n4), lambda i: (0, 0)),   # full weight matrix
                pl.BlockSpec((1, n4), lambda i: (0, 0)),     # bias
            ],
            out_specs=pl.BlockSpec((tm, n4), lambda i: (i, 0)),
        ),
        compiler_params=pltpu.CompilerParams(dimension_semantics=("parallel",)),
    )(a, wm, bias)

    u = out[:m].reshape(B, H, W, 2, 2, Cout)
    # TODO(synk): fold this 2x2 pixel-shuffle into the upconv out_spec (write the
    # (kh,kw) column groups straight to rows (2y+kh, 2x+kw)) to drop one HBM pass.
    return jnp.transpose(u, (0, 1, 3, 2, 4, 5)).reshape(B, 2 * H, 2 * W, Cout)


def _fold_bn(w, bn, eps=1e-5):
    """Fold BN scale into conv weights.  w: (Cout, Cin, 3, 3) torch layout.

    Returns tap-major weights (9, Cin, Cout) bf16 and BN shift (1, Cout) f32.
    """
    scale = bn["gamma"] * jax.lax.rsqrt(bn["var"] + eps)
    shift = (bn["beta"] - bn["mean"] * scale).reshape(1, -1).astype(jnp.float32)
    ws = w * scale[:, None, None, None]
    wt = jnp.transpose(ws, (2, 3, 1, 0)).reshape(9, w.shape[1], w.shape[0])
    return wt.astype(jnp.bfloat16), shift


def double_conv_stage(skip_nhwc, up_nhwc, w1t, sh1, w2t, sh2):
    """Fused DoubleConv (conv3x3+BN+ReLU x2) applied to concat([skip, up], channels)."""
    B, H, W, _ = skip_nhwc.shape
    c_in2 = w1t.shape[1]
    c_mid = w1t.shape[2]
    c_out = w2t.shape[2]
    wp8 = _round_up(W + 2, 8)            # 8-aligned padded row stride
    hband = H * wp8
    f4 = (H + 4) * wp8

    # channel concat (matches torch.cat((skip, x), dim=1)); XLA fuses it with the
    # zero-pad / flatten into a single bf16 relayout pass.
    x = jnp.concatenate([skip_nhwc, up_nhwc], axis=-1).astype(jnp.bfloat16)
    xp = jnp.pad(x, ((0, 0), (2, 2), (1, wp8 - W - 1), (0, 0)))
    slab = xp.reshape(B, f4, c_in2)

    col = jnp.arange(hband, dtype=jnp.int32) % wp8
    mask = ((col >= 1) & (col <= W)).astype(jnp.float32).reshape(hband, 1)

    # TODO(synk): at realistic UNet sizes add a row-band grid axis (1-row halo) so
    # per-step VMEM is bounded on v7x (64 MiB) and the unrolled accumulator stays
    # in the vreg file; at these toy shapes whole-image-per-step is fine.
    band = pl.pallas_call(
        functools.partial(_stage_kernel, wp8=wp8, hband=hband),
        out_shape=jax.ShapeDtypeStruct((B, hband, c_out), jnp.bfloat16),
        grid_spec=pltpu.PrefetchScalarGridSpec(
            num_scalar_prefetch=0,
            grid=(B,),                                   # one image per grid step
            in_specs=[
                pl.BlockSpec((None, f4, c_in2), lambda b: (b, 0, 0)),
                pl.BlockSpec(w1t.shape, lambda b: (0, 0, 0)),
                pl.BlockSpec(sh1.shape, lambda b: (0, 0)),
                pl.BlockSpec(w2t.shape, lambda b: (0, 0, 0)),
                pl.BlockSpec(sh2.shape, lambda b: (0, 0)),
                pl.BlockSpec(mask.shape, lambda b: (0, 0)),
            ],
            out_specs=pl.BlockSpec((None, hband, c_out), lambda b: (b, 0, 0)),
            scratch_shapes=[pltpu.VMEM((f4, c_mid), jnp.bfloat16)],  # conv1 out, padded
        ),
        compiler_params=pltpu.CompilerParams(dimension_semantics=("parallel",)),
    )(slab, w1t, sh1, w2t, sh2, mask)

    # TODO(synk): lane-dense output packing (wp8*c_out in the lane dim) would help at
    # these tiny channel widths; left to the wrapper strip below for robustness.
    return band.reshape(B, H, wp8, c_out)[:, :, 1:1 + W, :]


def bilinear_align_corners_nhwc(x, out_hw):
    """F.interpolate(mode='bilinear', align_corners=True), NHWC, plain JAX."""
    # TODO(synk): never triggered for even spatial sizes; kept in JAX, not Pallas.
    B, H, W, C = x.shape
    Ho, Wo = out_hw

    def coords(n_out, n_in):
        if n_out == 1:
            return jnp.zeros((1,), jnp.float32)
        return jnp.arange(n_out, dtype=jnp.float32) * (n_in - 1) / (n_out - 1)

    ys, xs = coords(Ho, H), coords(Wo, W)
    y0 = jnp.clip(jnp.floor(ys).astype(jnp.int32), 0, H - 1)
    y1 = jnp.clip(y0 + 1, 0, H - 1)
    x0 = jnp.clip(jnp.floor(xs).astype(jnp.int32), 0, W - 1)
    x1 = jnp.clip(x0 + 1, 0, W - 1)
    wy = (ys - y0.astype(jnp.float32))[None, :, None, None]
    wx = (xs - x0.astype(jnp.float32))[None, None, :, None]
    xf = x.astype(jnp.float32)
    g = lambda yi, xi: xf[:, yi, :, :][:, :, xi, :]
    top = g(y0, x0) * (1 - wx) + g(y0, x1) * wx
    bot = g(y1, x0) * (1 - wx) + g(y1, x1) * wx
    return (top * (1 - wy) + bot * wy).astype(x.dtype)


# --------------------------- params + forward pass ----------------------------

def init_decoder_params(key, features):
    params = []
    for feature in reversed(features):
        cin_up = feature * 2
        key, k1, k2, k3, k4, k5, k6, k7, k8 = jax.random.split(key, 9)
        p = {
            "up_w": jax.random.normal(k1, (cin_up, feature, 2, 2), jnp.float32) * 0.1,
            "up_b": jax.random.normal(k2, (feature,), jnp.float32) * 0.1,
            "c1_w": jax.random.normal(k3, (feature, feature * 2, 3, 3), jnp.float32) * 0.1,
            "c2_w": jax.random.normal(k4, (feature, feature, 3, 3), jnp.float32) * 0.1,
            "bn1": {
                "gamma": 1.0 + 0.1 * jax.random.normal(k5, (feature,), jnp.float32),
                "beta": 0.1 * jax.random.normal(k6, (feature,), jnp.float32),
                "mean": jnp.zeros((feature,), jnp.float32),
                "var": jnp.ones((feature,), jnp.float32),
            },
            "bn2": {
                "gamma": 1.0 + 0.1 * jax.random.normal(k7, (feature,), jnp.float32),
                "beta": 0.1 * jax.random.normal(k8, (feature,), jnp.float32),
                "mean": jnp.zeros((feature,), jnp.float32),
                "var": jnp.ones((feature,), jnp.float32),
            },
        }
        params.append(p)
    return params


@jax.jit
def decoder_forward(params, x, skip_connections):
    skips = skip_connections[::-1]
    # NCHW -> NHWC once at entry; activations stay bf16 between kernels.
    h = jnp.transpose(x, (0, 2, 3, 1)).astype(jnp.bfloat16)
    for idx, p in enumerate(params):
        u = upconv2x2(h, p["up_w"], p["up_b"])                # (B, 2H, 2W, feature) bf16
        skip = jnp.transpose(skips[idx], (0, 2, 3, 1)).astype(jnp.bfloat16)
        if u.shape[:3] != skip.shape[:3]:
            u = bilinear_align_corners_nhwc(u, skip.shape[1:3])

        w1t, sh1 = _fold_bn(p["c1_w"], p["bn1"])               # (9, 2*feature, feature)
        w2t, sh2 = _fold_bn(p["c2_w"], p["bn2"])               # (9, feature, feature)
        h = double_conv_stage(skip, u, w1t, sh1, w2t, sh2)
    # NHWC -> NCHW once at exit; f32 to match the PyTorch interface.
    return jnp.transpose(h, (0, 3, 1, 2)).astype(jnp.float32)


# ------------------------------------ main -------------------------------------

if __name__ == "__main__":
    features = [4, 8]          # UNet encoder widths; decoder processes reversed([4, 8])
    B = 2

    key = jax.random.PRNGKey(0)
    key, kx, ks0, ks1, kp = jax.random.split(key, 5)

    # Bottleneck: (B, features[-1]*2, 4, 4); skips from encoder (shallow -> deep), NCHW.
    x = jax.random.normal(kx, (B, features[-1] * 2, 4, 4), jnp.float32)
    skip_connections = [
        jax.random.normal(ks0, (B, features[0], 16, 16), jnp.float32),
        jax.random.normal(ks1, (B, features[1], 8, 8), jnp.float32),
    ]

    params = init_decoder_params(kp, features)

    out = decoder_forward(params, x, skip_connections)
    out = jax.block_until_ready(out)
    assert out.shape == (B, features[0], 16, 16), out.shape
    assert jnp.all(jnp.isfinite(out))
    print("KERNEL_OK")
</pallas_src>

<mosaic_0001>
module attributes {stable_mosaic.version = 11 : i64} {
  func.func @_upconv_kernel(%arg0: i32, %arg1: memref<16x16xbf16, #tpu.memory_space<vmem>>, %arg2: memref<16x32xbf16, #tpu.memory_space<vmem>>, %arg3: memref<1x32xf32, #tpu.memory_space<vmem>>, %arg4: memref<16x32xbf16, #tpu.memory_space<vmem>>) attributes {dimension_semantics = [#tpu.dimension_semantics<parallel>], iteration_bounds = array<i64: 2>, scalar_prefetch = 0 : i64, scratch_operands = 0 : i64, tpu.core_type = #tpu.core_type<tc>, window_params = [{transform_indices = @transform_0, window_bounds = array<i64: 16, 16>}, {pipeline_mode = #tpu.pipeline_mode<synchronous>, transform_indices = @transform_1, window_bounds = array<i64: 16, 32>}, {pipeline_mode = #tpu.pipeline_mode<synchronous>, transform_indices = @transform_2, window_bounds = array<i64: 1, 32>}, {transform_indices = @transform_3, window_bounds = array<i64: 16, 32>}]} {
    %c0 = arith.constant 0 : index
    %c0_0 = arith.constant 0 : index
    %0 = vector.load %arg1[%c0, %c0_0] : memref<16x16xbf16, #tpu.memory_space<vmem>>, vector<16x16xbf16>
    %c0_1 = arith.constant 0 : index
    %c0_2 = arith.constant 0 : index
    %1 = vector.load %arg2[%c0_1, %c0_2] : memref<16x32xbf16, #tpu.memory_space<vmem>>, vector<16x32xbf16>
    %cst = arith.constant dense<0.000000e+00> : vector<16x32xf32>
    %2 = tpu.matmul %0, %1, %cst {dimension_numbers = #tpu.dot_dimension_numbers<[1], [0], [0], [1], [0, 0, 1, 1], [], []>} : vector<16x16xbf16>, vector<16x32xbf16>, vector<16x32xf32> -> vector<16x32xf32>
    %c0_3 = arith.constant 0 : index
    %c0_4 = arith.constant 0 : index
    %3 = vector.load %arg3[%c0_3, %c0_4] : memref<1x32xf32, #tpu.memory_space<vmem>>, vector<1x32xf32>
    %4 = vector.broadcast %3 : vector<1x32xf32> to vector<16x32xf32>
    %5 = arith.addf %2, %4 : vector<16x32xf32>
    %6 = arith.truncf %5 : vector<16x32xf32> to vector<16x32xbf16>
    %c0_5 = arith.constant 0 : index
    %c0_6 = arith.constant 0 : index
    %7 = vector.load %arg4[%c0_5, %c0_6] : memref<16x32xbf16, #tpu.memory_space<vmem>>, vector<16x32xbf16>
    tpu.vector_store %arg4[%c0_5, %c0_6], %6 {strides = array<i32>} : memref<16x32xbf16, #tpu.memory_space<vmem>>, vector<16x32xbf16>,
    return
  }
  func.func @transform_0(%arg0: i32) -> (i32, i32) {
    %c0_i32 = arith.constant 0 : i32
    %c0_i32_0 = arith.constant 0 : i32
    return %arg0, %c0_i32 : i32, i32
  }
  func.func @transform_1(%arg0: i32) -> (i32, i32) {
    %c0_i32 = arith.constant 0 : i32
    %c0_i32_0 = arith.constant 0 : i32
    %c0_i32_1 = arith.constant 0 : i32
    return %c0_i32, %c0_i32_0 : i32, i32
  }
  func.func @transform_2(%arg0: i32) -> (i32, i32) {
    %c0_i32 = arith.constant 0 : i32
    %c0_i32_0 = arith.constant 0 : i32
    %c0_i32_1 = arith.constant 0 : i32
    return %c0_i32, %c0_i32_0 : i32, i32
  }
  func.func @transform_3(%arg0: i32) -> (i32, i32) {
    %c0_i32 = arith.constant 0 : i32
    %c0_i32_0 = arith.constant 0 : i32
    return %arg0, %c0_i32 : i32, i32
  }
}

module attributes {stable_mosaic.version = 11 : i64} {
  func.func @_stage_kernel(%arg0: i32, %arg1: memref<1x192x16xbf16, #tpu.memory_space<vmem>>, %arg2: memref<9x16x8xbf16, #tpu.memory_space<vmem>>, %arg3: memref<1x8xf32, #tpu.memory_space<vmem>>, %arg4: memref<9x8x8xbf16, #tpu.memory_space<vmem>>, %arg5: memref<1x8xf32, #tpu.memory_space<vmem>>, %arg6: memref<128x1xf32, #tpu.memory_space<vmem>>, %arg7: memref<1x128x8xbf16, #tpu.memory_space<vmem>>, %arg8: memref<192x8xbf16, #tpu.memory_space<vmem>>) attributes {dimension_semantics = [#tpu.dimension_semantics<parallel>], iteration_bounds = array<i64: 2>, scalar_prefetch = 0 : i64, scratch_operands = 1 : i64, tpu.core_type = #tpu.core_type<tc>, window_params = [{transform_indices = @transform_0, window_bounds = array<i64: 1, 192, 16>}, {pipeline_mode = #tpu.pipeline_mode<synchronous>, transform_indices = @transform_1, window_bounds = array<i64: 9, 16, 8>}, {pipeline_mode = #tpu.pipeline_mode<synchronous>, transform_indices = @transform_2, window_bounds = array<i64: 1, 8>}, {pipeline_mode = #tpu.pipeline_mode<synchronous>, transform_indices = @transform_3, window_bounds = array<i64: 9, 8, 8>}, {pipeline_mode = #tpu.pipeline_mode<synchronous>, transform_indices = @transform_4, window_bounds = array<i64: 1, 8>}, {pipeline_mode = #tpu.pipeline_mode<synchronous>, transform_indices = @transform_5, window_bounds = array<i64: 128, 1>}, {transform_indices = @transform_6, window_bounds = array<i64: 1, 128, 8>}]} {
    %cst = arith.constant 0.000000e+00 : f32
    %0 = vector.broadcast %cst : f32 to vector<128x8xf32>
    %c0 = arith.constant 0 : index
    %c15 = arith.constant 15 : index
    %c0_0 = arith.constant 0 : index
    %1 = vector.load %arg1[%c0, %c15, %c0_0] : memref<1x192x16xbf16, #tpu.memory_space<vmem>>, vector<1x128x16xbf16>
    %2 = vector.shape_cast %1 : vector<1x128x16xbf16> to vector<128x16xbf16>
    %c0_1 = arith.constant 0 : index
    %c0_2 = arith.constant 0 : index
    %c0_3 = arith.constant 0 : index
    %3 = vector.load %arg2[%c0_1, %c0_2, %c0_3] : memref<9x16x8xbf16, #tpu.memory_space<vmem>>, vector<1x16x8xbf16>
    %4 = vector.shape_cast %3 : vector<1x16x8xbf16> to vector<16x8xbf16>
    %cst_4 = arith.constant dense<0.000000e+00> : vector<128x8xf32>
    %5 = tpu.matmul %2, %4, %cst_4 {dimension_numbers = #tpu.dot_dimension_numbers<[1], [0], [0], [1], [0, 0, 1, 1], [], []>} : vector<128x16xbf16>, vector<16x8xbf16>, vector<128x8xf32> -> vector<128x8xf32>
    %6 = arith.addf %0, %5 : vector<128x8xf32>
    %c0_5 = arith.constant 0 : index
    %c16 = arith.constant 16 : index
    %c0_6 = arith.constant 0 : index
    %7 = vector.load %arg1[%c0_5, %c16, %c0_6] : memref<1x192x16xbf16, #tpu.memory_space<vmem>>, vector<1x128x16xbf16>
    %8 = vector.shape_cast %7 : vector<1x128x16xbf16> to vector<128x16xbf16>
    %c1 = arith.constant 1 : index
    %c0_7 = arith.constant 0 : index
    %c0_8 = arith.constant 0 : index
    %9 = vector.load %arg2[%c1, %c0_7, %c0_8] : memref<9x16x8xbf16, #tpu.memory_space<vmem>>, vector<1x16x8xbf16>
    %10 = vector.shape_cast %9 : vector<1x16x8xbf16> to vector<16x8xbf16>
    %cst_9 = arith.constant dense<0.000000e+00> : vector<128x8xf32>
    %11 = tpu.matmul %8, %10, %cst_9 {dimension_numbers = #tpu.dot_dimension_numbers<[1], [0], [0], [1], [0, 0, 1, 1], [], []>} : vector<128x16xbf16>, vector<16x8xbf16>, vector<128x8xf32> -> vector<128x8xf32>
    %12 = arith.addf %6, %11 : vector<128x8xf32>
    %c0_10 = arith.constant 0 : index
    %c17 = arith.constant 17 : index
    %c0_11 = arith.constant 0 : index
    %13 = vector.load %arg1[%c0_10, %c17, %c0_11] : memref<1x192x16xbf16, #tpu.memory_space<vmem>>, vector<1x128x16xbf16>
    %14 = vector.shape_cast %13 : vector<1x128x16xbf16> to vector<128x16xbf16>
    %c2 = arith.constant 2 : index
    %c0_12 = arith.constant 0 : index
    %c0_13 = arith.constant 0 : index
    %15 = vector.load %arg2[%c2, %c0_12, %c0_13] : memref<9x16x8xbf16, #tpu.memory_space<vmem>>, vector<1x16x8xbf16>
    %16 = vector.shape_cast %15 : vector<1x16x8xbf16> to vector<16x8xbf16>
    %cst_14 = arith.constant dense<0.000000e+00> : vector<128x8xf32>
    %17 = tpu.matmul %14, %16, %cst_14 {dimension_numbers = #tpu.dot_dimension_numbers<[1], [0], [0], [1], [0, 0, 1, 1], [], []>} : vector<128x16xbf16>, vector<16x8xbf16>, vector<128x8xf32> -> vector<128x8xf32>
    %18 = arith.addf %12, %17 : vector<128x8xf32>
    %c0_15 = arith.constant 0 : index
    %c31 = arith.constant 31 : index
    %c0_16 = arith.constant 0 : index
    %19 = vector.load %arg1[%c0_15, %c31, %c0_16] : memref<1x192x16xbf16, #tpu.memory_space<vmem>>, vector<1x128x16xbf16>
    %20 = vector.shape_cast %19 : vector<1x128x16xbf16> to vector<128x16xbf16>
    %c3 = arith.constant 3 : index
    %c0_17 = arith.constant 0 : index
    %c0_18 = arith.constant 0 : index
    %21 = vector.load %arg2[%c3, %c0_17, %c0_18] : memref<9x16x8xbf16, #tpu.memory_space<vmem>>, vector<1x16x8xbf16>
    %22 = vector.shape_cast %21 : vector<1x16x8xbf16> to vector<16x8xbf16>
    %cst_19 = arith.constant dense<0.000000e+00> : vector<128x8xf32>
    %23 = tpu.matmul %20, %22, %cst_19 {dimension_numbers = #tpu.dot_dimension_numbers<[1], [0], [0], [1], [0, 0, 1, 1], [], []>} : vector<128x16xbf16>, vector<16x8xbf16>, vector<128x8xf32> -> vector<128x8xf32>
    %24 = arith.addf %18, %23 : vector<128x8xf32>
    %c0_20 = arith.constant 0 : index
    %c32 = arith.constant 32 : index
    %c0_21 = arith.constant 0 : index
    %25 = vector.load %arg1[%c0_20, %c32, %c0_21] : memref<1x192x16xbf16, #tpu.memory_space<vmem>>, vector<1x128x16xbf16>
    %26 = vector.shape_cast %25 : vector<1x128x16xbf16> to vector<128x16xbf16>
    %c4 = arith.constant 4 : index
    %c0_22 = arith.constant 0 : index
    %c0_23 = arith.constant 0 : index
    %27 = vector.load %arg2[%c4, %c0_22, %c0_23] : memref<9x16x8xbf16, #tpu.memory_space<vmem>>, vector<1x16x8xbf16>
    %28 = vector.shape_cast %27 : vector<1x16x8xbf16> to vector<16x8xbf16>
    %cst_24 = arith.constant dense<0.000000e+00> : vector<128x8xf32>
    %29 = tpu.matmul %26, %28, %cst_24 {dimension_numbers = #tpu.dot_dimension_numbers<[1], [0], [0], [1], [0, 0, 1, 1], [], []>} : vector<128x16xbf16>, vector<16x8xbf16>, vector<128x8xf32> -> vector<128x8xf32>
    %30 = arith.addf %24, %29 : vector<128x8xf32>
    %c0_25 = arith.constant 0 : index
    %c33 = arith.constant 33 : index
    %c0_26 = arith.constant 0 : index
    %31 = vector.load %arg1[%c0_25, %c33, %c0_26] : memref<1x192x16xbf16, #tpu.memory_space<vmem>>, vector<1x128x16xbf16>
    %32 = vector.shape_cast %31 : vector<1x128x16xbf16> to vector<128x16xbf16>
    %c5 = arith.constant 5 : index
    %c0_27 = arith.constant 0 : index
    %c0_28 = arith.constant 0 : index
    %33 = vector.load %arg2[%c5, %c0_27, %c0_28] : memref<9x16x8xbf16, #tpu.memory_space<vmem>>, vector<1x16x8xbf16>
    %34 = vector.shape_cast %33 : vector<1x16x8xbf16> to vector<16x8xbf16>
    %cst_29 = arith.constant dense<0.000000e+00> : vector<128x8xf32>
    %35 = tpu.matmul %32, %34, %cst_29 {dimension_numbers = #tpu.dot_dimension_numbers<[1], [0], [0], [1], [0, 0, 1, 1], [], []>} : vector<128x16xbf16>, vector<16x8xbf16>, vector<128x8xf32> -> vector<128x8xf32>
    %36 = arith.addf %30, %35 : vector<128x8xf32>
    %c0_30 = arith.constant 0 : index
    %c47 = arith.constant 47 : index
    %c0_31 = arith.constant 0 : index
    %37 = vector.load %arg1[%c0_30, %c47, %c0_31] : memref<1x192x16xbf16, #tpu.memory_space<vmem>>, vector<1x128x16xbf16>
    %38 = vector.shape_cast %37 : vector<1x128x16xbf16> to vector<128x16xbf16>
    %c6 = arith.constant 6 : index
    %c0_32 = arith.constant 0 : index
    %c0_33 = arith.constant 0 : index
    %39 = vector.load %arg2[%c6, %c0_32, %c0_33] : memref<9x16x8xbf16, #tpu.memory_space<vmem>>, vector<1x16x8xbf16>
    %40 = vector.shape_cast %39 : vector<1x16x8xbf16> to vector<16x8xbf16>
    %cst_34 = arith.constant dense<0.000000e+00> : vector<128x8xf32>
    %41 = tpu.matmul %38, %40, %cst_34 {dimension_numbers = #tpu.dot_dimension_numbers<[1], [0], [0], [1], [0, 0, 1, 1], [], []>} : vector<128x16xbf16>, vector<16x8xbf16>, vector<128x8xf32> -> vector<128x8xf32>
    %42 = arith.addf %36, %41 : vector<128x8xf32>
    %c0_35 = arith.constant 0 : index
    %c48 = arith.constant 48 : index
    %c0_36 = arith.constant 0 : index
    %43 = vector.load %arg1[%c0_35, %c48, %c0_36] : memref<1x192x16xbf16, #tpu.memory_space<vmem>>, vector<1x128x16xbf16>
    %44 = vector.shape_cast %43 : vector<1x128x16xbf16> to vector<128x16xbf16>
    %c7 = arith.constant 7 : index
    %c0_37 = arith.constant 0 : index
    %c0_38 = arith.constant 0 : index
    %45 = vector.load %arg2[%c7, %c0_37, %c0_38] : memref<9x16x8xbf16, #tpu.memory_space<vmem>>, vector<1x16x8xbf16>
    %46 = vector.shape_cast %45 : vector<1x16x8xbf16> to vector<16x8xbf16>
    %cst_39 = arith.constant dense<0.000000e+00> : vector<128x8xf32>
    %47 = tpu.matmul %44, %46, %cst_39 {dimension_numbers = #tpu.dot_dimension_numbers<[1], [0], [0], [1], [0, 0, 1, 1], [], []>} : vector<128x16xbf16>, vector<16x8xbf16>, vector<128x8xf32> -> vector<128x8xf32>
    %48 = arith.addf %42, %47 : vector<128x8xf32>
    %c0_40 = arith.constant 0 : index
    %c49 = arith.constant 49 : index
    %c0_41 = arith.constant 0 : index
    %49 = vector.load %arg1[%c0_40, %c49, %c0_41] : memref<1x192x16xbf16, #tpu.memory_space<vmem>>, vector<1x128x16xbf16>
    %50 = vector.shape_cast %49 : vector<1x128x16xbf16> to vector<128x16xbf16>
    %c8 = arith.constant 8 : index
    %c0_42 = arith.constant 0 : index
    %c0_43 = arith.constant 0 : index
    %51 = vector.load %arg2[%c8, %c0_42, %c0_43] : memref<9x16x8xbf16, #tpu.memory_space<vmem>>, vector<1x16x8xbf16>
    %52 = vector.shape_cast %51 : vector<1x16x8xbf16> to vector<16x8xbf16>
    %cst_44 = arith.constant dense<0.000000e+00> : vector<128x8xf32>
    %53 = tpu.matmul %50, %52, %cst_44 {dimension_numbers = #tpu.dot_dimension_numbers<[1], [0], [0], [1], [0, 0, 1, 1], [], []>} : vector<128x16xbf16>, vector<16x8xbf16>, vector<128x8xf32> -> vector<128x8xf32>
    %54 = arith.addf %48, %53 : vector<128x8xf32>
    %c0_45 = arith.constant 0 : index
    %c0_46 = arith.constant 0 : index
    %55 = vector.load %arg3[%c0_45, %c0_46] : memref<1x8xf32, #tpu.memory_space<vmem>>, vector<1x8xf32>
    %56 = vector.broadcast %55 : vector<1x8xf32> to vector<128x8xf32>
    %57 = arith.addf %54, %56 : vector<128x8xf32>
    %cst_47 = arith.constant 0.000000e+00 : f32
    %58 = vector.broadcast %cst_47 : f32 to vector<128x8xf32>
    %59 = arith.maximumf %57, %58 : vector<128x8xf32>
    %c0_48 = arith.constant 0 : index
    %c0_49 = arith.constant 0 : index
    %60 = vector.load %arg6[%c0_48, %c0_49] : memref<128x1xf32, #tpu.memory_space<vmem>>, vector<128x1xf32>
    %61 = vector.broadcast %60 : vector<128x1xf32> to vector<128x8xf32>
    %62 = arith.mulf %59, %61 : vector<128x8xf32>
    %cst_50 = arith.constant 0.000000e+00 : bf16
    %63 = vector.broadcast %cst_50 : bf16 to vector<32x8xbf16>
    %c0_51 = arith.constant 0 : index
    %c0_52 = arith.constant 0 : index
    %64 = vector.load %arg8[%c0_51, %c0_52] : memref<192x8xbf16, #tpu.memory_space<vmem>>, vector<32x8xbf16>
    tpu.vector_store %arg8[%c0_51, %c0_52], %63 {strides = array<i32>} : memref<192x8xbf16, #tpu.memory_space<vmem>>, vector<32x8xbf16>,
    %c160 = arith.constant 160 : index
    %c0_53 = arith.constant 0 : index
    %65 = vector.load %arg8[%c160, %c0_53] : memref<192x8xbf16, #tpu.memory_space<vmem>>, vector<32x8xbf16>
    tpu.vector_store %arg8[%c160, %c0_53], %63 {strides = array<i32>} : memref<192x8xbf16, #tpu.memory_space<vmem>>, vector<32x8xbf16>,
    %66 = arith.truncf %62 : vector<128x8xf32> to vector<128x8xbf16>
    %c32_54 = arith.constant 32 : index
    %c0_55 = arith.constant 0 : index
    %67 = vector.load %arg8[%c32_54, %c0_55] : memref<192x8xbf16, #tpu.memory_space<vmem>>, vector<128x8xbf16>
    tpu.vector_store %arg8[%c32_54, %c0_55], %66 {strides = array<i32>} : memref<192x8xbf16, #tpu.memory_space<vmem>>, vector<128x8xbf16>,
    %cst_56 = arith.constant 0.000000e+00 : f32
    %68 = vector.broadcast %cst_56 : f32 to vector<128x8xf32>
    %c15_57 = arith.constant 15 : index
    %c0_58 = arith.constant 0 : index
    %69 = vector.load %arg8[%c15_57, %c0_58] : memref<192x8xbf16, #tpu.memory_space<vmem>>, vector<128x8xbf16>
    %c0_59 = arith.constant 0 : index
    %c0_60 = arith.constant 0 : index
    %c0_61 = arith.constant 0 : index
    %70 = vector.load %arg4[%c0_59, %c0_60, %c0_61] : memref<9x8x8xbf16, #tpu.memory_space<vmem>>, vector<1x8x8xbf16>
    %71 = vector.shape_cast %70 : vector<1x8x8xbf16> to vector<8x8xbf16>
    %cst_62 = arith.constant dense<0.000000e+00> : vector<128x8xf32>
    %72 = tpu.matmul %69, %71, %cst_62 {dimension_numbers = #tpu.dot_dimension_numbers<[1], [0], [0], [1], [0, 0, 1, 1], [], []>} : vector<128x8xbf16>, vector<8x8xbf16>, vector<128x8xf32> -> vector<128x8xf32>
    %73 = arith.addf %68, %72 : vector<128x8xf32>
    %c16_63 = arith.constant 16 : index
    %c0_64 = arith.constant 0 : index
    %74 = vector.load %arg8[%c16_63, %c0_64] : memref<192x8xbf16, #tpu.memory_space<vmem>>, vector<128x8xbf16>
    %c1_65 = arith.constant 1 : index
    %c0_66 = arith.constant 0 : index
    %c0_67 = arith.constant 0 : index
    %75 = vector.load %arg4[%c1_65, %c0_66, %c0_67] : memref<9x8x8xbf16, #tpu.memory_space<vmem>>, vector<1x8x8xbf16>
    %76 = vector.shape_cast %75 : vector<1x8x8xbf16> to vector<8x8xbf16>
    %cst_68 = arith.constant dense<0.000000e+00> : vector<128x8xf32>
    %77 = tpu.matmul %74, %76, %cst_68 {dimension_numbers = #tpu.dot_dimension_numbers<[1], [0], [0], [1], [0, 0, 1, 1], [], []>} : vector<128x8xbf16>, vector<8x8xbf16>, vector<128x8xf32> -> vector<128x8xf32>
    %78 = arith.addf %73, %77 : vector<128x8xf32>
    %c17_69 = arith.constant 17 : index
    %c0_70 = arith.constant 0 : index
    %79 = vector.load %arg8[%c17_69, %c0_70] : memref<192x8xbf16, #tpu.memory_space<vmem>>, vector<128x8xbf16>
    %c2_71 = arith.constant 2 : index
    %c0_72 = arith.constant 0 : index
    %c0_73 = arith.constant 0 : index
    %80 = vector.load %arg4[%c2_71, %c0_72, %c0_73] : memref<9x8x8xbf16, #tpu.memory_space<vmem>>, vector<1x8x8xbf16>
    %81 = vector.shape_cast %80 : vector<1x8x8xbf16> to vector<8x8xbf16>
    %cst_74 = arith.constant dense<0.000000e+00> : vector<128x8xf32>
    %82 = tpu.matmul %79, %81, %cst_74 {dimension_numbers = #tpu.dot_dimension_numbers<[1], [0], [0], [1], [0, 0, 1, 1], [], []>} : vector<128x8xbf16>, vector<8x8xbf16>, vector<128x8xf32> -> vector<128x8xf32>
    %83 = arith.addf %78, %82 : vector<128x8xf32>
    %c31_75 = arith.constant 31 : index
    %c0_76 = arith.constant 0 : index
    %84 = vector.load %arg8[%c31_75, %c0_76] : memref<192x8xbf16, #tpu.memory_space<vmem>>, vector<128x8xbf16>
    %c3_77 = arith.constant 3 : index
    %c0_78 = arith.constant 0 : index
    %c0_79 = arith.constant 0 : index
    %85 = vector.load %arg4[%c3_77, %c0_78, %c0_79] : memref<9x8x8xbf16, #tpu.memory_space<vmem>>, vector<1x8x8xbf16>
    %86 = vector.shape_cast %85 : vector<1x8x8xbf16> to vector<8x8xbf16>
    %cst_80 = arith.constant dense<0.000000e+00> : vector<128x8xf32>
    %87 = tpu.matmul %84, %86, %cst_80 {dimension_numbers = #tpu.dot_dimension_numbers<[1], [0], [0], [1], [0, 0, 1, 1], [], []>} : vector<128x8xbf16>, vector<8x8xbf16>, vector<128x8xf32> -> vector<128x8xf32>
    %88 = arith.addf %83, %87 : vector<128x8xf32>
    %c32_81 = arith.constant 32 : index
    %c0_82 = arith.constant 0 : index
    %89 = vector.load %arg8[%c32_81, %c0_82] : memref<192x8xbf16, #tpu.memory_space<vmem>>, vector<128x8xbf16>
    %c4_83 = arith.constant 4 : index
    %c0_84 = arith.constant 0 : index
    %c0_85 = arith.constant 0 : index
    %90 = vector.load %arg4[%c4_83, %c0_84, %c0_85] : memref<9x8x8xbf16, #tpu.memory_space<vmem>>, vector<1x8x8xbf16>
    %91 = vector.shape_cast %90 : vector<1x8x8xbf16> to vector<8x8xbf16>
    %cst_86 = arith.constant dense<0.000000e+00> : vector<128x8xf32>
    %92 = tpu.matmul %89, %91, %cst_86 {dimension_numbers = #tpu.dot_dimension_numbers<[1], [0], [0], [1], [0, 0, 1, 1], [], []>} : vector<128x8xbf16>, vector<8x8xbf16>, vector<128x8xf32> -> vector<128x8xf32>
    %93 = arith.addf %88, %92 : vector<128x8xf32>
    %c33_87 = arith.constant 33 : index
    %c0_88 = arith.constant 0 : index
    %94 = vector.load %arg8[%c33_87, %c0_88] : memref<192x8xbf16, #tpu.memory_space<vmem>>, vector<128x8xbf16>
    %c5_89 = arith.constant 5 : index
    %c0_90 = arith.constant 0 : index
    %c0_91 = arith.constant 0 : index
    %95 = vector.load %arg4[%c5_89, %c0_90, %c0_91] : memref<9x8x8xbf16, #tpu.memory_space<vmem>>, vector<1x8x8xbf16>
    %96 = vector.shape_cast %95 : vector<1x8x8xbf16> to vector<8x8xbf16>
    %cst_92 = arith.constant dense<0.000000e+00> : vector<128x8xf32>
    %97 = tpu.matmul %94, %96, %cst_92 {dimension_numbers = #tpu.dot_dimension_numbers<[1], [0], [0], [1], [0, 0, 1, 1], [], []>} : vector<128x8xbf16>, vector<8x8xbf16>, vector<128x8xf32> -> vector<128x8xf32>
    %98 = arith.addf %93, %97 : vector<128x8xf32>
    %c47_93 = arith.constant 47 : index
    %c0_94 = arith.constant 0 : index
    %99 = vector.load %arg8[%c47_93, %c0_94] : memref<192x8xbf16, #tpu.memory_space<vmem>>, vector<128x8xbf16>
    %c6_95 = arith.constant 6 : index
    %c0_96 = arith.constant 0 : index
    %c0_97 = arith.constant 0 : index
    %100 = vector.load %arg4[%c6_95, %c0_96, %c0_97] : memref<9x8x8xbf16, #tpu.memory_space<vmem>>, vector<1x8x8xbf16>
    %101 = vector.shape_cast %100 : vector<1x8x8xbf16> to vector<8x8xbf16>
    %cst_98 = arith.constant dense<0.000000e+00> : vector<128x8xf32>
    %102 = tpu.matmul %99, %101, %cst_98 {dimension_numbers = #tpu.dot_dimension_numbers<[1], [0], [0], [1], [0, 0, 1, 1], [], []>} : vector<128x8xbf16>, vector<8x8xbf16>, vector<128x8xf32> -> vector<128x8xf32>
    %103 = arith.addf %98, %102 : vector<128x8xf32>
    %c48_99 = arith.constant 48 : index
    %c0_100 = arith.constant 0 : index
    %104 = vector.load %arg8[%c48_99, %c0_100] : memref<192x8xbf16, #tpu.memory_space<vmem>>, vector<128x8xbf16>
    %c7_101 = arith.constant 7 : index
    %c0_102 = arith.constant 0 : index
    %c0_103 = arith.constant 0 : index
    %105 = vector.load %arg4[%c7_101, %c0_102, %c0_103] : memref<9x8x8xbf16, #tpu.memory_space<vmem>>, vector<1x8x8xbf16>
    %106 = vector.shape_cast %105 : vector<1x8x8xbf16> to vector<8x8xbf16>
    %cst_104 = arith.constant dense<0.000000e+00> : vector<128x8xf32>
    %107 = tpu.matmul %104, %106, %cst_104 {dimension_numbers = #tpu.dot_dimension_numbers<[1], [0], [0], [1], [0, 0, 1, 1], [], []>} : vector<128x8xbf16>, vector<8x8xbf16>, vector<128x8xf32> -> vector<128x8xf32>
    %108 = arith.addf %103, %107 : vector<128x8xf32>
    %c49_105 = arith.constant 49 : index
    %c0_106 = arith.constant 0 : index
    %109 = vector.load %arg8[%c49_105, %c0_106] : memref<192x8xbf16, #tpu.memory_space<vmem>>, vector<128x8xbf16>
    %c8_107 = arith.constant 8 : index
    %c0_108 = arith.constant 0 : index
    %c0_109 = arith.constant 0 : index
    %110 = vector.load %arg4[%c8_107, %c0_108, %c0_109] : memref<9x8x8xbf16, #tpu.memory_space<vmem>>, vector<1x8x8xbf16>
    %111 = vector.shape_cast %110 : vector<1x8x8xbf16> to vector<8x8xbf16>
    %cst_110 = arith.constant dense<0.000000e+00> : vector<128x8xf32>
    %112 = tpu.matmul %109, %111, %cst_110 {dimension_numbers = #tpu.dot_dimension_numbers<[1], [0], [0], [1], [0, 0, 1, 1], [], []>} : vector<128x8xbf16>, vector<8x8xbf16>, vector<128x8xf32> -> vector<128x8xf32>
    %113 = arith.addf %108, %112 : vector<128x8xf32>
    %c0_111 = arith.constant 0 : index
    %c0_112 = arith.constant 0 : index
    %114 = vector.load %arg5[%c0_111, %c0_112] : memref<1x8xf32, #tpu.memory_space<vmem>>, vector<1x8xf32>
    %115 = vector.broadcast %114 : vector<1x8xf32> to vector<128x8xf32>
    %116 = arith.addf %113, %115 : vector<128x8xf32>
    %cst_113 = arith.constant 0.000000e+00 : f32
    %117 = vector.broadcast %cst_113 : f32 to vector<128x8xf32>
    %118 = arith.maximumf %116, %117 : vector<128x8xf32>
    %119 = arith.truncf %118 : vector<128x8xf32> to vector<128x8xbf16>
    %c0_114 = arith.constant 0 : index
    %c0_115 = arith.constant 0 : index
    %c0_116 = arith.constant 0 : index
    %120 = vector.load %arg7[%c0_114, %c0_115, %c0_116] : memref<1x128x8xbf16, #tpu.memory_space<vmem>>, vector<1x128x8xbf16>
    %121 = vector.shape_cast %120 : vector<1x128x8xbf16> to vector<128x8xbf16>
    %122 = vector.shape_cast %119 : vector<128x8xbf16> to vector<1x128x8xbf16>
    tpu.vector_store %arg7[%c0_114, %c0_115, %c0_116], %122 {strides = array<i32>} : memref<1x128x8xbf16, #tpu.memory_space<vmem>>, vector<1x128x8xbf16>,
    return
  }
  func.func @transform_0(%arg0: i32) -> (i32, i32, i32) {
    %c0_i32 = arith.constant 0 : i32
    %c0_i32_0 = arith.constant 0 : i32
    %c0_i32_1 = arith.constant 0 : i32
    return %arg0, %c0_i32, %c0_i32_0 : i32, i32, i32
  }
  func.func @transform_1(%arg0: i32) -> (i32, i32, i32) {
    %c0_i32 = arith.constant 0 : i32
    %c0_i32_0 = arith.constant 0 : i32
    %c0_i32_1 = arith.constant 0 : i32
    %c0_i32_2 = arith.constant 0 : i32
    return %c0_i32, %c0_i32_0, %c0_i32_1 : i32, i32, i32
  }
  func.func @transform_2(%arg0: i32) -> (i32, i32) {
    %c0_i32 = arith.constant 0 : i32
    %c0_i32_0 = arith.constant 0 : i32
    %c0_i32_1 = arith.constant 0 : i32
    return %c0_i32, %c0_i32_0 : i32, i32
  }
  func.func @transform_3(%arg0: i32) -> (i32, i32, i32) {
    %c0_i32 = arith.constant 0 : i32
    %c0_i32_0 = arith.constant 0 : i32
    %c0_i32_1 = arith.constant 0 : i32
    %c0_i32_2 = arith.constant 0 : i32
    return %c0_i32, %c0_i32_0, %c0_i32_1 : i32, i32, i32
  }
  func.func @transform_4(%arg0: i32) -> (i32, i32) {
    %c0_i32 = arith.constant 0 : i32
    %c0_i32_0 = arith.constant 0 : i32
    %c0_i32_1 = arith.constant 0 : i32
    return %c0_i32, %c0_i32_0 : i32, i32
  }
  func.func @transform_5(%arg0: i32) -> (i32, i32) {
    %c0_i32 = arith.constant 0 : i32
    %c0_i32_0 = arith.constant 0 : i32
    %c0_i32_1 = arith.constant 0 : i32
    return %c0_i32, %c0_i32_0 : i32, i32
  }
  func.func @transform_6(%arg0: i32) -> (i32, i32, i32) {
    %c0_i32 = arith.constant 0 : i32
    %c0_i32_0 = arith.constant 0 : i32
    %c0_i32_1 = arith.constant 0 : i32
    return %arg0, %c0_i32, %c0_i32_0 : i32, i32, i32
  }
}

module attributes {stable_mosaic.version = 11 : i64} {
  func.func @_upconv_kernel(%arg0: i32, %arg1: memref<64x8xbf16, #tpu.memory_space<vmem>>, %arg2: memref<8x16xbf16, #tpu.memory_space<vmem>>, %arg3: memref<1x16xf32, #tpu.memory_space<vmem>>, %arg4: memref<64x16xbf16, #tpu.memory_space<vmem>>) attributes {dimension_semantics = [#tpu.dimension_semantics<parallel>], iteration_bounds = array<i64: 2>, scalar_prefetch = 0 : i64, scratch_operands = 0 : i64, tpu.core_type = #tpu.core_type<tc>, window_params = [{transform_indices = @transform_0, window_bounds = array<i64: 64, 8>}, {pipeline_mode = #tpu.pipeline_mode<synchronous>, transform_indices = @transform_1, window_bounds = array<i64: 8, 16>}, {pipeline_mode = #tpu.pipeline_mode<synchronous>, transform_indices = @transform_2, window_bounds = array<i64: 1, 16>}, {transform_indices = @transform_3, window_bounds = array<i64: 64, 16>}]} {
    %c0 = arith.constant 0 : index
    %c0_0 = arith.constant 0 : index
    %0 = vector.load %arg1[%c0, %c0_0] : memref<64x8xbf16, #tpu.memory_space<vmem>>, vector<64x8xbf16>
    %c0_1 = arith.constant 0 : index
    %c0_2 = arith.constant 0 : index
    %1 = vector.load %arg2[%c0_1, %c0_2] : memref<8x16xbf16, #tpu.memory_space<vmem>>, vector<8x16xbf16>
    %cst = arith.constant dense<0.000000e+00> : vector<64x16xf32>
    %2 = tpu.matmul %0, %1, %cst {dimension_numbers = #tpu.dot_dimension_numbers<[1], [0], [0], [1], [0, 0, 1, 1], [], []>} : vector<64x8xbf16>, vector<8x16xbf16>, vector<64x16xf32> -> vector<64x16xf32>
    %c0_3 = arith.constant 0 : index
    %c0_4 = arith.constant 0 : index
    %3 = vector.load %arg3[%c0_3, %c0_4] : memref<1x16xf32, #tpu.memory_space<vmem>>, vector<1x16xf32>
    %4 = vector.broadcast %3 : vector<1x16xf32> to vector<64x16xf32>
    %5 = arith.addf %2, %4 : vector<64x16xf32>
    %6 = arith.truncf %5 : vector<64x16xf32> to vector<64x16xbf16>
    %c0_5 = arith.constant 0 : index
    %c0_6 = arith.constant 0 : index
    %7 = vector.load %arg4[%c0_5, %c0_6] : memref<64x16xbf16, #tpu.memory_space<vmem>>, vector<64x16xbf16>
    tpu.vector_store %arg4[%c0_5, %c0_6], %6 {strides = array<i32>} : memref<64x16xbf16, #tpu.memory_space<vmem>>, vector<64x16xbf16>,
    return
  }
  func.func @transform_0(%arg0: i32) -> (i32, i32) {
    %c0_i32 = arith.constant 0 : i32
    %c0_i32_0 = arith.constant 0 : i32
    return %arg0, %c0_i32 : i32, i32
  }
  func.func @transform_1(%arg0: i32) -> (i32, i32) {
    %c0_i32 = arith.constant 0 : i32
    %c0_i32_0 = arith.constant 0 : i32
    %c0_i32_1 = arith.constant 0 : i32
    return %c0_i32, %c0_i32_0 : i32, i32
  }
  func.func @transform_2(%arg0: i32) -> (i32, i32) {
    %c0_i32 = arith.constant 0 : i32
    %c0_i32_0 = arith.constant 0 : i32
    %c0_i32_1 = arith.constant 0 : i32
    return %c0_i32, %c0_i32_0 : i32, i32
  }
  func.func @transform_3(%arg0: i32) -> (i32, i32) {
    %c0_i32 = arith.constant 0 : i32
    %c0_i32_0 = arith.constant 0 : i32
    return %arg0, %c0_i32 : i32, i32
  }
}

module attributes {stable_mosaic.version = 11 : i64} {
  func.func @_stage_kernel(%arg0: i32, %arg1: memref<1x480x8xbf16, #tpu.memory_space<vmem>>, %arg2: memref<9x8x4xbf16, #tpu.memory_space<vmem>>, %arg3: memref<1x4xf32, #tpu.memory_space<vmem>>, %arg4: memref<9x4x4xbf16, #tpu.memory_space<vmem>>, %arg5: memref<1x4xf32, #tpu.memory_space<vmem>>, %arg6: memref<384x1xf32, #tpu.memory_space<vmem>>, %arg7: memref<1x384x4xbf16, #tpu.memory_space<vmem>>, %arg8: memref<480x4xbf16, #tpu.memory_space<vmem>>) attributes {dimension_semantics = [#tpu.dimension_semantics<parallel>], iteration_bounds = array<i64: 2>, scalar_prefetch = 0 : i64, scratch_operands = 1 : i64, tpu.core_type = #tpu.core_type<tc>, window_params = [{transform_indices = @transform_0, window_bounds = array<i64: 1, 480, 8>}, {pipeline_mode = #tpu.pipeline_mode<synchronous>, transform_indices = @transform_1, window_bounds = array<i64: 9, 8, 4>}, {pipeline_mode = #tpu.pipeline_mode<synchronous>, transform_indices = @transform_2, window_bounds = array<i64: 1, 4>}, {pipeline_mode = #tpu.pipeline_mode<synchronous>, transform_indices = @transform_3, window_bounds = array<i64: 9, 4, 4>}, {pipeline_mode = #tpu.pipeline_mode<synchronous>, transform_indices = @transform_4, window_bounds = array<i64: 1, 4>}, {pipeline_mode = #tpu.pipeline_mode<synchronous>, transform_indices = @transform_5, window_bounds = array<i64: 384, 1>}, {transform_indices = @transform_6, window_bounds = array<i64: 1, 384, 4>}]} {
    %cst = arith.constant 0.000000e+00 : f32
    %0 = vector.broadcast %cst : f32 to vector<384x4xf32>
    %c0 = arith.constant 0 : index
    %c23 = arith.constant 23 : index
    %c0_0 = arith.constant 0 : index
    %1 = vector.load %arg1[%c0, %c23, %c0_0] : memref<1x480x8xbf16, #tpu.memory_space<vmem>>, vector<1x384x8xbf16>
    %2 = vector.shape_cast %1 : vector<1x384x8xbf16> to vector<384x8xbf16>
    %c0_1 = arith.constant 0 : index
    %c0_2 = arith.constant 0 : index
    %c0_3 = arith.constant 0 : index
    %3 = vector.load %arg2[%c0_1, %c0_2, %c0_3] : memref<9x8x4xbf16, #tpu.memory_space<vmem>>, vector<1x8x4xbf16>
    %4 = vector.shape_cast %3 : vector<1x8x4xbf16> to vector<8x4xbf16>
    %cst_4 = arith.constant dense<0.000000e+00> : vector<384x4xf32>
    %5 = tpu.matmul %2, %4, %cst_4 {dimension_numbers = #tpu.dot_dimension_numbers<[1], [0], [0], [1], [0, 0, 1, 1], [], []>} : vector<384x8xbf16>, vector<8x4xbf16>, vector<384x4xf32> -> vector<384x4xf32>
    %6 = arith.addf %0, %5 : vector<384x4xf32>
    %c0_5 = arith.constant 0 : index
    %c24 = arith.constant 24 : index
    %c0_6 = arith.constant 0 : index
    %7 = vector.load %arg1[%c0_5, %c24, %c0_6] : memref<1x480x8xbf16, #tpu.memory_space<vmem>>, vector<1x384x8xbf16>
    %8 = vector.shape_cast %7 : vector<1x384x8xbf16> to vector<384x8xbf16>
    %c1 = arith.constant 1 : index
    %c0_7 = arith.constant 0 : index
    %c0_8 = arith.constant 0 : index
    %9 = vector.load %arg2[%c1, %c0_7, %c0_8] : memref<9x8x4xbf16, #tpu.memory_space<vmem>>, vector<1x8x4xbf16>
    %10 = vector.shape_cast %9 : vector<1x8x4xbf16> to vector<8x4xbf16>
    %cst_9 = arith.constant dense<0.000000e+00> : vector<384x4xf32>
    %11 = tpu.matmul %8, %10, %cst_9 {dimension_numbers = #tpu.dot_dimension_numbers<[1], [0], [0], [1], [0, 0, 1, 1], [], []>} : vector<384x8xbf16>, vector<8x4xbf16>, vector<384x4xf32> -> vector<384x4xf32>
    %12 = arith.addf %6, %11 : vector<384x4xf32>
    %c0_10 = arith.constant 0 : index
    %c25 = arith.constant 25 : index
    %c0_11 = arith.constant 0 : index
    %13 = vector.load %arg1[%c0_10, %c25, %c0_11] : memref<1x480x8xbf16, #tpu.memory_space<vmem>>, vector<1x384x8xbf16>
    %14 = vector.shape_cast %13 : vector<1x384x8xbf16> to vector<384x8xbf16>
    %c2 = arith.constant 2 : index
    %c0_12 = arith.constant 0 : index
    %c0_13 = arith.constant 0 : index
    %15 = vector.load %arg2[%c2, %c0_12, %c0_13] : memref<9x8x4xbf16, #tpu.memory_space<vmem>>, vector<1x8x4xbf16>
    %16 = vector.shape_cast %15 : vector<1x8x4xbf16> to vector<8x4xbf16>
    %cst_14 = arith.constant dense<0.000000e+00> : vector<384x4xf32>
    %17 = tpu.matmul %14, %16, %cst_14 {dimension_numbers = #tpu.dot_dimension_numbers<[1], [0], [0], [1], [0, 0, 1, 1], [], []>} : vector<384x8xbf16>, vector<8x4xbf16>, vector<384x4xf32> -> vector<384x4xf32>
    %18 = arith.addf %12, %17 : vector<384x4xf32>
    %c0_15 = arith.constant 0 : index
    %c47 = arith.constant 47 : index
    %c0_16 = arith.constant 0 : index
    %19 = vector.load %arg1[%c0_15, %c47, %c0_16] : memref<1x480x8xbf16, #tpu.memory_space<vmem>>, vector<1x384x8xbf16>
    %20 = vector.shape_cast %19 : vector<1x384x8xbf16> to vector<384x8xbf16>
    %c3 = arith.constant 3 : index
    %c0_17 = arith.constant 0 : index
    %c0_18 = arith.constant 0 : index
    %21 = vector.load %arg2[%c3, %c0_17, %c0_18] : memref<9x8x4xbf16, #tpu.memory_space<vmem>>, vector<1x8x4xbf16>
    %22 = vector.shape_cast %21 : vector<1x8x4xbf16> to vector<8x4xbf16>
    %cst_19 = arith.constant dense<0.000000e+00> : vector<384x4xf32>
    %23 = tpu.matmul %20, %22, %cst_19 {dimension_numbers = #tpu.dot_dimension_numbers<[1], [0], [0], [1], [0, 0, 1, 1], [], []>} : vector<384x8xbf16>, vector<8x4xbf16>, vector<384x4xf32> -> vector<384x4xf32>
    %24 = arith.addf %18, %23 : vector<384x4xf32>
    %c0_20 = arith.constant 0 : index
    %c48 = arith.constant 48 : index
    %c0_21 = arith.constant 0 : index
    %25 = vector.load %arg1[%c0_20, %c48, %c0_21] : memref<1x480x8xbf16, #tpu.memory_space<vmem>>, vector<1x384x8xbf16>
    %26 = vector.shape_cast %25 : vector<1x384x8xbf16> to vector<384x8xbf16>
    %c4 = arith.constant 4 : index
    %c0_22 = arith.constant 0 : index
    %c0_23 = arith.constant 0 : index
    %27 = vector.load %arg2[%c4, %c0_22, %c0_23] : memref<9x8x4xbf16, #tpu.memory_space<vmem>>, vector<1x8x4xbf16>
    %28 = vector.shape_cast %27 : vector<1x8x4xbf16> to vector<8x4xbf16>
    %cst_24 = arith.constant dense<0.000000e+00> : vector<384x4xf32>
    %29 = tpu.matmul %26, %28, %cst_24 {dimension_numbers = #tpu.dot_dimension_numbers<[1], [0], [0], [1], [0, 0, 1, 1], [], []>} : vector<384x8xbf16>, vector<8x4xbf16>, vector<384x4xf32> -> vector<384x4xf32>
    %30 = arith.addf %24, %29 : vector<384x4xf32>
    %c0_25 = arith.constant 0 : index
    %c49 = arith.constant 49 : index
    %c0_26 = arith.constant 0 : index
    %31 = vector.load %arg1[%c0_25, %c49, %c0_26] : memref<1x480x8xbf16, #tpu.memory_space<vmem>>, vector<1x384x8xbf16>
    %32 = vector.shape_cast %31 : vector<1x384x8xbf16> to vector<384x8xbf16>
    %c5 = arith.constant 5 : index
    %c0_27 = arith.constant 0 : index
    %c0_28 = arith.constant 0 : index
    %33 = vector.load %arg2[%c5, %c0_27, %c0_28] : memref<9x8x4xbf16, #tpu.memory_space<vmem>>, vector<1x8x4xbf16>
    %34 = vector.shape_cast %33 : vector<1x8x4xbf16> to vector<8x4xbf16>
    %cst_29 = arith.constant dense<0.000000e+00> : vector<384x4xf32>
    %35 = tpu.matmul %32, %34, %cst_29 {dimension_numbers = #tpu.dot_dimension_numbers<[1], [0], [0], [1], [0, 0, 1, 1], [], []>} : vector<384x8xbf16>, vector<8x4xbf16>, vector<384x4xf32> -> vector<384x4xf32>
    %36 = arith.addf %30, %35 : vector<384x4xf32>
    %c0_30 = arith.constant 0 : index
    %c71 = arith.constant 71 : index
    %c0_31 = arith.constant 0 : index
    %37 = vector.load %arg1[%c0_30, %c71, %c0_31] : memref<1x480x8xbf16, #tpu.memory_space<vmem>>, vector<1x384x8xbf16>
    %38 = vector.shape_cast %37 : vector<1x384x8xbf16> to vector<384x8xbf16>
    %c6 = arith.constant 6 : index
    %c0_32 = arith.constant 0 : index
    %c0_33 = arith.constant 0 : index
    %39 = vector.load %arg2[%c6, %c0_32, %c0_33] : memref<9x8x4xbf16, #tpu.memory_space<vmem>>, vector<1x8x4xbf16>
    %40 = vector.shape_cast %39 : vector<1x8x4xbf16> to vector<8x4xbf16>
    %cst_34 = arith.constant dense<0.000000e+00> : vector<384x4xf32>
    %41 = tpu.matmul %38, %40, %cst_34 {dimension_numbers = #tpu.dot_dimension_numbers<[1], [0], [0], [1], [0, 0, 1, 1], [], []>} : vector<384x8xbf16>, vector<8x4xbf16>, vector<384x4xf32> -> vector<384x4xf32>
    %42 = arith.addf %36, %41 : vector<384x4xf32>
    %c0_35 = arith.constant 0 : index
    %c72 = arith.constant 72 : index
    %c0_36 = arith.constant 0 : index
    %43 = vector.load %arg1[%c0_35, %c72, %c0_36] : memref<1x480x8xbf16, #tpu.memory_space<vmem>>, vector<1x384x8xbf16>
    %44 = vector.shape_cast %43 : vector<1x384x8xbf16> to vector<384x8xbf16>
    %c7 = arith.constant 7 : index
    %c0_37 = arith.constant 0 : index
    %c0_38 = arith.constant 0 : index
    %45 = vector.load %arg2[%c7, %c0_37, %c0_38] : memref<9x8x4xbf16, #tpu.memory_space<vmem>>, vector<1x8x4xbf16>
    %46 = vector.shape_cast %45 : vector<1x8x4xbf16> to vector<8x4xbf16>
    %cst_39 = arith.constant dense<0.000000e+00> : vector<384x4xf32>
    %47 = tpu.matmul %44, %46, %cst_39 {dimension_numbers = #tpu.dot_dimension_numbers<[1], [0], [0], [1], [0, 0, 1, 1], [], []>} : vector<384x8xbf16>, vector<8x4xbf16>, vector<384x4xf32> -> vector<384x4xf32>
    %48 = arith.addf %42, %47 : vector<384x4xf32>
    %c0_40 = arith.constant 0 : index
    %c73 = arith.constant 73 : index
    %c0_41 = arith.constant 0 : index
    %49 = vector.load %arg1[%c0_40, %c73, %c0_41] : memref<1x480x8xbf16, #tpu.memory_space<vmem>>, vector<1x384x8xbf16>
    %50 = vector.shape_cast %49 : vector<1x384x8xbf16> to vector<384x8xbf16>
    %c8 = arith.constant 8 : index
    %c0_42 = arith.constant 0 : index
    %c0_43 = arith.constant 0 : index
    %51 = vector.load %arg2[%c8, %c0_42, %c0_43] : memref<9x8x4xbf16, #tpu.memory_space<vmem>>, vector<1x8x4xbf16>
    %52 = vector.shape_cast %51 : vector<1x8x4xbf16> to vector<8x4xbf16>
    %cst_44 = arith.constant dense<0.000000e+00> : vector<384x4xf32>
    %53 = tpu.matmul %50, %52, %cst_44 {dimension_numbers = #tpu.dot_dimension_numbers<[1], [0], [0], [1], [0, 0, 1, 1], [], []>} : vector<384x8xbf16>, vector<8x4xbf16>, vector<384x4xf32> -> vector<384x4xf32>
    %54 = arith.addf %48, %53 : vector<384x4xf32>
    %c0_45 = arith.constant 0 : index
    %c0_46 = arith.constant 0 : index
    %55 = vector.load %arg3[%c0_45, %c0_46] : memref<1x4xf32, #tpu.memory_space<vmem>>, vector<1x4xf32>
    %56 = vector.broadcast %55 : vector<1x4xf32> to vector<384x4xf32>
    %57 = arith.addf %54, %56 : vector<384x4xf32>
    %cst_47 = arith.constant 0.000000e+00 : f32
    %58 = vector.broadcast %cst_47 : f32 to vector<384x4xf32>
    %59 = arith.maximumf %57, %58 : vector<384x4xf32>
    %c0_48 = arith.constant 0 : index
    %c0_49 = arith.constant 0 : index
    %60 = vector.load %arg6[%c0_48, %c0_49] : memref<384x1xf32, #tpu.memory_space<vmem>>, vector<384x1xf32>
    %61 = vector.broadcast %60 : vector<384x1xf32> to vector<384x4xf32>
    %62 = arith.mulf %59, %61 : vector<384x4xf32>
    %cst_50 = arith.constant 0.000000e+00 : bf16
    %63 = vector.broadcast %cst_50 : bf16 to vector<48x4xbf16>
    %c0_51 = arith.constant 0 : index
    %c0_52 = arith.constant 0 : index
    %64 = vector.load %arg8[%c0_51, %c0_52] : memref<480x4xbf16, #tpu.memory_space<vmem>>, vector<48x4xbf16>
    tpu.vector_store %arg8[%c0_51, %c0_52], %63 {strides = array<i32>} : memref<480x4xbf16, #tpu.memory_space<vmem>>, vector<48x4xbf16>,
    %c432 = arith.constant 432 : index
    %c0_53 = arith.constant 0 : index
    %65 = vector.load %arg8[%c432, %c0_53] : memref<480x4xbf16, #tpu.memory_space<vmem>>, vector<48x4xbf16>
    tpu.vector_store %arg8[%c432, %c0_53], %63 {strides = array<i32>} : memref<480x4xbf16, #tpu.memory_space<vmem>>, vector<48x4xbf16>,
    %66 = arith.truncf %62 : vector<384x4xf32> to vector<384x4xbf16>
    %c48_54 = arith.constant 48 : index
    %c0_55 = arith.constant 0 : index
    %67 = vector.load %arg8[%c48_54, %c0_55] : memref<480x4xbf16, #tpu.memory_space<vmem>>, vector<384x4xbf16>
    tpu.vector_store %arg8[%c48_54, %c0_55], %66 {strides = array<i32>} : memref<480x4xbf16, #tpu.memory_space<vmem>>, vector<384x4xbf16>,
    %cst_56 = arith.constant 0.000000e+00 : f32
    %68 = vector.broadcast %cst_56 : f32 to vector<384x4xf32>
    %c23_57 = arith.constant 23 : index
    %c0_58 = arith.constant 0 : index
    %69 = vector.load %arg8[%c23_57, %c0_58] : memref<480x4xbf16, #tpu.memory_space<vmem>>, vector<384x4xbf16>
    %c0_59 = arith.constant 0 : index
    %c0_60 = arith.constant 0 : index
    %c0_61 = arith.constant 0 : index
    %70 = vector.load %arg4[%c0_59, %c0_60, %c0_61] : memref<9x4x4xbf16, #tpu.memory_space<vmem>>, vector<1x4x4xbf16>
    %71 = vector.shape_cast %70 : vector<1x4x4xbf16> to vector<4x4xbf16>
    %cst_62 = arith.constant dense<0.000000e+00> : vector<384x4xf32>
    %72 = tpu.matmul %69, %71, %cst_62 {dimension_numbers = #tpu.dot_dimension_numbers<[1], [0], [0], [1], [0, 0, 1, 1], [], []>} : vector<384x4xbf16>, vector<4x4xbf16>, vector<384x4xf32> -> vector<384x4xf32>
    %73 = arith.addf %68, %72 : vector<384x4xf32>
    %c24_63 = arith.constant 24 : index
    %c0_64 = arith.constant 0 : index
    %74 = vector.load %arg8[%c24_63, %c0_64] : memref<480x4xbf16, #tpu.memory_space<vmem>>, vector<384x4xbf16>
    %c1_65 = arith.constant 1 : index
    %c0_66 = arith.constant 0 : index
    %c0_67 = arith.constant 0 : index
    %75 = vector.load %arg4[%c1_65, %c0_66, %c0_67] : memref<9x4x4xbf16, #tpu.memory_space<vmem>>, vector<1x4x4xbf16>
    %76 = vector.shape_cast %75 : vector<1x4x4xbf16> to vector<4x4xbf16>
    %cst_68 = arith.constant dense<0.000000e+00> : vector<384x4xf32>
    %77 = tpu.matmul %74, %76, %cst_68 {dimension_numbers = #tpu.dot_dimension_numbers<[1], [0], [0], [1], [0, 0, 1, 1], [], []>} : vector<384x4xbf16>, vector<4x4xbf16>, vector<384x4xf32> -> vector<384x4xf32>
    %78 = arith.addf %73, %77 : vector<384x4xf32>
    %c25_69 = arith.constant 25 : index
    %c0_70 = arith.constant 0 : index
    %79 = vector.load %arg8[%c25_69, %c0_70] : memref<480x4xbf16, #tpu.memory_space<vmem>>, vector<384x4xbf16>
    %c2_71 = arith.constant 2 : index
    %c0_72 = arith.constant 0 : index
    %c0_73 = arith.constant 0 : index
    %80 = vector.load %arg4[%c2_71, %c0_72, %c0_73] : memref<9x4x4xbf16, #tpu.memory_space<vmem>>, vector<1x4x4xbf16>
    %81 = vector.shape_cast %80 : vector<1x4x4xbf16> to vector<4x4xbf16>
    %cst_74 = arith.constant dense<0.000000e+00> : vector<384x4xf32>
    %82 = tpu.matmul %79, %81, %cst_74 {dimension_numbers = #tpu.dot_dimension_numbers<[1], [0], [0], [1], [0, 0, 1, 1], [], []>} : vector<384x4xbf16>, vector<4x4xbf16>, vector<384x4xf32> -> vector<384x4xf32>
    %83 = arith.addf %78, %82 : vector<384x4xf32>
    %c47_75 = arith.constant 47 : index
    %c0_76 = arith.constant 0 : index
    %84 = vector.load %arg8[%c47_75, %c0_76] : memref<480x4xbf16, #tpu.memory_space<vmem>>, vector<384x4xbf16>
    %c3_77 = arith.constant 3 : index
    %c0_78 = arith.constant 0 : index
    %c0_79 = arith.constant 0 : index
    %85 = vector.load %arg4[%c3_77, %c0_78, %c0_79] : memref<9x4x4xbf16, #tpu.memory_space<vmem>>, vector<1x4x4xbf16>
    %86 = vector.shape_cast %85 : vector<1x4x4xbf16> to vector<4x4xbf16>
    %cst_80 = arith.constant dense<0.000000e+00> : vector<384x4xf32>
    %87 = tpu.matmul %84, %86, %cst_80 {dimension_numbers = #tpu.dot_dimension_numbers<[1], [0], [0], [1], [0, 0, 1, 1], [], []>} : vector<384x4xbf16>, vector<4x4xbf16>, vector<384x4xf32> -> vector<384x4xf32>
    %88 = arith.addf %83, %87 : vector<384x4xf32>
    %c48_81 = arith.constant 48 : index
    %c0_82 = arith.constant 0 : index
    %89 = vector.load %arg8[%c48_81, %c0_82] : memref<480x4xbf16, #tpu.memory_space<vmem>>, vector<384x4xbf16>
    %c4_83 = arith.constant 4 : index
    %c0_84 = arith.constant 0 : index
    %c0_85 = arith.constant 0 : index
    %90 = vector.load %arg4[%c4_83, %c0_84, %c0_85] : memref<9x4x4xbf16, #tpu.memory_space<vmem>>, vector<1x4x4xbf16>
    %91 = vector.shape_cast %90 : vector<1x4x4xbf16> to vector<4x4xbf16>
    %cst_86 = arith.constant dense<0.000000e+00> : vector<384x4xf32>
    %92 = tpu.matmul %89, %91, %cst_86 {dimension_numbers = #tpu.dot_dimension_numbers<[1], [0], [0], [1], [0, 0, 1, 1], [], []>} : vector<384x4xbf16>, vector<4x4xbf16>, vector<384x4xf32> -> vector<384x4xf32>
    %93 = arith.addf %88, %92 : vector<384x4xf32>
    %c49_87 = arith.constant 49 : index
    %c0_88 = arith.constant 0 : index
    %94 = vector.load %arg8[%c49_87, %c0_88] : memref<480x4xbf16, #tpu.memory_space<vmem>>, vector<384x4xbf16>
    %c5_89 = arith.constant 5 : index
    %c0_90 = arith.constant 0 : index
    %c0_91 = arith.constant 0 : index
    %95 = vector.load %arg4[%c5_89, %c0_90, %c0_91] : memref<9x4x4xbf16, #tpu.memory_space<vmem>>, vector<1x4x4xbf16>
    %96 = vector.shape_cast %95 : vector<1x4x4xbf16> to vector<4x4xbf16>
    %cst_92 = arith.constant dense<0.000000e+00> : vector<384x4xf32>
    %97 = tpu.matmul %94, %96, %cst_92 {dimension_numbers = #tpu.dot_dimension_numbers<[1], [0], [0], [1], [0, 0, 1, 1], [], []>} : vector<384x4xbf16>, vector<4x4xbf16>, vector<384x4xf32> -> vector<384x4xf32>
    %98 = arith.addf %93, %97 : vector<384x4xf32>
    %c71_93 = arith.constant 71 : index
    %c0_94 = arith.constant 0 : index
    %99 = vector.load %arg8[%c71_93, %c0_94] : memref<480x4xbf16, #tpu.memory_space<vmem>>, vector<384x4xbf16>
    %c6_95 = arith.constant 6 : index
    %c0_96 = arith.constant 0 : index
    %c0_97 = arith.constant 0 : index
    %100 = vector.load %arg4[%c6_95, %c0_96, %c0_97] : memref<9x4x4xbf16, #tpu.memory_space<vmem>>, vector<1x4x4xbf16>
    %101 = vector.shape_cast %100 : vector<1x4x4xbf16> to vector<4x4xbf16>
    %cst_98 = arith.constant dense<0.000000e+00> : vector<384x4xf32>
    %102 = tpu.matmul %99, %101, %cst_98 {dimension_numbers = #tpu.dot_dimension_numbers<[1], [0], [0], [1], [0, 0, 1, 1], [], []>} : vector<384x4xbf16>, vector<4x4xbf16>, vector<384x4xf32> -> vector<384x4xf32>
    %103 = arith.addf %98, %102 : vector<384x4xf32>
    %c72_99 = arith.constant 72 : index
    %c0_100 = arith.constant 0 : index
    %104 = vector.load %arg8[%c72_99, %c0_100] : memref<480x4xbf16, #tpu.memory_space<vmem>>, vector<384x4xbf16>
    %c7_101 = arith.constant 7 : index
    %c0_102 = arith.constant 0 : index
    %c0_103 = arith.constant 0 : index
    %105 = vector.load %arg4[%c7_101, %c0_102, %c0_103] : memref<9x4x4xbf16, #tpu.memory_space<vmem>>, vector<1x4x4xbf16>
    %106 = vector.shape_cast %105 : vector<1x4x4xbf16> to vector<4x4xbf16>
    %cst_104 = arith.constant dense<0.000000e+00> : vector<384x4xf32>
    %107 = tpu.matmul %104, %106, %cst_104 {dimension_numbers = #tpu.dot_dimension_numbers<[1], [0], [0], [1], [0, 0, 1, 1], [], []>} : vector<384x4xbf16>, vector<4x4xbf16>, vector<384x4xf32> -> vector<384x4xf32>
    %108 = arith.addf %103, %107 : vector<384x4xf32>
    %c73_105 = arith.constant 73 : index
    %c0_106 = arith.constant 0 : index
    %109 = vector.load %arg8[%c73_105, %c0_106] : memref<480x4xbf16, #tpu.memory_space<vmem>>, vector<384x4xbf16>
    %c8_107 = arith.constant 8 : index
    %c0_108 = arith.constant 0 : index
    %c0_109 = arith.constant 0 : index
    %110 = vector.load %arg4[%c8_107, %c0_108, %c0_109] : memref<9x4x4xbf16, #tpu.memory_space<vmem>>, vector<1x4x4xbf16>
    %111 = vector.shape_cast %110 : vector<1x4x4xbf16> to vector<4x4xbf16>
    %cst_110 = arith.constant dense<0.000000e+00> : vector<384x4xf32>
    %112 = tpu.matmul %109, %111, %cst_110 {dimension_numbers = #tpu.dot_dimension_numbers<[1], [0], [0], [1], [0, 0, 1, 1], [], []>} : vector<384x4xbf16>, vector<4x4xbf16>, vector<384x4xf32> -> vector<384x4xf32>
    %113 = arith.addf %108, %112 : vector<384x4xf32>
    %c0_111 = arith.constant 0 : index
    %c0_112 = arith.constant 0 : index
    %114 = vector.load %arg5[%c0_111, %c0_112] : memref<1x4xf32, #tpu.memory_space<vmem>>, vector<1x4xf32>
    %115 = vector.broadcast %114 : vector<1x4xf32> to vector<384x4xf32>
    %116 = arith.addf %113, %115 : vector<384x4xf32>
    %cst_113 = arith.constant 0.000000e+00 : f32
    %117 = vector.broadcast %cst_113 : f32 to vector<384x4xf32>
    %118 = arith.maximumf %116, %117 : vector<384x4xf32>
    %119 = arith.truncf %118 : vector<384x4xf32> to vector<384x4xbf16>
    %c0_114 = arith.constant 0 : index
    %c0_115 = arith.constant 0 : index
    %c0_116 = arith.constant 0 : index
    %120 = vector.load %arg7[%c0_114, %c0_115, %c0_116] : memref<1x384x4xbf16, #tpu.memory_space<vmem>>, vector<1x384x4xbf16>
    %121 = vector.shape_cast %120 : vector<1x384x4xbf16> to vector<384x4xbf16>
    %122 = vector.shape_cast %119 : vector<384x4xbf16> to vector<1x384x4xbf16>
    tpu.vector_store %arg7[%c0_114, %c0_115, %c0_116], %122 {strides = array<i32>} : memref<1x384x4xbf16, #tpu.memory_space<vmem>>, vector<1x384x4xbf16>,
    return
  }
  func.func @transform_0(%arg0: i32) -> (i32, i32, i32) {
    %c0_i32 = arith.constant 0 : i32
    %c0_i32_0 = arith.constant 0 : i32
    %c0_i32_1 = arith.constant 0 : i32
    return %arg0, %c0_i32, %c0_i32_0 : i32, i32, i32
  }
  func.func @transform_1(%arg0: i32) -> (i32, i32, i32) {
    %c0_i32 = arith.constant 0 : i32
    %c0_i32_0 = arith.constant 0 : i32
    %c0_i32_1 = arith.constant 0 : i32
    %c0_i32_2 = arith.constant 0 : i32
    return %c0_i32, %c0_i32_0, %c0_i32_1 : i32, i32, i32
  }
  func.func @transform_2(%arg0: i32) -> (i32, i32) {
    %c0_i32 = arith.constant 0 : i32
    %c0_i32_0 = arith.constant 0 : i32
    %c0_i32_1 = arith.constant 0 : i32
    return %c0_i32, %c0_i32_0 : i32, i32
  }
  func.func @transform_3(%arg0: i32) -> (i32, i32, i32) {
    %c0_i32 = arith.constant 0 : i32
    %c0_i32_0 = arith.constant 0 : i32
    %c0_i32_1 = arith.constant 0 : i32
    %c0_i32_2 = arith.constant 0 : i32
    return %c0_i32, %c0_i32_0, %c0_i32_1 : i32, i32, i32
  }
  func.func @transform_4(%arg0: i32) -> (i32, i32) {
    %c0_i32 = arith.constant 0 : i32
    %c0_i32_0 = arith.constant 0 : i32
    %c0_i32_1 = arith.constant 0 : i32
    return %c0_i32, %c0_i32_0 : i32, i32
  }
  func.func @transform_5(%arg0: i32) -> (i32, i32) {
    %c0_i32 = arith.constant 0 : i32
    %c0_i32_0 = arith.constant 0 : i32
    %c0_i32_1 = arith.constant 0 : i32
    return %c0_i32, %c0_i32_0 : i32, i32
  }
  func.func @transform_6(%arg0: i32) -> (i32, i32, i32) {
    %c0_i32 = arith.constant 0 : i32
    %c0_i32_0 = arith.constant 0 : i32
    %c0_i32_1 = arith.constant 0 : i32
    return %arg0, %c0_i32, %c0_i32_0 : i32, i32, i32
  }
}

</mosaic_0001>

<bundles_post_ra>
// kernel: tile.13
= control target key start
LH: loop header
LB: loop body
LE: loop exit
PB: predicated region body
PF: predicated region fallthrough
CT: control target
= control target key end

     0   :  { %s22_s0 = inlined_call_operand.vmem [shape: f32[8], index: 0, kind: input, shape index: {}]   ;;  %s23_s1 = inlined_call_operand.vmem [shape: f32[4,8], index: 1, kind: output, shape index: {}]  }
   0x1   :  { %v4_v0 = vld [vmem:[%s22_s0] ss:$0 sm:$0xff] }
   0x2   :  { %5 = vst [vmem:[%s23_s1] sm:$0xf] %v4_v0 }

// kernel: tile.19
= control target key start
LH: loop header
LB: loop body
LE: loop exit
PB: predicated region body
PF: predicated region fallthrough
CT: control target
= control target key end

     0   :  { %s37_s8 = smov 4   ;;  %s38_s9 = smov 8   ;;  %vm7_vm0 = vcmask 31744   ;;  %vm13_vm1 = vcmask 130144   ;;  %vm19_vm2 = vcmask 97344   ;;  %vm25_vm3 = vcmask 64544   ;;  %s55_s0 = inlined_call_operand.vmem [shape: f32[4,4], index: 0, kind: input, shape index: {}]   ;;  %s56_s1 = inlined_call_operand.vmem [shape: f32[1,16], index: 1, kind: output, shape index: {}]  }
   0x1   :  { %v4_v0 = vld [vmem:[%s55_s0] sm:$0xf]  ;;  %s36_s0 = smov 12  }
   0x2   :  { %5 = vst [vmem:[#allocation1] sm:$0xf] %v4_v0 }
   0x9   :  { %v10_v1 = vld [vmem:[#allocation1 + $0x3] sm:$0x1]   ;;  %v22_v2 = vld [vmem:[#allocation1 + $0x1] sm:$0x1]   ;;  %v16_v3 = vld [vmem:[#allocation1 + $0x2] sm:$0x1]  }
   0xa   :  { %11 = vrot.lane.b32.xlu0 %v10_v1, %s36_s0  ;;  %23 = vrot.lane.b32.xlu1 %v22_v2, %s37_s8  ;;  %v6_v4 = vld [vmem:[#allocation1] sm:$0x1]  }
   0xb   :  { %8 = vst.msk [vmem:[#allocation0] sm:$0x1] %vm7_vm0, %v6_v4  }
  0x12   :  { %17 = vrot.lane.b32.xlu0 %v16_v3, %s38_s9 }
  0x7c   :  { %v12_v5 = vpop.permute.xlu0 %11   ;;  %v24_v6 = vpop.permute.xlu1 %23  }
  0x7d   :  { %14 = vst.msk [vmem:[#allocation0] sm:$0x1] %vm13_vm1, %v12_v5  }
  0x84   :  { %v18_v7 = vpop.permute.xlu0 %17  }
  0x85   :  { %20 = vst.msk [vmem:[#allocation0] sm:$0x1] %vm19_vm2, %v18_v7  }
  0x86   :  { %26 = vst.msk [vmem:[#allocation0] sm:$0x1] %vm25_vm3, %v24_v6  }
  0x8d   :  { %v29_v8 = vld [vmem:[#allocation0] sm:$0x1] }
  0x8e   :  { %32 = vst [vmem:[%s56_s1] sm:$0x1] %v29_v8 }

// kernel: tile.14
= control target key start
LH: loop header
LB: loop body
LE: loop exit
PB: predicated region body
PF: predicated region fallthrough
CT: control target
= control target key end

     0   :  { %s37_s8 = smov 8   ;;  %s38_s9 = smov 16   ;;  %vm7_vm0 = vcmask 64512   ;;  %vm13_vm1 = vcmask 261312   ;;  %vm19_vm2 = vcmask 195712   ;;  %vm25_vm3 = vcmask 130112   ;;  %s55_s0 = inlined_call_operand.vmem [shape: f32[4,8], index: 0, kind: input, shape index: {}]   ;;  %s56_s1 = inlined_call_operand.vmem [shape: f32[1,32], index: 1, kind: output, shape index: {}]  }
   0x1   :  { %v4_v0 = vld [vmem:[%s55_s0] sm:$0xf]  ;;  %s36_s0 = smov 24  }
   0x2   :  { %5 = vst [vmem:[#allocation1] sm:$0xf] %v4_v0 }
   0x9   :  { %v10_v1 = vld [vmem:[#allocation1 + $0x3] sm:$0x1]   ;;  %v22_v2 = vld [vmem:[#allocation1 + $0x1] sm:$0x1]   ;;  %v16_v3 = vld [vmem:[#allocation1 + $0x2] sm:$0x1]  }
   0xa   :  { %11 = vrot.lane.b32.xlu0 %v10_v1, %s36_s0  ;;  %23 = vrot.lane.b32.xlu1 %v22_v2, %s37_s8  ;;  %v6_v4 = vld [vmem:[#allocation1] sm:$0x1]  }
   0xb   :  { %8 = vst.msk [vmem:[#allocation0] sm:$0x1] %vm7_vm0, %v6_v4  }
  0x12   :  { %17 = vrot.lane.b32.xlu0 %v16_v3, %s38_s9 }
  0x7c   :  { %v12_v5 = vpop.permute.xlu0 %11   ;;  %v24_v6 = vpop.permute.xlu1 %23  }
  0x7d   :  { %14 = vst.msk [vmem:[#allocation0] sm:$0x1] %vm13_vm1, %v12_v5  }
  0x84   :  { %v18_v7 = vpop.permute.xlu0 %17  }
  0x85   :  { %20 = vst.msk [vmem:[#allocation0] sm:$0x1] %vm19_vm2, %v18_v7  }
  0x86   :  { %26 = vst.msk [vmem:[#allocation0] sm:$0x1] %vm25_vm3, %v24_v6  }
  0x8d   :  { %v29_v8 = vld [vmem:[#allocation0] sm:$0x1] }
  0x8e   :  { %32 = vst [vmem:[%s56_s1] sm:$0x1] %v29_v8 }

// kernel: tile.18
= control target key start
LH: loop header
LB: loop body
LE: loop exit
PB: predicated region body
PF: predicated region fallthrough
CT: control target
= control target key end

     0   :  { %s22_s0 = inlined_call_operand.vmem [shape: f32[4], index: 0, kind: input, shape index: {}]   ;;  %s23_s1 = inlined_call_operand.vmem [shape: f32[4,4], index: 1, kind: output, shape index: {}]  }
   0x1   :  { %v4_v0 = vld [vmem:[%s22_s0] ss:$0 sm:$0xff] }
   0x2   :  { %5 = vst [vmem:[%s23_s1] sm:$0xf] %v4_v0 }

// kernel: decoder_forward.4
= control target key start
LH: loop header
LB: loop body
LE: loop exit
PB: predicated region body
PF: predicated region fallthrough
CT: control target
= control target key end

     0   :  { %s332_s12 = smov 0   ;;  %s355_s0 = inlined_call_operand.vmem [shape: bf16[32,16], index: 0, kind: input, shape index: {}]   ;;  %s356_s1 = inlined_call_operand.vmem [shape: bf16[16,32], index: 1, kind: input, shape index: {}]   ;;  %s357_s2 = inlined_call_operand.vmem [shape: f32[1,32], index: 2, kind: input, shape index: {}]   ;;  %s358_s3 = inlined_call_operand.vmem [shape: bf16[32,32], index: 3, kind: output, shape index: {}]  }
   0x1 LB: > { %s273_s13 = sadd.s32 4294967295, %s310_s12   ;;  %p277_p0 = scmp.ge.s32.totalorder %s310_s12, 1  ;;  %s310_s12 = sphi %s332_s12, %s13_s12  }
   0x2   : > { %p138_p1 = scmp.lt.s32.totalorder %s310_s12, 3 }
   0x4   : > { %p139_p2 = pnand %p277_p0, %p138_p1 }
   0x5   : > { %s278_s16 = sshll.u32 (!%p139_p2), %s273_s13, 1 }
   0x6   : > { %142 = sbr.rel (%p139_p2) target bundleno = 154 (0x9a), region = 32  ;;  %p163_p3 = scmp.lt.s32.totalorder (!%p139_p2), %s278_s16, 3 }
   0xb   : > { %v294_v0 = vld [vmem:[%s356_s1] sm:$0xff]  ;;  %s360_s16 = smov (!%p163_p3, %s278_s16), 3  ;;  %vm194_vm0 = vcmask 130048   ;;  %vm214_vm1 = vcmask 257024  }
   0xc   : > { %205 = vmatpush.bf16.msra.mxu0 %v294_v0  ;;  %s279_s17 = sshll.u32 %s360_s16, 2  ;;  %v303_v2 = vld [vmem:[%s357_s2] ss:$0 sm:$0xff] }
   0xd   : > { %s166_s20 = scalar_lea.vmem %s355_s0, %s279_s17  ;;  %s172_s25 = scalar_lea.vmem %s358_s3, %s279_s17 }
   0xe   : > { %v293_v1 = vld [vmem:[%s166_s20] sm:$0xff] }
   0xf   : > { %290 = vmatmul.msk.bf16.vlgmr.msra.gmra.mxu0 %vm194_vm0, %v293_v1 }
  0x8c   : > { %v207_v3 = vpop.f32.mrf.mxu0 }
  0x8d   : > { %v208_v4 = vadd.f32 %v303_v2, %v207_v3 }
  0x8f   : > { %v212_v5 = vpack.c.bf16 %v208_v4, %v208_v4 }
  0x91   : > { %215 = vst.msk [vmem:[%s172_s25] sm:$0xf] %vm214_vm1, %v212_v5 }
  0x94   : > { %v209_v6 = vpop.f32.mrf.mxu0 }
  0x95   : > { %v210_v7 = vadd.f32 %v303_v2, %v209_v6 }
  0x97   : > { %v213_v8 = vpack.c.bf16 %v210_v7, %v210_v7 }
  0x99   : > { %216 = vst.msk [vmem:[%s172_s25 + $0x4] sm:$0xf] %vm214_vm1, %v213_v8 }
  0x9a PF: > { %s13_s12 = sadd.s32 1, %s310_s12  }
  0x9b   : > { %p10_p4 = scmp.ge.s32.totalorder %s13_s12, 4  }
  0x9d   :  { %12 = sbr.rel (!%p10_p4) target bundleno = 1 (0x1), region = 62 }

// kernel: decoder_forward.6
= control target key start
LH: loop header
LB: loop body
LE: loop exit
PB: predicated region body
PF: predicated region fallthrough
CT: control target
= control target key end

     0   :  { %s402_s12 = smov 0   ;;  %s433_s0 = inlined_call_operand.vmem [shape: bf16[128,8], index: 0, kind: input, shape index: {}]   ;;  %s434_s1 = inlined_call_operand.vmem [shape: bf16[8,16], index: 1, kind: input, shape index: {}]   ;;  %s435_s2 = inlined_call_operand.vmem [shape: f32[1,16], index: 2, kind: input, shape index: {}]   ;;  %s436_s3 = inlined_call_operand.vmem [shape: bf16[128,16], index: 3, kind: output, shape index: {}]  }
   0x1 LB: > { %s327_s13 = sadd.s32 4294967295, %s380_s12   ;;  %p331_p0 = scmp.ge.s32.totalorder %s380_s12, 1  ;;  %s380_s12 = sphi %s402_s12, %s13_s12  }
   0x2   : > { %p138_p1 = scmp.lt.s32.totalorder %s380_s12, 3 }
   0x4   : > { %p139_p2 = pnand %p331_p0, %p138_p1 }
   0x5   : > { %s332_s16 = sshll.u32 (!%p139_p2), %s327_s13, 3 }
   0x6   : > { %142 = sbr.rel (%p139_p2) target bundleno = 163 (0xa3), region = 32  ;;  %p163_p3 = scmp.lt.s32.totalorder (!%p139_p2), %s332_s16, 15 }
   0xb   : > { %v183_v0 = vld [vmem:[%s434_s1] sm:$0xf]  ;;  %vm221_vm0 = vcmask 1043456   ;;  %s438_s16 = smov (!%p163_p3, %s332_s16), 15  ;;  %vm208_vm1 = vcmask 64512   ;;  %vm262_vm2 = vcmask 125952  }
   0xc   : > { %v223_v1 = vsel %vm221_vm0, %v183_v0, 0  ;;  %s333_s17 = sshll.u32 %s438_s16, 2  ;;  %v373_v6 = vld [vmem:[%s435_s2] ss:$0 sm:$0xff] }
   0xd   : > { %232 = vmatpush.bf16.msra.mxu0 %v223_v1  ;;  %362 = vmatpush.bf16.msra.mxu1 %v223_v1  ;;  %s166_s20 = scalar_lea.vmem %s433_s0, %s333_s17  ;;  %s172_s25 = scalar_lea.vmem %s436_s3, %s333_s17 }
   0xe   : > { %363 = vmatpush.bf16.msra.mxu2 %v223_v1  ;;  %364 = vmatpush.bf16.msra.mxu3 %v223_v1  ;;  %v358_v2 = vld [vmem:[%s166_s20] sm:$0xff]  ;;  %v359_v3 = vld [vmem:[%s166_s20 + $0x8] sm:$0xff]  ;;  %v360_v4 = vld [vmem:[%s166_s20 + $0x10] sm:$0xff] }
   0xf   : > { %v361_v5 = vld [vmem:[%s166_s20 + $0x18] sm:$0xff] }
  0x10   : > { %352 = vmatmul.msk.bf16.vlgmr.msra.gmra.mxu0 %vm208_vm1, %v358_v2  ;;  %353 = vmatmul.msk.bf16.vlgmr.msra.gmra.mxu1 %vm208_vm1, %v359_v3 }
  0x11   : > { %354 = vmatmul.msk.bf16.vlgmr.msra.gmra.mxu2 %vm208_vm1, %v360_v4  ;;  %355 = vmatmul.msk.bf16.vlgmr.msra.gmra.mxu3 %vm208_vm1, %v361_v5 }
  0x8d   : > { %v234_v7 = vpop.f32.mrf.mxu0  ;;  %v239_v8 = vpop.f32.mrf.mxu1 }
  0x8e   : > { %v235_v9 = vadd.f32 %v373_v6, %v234_v7  ;;  %v240_v10 = vadd.f32 %v373_v6, %v239_v8 }
  0x90   : > { %v254_v11 = vpack.c.bf16 %v235_v9, %v235_v9  ;;  %v256_v12 = vpack.c.bf16 %v240_v10, %v240_v10 }
  0x92   : > { %263 = vst.msk [vmem:[%s172_s25] sm:$0xf] %vm262_vm2, %v254_v11 }
  0x93   : > { %265 = vst.msk [vmem:[%s172_s25 + $0x8] sm:$0xf] %vm262_vm2, %v256_v12 }
  0x94   : > { %v244_v13 = vpop.f32.mrf.mxu2  ;;  %v249_v14 = vpop.f32.mrf.mxu3 }
  0x95   : > { %v245_v15 = vadd.f32 %v373_v6, %v244_v13  ;;  %v250_v16 = vadd.f32 %v373_v6, %v249_v14  ;;  %v236_v17 = vpop.f32.mrf.mxu0  ;;  %v241_v18 = vpop.f32.mrf.mxu1 }
  0x96   : > { %v237_v19 = vadd.f32 %v373_v6, %v236_v17  ;;  %v242_v20 = vadd.f32 %v373_v6, %v241_v18 }
  0x97   : > { %v258_v21 = vpack.c.bf16 %v245_v15, %v245_v15  ;;  %v260_v22 = vpack.c.bf16 %v250_v16, %v250_v16 }
  0x98   : > { %v255_v23 = vpack.c.bf16 %v237_v19, %v237_v19  ;;  %v257_v24 = vpack.c.bf16 %v242_v20, %v242_v20 }
  0x99   : > { %267 = vst.msk [vmem:[%s172_s25 + $0x10] sm:$0xf] %vm262_vm2, %v258_v21 }
  0x9a   : > { %269 = vst.msk [vmem:[%s172_s25 + $0x18] sm:$0xf] %vm262_vm2, %v260_v22 }
  0x9b   : > { %264 = vst.msk [vmem:[%s172_s25 + $0x4] sm:$0xf] %vm262_vm2, %v255_v23 }
  0x9c   : > { %266 = vst.msk [vmem:[%s172_s25 + $0xc] sm:$0xf] %vm262_vm2, %v257_v24  ;;  %v246_v25 = vpop.f32.mrf.mxu2  ;;  %v251_v26 = vpop.f32.mrf.mxu3 }
  0x9d   : > { %v247_v27 = vadd.f32 %v373_v6, %v246_v25  ;;  %v252_v28 = vadd.f32 %v373_v6, %v251_v26 }
  0x9f   : > { %v259_v29 = vpack.c.bf16 %v247_v27, %v247_v27  ;;  %v261_v30 = vpack.c.bf16 %v252_v28, %v252_v28 }
  0xa1   : > { %268 = vst.msk [vmem:[%s172_s25 + $0x14] sm:$0xf] %vm262_vm2, %v259_v29 }
  0xa2   : > { %270 = vst.msk [vmem:[%s172_s25 + $0x1c] sm:$0xf] %vm262_vm2, %v261_v30 }
  0xa3 PF: > { %s13_s12 = sadd.s32 1, %s380_s12  }
  0xa4   : > { %p10_p4 = scmp.ge.s32.totalorder %s13_s12, 4  }
  0xa6   :  { %12 = sbr.rel (!%p10_p4) target bundleno = 1 (0x1), region = 62 }

// kernel: decoder_forward.5
= control target key start
LH: loop header
LB: loop body
LE: loop exit
PB: predicated region body
PF: predicated region fallthrough
CT: control target
= control target key end

     0   :  { %s4977_s21 = smov 0   ;;  %s5908_s0 = inlined_call_operand.vmem [shape: bf16[2,192,16], index: 0, kind: input, shape index: {}]   ;;  %s5909_s1 = inlined_call_operand.vmem [shape: bf16[9,16,8], index: 1, kind: input, shape index: {}]   ;;  %s5910_s2 = inlined_call_operand.vmem [shape: f32[1,8], index: 2, kind: input, shape index: {}]   ;;  %s5911_s3 = inlined_call_operand.vmem [shape: bf16[9,8,8], index: 3, kind: input, shape index: {}]   ;;  %s5912_s4 = inlined_call_operand.vmem [shape: f32[1,8], index: 4, kind: input, shape index: {}]   ;;  %s5913_s5 = inlined_call_operand.vmem [shape: f32[128,1], index: 5, kind: input, shape index: {}]   ;;  %s5914_s6 = inlined_call_operand.vmem [shape: bf16[2,128,8], index: 6, kind: output, shape index: {}]  }
   0x1 LB: > { %s3888_s22 = sadd.s32 4294967295, %s4939_s21   ;;  %p3892_p0 = scmp.ge.s32.totalorder %s4939_s21, 1  ;;  %s4939_s21 = sphi %s4977_s21, %s16_s21  }
   0x2   : > { %p212_p1 = scmp.lt.s32.totalorder %s4939_s21, 3 }
   0x4   : > { %p213_p2 = pnand %p3892_p0, %p212_p1 }
   0x5   : > { %p242_p3 = scmp.lt.s32.totalorder (!%p213_p2), %s3888_s22, 1 }
   0x6   : > { %216 = sbr.rel (%p213_p2) target bundleno = 873 (0x369), region = 44 }
   0xb   : > { %v4296_v0 = vld [vmem:[%s5909_s1 + $0x8] sm:$0xff]  ;;  %v4295_v1 = vld [vmem:[%s5909_s1] sm:$0xff]  ;;  %v4305_v2 = vld [vmem:[%s5909_s1 + $0x10] sm:$0xff]  ;;  %s5916_s22 = smov (!%p242_p3, %s3888_s22), 1  ;;  %vm321_vm0 = vcmask 130048   ;;  %vm2081_vm3 = vcmask 60416  }
   0xc   : > { %v4306_v3 = vld [vmem:[%s5909_s1 + $0x18] sm:$0xff]  ;;  %v4307_v4 = vld [vmem:[%s5909_s1 + $0x20] sm:$0xff]  ;;  %4856 = vmatpush.bf16.msra.mxu2 %v4296_v0  ;;  %353 = vmatpush.bf16.msra.mxu0 %v4296_v0  ;;  %s4918_s9 = smul.u32 96, %s5916_s22  ;;  %vm406_vm1 = vsmask.f32 4352  ;;  %v4317_v0 = vld [vmem:[%s5909_s1 + $0x30] sm:$0xff] }
   0xd   : > { %524 = vmatpush.bf16.msra.mxu1 %v4295_v1  ;;  %4857 = vmatpush.bf16.msra.mxu3 %v4295_v1  ;;  %vm629_vm2 = vsmask.f32 7424  ;;  %vm2207_vm4 = vcmask 1043456   ;;  %vm2182_vm5 = vcmask 64512   ;;  %s4294_s10 = sshll.u32 %s5916_s22, 6 }
   0xe   : > { %s5006_s12 = scalar_lea.vmem %s5908_s0, %s4918_s9  ;;  %s5842_s13 = scalar_lea.vmem %s5914_s6, %s4294_s10 }
   0xf   : > { %v5009_v5 = vld [vmem:[%s5006_s12 + $0x28] sm:$0xff]   ;;  %v4554_v7 = vld [vmem:[%s5006_s12 + $0x4] sm:$0x8]  ;;  %v4675_v33 = vld [vmem:[%s5006_s12 + $0x14] sm:$0xff]  }
  0x10   : > { %735 = vmatpush.bf16.msrb.mxu2 %v4305_v2  ;;  %1079 = vmatpush.bf16.msrb.mxu0 %v4307_v4  ;;  %v4544_v6 = vld [vmem:[%s5006_s12 + $0x8] sm:$0xff]   ;;  %v4683_v34 = vld [vmem:[%s5006_s12 + $0x34] sm:$0xff]   ;;  %v425_v37 = vshrl.u32 %v4675_v33, 16  ;;  %v428_v38 = vshll.u32 %v4675_v33, 16  ;;  %v4677_v51 = vld [vmem:[%s5006_s12 + $0x1c] sm:$0xff]  }
  0x11   : > { %973 = vmatpush.bf16.msrb.mxu3 %v4306_v3  ;;  %3906 = vmatmul.msk.bf16.vlgmr.msra.gmra.mxu2 %vm321_vm0, %v5009_v5  ;;  %v4671_v8 = vld [vmem:[%s5006_s12 + $0x4] sm:$0xf0]   ;;  %v4673_v9 = vld [vmem:[%s5006_s12 + $0xc] sm:$0xff]   ;;  %v461_v39 = vshrl.u32 %v4683_v34, 16  ;;  %v464_v40 = vshll.u32 %v4683_v34, 16  ;;  %v4684_v52 = vld [vmem:[%s5006_s12 + $0x3c] sm:$0xff]  }
  0x12   : > { %3902 = vmatmul.msk.bf16.vlgmr.msra.gmra.mxu0 %vm321_vm0, %v4544_v6  ;;  %v4679_v10 = vld [vmem:[%s5006_s12 + $0x24] sm:$0xff]   ;;  %v4555_v11 = vor.u32 %v4671_v8, %v4554_v7  ;;  %v4681_v12 = vld [vmem:[%s5006_s12 + $0x2c] sm:$0xff]   ;;  %v416_v13 = vshrl.u32 %v4673_v9, 16  ;;  %v419_v14 = vshll.u32 %v4673_v9, 16  ;;  %v427_v43 = vrot.slane %v425_v37, 3  ;;  %v5046_v57 = vld [vmem:[%s5006_s12 + $0x38] sm:$0xff]  }
  0x13   : > { %v443_v15 = vshrl.u32 %v4679_v10, 16  ;;  %v446_v16 = vshll.u32 %v4679_v10, 16  ;;  %v452_v19 = vshrl.u32 %v4681_v12, 16  ;;  %v455_v20 = vshll.u32 %v4681_v12, 16  ;;  %v5030_v41 = vld [vmem:[%s5006_s12 + $0x30] sm:$0xff]   ;;  %v5049_v58 = vld [vmem:[%s5006_s12 + $0x18] sm:$0xff]  }
  0x14   : > { %v408_v17 = vshrl.u32 %v4555_v11, 16  ;;  %v411_v18 = vshll.u32 %v4555_v11, 16  ;;  %v418_v21 = vrot.slane %v416_v13, 3  ;;  %v421_v22 = vrot.slane %v419_v14, 4  ;;  %v5033_v42 = vld [vmem:[%s5006_s12 + $0x10] sm:$0xff]   ;;  %v5056_v63 = vld [vmem:[%s5006_s12 + $0x40] sm:$0xff]   ;;  %1543 = vmatpush.bf16.msra.mxu2 %v4317_v0 }
  0x15   : > { %v445_v23 = vrot.slane %v443_v15, 3  ;;  %v448_v24 = vrot.slane %v446_v16, 4  ;;  %v454_v27 = vrot.slane %v452_v19, 3  ;;  %v457_v28 = vrot.slane %v455_v20, 4  ;;  %v4318_v8 = vld [vmem:[%s5909_s1 + $0x38] sm:$0xff]  ;;  %v5070_v11 = vld [vmem:[%s5006_s12 + $0x20] sm:$0xff]  }
  0x16   : > { %v410_v25 = vrot.slane %v408_v17, 3  ;;  %v413_v26 = vrot.slane %v411_v18, 4  ;;  %v422_v29 = vor.u32 %v421_v22, %v418_v21  ;;  %v430_v44 = vrot.slane %v428_v38, 4  ;;  %v4297_v12 = vld [vmem:[%s5006_s12 + $0x8] sm:$0xff]  ;;  %v4327_v16 = vld [vmem:[%s5909_s1 + $0x40] sm:$0xff]  ;;  %v4298_v17 = vld [vmem:[%s5006_s12 + $0x10] sm:$0xff] }
  0x17   : > { %v5020_v30 = vor.u32 %v448_v24, %v445_v23  ;;  %v458_v32 = vor.u32 %v457_v28, %v454_v27  ;;  %v463_v45 = vrot.slane %v461_v39, 3  ;;  %v466_v46 = vrot.slane %v464_v40, 4  ;;  %v4316_v15 = vld [vmem:[%s5909_s1 + $0x28] sm:$0xff]  ;;  %1875 = vmatpush.bf16.msra.mxu0 %v4327_v16  ;;  %v4859_v21 = vld [vmem:[%s5006_s12 + $0xc] sm:$0xf0]   ;;  %v4309_v37 = vld [vmem:[%s5006_s12 + $0x18] sm:$0xff] }
  0x18   : > { %v414_v31 = vor.u32 %v413_v26, %v410_v25  ;;  %v431_v47 = vor.u32 %v430_v44, %v427_v43  ;;  %v434_v53 = vshrl.u32 %v4677_v51, 16  ;;  %v437_v54 = vshll.u32 %v4677_v51, 16  ;;  %1305 = vmatpush.bf16.msrb.mxu1 %v4316_v15  ;;  %v4687_v20 = vld [vmem:[%s5006_s12 + $0xc] sm:$0x8]  ;;  %v4861_v25 = vld [vmem:[%s5006_s12 + $0x14] sm:$0xff]   ;;  %v4310_v0 = vld [vmem:[%s5006_s12 + $0x20] sm:$0xff] }
  0x19   : > { %v459_v36 = vsel %vm406_vm1, %v5020_v30, %v458_v32  ;;  %v467_v48 = vor.u32 %v466_v46, %v463_v45  ;;  %v470_v55 = vshrl.u32 %v4684_v52, 16  ;;  %v473_v56 = vshll.u32 %v4684_v52, 16  ;;  %v4865_v16 = vld [vmem:[%s5006_s12 + $0x24] sm:$0xff]  }
  0x1a   : > { %v423_v35 = vsel %vm406_vm1, %v414_v31, %v422_v29  ;;  %3918 = vmatmul.msk.bf16.vlgmr.msra.gmra.mxu3 %vm321_vm0, %v459_v36  ;;  %v432_v49 = vsel %vm406_vm1, %v422_v29, %v431_v47  ;;  %v436_v59 = vrot.slane %v434_v53, 3  ;;  %v439_v60 = vrot.slane %v437_v54, 4  ;;  %v4308_v29 = vld [vmem:[%s5006_s12 + $0x10] sm:$0xff] }
  0x1b   : > { %3914 = vmatmul.msk.bf16.vlgmr.msra.gmra.mxu1 %vm321_vm0, %v423_v35  ;;  %v468_v50 = vsel %vm406_vm1, %v458_v32, %v467_v48  ;;  %v472_v61 = vrot.slane %v470_v55, 3  ;;  %v475_v62 = vrot.slane %v473_v56, 4  ;;  %v4383_v3 = vunpack.c.h.b16 %v5056_v63  ;;  %1649 = vmatpush.bf16.msra.mxu3 %v4318_v8 }
  0x1c   : > { %v440_v1 = vor.u32 %v439_v60, %v436_v59  ;;  %v633_v18 = vshll.u32 %v4297_v12, 16  ;;  %v631_v22 = vshrl.u32 %v4297_v12, 16  ;;  %v638_v24 = vshll.u32 %v4298_v17, 16  ;;  %v4863_v59 = vld [vmem:[%s5006_s12 + $0x1c] sm:$0xff]  }
  0x1d   : > { %v476_v2 = vor.u32 %v475_v62, %v472_v61  ;;  %v405_v7 = vpack.c.b16 %v4383_v3, %v4383_v3  ;;  %v4688_v26 = vor.u32 %v4859_v21, %v4687_v20  ;;  %v865_v35 = vshrl.u32 %v4861_v25, 16  ;;  %v4311_v21 = vld [vmem:[%s5006_s12 + $0x28] sm:$0xff] }
  0x1e   : > { %v441_v4 = vsel %vm406_vm1, %v431_v47, %v440_v1  ;;  %v635_v23 = vrot.slane %v633_v18, 1  ;;  %v450_v27 = vsel %vm406_vm1, %v440_v1, %v5020_v30  ;;  %v640_v32 = vrot.slane %v638_v24, 1 }
  0x1f   : > { %v477_v6 = vsel %vm406_vm1, %v467_v48, %v476_v2  ;;  %v479_v9 = vshrl.u32 %v405_v7, 16  ;;  %v482_v10 = vshll.u32 %v405_v7, 16  ;;  %v857_v33 = vshrl.u32 %v4688_v26, 16  ;;  %v4299_v48 = vld [vmem:[%s5006_s12 + $0x18] sm:$0xff]  ;;  %v4300_v7 = vld [vmem:[%s5006_s12 + $0x20] sm:$0xff] }
  0x20   : > { %v636_v31 = vor.u32 %v635_v23, %v631_v22  ;;  %v860_v34 = vshll.u32 %v4688_v26, 16  ;;  %v868_v36 = vshll.u32 %v4861_v25, 16  ;;  %v1203_v38 = vshll.u32 %v4308_v29, 16 }
  0x21   : > { %3907 = vmatmul.msk.bf16.gmra.mxu2 %vm321_vm0, %v5030_v41  ;;  %v481_v13 = vrot.slane %v479_v9, 3  ;;  %v484_v14 = vrot.slane %v482_v10, 4  ;;  %v859_v30 = vrot.slane %v857_v33, 3  ;;  %v867_v43 = vrot.slane %v865_v35, 3 }
  0x22   : > { %3903 = vmatmul.msk.bf16.gmra.mxu0 %vm321_vm0, %v5033_v42  ;;  %v641_v39 = vsel %vm629_vm2, %v636_v31, %v640_v32  ;;  %v862_v40 = vrot.slane %v860_v34, 4  ;;  %v870_v44 = vrot.slane %v868_v36, 4  ;;  %v1201_v45 = vshrl.u32 %v4308_v29, 16  ;;  %v4867_v36 = vld [vmem:[%s5006_s12 + $0x2c] sm:$0xff]  }
  0x23   : > { %v485_v19 = vor.u32 %v484_v14, %v481_v13  ;;  %v1205_v46 = vrot.slane %v1203_v38, 1  ;;  %v1208_v47 = vshll.u32 %v4309_v37, 16  ;;  %v642_v53 = vshrl.u32 %v4298_v17, 16 }
  0x24   : > { %v646_v54 = vshll.u32 %v4299_v48, 16  ;;  %v877_v62 = vshll.u32 %v4863_v59, 16  ;;  %v650_v12 = vshrl.u32 %v4299_v48, 16  ;;  %v654_v13 = vshll.u32 %v4300_v7, 16  ;;  %v4302_v48 = vld [vmem:[%s5006_s12 + $0x30] sm:$0xff] }
  0x25   : > { %v486_v28 = vsel %vm406_vm1, %v476_v2, %v485_v19  ;;  %v1206_v51 = vor.u32 %v1205_v46, %v1201_v45  ;;  %v1210_v52 = vrot.slane %v1208_v47, 1  ;;  %v644_v60 = vor.u32 %v642_v53, %v640_v32 }
  0x26   : > { %v648_v61 = vrot.slane %v646_v54, 1  ;;  %v879_v3 = vrot.slane %v877_v62, 4  ;;  %v656_v18 = vrot.slane %v654_v13, 1  ;;  %v883_v19 = vshrl.u32 %v4865_v16, 16 }
  0x27   : > { %v1211_v56 = vsel %vm629_vm2, %v1206_v51, %v1210_v52  ;;  %v886_v20 = vshll.u32 %v4865_v16, 16  ;;  %v1220_v25 = vshrl.u32 %v4310_v0, 16  ;;  %v1224_v26 = vshll.u32 %v4311_v21, 16 }
  0x28   : > { %v649_v1 = vsel %vm629_vm2, %v644_v60, %v648_v61  ;;  %v652_v17 = vor.u32 %v650_v12, %v648_v61  ;;  %v885_v23 = vrot.slane %v883_v19, 3  ;;  %v658_v32 = vshrl.u32 %v4300_v7, 16 }
  0x29   : > { %v888_v24 = vrot.slane %v886_v20, 4  ;;  %v1226_v31 = vrot.slane %v1224_v26, 1  ;;  %v1228_v46 = vshrl.u32 %v4311_v21, 16  ;;  %v670_v53 = vshll.u32 %v4302_v48, 16 }
  0x2a   : > { %3919 = vmatmul.msk.bf16.gmra.mxu3 %vm321_vm0, %v468_v50  ;;  %v871_v50 = vor.u32 %v870_v44, %v867_v43  ;;  %v657_v22 = vsel %vm629_vm2, %v652_v17, %v656_v18  ;;  %v674_v13 = vshrl.u32 %v4302_v48, 16  ;;  %v4871_v17 = vld [vmem:[%s5006_s12 + $0x3c] sm:$0xff]   ;;  %v582_v48 = vld [vmem:[%s5006_s12 + $0x48] sm:$0x1] }
  0x2b   : > { %3915 = vmatmul.msk.bf16.gmra.mxu1 %vm321_vm0, %v432_v49  ;;  %v863_v49 = vor.u32 %v862_v40, %v859_v30  ;;  %v895_v30 = vshll.u32 %v4867_v36, 16  ;;  %v4312_v40 = vld [vmem:[%s5006_s12 + $0x30] sm:$0xff]  ;;  %v672_v60 = vrot.slane %v670_v53, 1  ;;  %v910_v20 = vshrl.u32 %v4871_v17, 16  ;;  %v5182_v53 = vld [vmem:[%s5006_s12 + $0x48] sm:$0xff] }
  0x2c   : > { %v1232_v47 = vshll.u32 %v4312_v40, 16  ;;  %v913_v21 = vshll.u32 %v4871_v17, 16 }
  0x2d   : > { %v872_v55 = vsel %vm406_vm1, %v863_v49, %v871_v50  ;;  %v897_v45 = vrot.slane %v895_v30, 4 }
  0x2e   : > { %v1234_v51 = vrot.slane %v1232_v47, 1  ;;  %v4941_v47 = vmov 0  }
  0x2f   : > { %4928 = vset.pattern.permute.xlu0 %v4941_v47  ;;  %4929 = vset.pattern.permute.xlu1 %v4941_v47  ;;  %2083 = vst.msk [vmem:[#allocation2 + $0x4] sm:$0xf] %vm2081_vm3, %v4941_v47 }
  0x30   : > { %4930 = vset.pattern.permute.xlu2 %v4941_v47  ;;  %2084 = vst.msk [vmem:[#allocation2 + $0x8] sm:$0xf] %vm2081_vm3, %v4941_v47 }
  0x31   : > { %3908 = vmatmul.msk.bf16.gmra.mxu2 %vm321_vm0, %v5046_v57  ;;  %2085 = vst.msk [vmem:[#allocation2 + $0xc] sm:$0xf] %vm2081_vm3, %v4941_v47 }
  0x32   : > { %3904 = vmatmul.msk.bf16.gmra.mxu0 %vm321_vm0, %v5049_v58  ;;  %2086 = vst.msk [vmem:[#allocation2 + $0x50] sm:$0xf] %vm2081_vm3, %v4941_v47 }
  0x33   : > { %2087 = vst.msk [vmem:[#allocation2 + $0x54] sm:$0xf] %vm2081_vm3, %v4941_v47 }
  0x34   : > { %2088 = vst.msk [vmem:[#allocation2 + $0x58] sm:$0xf] %vm2081_vm3, %v4941_v47 }
  0x3a   : > { %3920 = vmatmul.msk.bf16.gmra.mxu3 %vm321_vm0, %v477_v6  ;;  %v1216_v6 = vshll.u32 %v4310_v0, 16 }
  0x3b   : > { %3916 = vmatmul.msk.bf16.gmra.mxu1 %vm321_vm0, %v441_v4  ;;  %v1212_v4 = vshrl.u32 %v4309_v37, 16  ;;  %v660_v37 = vor.u32 %v658_v32, %v656_v18  ;;  %v676_v18 = vor.u32 %v674_v13, %v672_v60  ;;  %v5165_v32 = vld [vmem:[%s5006_s12 + $0x40] sm:$0xff] }
  0x3c   : > { %v1218_v10 = vrot.slane %v1216_v6, 1  ;;  %v4303_v6 = vld [vmem:[%s5006_s12 + $0x38] sm:$0xff]  ;;  %v686_v30 = vshll.u32 %v5165_v32, 16 }
  0x3d   : > { %v1214_v9 = vor.u32 %v1212_v4, %v1210_v52 }
  0x3e   : > { %v1222_v29 = vor.u32 %v1220_v25, %v1218_v10 }
  0x3f   : > { %v1219_v15 = vsel %vm629_vm2, %v1214_v9, %v1218_v10 }
  0x40   : > { %v1227_v35 = vsel %vm629_vm2, %v1222_v29, %v1226_v31 }
  0x41   : > { %3909 = vmatmul.msk.bf16.gmra.mxu2 %vm321_vm0, %v5056_v63 }
  0x42   : > { %3905 = vmatmul.msk.bf16.gmra.mxu0 %vm321_vm0, %v5070_v11 }
  0x4a   : > { %3921 = vmatmul.msk.bf16.gmra.mxu3 %vm321_vm0, %v486_v28  ;;  %v889_v28 = vor.u32 %v888_v24, %v885_v23 }
  0x4b   : > { %3917 = vmatmul.msk.bf16.gmra.mxu1 %vm321_vm0, %v450_v27  ;;  %v4301_v27 = vld [vmem:[%s5006_s12 + $0x28] sm:$0xff] }
  0x4c   : > { %v662_v33 = vshll.u32 %v4301_v27, 16  ;;  %v666_v52 = vshrl.u32 %v4301_v27, 16  ;;  %v912_v27 = vrot.slane %v910_v20, 3 }
  0x4e   : > { %v664_v38 = vrot.slane %v662_v33, 1 }
  0x50   : > { %v665_v43 = vsel %vm629_vm2, %v660_v37, %v664_v38 }
  0x51   : > { %3960 = vmatmul.msk.bf16.vlgmr.msrb.gmra.mxu2 %vm321_vm0, %v641_v39  ;;  %v892_v39 = vshrl.u32 %v4867_v36, 16 }
  0x52   : > { %3988 = vmatmul.msk.bf16.vlgmr.msrb.gmra.mxu0 %vm321_vm0, %v5033_v42  ;;  %v874_v42 = vshrl.u32 %v4863_v59, 16  ;;  %v668_v59 = vor.u32 %v666_v52, %v664_v38 }
  0x53   : > { %v894_v44 = vrot.slane %v892_v39, 3  ;;  %v682_v39 = vshrl.u32 %v4303_v6, 16 }
  0x54   : > { %v876_v2 = vrot.slane %v874_v42, 3  ;;  %v4313_v42 = vld [vmem:[%s5006_s12 + $0x38] sm:$0xff]  ;;  %v673_v62 = vsel %vm629_vm2, %v668_v59, %v672_v60  ;;  %v619_v59 = vunpack.c.l.b16 %v582_v48 }
  0x55   : > { %v898_v49 = vor.u32 %v897_v45, %v894_v44  ;;  %v1240_v4 = vshll.u32 %v4313_v42, 16  ;;  %v1244_v29 = vshrl.u32 %v4313_v42, 16  ;;  %v4872_v44 = vld [vmem:[%s5006_s12 + $0x44] sm:$0xff]  }
  0x56   : > { %v880_v8 = vor.u32 %v879_v3, %v876_v2  ;;  %v1236_v3 = vshrl.u32 %v4312_v40, 16  ;;  %v922_v52 = vshll.u32 %v4872_v44, 16 }
  0x57   : > { %v899_v54 = vsel %vm406_vm1, %v889_v28, %v898_v49  ;;  %v1242_v10 = vrot.slane %v1240_v4, 1 }
  0x58   : > { %v881_v14 = vsel %vm406_vm1, %v871_v50, %v880_v8  ;;  %v890_v34 = vsel %vm406_vm1, %v880_v8, %v889_v28  ;;  %v1230_v50 = vor.u32 %v1228_v46, %v1226_v31  ;;  %v1238_v9 = vor.u32 %v1236_v3, %v1234_v51 }
  0x59   : > { %v915_v28 = vrot.slane %v913_v21, 4  ;;  %v688_v46 = vrot.slane %v686_v30, 1  ;;  %v628_v3 = vpack.c.b16 %v619_v59, %v619_v59 }
  0x5a   : > { %3974 = vmatmul.msk.bf16.vlgmr.msrb.gmra.mxu3 %vm321_vm0, %v872_v55  ;;  %v1235_v55 = vsel %vm629_vm2, %v1230_v50, %v1234_v51  ;;  %v1243_v16 = vsel %vm629_vm2, %v1238_v9, %v1242_v10  ;;  %v919_v51 = vshrl.u32 %v4872_v44, 16 }
  0x5b   : > { %4034 = vmatmul.msk.bf16.vlgmr.msrb.gmra.mxu1 %vm321_vm0, %v1211_v56  ;;  %v4869_v56 = vld [vmem:[%s5006_s12 + $0x34] sm:$0xff]  }
  0x5c   : > { %v904_v61 = vshll.u32 %v4869_v56, 16 }
  0x5e   : > { %v906_v2 = vrot.slane %v904_v61, 4  ;;  %v924_v61 = vrot.slane %v922_v52, 4  ;;  %v1971_v52 = vld [vmem:[%s5913_s5 + $0x10] sm:$0xff] }
  0x5f   : > { %1997 = vperm.xlu1 %4929, %v1971_v52  }
  0x61   : > { %3961 = vmatmul.msk.bf16.gmra.mxu2 %vm321_vm0, %v649_v1 }
  0x62   : > { %3989 = vmatmul.msk.bf16.gmra.mxu0 %vm321_vm0, %v5049_v58 }
  0x6a   : > { %3975 = vmatmul.msk.bf16.gmra.mxu3 %vm321_vm0, %v881_v14  ;;  %v678_v14 = vshll.u32 %v4303_v6, 16 }
  0x6b   : > { %4035 = vmatmul.msk.bf16.gmra.mxu1 %vm321_vm0, %v1219_v15 }
  0x6c   : > { %v680_v19 = vrot.slane %v678_v14, 1  ;;  %v690_v14 = vshrl.u32 %v5165_v32, 16  ;;  %v4876_v32 = vld [vmem:[%s5006_s12 + $0x1c] sm:$0xff]  }
  0x6d   : > { %v1435_v48 = vshrl.u32 %v4876_v32, 16 }
  0x6e   : > { %v681_v24 = vsel %vm629_vm2, %v676_v18, %v680_v19  ;;  %v684_v45 = vor.u32 %v682_v39, %v680_v19  ;;  %v692_v20 = vor.u32 %v690_v14, %v688_v46 }
  0x71   : > { %3962 = vmatmul.msk.bf16.gmra.mxu2 %vm321_vm0, %v657_v22  ;;  %v5153_v22 = vld [vmem:[%s5006_s12 + $0x40] sm:$0xff] }
  0x72   : > { %3990 = vmatmul.msk.bf16.gmra.mxu0 %vm321_vm0, %v5070_v11  ;;  %v1248_v31 = vshll.u32 %v5153_v22, 16  ;;  %v1252_v42 = vshrl.u32 %v5153_v22, 16  ;;  %v4726_v22 = vld [vmem:[%s5006_s12 + $0x14] sm:$0x8] }
  0x74   : > { %v1250_v36 = vrot.slane %v1248_v31, 1 }
  0x7a   : > { %3976 = vmatmul.msk.bf16.gmra.mxu3 %vm321_vm0, %v890_v34  ;;  %v916_v34 = vor.u32 %v915_v28, %v912_v27 }
  0x7b   : > { %4036 = vmatmul.msk.bf16.gmra.mxu1 %vm321_vm0, %v1227_v35  ;;  %v1246_v35 = vor.u32 %v1244_v29, %v1242_v10 }
  0x81   : > { %3963 = vmatmul.msk.bf16.gmra.mxu2 %vm321_vm0, %v665_v43 }
  0x82   : > { %3991 = vmatmul.msk.bf16.gmra.mxu0 %vm321_vm0, %v5009_v5  ;;  %v901_v5 = vshrl.u32 %v4869_v56, 16 }
  0x84   : > { %v903_v1 = vrot.slane %v901_v5, 3  ;;  %v921_v5 = vrot.slane %v919_v51, 3 }
  0x86   : > { %v907_v8 = vor.u32 %v906_v2, %v903_v1  ;;  %v5201_v1 = vld [vmem:[%s5006_s12 + $0x48] sm:$0xff]   ;;  %v5206_v6 = vor.u32 %v924_v61, %v921_v5 }
  0x87   : > { %v1970_v2 = vld [vmem:[%s5913_s5 + $0x8] sm:$0xff]  ;;  %v4415_v9 = vunpack.c.h.b16 %v5201_v1 }
  0x88   : > { %v908_v15 = vsel %vm406_vm1, %v898_v49, %v907_v8  ;;  %v917_v43 = vsel %vm406_vm1, %v907_v8, %v916_v34  ;;  %v1969_v49 = vld [vmem:[%s5913_s5] sm:$0xff]  ;;  %v926_v17 = vsel %vm406_vm1, %v916_v34, %v5206_v6 }
  0x89   : > { %1987 = vperm.xlu0 %4928, %v1969_v49   ;;  %v855_v19 = vpack.c.b16 %v4415_v9, %v4415_v9  ;;  %v1438_v49 = vshll.u32 %v4876_v32, 16 }
  0x8a   : > { %3977 = vmatmul.msk.bf16.gmra.mxu3 %vm321_vm0, %v899_v54 }
  0x8b   : > { %4037 = vmatmul.msk.bf16.gmra.mxu1 %vm321_vm0, %v1235_v55  ;;  %v689_v55 = vsel %vm629_vm2, %v684_v45, %v688_v46  ;;  %v928_v28 = vshrl.u32 %v855_v19, 16  ;;  %v931_v29 = vshll.u32 %v855_v19, 16 }
  0x8d   : > { %v930_v30 = vrot.slane %v928_v28, 3 }
  0x8f   : > { %v5139_v0 = vpop.f32.mrf.mxu0 }
  0x91   : > { %3964 = vmatmul.msk.bf16.gmra.mxu2 %vm321_vm0, %v673_v62  ;;  %v1256_v62 = vshll.u32 %v5182_v53, 16  ;;  %1992 = vperm.xlu0 %4928, %v1970_v2  }
  0x92   : > { %3992 = vmatmul.msk.bf16.gmra.mxu0 %vm321_vm0, %v5030_v41 }
  0x93   : > { %v1258_v8 = vrot.slane %v1256_v62, 1  ;;  %v1437_v62 = vrot.slane %v1435_v48, 3 }
  0x94   : > { %v375_v7 = vpop.f32.mrf.mxu2 }
  0x97   : > { %v5145_v12 = vpop.f32.mrf.mxu0 }
  0x98   : > { %v526_v45 = vpop.f32.mrf.mxu1 }
  0x9a   : > { %3978 = vmatmul.msk.bf16.gmra.mxu3 %vm321_vm0, %v908_v15  ;;  %v694_v15 = vshll.u32 %v628_v3, 16 }
  0x9b   : > { %4038 = vmatmul.msk.bf16.gmra.mxu1 %vm321_vm0, %v1243_v16 }
  0x9c   : > { %v377_v41 = vpop.f32.mrf.mxu2  ;;  %v696_v21 = vrot.slane %v694_v15, 1 }
  0x9d   : > { %v546_v23 = vpop.f32.mrf.mxu3 }
  0x9e   : > { %v5158_v26 = vadd.f32 %v546_v23, %v375_v7  ;;  %v1254_v7 = vor.u32 %v1252_v42, %v1250_v36  ;;  %v4874_v23 = vld [vmem:[%s5006_s12 + $0x14] sm:$0xf0]  }
  0x9f   : > { %v5156_v25 = vpop.f32.mrf.mxu0 }
  0xa0   : > { %v1259_v18 = vsel %vm629_vm2, %v1254_v7, %v1258_v8 }
  0xa1   : > { %3965 = vmatmul.msk.bf16.gmra.mxu2 %vm321_vm0, %v681_v24  ;;  %v1975_v24 = vld [vmem:[%s5913_s5 + $0x30] sm:$0xff] }
  0xa2   : > { %3993 = vmatmul.msk.bf16.gmra.mxu0 %vm321_vm0, %v5046_v57  ;;  %v1251_v57 = vsel %vm629_vm2, %v1246_v35, %v1250_v36  ;;  %2017 = vperm.xlu0 %4928, %v1975_v24   ;;  %v697_v35 = vsel %vm629_vm2, %v692_v20, %v696_v21  ;;  %v4116_v20 = vld [vmem:[%s5911_s3 + $0x4] sm:$0xf] }
  0xa3   : > { %v1981_v21 = vld [vmem:[%s5913_s5 + $0x60] sm:$0xff] }
  0xa4   : > { %v380_v33 = vpop.f32.mrf.mxu2 }
  0xa5   : > { %v548_v37 = vpop.f32.mrf.mxu3 }
  0xa6   : > { %v5170_v40 = vadd.f32 %v548_v37, %v377_v41  ;;  %v4319_v37 = vld [vmem:[%s5006_s12 + $0x18] sm:$0xff] }
  0xa7   : > { %v5167_v38 = vpop.f32.mrf.mxu0  ;;  %v1773_v51 = vshll.u32 %v4319_v37, 16  ;;  %v1771_v7 = vshrl.u32 %v4319_v37, 16  ;;  %v527_v37 = vadd.f32 %v526_v45, %v5139_v0 }
  0xa9   : > { %v1775_v9 = vrot.slane %v1773_v51, 1 }
  0xaa   : > { %3979 = vmatmul.msk.bf16.gmra.mxu3 %vm321_vm0, %v917_v43  ;;  %v933_v43 = vrot.slane %v931_v29, 4 }
  0xab   : > { %4039 = vmatmul.msk.bf16.gmra.mxu1 %vm321_vm0, %v1251_v57  ;;  %v1260_v57 = vshrl.u32 %v5182_v53, 16  ;;  %v1978_v53 = vld [vmem:[%s5913_s5 + $0x48] sm:$0xff] }
  0xac   : > { %v382_v50 = vpop.f32.mrf.mxu2  ;;  %2032 = vperm.xlu0 %4928, %v1978_v53  }
  0xad   : > { %v551_v54 = vpop.f32.mrf.mxu3  ;;  %v1262_v59 = vor.u32 %v1260_v57, %v1258_v8 }
  0xae   : > { %v5190_v60 = vadd.f32 %v551_v54, %v380_v33  ;;  %v4727_v33 = vor.u32 %v4874_v23, %v4726_v22  ;;  %v2209_v23 = vsel %vm2207_vm4, %v4116_v20, 0 }
  0xaf   : > { %v5187_v56 = vpop.f32.mrf.mxu0  ;;  %2218 = vmatpush.bf16.msra.mxu1 %v2209_v23 }
  0xb0   : > { %v1427_v46 = vshrl.u32 %v4727_v33, 16  ;;  %v1430_v47 = vshll.u32 %v4727_v33, 16 }
  0xb1   : > { %3966 = vmatmul.msk.bf16.gmra.mxu2 %vm321_vm0, %v689_v55  ;;  %v934_v55 = vor.u32 %v933_v43, %v930_v30  ;;  %v1976_v30 = vld [vmem:[%s5913_s5 + $0x38] sm:$0xff] }
  0xb2   : > { %3994 = vmatmul.msk.bf16.gmra.mxu0 %vm321_vm0, %v5056_v63  ;;  %v1153_v63 = vld [vmem:[%s5006_s12 + $0x50] sm:$0x1]  ;;  %v1429_v61 = vrot.slane %v1427_v46, 3  ;;  %v1432_v42 = vrot.slane %v1430_v47, 4  ;;  %v1984_v43 = vld [vmem:[%s5913_s5 + $0x78] sm:$0xff] }
  0xb3   : > { %v1190_v41 = vunpack.c.l.b16 %v1153_v63  ;;  %v935_v14 = vsel %vm406_vm1, %v5206_v6, %v934_v55  ;;  %v1972_v6 = vld [vmem:[%s5913_s5 + $0x18] sm:$0xff] }
  0xb4   : > { %v385_v4 = vpop.f32.mrf.mxu2  ;;  %v1433_v15 = vor.u32 %v1432_v42, %v1429_v61  ;;  %2002 = vperm.xlu1 %4929, %v1972_v6   ;;  %2047 = vperm.xlu0 %4928, %v1981_v21  }
  0xb5   : > { %v553_v10 = vpop.f32.mrf.mxu3  ;;  %v1199_v31 = vpack.c.b16 %v1190_v41, %v1190_v41  ;;  %v528_v41 = vpop.f32.mrf.mxu1 }
  0xb6   : > { %v5213_v16 = vadd.f32 %v553_v10, %v382_v50  ;;  %v5237_v50 = vld [vmem:[%s5006_s12 + $0x20] sm:$0xff] }
  0xb7   : > { %v5210_v13 = vpop.f32.mrf.mxu0  ;;  %v1264_v44 = vshll.u32 %v1199_v31, 16  ;;  %v1778_v63 = vshll.u32 %v5237_v50, 16  ;;  %v4878_v31 = vld [vmem:[%s5006_s12 + $0x24] sm:$0xff]   ;;  %v1782_v52 = vshrl.u32 %v5237_v50, 16 }
  0xb8   : > { %v1444_v33 = vshrl.u32 %v4878_v31, 16 }
  0xb9   : > { %v1266_v5 = vrot.slane %v1264_v44, 1  ;;  %v1780_v19 = vrot.slane %v1778_v63, 1 }
  0xba   : > { %3980 = vmatmul.msk.bf16.gmra.mxu3 %vm321_vm0, %v926_v17 }
  0xbb   : > { %4040 = vmatmul.msk.bf16.gmra.mxu1 %vm321_vm0, %v1259_v18  ;;  %v1267_v8 = vsel %vm629_vm2, %v1262_v59, %v1266_v5  ;;  %v1776_v18 = vor.u32 %v1775_v9, %v1771_v7  ;;  %v529_v59 = vadd.f32 %v528_v41, %v5145_v12  ;;  %v1979_v5 = vld [vmem:[%s5913_s5 + $0x50] sm:$0xff] }
  0xbc   : > { %v387_v27 = vpop.f32.mrf.mxu2  ;;  %2022 = vperm.xlu1 %4929, %v1976_v30   ;;  %2062 = vperm.xlu0 %4928, %v1984_v43   ;;  %v4880_v7 = vld [vmem:[%s5006_s12 + $0x2c] sm:$0xff]  }
  0xbd   : > { %v556_v34 = vpop.f32.mrf.mxu3  ;;  %v1781_v29 = vsel %vm629_vm2, %v1776_v18, %v1780_v19  ;;  %v531_v44 = vpop.f32.mrf.mxu1 }
  0xbe   : > { %v5230_v39 = vadd.f32 %v556_v34, %v385_v4  ;;  %v1440_v4 = vrot.slane %v1438_v49, 4  ;;  %v1447_v34 = vshll.u32 %v4878_v31, 16  ;;  %v1446_v49 = vrot.slane %v1444_v33, 3 }
  0xbf   : > { %v5227_v36 = vpop.f32.mrf.mxu0 }
  0xc0   : > { %v1441_v17 = vor.u32 %v1440_v4, %v1437_v62  ;;  %v1449_v51 = vrot.slane %v1447_v34, 4  ;;  %v1973_v34 = vld [vmem:[%s5913_s5 + $0x20] sm:$0xff] }
  0xc1   : > { %3967 = vmatmul.msk.bf16.gmra.mxu2 %vm321_vm0, %v697_v35  ;;  %v4321_v35 = vld [vmem:[%s5006_s12 + $0x28] sm:$0xff]  ;;  %2007 = vperm.xlu2 %4930, %v1973_v34  }
  0xc2   : > { %3995 = vmatmul.msk.bf16.gmra.mxu0 %vm321_vm0, %v5201_v1  ;;  %v1786_v0 = vshll.u32 %v4321_v35, 16  ;;  %v1450_v53 = vor.u32 %v1449_v51, %v1446_v49  ;;  %v4323_v49 = vld [vmem:[%s5006_s12 + $0x38] sm:$0xff] }
  0xc4   : > { %v390_v54 = vpop.f32.mrf.mxu2  ;;  %v1788_v55 = vrot.slane %v1786_v0, 1  ;;  %2037 = vperm.xlu1 %4929, %v1979_v5   ;;  %v1451_v62 = vsel %vm406_vm1, %v1441_v17, %v1450_v53  ;;  %v1974_v0 = vld [vmem:[%s5913_s5 + $0x28] sm:$0xff] }
  0xc5   : > { %v558_v2 = vpop.f32.mrf.mxu3  ;;  %v533_v9 = vpop.f32.mrf.mxu1 }
  0xc6   : > { %v5248_v10 = vadd.f32 %v558_v2, %v387_v27  ;;  %v1442_v27 = vsel %vm406_vm1, %v1433_v15, %v1441_v17  ;;  %v532_v15 = vadd.f32 %v531_v44, %v5156_v25  ;;  %v1982_v17 = vld [vmem:[%s5913_s5 + $0x68] sm:$0xff]  ;;  %v534_v33 = vadd.f32 %v533_v9, %v5167_v38 }
  0xc7   : > { %v5245_v3 = vpop.f32.mrf.mxu0 }
  0xc9   : > { %2012 = vperm.xlu2 %4930, %v1974_v0  }
  0xca   : > { %3981 = vmatmul.msk.bf16.gmra.mxu3 %vm321_vm0, %v935_v14  ;;  %v1456_v14 = vshll.u32 %v4880_v7, 16 }
  0xcb   : > { %4041 = vmatmul.msk.bf16.gmra.mxu1 %vm321_vm0, %v1267_v8  ;;  %v4322_v8 = vld [vmem:[%s5006_s12 + $0x30] sm:$0xff] }
  0xcc   : > { %v392_v22 = vpop.f32.mrf.mxu2  ;;  %2052 = vperm.xlu1 %4929, %v1982_v17   ;;  %v1458_v21 = vrot.slane %v1456_v14, 4  ;;  %v1794_v23 = vshll.u32 %v4322_v8, 16 }
  0xcd   : > { %v561_v24 = vpop.f32.mrf.mxu3 }
  0xce   : > { %v5268_v32 = vadd.f32 %v561_v24, %v390_v54  ;;  %v1784_v54 = vor.u32 %v1782_v52, %v1780_v19  ;;  %v1796_v31 = vrot.slane %v1794_v23, 1  ;;  %v4324_v23 = vld [vmem:[%s5006_s12 + $0x40] sm:$0xff] }
  0xcf   : > { %v1081_v28 = vpop.f32.mrf.mxu0 }
  0xd0   : > { %v1789_v4 = vsel %vm629_vm2, %v1784_v54, %v1788_v55 }
  0xd1   : > { %4048 = vmatmul.msk.bf16.vlgmr.msra.gmra.mxu2 %vm321_vm0, %v1442_v27  ;;  %v536_v27 = vpop.f32.mrf.mxu1 }
  0xd2   : > { %4108 = vmatmul.msk.bf16.vlgmr.msra.gmra.mxu0 %vm321_vm0, %v1781_v29  ;;  %v537_v51 = vadd.f32 %v536_v27, %v5187_v56  ;;  %v1980_v27 = vld [vmem:[%s5913_s5 + $0x58] sm:$0xff] }
  0xd4   : > { %v737_v57 = vpop.f32.mrf.mxu2 }
  0xd5   : > { %v777_v46 = vadd.f32 %v737_v57, %v527_v37  ;;  %v563_v47 = vpop.f32.mrf.mxu3 }
  0xd6   : > { %v5281_v45 = vadd.f32 %v563_v47, %v392_v22  ;;  %v1790_v22 = vshrl.u32 %v4321_v35, 16 }
  0xd7   : > { %v1083_v48 = vpop.f32.mrf.mxu0 }
  0xd8   : > { %v1792_v25 = vor.u32 %v1790_v22, %v1788_v55 }
  0xd9   : > { %v538_v52 = vpop.f32.mrf.mxu1 }
  0xda   : > { %4062 = vmatmul.msk.bf16.vlgmr.msra.gmra.mxu3 %vm321_vm0, %v5049_v58  ;;  %v1453_v58 = vshrl.u32 %v4880_v7, 16  ;;  %v1797_v44 = vsel %vm629_vm2, %v1792_v25, %v1796_v31 }
  0xdc   : > { %v739_v61 = vpop.f32.mrf.mxu2  ;;  %v1455_v6 = vrot.slane %v1453_v58, 3  ;;  %v1977_v58 = vld [vmem:[%s5913_s5 + $0x40] sm:$0xff] }
  0xdd   : > { %v778_v50 = vadd.f32 %v739_v61, %v529_v59  ;;  %v975_v42 = vpop.f32.mrf.mxu3  ;;  %2027 = vperm.xlu2 %4930, %v1977_v58   ;;  %v1814_v58 = vshrl.u32 %v4324_v23, 16 }
  0xde   : > { %v1015_v12 = vadd.f32 %v975_v42, %v777_v46  ;;  %v1459_v29 = vor.u32 %v1458_v21, %v1455_v6  ;;  %v4882_v46 = vld [vmem:[%s5006_s12 + $0x34] sm:$0xff]   ;;  %v1802_v42 = vshll.u32 %v4323_v49, 16 }
  0xdf   : > { %v1086_v2 = vpop.f32.mrf.mxu0 }
  0xe0   : > { %v5292_v63 = vadd.f32 %v1081_v28, %v1015_v12  ;;  %v1460_v43 = vsel %vm406_vm1, %v1450_v53, %v1459_v29  ;;  %v1804_v9 = vrot.slane %v1802_v42, 1  ;;  %v539_v12 = vadd.f32 %v538_v52, %v5210_v13  ;;  %v4325_v42 = vld [vmem:[%s5006_s12 + $0x48] sm:$0xff] }
  0xe1   : > { %4049 = vmatmul.msk.bf16.gmra.mxu2 %vm321_vm0, %v1451_v62 }
  0xe2   : > { %4109 = vmatmul.msk.bf16.gmra.mxu0 %vm321_vm0, %v1789_v4 }
  0xe4   : > { %v742_v18 = vpop.f32.mrf.mxu2 }
  0xe5   : > { %v779_v19 = vadd.f32 %v742_v18, %v532_v15  ;;  %v977_v41 = vpop.f32.mrf.mxu3  ;;  %2042 = vperm.xlu2 %4930, %v1980_v27  }
  0xe6   : > { %v1016_v24 = vadd.f32 %v977_v41, %v778_v50  ;;  %v1798_v50 = vshrl.u32 %v4322_v8, 16  ;;  %v541_v8 = vpop.f32.mrf.mxu1 }
  0xe7   : > { %v1088_v20 = vpop.f32.mrf.mxu0 }
  0xe8   : > { %v5301_v28 = vadd.f32 %v1083_v48, %v1016_v24  ;;  %v1465_v48 = vshll.u32 %v4882_v46, 16  ;;  %v1800_v7 = vor.u32 %v1798_v50, %v1796_v31  ;;  %v542_v24 = vadd.f32 %v541_v8, %v5227_v36 }
  0xea   : > { %4063 = vmatmul.msk.bf16.gmra.mxu3 %vm321_vm0, %v5070_v11  ;;  %v1462_v11 = vshrl.u32 %v4882_v46, 16  ;;  %v1467_v61 = vrot.slane %v1465_v48, 4  ;;  %v1805_v41 = vsel %vm629_vm2, %v1800_v7, %v1804_v9 }
  0xec   : > { %v744_v35 = vpop.f32.mrf.mxu2  ;;  %v1464_v5 = vrot.slane %v1462_v11, 3 }
  0xed   : > { %v780_v37 = vadd.f32 %v744_v35, %v534_v33  ;;  %v980_v30 = vpop.f32.mrf.mxu3 }
  0xee   : > { %v1017_v47 = vadd.f32 %v980_v30, %v779_v19  ;;  %v1468_v56 = vor.u32 %v1467_v61, %v1464_v5  ;;  %v1810_v30 = vshll.u32 %v4324_v23, 16  ;;  %v4887_v23 = vld [vmem:[%s5006_s12 + $0x4c] sm:$0xff]  }
  0xef   : > { %v1091_v57 = vpop.f32.mrf.mxu0 }
  0xf0   : > { %v5312_v38 = vadd.f32 %v1086_v2, %v1017_v47  ;;  %v4601_v2 = vld [vmem:[%s5006_s12 + $0x28] sm:$0xff]   ;;  %v1469_v18 = vsel %vm406_vm1, %v1459_v29, %v1468_v56  ;;  %v1812_v11 = vrot.slane %v1810_v30, 1 }
  0xf1   : > { %4050 = vmatmul.msk.bf16.gmra.mxu2 %vm321_vm0, %v1460_v43 }
  0xf2   : > { %4110 = vmatmul.msk.bf16.gmra.mxu0 %vm321_vm0, %v1797_v44  ;;  %v4602_v44 = vld [vmem:[%s5006_s12 + $0x30] sm:$0xff]  }
  0xf4   : > { %v747_v53 = vpop.f32.mrf.mxu2 }
  0xf5   : > { %v781_v54 = vadd.f32 %v747_v53, %v537_v51  ;;  %v982_v55 = vpop.f32.mrf.mxu3  ;;  %v1983_v51 = vld [vmem:[%s5913_s5 + $0x70] sm:$0xff] }
  0xf6   : > { %v1018_v62 = vadd.f32 %v982_v55, %v780_v37  ;;  %v1806_v37 = vshrl.u32 %v4323_v49, 16  ;;  %2057 = vperm.xlu2 %4930, %v1983_v51  }
  0xf7   : > { %v1093_v59 = vpop.f32.mrf.mxu0 }
  0xf8   : > { %v5322_v4 = vadd.f32 %v1088_v20, %v1018_v62  ;;  %v4884_v20 = vld [vmem:[%s5006_s12 + $0x3c] sm:$0xff]   ;;  %v1808_v47 = vor.u32 %v1806_v37, %v1804_v9 }
  0xf9   : > { %v1471_v21 = vshrl.u32 %v4884_v20, 16  ;;  %v1474_v22 = vshll.u32 %v4884_v20, 16 }
  0xfa   : > { %4064 = vmatmul.msk.bf16.gmra.mxu3 %vm321_vm0, %v4601_v2  ;;  %v1813_v55 = vsel %vm629_vm2, %v1808_v47, %v1812_v11  ;;  %v4604_v47 = vld [vmem:[%s5006_s12 + $0x40] sm:$0xff]  }
  0xfb   : > { %v1473_v34 = vrot.slane %v1471_v21, 3  ;;  %v1476_v35 = vrot.slane %v1474_v22, 4 }
  0xfc   : > { %v749_v14 = vpop.f32.mrf.mxu2 }
  0xfd   : > { %v782_v15 = vadd.f32 %v749_v14, %v539_v12  ;;  %v985_v17 = vpop.f32.mrf.mxu3  ;;  %v1477_v36 = vor.u32 %v1476_v35, %v1473_v34  ;;  %v1818_v14 = vshll.u32 %v4325_v42, 16 }
  0xfe   : > { %v1019_v6 = vadd.f32 %v985_v17, %v781_v54 }
  0xff   : > { %v1096_v19 = vpop.f32.mrf.mxu0  ;;  %v1478_v53 = vsel %vm406_vm1, %v1468_v56, %v1477_v36 }
 0x100   : > { %v5332_v13 = vadd.f32 %v1091_v57, %v1019_v6  ;;  %v543_v57 = vpop.f32.mrf.mxu1 }
 0x101   : > { %4051 = vmatmul.msk.bf16.gmra.mxu2 %vm321_vm0, %v1469_v18  ;;  %v544_v48 = vadd.f32 %v543_v57, %v5245_v3  ;;  %v1822_v57 = vshrl.u32 %v4325_v42, 16 }
 0x102   : > { %4111 = vmatmul.msk.bf16.gmra.mxu0 %vm321_vm0, %v1805_v41  ;;  %v1820_v41 = vrot.slane %v1818_v14, 1 }
 0x104   : > { %v752_v29 = vpop.f32.mrf.mxu2 }
 0x105   : > { %v783_v25 = vadd.f32 %v752_v29, %v542_v24  ;;  %v987_v31 = vpop.f32.mrf.mxu3  ;;  %v1489_v29 = vshrl.u32 %v4887_v23, 16 }
 0x106   : > { %v1020_v43 = vadd.f32 %v987_v31, %v782_v15  ;;  %v4603_v15 = vld [vmem:[%s5006_s12 + $0x38] sm:$0xff]   ;;  %v4326_v31 = vld [vmem:[%s5006_s12 + $0x50] sm:$0xff] }
 0x107   : > { %v1098_v33 = vpop.f32.mrf.mxu0  ;;  %v1491_v30 = vrot.slane %v1489_v29, 3 }
 0x108   : > { %v5342_v46 = vadd.f32 %v1093_v59, %v1020_v43  ;;  %v4886_v59 = vld [vmem:[%s5006_s12 + $0x44] sm:$0xff]  }
 0x109   : > { %v1480_v61 = vshrl.u32 %v4886_v59, 16  ;;  %v1483_v50 = vshll.u32 %v4886_v59, 16 }
 0x10a   : > { %4065 = vmatmul.msk.bf16.gmra.mxu3 %vm321_vm0, %v4602_v44  ;;  %v1826_v44 = vshll.u32 %v4326_v31, 16 }
 0x10b   : > { %v1482_v9 = vrot.slane %v1480_v61, 3  ;;  %v1485_v12 = vrot.slane %v1483_v50, 4 }
 0x10c   : > { %v754_v49 = vpop.f32.mrf.mxu2  ;;  %v1828_v51 = vrot.slane %v1826_v44, 1  ;;  %v4133_v44 = vld [vmem:[%s5911_s3 + $0x8] sm:$0xf] }
 0x10d   : > { %v784_v52 = vadd.f32 %v754_v49, %v544_v48  ;;  %v990_v0 = vpop.f32.mrf.mxu3  ;;  %v1486_v18 = vor.u32 %v1485_v12, %v1482_v9  ;;  %v1824_v48 = vor.u32 %v1822_v57, %v1820_v41  ;;  %v2139_v57 = vld [vmem:[%s5911_s3] sm:$0xf] }
 0x10e   : > { %v1021_v5 = vadd.f32 %v990_v0, %v783_v25  ;;  %v1492_v25 = vshll.u32 %v4887_v23, 16 }
 0x10f   : > { %v1101_v54 = vpop.f32.mrf.mxu0  ;;  %v1487_v6 = vsel %vm406_vm1, %v1477_v36, %v1486_v18  ;;  %v4606_v36 = vld [vmem:[%s5006_s12 + $0x50] sm:$0xff]  }
 0x110   : > { %v5352_v3 = vadd.f32 %v1096_v19, %v1021_v5  ;;  %v1816_v19 = vor.u32 %v1814_v58, %v1812_v11  ;;  %v1494_v43 = vrot.slane %v1492_v25, 4  ;;  %v4447_v49 = vunpack.c.h.b16 %v4606_v36 }
 0x111   : > { %4052 = vmatmul.msk.bf16.gmra.mxu2 %vm321_vm0, %v1478_v53 }
 0x112   : > { %4112 = vmatmul.msk.bf16.gmra.mxu0 %vm321_vm0, %v1813_v55  ;;  %v1821_v22 = vsel %vm629_vm2, %v1816_v19, %v1820_v41  ;;  %v1495_v11 = vor.u32 %v1494_v43, %v1491_v30  ;;  %v1829_v55 = vsel %vm629_vm2, %v1824_v48, %v1828_v51  ;;  %v1425_v59 = vpack.c.b16 %v4447_v49, %v4447_v49  ;;  %v1307_v19 = vpop.f32.mrf.mxu1 }
 0x114   : > { %v757_v62 = vpop.f32.mrf.mxu2  ;;  %v1496_v53 = vsel %vm406_vm1, %v1486_v18, %v1495_v11  ;;  %v1498_v42 = vshrl.u32 %v1425_v59, 16 }
 0x115   : > { %v785_v2 = vadd.f32 %v757_v62, %v5158_v26  ;;  %v992_v7 = vpop.f32.mrf.mxu3  ;;  %v1501_v62 = vshll.u32 %v1425_v59, 16 }
 0x116   : > { %v1022_v8 = vadd.f32 %v992_v7, %v784_v52  ;;  %v1723_v52 = vld [vmem:[%s5006_s12 + $0x58] sm:$0x1]  ;;  %v1500_v14 = vrot.slane %v1498_v42, 3 }
 0x117   : > { %v5358_v56 = vpop.f32.mrf.mxu0  ;;  %v1760_v5 = vunpack.c.l.b16 %v1723_v52 }
 0x118   : > { %v5361_v17 = vadd.f32 %v1098_v33, %v1022_v8  ;;  %v1503_v8 = vrot.slane %v1501_v62, 4  ;;  %v1347_v62 = vadd.f32 %v1307_v19, %v5292_v63 }
 0x11a   : > { %4066 = vmatmul.msk.bf16.gmra.mxu3 %vm321_vm0, %v4603_v15  ;;  %v1830_v15 = vshrl.u32 %v4326_v31, 16  ;;  %v1504_v41 = vor.u32 %v1503_v8, %v1500_v14  ;;  %v4607_v31 = vld [vmem:[#allocation2 + $0x8] sm:$0xff]  }
 0x11b   : > { %4117 = vmatmul.msk.bf16.vlgmr.msra.gmra.mxu1 %vm2182_vm5, %v4607_v31 }
 0x11c   : > { %v5364_v20 = vpop.f32.mrf.mxu2 }
 0x11d   : > { %v995_v26 = vpop.f32.mrf.mxu3 }
 0x11e   : > { %v1023_v24 = vadd.f32 %v995_v26, %v785_v2  ;;  %v1769_v2 = vpack.c.b16 %v1760_v5, %v1760_v5  ;;  %v1832_v26 = vor.u32 %v1830_v15, %v1828_v51  ;;  %v5439_v15 = vld [vmem:[%s5910_s2] ss:$0 sm:$0xff] }
 0x11f   : > { %v1106_v21 = vpop.f32.mrf.mxu0 }
 0x120   : > { %v5369_v27 = vadd.f32 %v1101_v54, %v1023_v24  ;;  %v1834_v18 = vshll.u32 %v1769_v2, 16 }
 0x121   : > { %4053 = vmatmul.msk.bf16.gmra.mxu2 %vm321_vm0, %v1487_v6 }
 0x122   : > { %4113 = vmatmul.msk.bf16.gmra.mxu0 %vm321_vm0, %v1821_v22  ;;  %v1836_v6 = vrot.slane %v1834_v18, 1 }
 0x124   : > { %v762_v33 = vpop.f32.mrf.mxu2  ;;  %v1837_v24 = vsel %vm629_vm2, %v1832_v26, %v1836_v6  ;;  %v1988_v6 = vpop.permute.xlu0 %1987 }
 0x125   : > { %v787_v34 = vadd.f32 %v762_v33, %v5190_v60  ;;  %v5375_v35 = vpop.f32.mrf.mxu3  ;;  %v1309_v33 = vpop.f32.mrf.mxu1 }
 0x126   : > { %v1348_v26 = vadd.f32 %v1309_v33, %v5301_v28 }
 0x127   : > { %v5377_v37 = vpop.f32.mrf.mxu0 }
 0x12a   : > { %4067 = vmatmul.msk.bf16.gmra.mxu3 %vm321_vm0, %v4604_v47 }
 0x12c   : > { %v5383_v0 = vpop.f32.mrf.mxu2 }
 0x12d   : > { %v1000_v60 = vpop.f32.mrf.mxu3  ;;  %v1312_v48 = vpop.f32.mrf.mxu1 }
 0x12e   : > { %v1025_v61 = vadd.f32 %v1000_v60, %v787_v34  ;;  %v4174_v60 = vld [vmem:[%s5911_s3 + $0xc] sm:$0xf] }
 0x12f   : > { %v1111_v54 = vpop.f32.mrf.mxu0 }
 0x130   : > { %v5387_v50 = vadd.f32 %v1106_v21, %v1025_v61 }
 0x131   : > { %4054 = vmatmul.msk.bf16.gmra.mxu2 %vm321_vm0, %v1496_v53  ;;  %v4183_v53 = vld [vmem:[%s5911_s3 + $0x10] sm:$0xf] }
 0x132   : > { %4114 = vmatmul.msk.bf16.gmra.mxu0 %vm321_vm0, %v1829_v55  ;;  %v2816_v55 = vsel %vm2207_vm4, %v4174_v60, 0  ;;  %v2918_v59 = vsel %vm2207_vm4, %v4183_v53, 0 }
 0x133   : > { %2825 = vmatpush.bf16.msrb.mxu0 %v2816_v55  ;;  %2927 = vmatpush.bf16.msrb.mxu1 %v2918_v59 }
 0x134   : > { %v767_v7 = vpop.f32.mrf.mxu2 }
 0x135   : > { %v789_v9 = vadd.f32 %v767_v7, %v5230_v39  ;;  %v5392_v12 = vpop.f32.mrf.mxu3  ;;  %v1505_v39 = vsel %vm406_vm1, %v1495_v11, %v1504_v41  ;;  %v2376_v11 = vsel %vm2207_vm4, %v2139_v57, 0  ;;  %v1314_v42 = vpop.f32.mrf.mxu1 }
 0x136   : > { %2385 = vmatpush.bf16.msrb.mxu2 %v2376_v11 }
 0x137   : > { %v5394_v58 = vpop.f32.mrf.mxu0 }
 0x13a   : > { %4068 = vmatmul.msk.bf16.gmra.mxu3 %vm321_vm0, %v5201_v1 }
 0x13c   : > { %v5398_v21 = vpop.f32.mrf.mxu2 }
 0x13d   : > { %v1005_v22 = vpop.f32.mrf.mxu3  ;;  %v5441_v18 = vpop.f32.mrf.mxu1 }
 0x13e   : > { %v1027_v29 = vadd.f32 %v1005_v22, %v789_v9 }
 0x13f   : > { %v1116_v23 = vpop.f32.mrf.mxu0 }
 0x140   : > { %v5402_v25 = vadd.f32 %v1111_v54, %v1027_v29 }
 0x141   : > { %4055 = vmatmul.msk.bf16.gmra.mxu2 %vm321_vm0, %v1505_v39 }
 0x142   : > { %4115 = vmatmul.msk.bf16.gmra.mxu0 %vm321_vm0, %v1837_v24 }
 0x144   : > { %v772_v1 = vpop.f32.mrf.mxu2 }
 0x145   : > { %v791_v34 = vadd.f32 %v772_v1, %v5268_v32  ;;  %v5408_v30 = vpop.f32.mrf.mxu3  ;;  %v2582_v32 = vsel %vm2207_vm4, %v4133_v44, 0  ;;  %v4617_v1 = vld [vmem:[#allocation2 + $0x4] sm:$0x8] }
 0x146   : > { %2591 = vmatpush.bf16.msrb.mxu3 %v2582_v32  ;;  %v1349_v32 = vadd.f32 %v1312_v48, %v5312_v38 }
 0x147   : > { %v5410_v43 = vpop.f32.mrf.mxu0 }
 0x14a   : > { %4069 = vmatmul.msk.bf16.gmra.mxu3 %vm321_vm0, %v4606_v36 }
 0x14c   : > { %v5419_v47 = vpop.f32.mrf.mxu2 }
 0x14d   : > { %v1010_v51 = vpop.f32.mrf.mxu3 }
 0x14e   : > { %v1029_v36 = vadd.f32 %v1010_v51, %v791_v34  ;;  %v4764_v34 = vld [vmem:[#allocation2 + $0x4] sm:$0xf0]   ;;  %v5446_v51 = vpop.f32.mrf.mxu1 }
 0x14f   : > { %v1877_v49 = vpop.f32.mrf.mxu0  ;;  %v4618_v11 = vor.u32 %v4764_v34, %v4617_v1 }
 0x150   : > { %v5423_v52 = vadd.f32 %v1116_v23, %v1029_v36 }
 0x151   : > { %v2272_v55 = vshrl.u32 %v4618_v11, 16  ;;  %v2275_v59 = vshll.u32 %v4618_v11, 16 }
 0x153   : > { %v2274_v48 = vrot.slane %v2272_v55, 3 }
 0x154   : > { %v1545_v54 = vpop.f32.mrf.mxu2 }
 0x155   : > { %v5433_v5 = vpop.f32.mrf.mxu3  ;;  %v1585_v7 = vadd.f32 %v1545_v54, %v1347_v62 }
 0x157   : > { %v1879_v61 = vpop.f32.mrf.mxu0 }
 0x15c   : > { %v1547_v2 = vpop.f32.mrf.mxu2 }
 0x15d   : > { %v1651_v9 = vpop.f32.mrf.mxu3  ;;  %v1586_v63 = vadd.f32 %v1547_v2, %v1348_v26  ;;  %v1998_v26 = vpop.permute.xlu1 %1997 }
 0x15e   : > { %v1691_v8 = vadd.f32 %v1651_v9, %v1585_v7 }
 0x15f   : > { %v1882_v14 = vpop.f32.mrf.mxu0 }
 0x160   : > { %v1917_v41 = vadd.f32 %v1877_v49, %v1691_v8  ;;  %v1993_v49 = vpop.permute.xlu0 %1992  ;;  %v2277_v8 = vrot.slane %v2275_v59, 4 }
 0x162   : > { %v1937_v22 = vadd.f32 %v5439_v15, %v1917_v41  ;;  %v1350_v41 = vadd.f32 %v1314_v42, %v5322_v4 }
 0x164   : > { %v1550_v39 = vpop.f32.mrf.mxu2  ;;  %v1953_v19 = vmax.f32 %v1937_v22, 0.0 }
 0x165   : > { %v1653_v23 = vpop.f32.mrf.mxu3  ;;  %v1587_v36 = vadd.f32 %v1550_v39, %v1349_v32 }
 0x166   : > { %v2065_v29 = vmul.f32 %v1988_v6, %v1953_v19  ;;  %v1692_v31 = vadd.f32 %v1653_v23, %v1586_v63  ;;  %v5453_v23 = vpop.f32.mrf.mxu1 }
 0x167   : > { %v1884_v24 = vpop.f32.mrf.mxu0 }
 0x168   : > { %v2090_v57 = vpack.c.bf16 %v2065_v29, %v2065_v29  ;;  %v1918_v44 = vadd.f32 %v1879_v61, %v1692_v31  ;;  %v4328_v61 = vld [vmem:[#allocation2 + $0x8] sm:$0xff] }
 0x169   : > { %v2492_v19 = vshll.u32 %v4328_v61, 16  ;;  %v2490_v32 = vshrl.u32 %v4328_v61, 16 }
 0x16a   : > { %2106 = vst.msk [vmem:[#allocation2 + $0x10] sm:$0xf] %vm2081_vm3, %v2090_v57  ;;  %v1938_v28 = vadd.f32 %v5439_v15, %v1918_v44 }
 0x16c   : > { %v1552_v33 = vpop.f32.mrf.mxu2  ;;  %v1954_v60 = vmax.f32 %v1938_v28, 0.0  ;;  %v2494_v28 = vrot.slane %v2492_v19, 1 }
 0x16d   : > { %v1656_v53 = vpop.f32.mrf.mxu3  ;;  %v1588_v29 = vadd.f32 %v1552_v33, %v1350_v41 }
 0x16e   : > { %v2066_v62 = vmul.f32 %v1993_v49, %v1954_v60  ;;  %v1693_v2 = vadd.f32 %v1656_v53, %v1587_v36  ;;  %v4780_v49 = vld [vmem:[#allocation2 + $0xc] sm:$0x8] }
 0x16f   : > { %v1887_v54 = vpop.f32.mrf.mxu0 }
 0x170   : > { %v2091_v7 = vpack.c.bf16 %v2066_v62, %v2066_v62  ;;  %v1919_v9 = vadd.f32 %v1882_v14, %v1693_v2  ;;  %v2278_v14 = vor.u32 %v2277_v8, %v2274_v48  ;;  %v1351_v62 = vadd.f32 %v5441_v18, %v5332_v13  ;;  %v5473_v18 = vpop.f32.mrf.mxu1 }
 0x171   : > { %v4766_v38 = vld [vmem:[#allocation2 + $0xc] sm:$0xff]  }
 0x172   : > { %2107 = vst.msk [vmem:[#allocation2 + $0x14] sm:$0xf] %vm2081_vm3, %v2091_v7  ;;  %v1939_v6 = vadd.f32 %v5439_v15, %v1919_v9  ;;  %v2280_v39 = vshrl.u32 %v4766_v38, 16  ;;  %v2283_v63 = vshll.u32 %v4766_v38, 16  ;;  %v4889_v36 = vld [vmem:[#allocation2 + $0xc] sm:$0xf0]   ;;  %v2495_v7 = vor.u32 %v2494_v28, %v2490_v32  ;;  %v2003_v38 = vpop.permute.xlu1 %2002  ;;  %v2008_v32 = vpop.permute.xlu2 %2007 }
 0x174   : > { %v1555_v22 = vpop.f32.mrf.mxu2  ;;  %v1955_v31 = vmax.f32 %v1939_v6, 0.0  ;;  %v2282_v34 = vrot.slane %v2280_v39, 3  ;;  %v2285_v57 = vrot.slane %v2283_v63, 4 }
 0x175   : > { %v1658_v1 = vpop.f32.mrf.mxu3  ;;  %v1589_v48 = vadd.f32 %v1555_v22, %v1351_v62  ;;  %v1352_v22 = vadd.f32 %v5446_v51, %v5342_v46 }
 0x176   : > { %v2067_v4 = vmul.f32 %v1998_v26, %v1955_v31  ;;  %v1694_v42 = vadd.f32 %v1658_v1, %v1588_v29  ;;  %v5457_v11 = vor.u32 %v2285_v57, %v2282_v34 }
 0x177   : > { %v5455_v44 = vpop.f32.mrf.mxu0 }
 0x178   : > { %v2092_v60 = vpack.c.bf16 %v2067_v4, %v2067_v4  ;;  %v1920_v53 = vadd.f32 %v1884_v24, %v1694_v42  ;;  %v2287_v33 = vsel %vm406_vm1, %v2278_v14, %v5457_v11  ;;  %v4781_v24 = vor.u32 %v4889_v36, %v4780_v49 }
 0x179   : > { %v5459_v55 = vld [vmem:[#allocation2 + $0x10] sm:$0xff]   ;;  %4125 = vmatmul.msk.bf16.vlgmr.msrb.gmra.mxu2 %vm2182_vm5, %v2287_v33 }
 0x17a   : > { %v5463_v59 = vld [vmem:[#allocation2 + $0x10] sm:$0xff]  ;;  %2108 = vst.msk [vmem:[#allocation2 + $0x18] sm:$0xf] %vm2081_vm3, %v2092_v60  ;;  %v1940_v2 = vadd.f32 %v5439_v15, %v1920_v53  ;;  %4118 = vmatmul.msk.bf16.gmra.mxu1 %vm2182_vm5, %v5459_v55  ;;  %v2712_v63 = vshrl.u32 %v4781_v24, 16  ;;  %v2715_v19 = vshll.u32 %v4781_v24, 16 }
 0x17b   : > { %v2497_v9 = vshll.u32 %v5463_v59, 16 }
 0x17c   : > { %v1557_v61 = vpop.f32.mrf.mxu2  ;;  %v1956_v8 = vmax.f32 %v1940_v2, 0.0  ;;  %v2714_v4 = vrot.slane %v2712_v63, 3  ;;  %v2717_v42 = vrot.slane %v2715_v19, 4 }
 0x17d   : > { %v1661_v41 = vpop.f32.mrf.mxu3  ;;  %v2499_v26 = vrot.slane %v2497_v9, 1 }
 0x17e   : > { %v2068_v6 = vmul.f32 %v2003_v38, %v1956_v8  ;;  %v1695_v39 = vadd.f32 %v1661_v41, %v1589_v48  ;;  %v2718_v48 = vor.u32 %v2717_v42, %v2714_v4  ;;  %v2013_v4 = vpop.permute.xlu2 %2012 }
 0x17f   : > { %v1892_v13 = vpop.f32.mrf.mxu0  ;;  %v2500_v29 = vsel %vm629_vm2, %v2495_v7, %v2499_v26 }
 0x180   : > { %v2093_v31 = vpack.c.bf16 %v2068_v6, %v2068_v6  ;;  %v1921_v1 = vadd.f32 %v1887_v54, %v1695_v39  ;;  %4166 = vmatmul.msk.bf16.vlgmr.msrb.gmra.mxu3 %vm2182_vm5, %v2500_v29  ;;  %v1590_v54 = vadd.f32 %v1557_v61, %v1352_v22  ;;  %v1327_v6 = vpop.f32.mrf.mxu1 }
 0x181   : > { %v4768_v14 = vld [vmem:[#allocation2 + $0x14] sm:$0xff]  }
 0x182   : > { %v4891_v34 = vld [vmem:[#allocation2 + $0x14] sm:$0xff]   ;;  %2109 = vst.msk [vmem:[#allocation2 + $0x1c] sm:$0xf] %vm2081_vm3, %v2093_v31  ;;  %v1941_v57 = vadd.f32 %v5439_v15, %v1921_v1  ;;  %v2289_v49 = vshrl.u32 %v4768_v14, 16  ;;  %v2292_v36 = vshll.u32 %v4768_v14, 16  ;;  %v1353_v1 = vadd.f32 %v5453_v23, %v5352_v3 }
 0x183   : > { %v2720_v60 = vshrl.u32 %v4891_v34, 16  ;;  %v2723_v53 = vshll.u32 %v4891_v34, 16 }
 0x184   : > { %v1560_v28 = vpop.f32.mrf.mxu2  ;;  %v1957_v33 = vmax.f32 %v1941_v57, 0.0  ;;  %v2291_v2 = vrot.slane %v2289_v49, 3  ;;  %v2294_v24 = vrot.slane %v2292_v36, 4 }
 0x185   : > { %v1663_v62 = vpop.f32.mrf.mxu3  ;;  %v2722_v7 = vrot.slane %v2720_v60, 3  ;;  %v2725_v9 = vrot.slane %v2723_v53, 4  ;;  %v1591_v22 = vadd.f32 %v1560_v28, %v1353_v1 }
 0x186   : > { %v2069_v46 = vmul.f32 %v2008_v32, %v1957_v33  ;;  %v1696_v51 = vadd.f32 %v1663_v62, %v1590_v54  ;;  %v2295_v38 = vor.u32 %v2294_v24, %v2291_v2 }
 0x187   : > { %v2726_v8 = vor.u32 %v2725_v9, %v2722_v7  ;;  %v1894_v41 = vpop.f32.mrf.mxu0 }
 0x188   : > { %v2094_v39 = vpack.c.bf16 %v2069_v46, %v2069_v46  ;;  %v1922_v63 = vadd.f32 %v5455_v44, %v1696_v51  ;;  %v2296_v61 = vsel %vm406_vm1, %v5457_v11, %v2295_v38  ;;  %v2501_v11 = vshrl.u32 %v5463_v59, 16  ;;  %v1329_v28 = vpop.f32.mrf.mxu1 }
 0x189   : > { %v5482_v19 = vld [vmem:[#allocation2 + $0x18] sm:$0xff]   ;;  %v2727_v29 = vsel %vm406_vm1, %v2718_v48, %v2726_v8  ;;  %4126 = vmatmul.msk.bf16.gmra.mxu2 %vm2182_vm5, %v2296_v61  ;;  %v1354_v59 = vadd.f32 %v5473_v18, %v5361_v17  ;;  %v2018_v48 = vpop.permute.xlu0 %2017 }
 0x18a   : > { %v5487_v31 = vld [vmem:[#allocation2 + $0x18] sm:$0xff]  ;;  %2110 = vst.msk [vmem:[#allocation2 + $0x20] sm:$0xf] %vm2081_vm3, %v2094_v39  ;;  %v1942_v14 = vadd.f32 %v5439_v15, %v1922_v63  ;;  %4119 = vmatmul.msk.bf16.gmra.mxu1 %vm2182_vm5, %v5482_v19  ;;  %4175 = vmatmul.msk.bf16.vlgmr.msrb.gmra.mxu0 %vm2182_vm5, %v2727_v29  ;;  %v2503_v23 = vor.u32 %v2501_v11, %v2499_v26 }
 0x18b   : > { %v2505_v34 = vshll.u32 %v5487_v31, 16 }
 0x18c   : > { %v1562_v44 = vpop.f32.mrf.mxu2  ;;  %v1958_v57 = vmax.f32 %v1942_v14, 0.0 }
 0x18d   : > { %v1666_v3 = vpop.f32.mrf.mxu3  ;;  %v2507_v42 = vrot.slane %v2505_v34, 1  ;;  %v1592_v51 = vadd.f32 %v1562_v44, %v1354_v59  ;;  %v786_v34 = vadd.f32 %v5364_v20, %v5170_v40 }
 0x18e   : > { %v2070_v32 = vmul.f32 %v2013_v4, %v1958_v57  ;;  %v1697_v49 = vadd.f32 %v1666_v3, %v1591_v22 }
 0x18f   : > { %v2508_v36 = vsel %vm629_vm2, %v2503_v23, %v2507_v42  ;;  %v1897_v54 = vpop.f32.mrf.mxu0 }
 0x190   : > { %v2095_v60 = vpack.c.bf16 %v2070_v32, %v2070_v32  ;;  %v1923_v53 = vadd.f32 %v1892_v13, %v1697_v49  ;;  %4167 = vmatmul.msk.bf16.gmra.mxu3 %vm2182_vm5, %v2508_v36  ;;  %v1355_v32 = vadd.f32 %v1327_v6, %v5369_v27  ;;  %v1024_v49 = vadd.f32 %v5375_v35, %v786_v34  ;;  %v1332_v27 = vpop.f32.mrf.mxu1  ;;  %v2023_v36 = vpop.permute.xlu1 %2022 }
 0x191   : > { %v4770_v33 = vld [vmem:[#allocation2 + $0x1c] sm:$0xff]  }
 0x192   : > { %v4893_v62 = vld [vmem:[#allocation2 + $0x1c] sm:$0xff]   ;;  %2111 = vst.msk [vmem:[#allocation2 + $0x24] sm:$0xf] %vm2081_vm3, %v2095_v60  ;;  %v1943_v26 = vadd.f32 %v5439_v15, %v1923_v53  ;;  %v2298_v24 = vshrl.u32 %v4770_v33, 16  ;;  %v2301_v7 = vshll.u32 %v4770_v33, 16 }
 0x193   : > { %v2729_v9 = vshrl.u32 %v4893_v62, 16  ;;  %v2732_v46 = vshll.u32 %v4893_v62, 16  ;;  %v1130_v62 = vadd.f32 %v5358_v56, %v1024_v49  ;;  %v788_v49 = vadd.f32 %v5383_v0, %v5213_v16 }
 0x194   : > { %v1565_v2 = vpop.f32.mrf.mxu2  ;;  %v1959_v13 = vmax.f32 %v1943_v26, 0.0  ;;  %v2300_v63 = vrot.slane %v2298_v24, 3  ;;  %v2303_v61 = vrot.slane %v2301_v7, 4 }
 0x195   : > { %v1668_v39 = vpop.f32.mrf.mxu3  ;;  %v2731_v29 = vrot.slane %v2729_v9, 3  ;;  %v2734_v1 = vrot.slane %v2732_v46, 4  ;;  %v1593_v6 = vadd.f32 %v1565_v2, %v1355_v32 }
 0x196   : > { %v2071_v14 = vmul.f32 %v2018_v48, %v1959_v13  ;;  %v1698_v17 = vadd.f32 %v1668_v39, %v1592_v51  ;;  %v5505_v18 = vor.u32 %v2303_v61, %v2300_v63  ;;  %v1356_v51 = vadd.f32 %v1329_v28, %v1130_v62  ;;  %v2028_v63 = vpop.permute.xlu2 %2027 }
 0x197   : > { %v5507_v11 = vor.u32 %v2734_v1, %v2731_v29 }
 0x198   : > { %v2096_v22 = vpack.c.bf16 %v2071_v14, %v2071_v14  ;;  %v1924_v57 = vadd.f32 %v1894_v41, %v1698_v17  ;;  %v2305_v44 = vsel %vm406_vm1, %v2295_v38, %v5505_v18  ;;  %v1899_v38 = vpop.f32.mrf.mxu0 }
 0x199   : > { %v5511_v4 = vld [vmem:[#allocation2 + $0x20] sm:$0xff]   ;;  %v2736_v3 = vsel %vm406_vm1, %v2726_v8, %v5507_v11  ;;  %4127 = vmatmul.msk.bf16.gmra.mxu2 %vm2182_vm5, %v2305_v44  ;;  %v2509_v8 = vshrl.u32 %v5487_v31, 16  ;;  %v1334_v44 = vpop.f32.mrf.mxu1 }
 0x19a   : > { %v5517_v23 = vld [vmem:[#allocation2 + $0x20] sm:$0xff]  ;;  %2112 = vst.msk [vmem:[#allocation2 + $0x28] sm:$0xf] %vm2081_vm3, %v2096_v22  ;;  %v1944_v40 = vadd.f32 %v5439_v15, %v1924_v57  ;;  %4120 = vmatmul.msk.bf16.gmra.mxu1 %vm2182_vm5, %v5511_v4  ;;  %4176 = vmatmul.msk.bf16.gmra.mxu0 %vm2182_vm5, %v2736_v3 }
 0x19b   : > { %v2513_v41 = vshll.u32 %v5517_v23, 16  ;;  %v2511_v53 = vor.u32 %v2509_v8, %v2507_v42 }
 0x19c   : > { %v1567_v20 = vpop.f32.mrf.mxu2  ;;  %v1960_v35 = vmax.f32 %v1944_v40, 0.0 }
 0x19d   : > { %v1671_v60 = vpop.f32.mrf.mxu3  ;;  %v2515_v33 = vrot.slane %v2513_v41, 1  ;;  %v1594_v61 = vadd.f32 %v1567_v20, %v1356_v51 }
 0x19e   : > { %v2072_v59 = vmul.f32 %v2023_v36, %v1960_v35  ;;  %v1699_v26 = vadd.f32 %v1671_v60, %v1593_v6  ;;  %v1357_v36 = vadd.f32 %v1332_v27, %v5387_v50  ;;  %v1026_v60 = vadd.f32 %v5392_v12, %v788_v49  ;;  %v2033_v27 = vpop.permute.xlu0 %2032 }
 0x19f   : > { %v2516_v24 = vsel %vm629_vm2, %v2511_v53, %v2515_v33  ;;  %v790_v49 = vadd.f32 %v5398_v21, %v5248_v10 }
 0x1a0   : > { %v2097_v7 = vpack.c.bf16 %v2072_v59, %v2072_v59  ;;  %v1925_v9 = vadd.f32 %v1897_v54, %v1699_v26  ;;  %4168 = vmatmul.msk.bf16.gmra.mxu3 %vm2182_vm5, %v2516_v24  ;;  %v1902_v14 = vpop.f32.mrf.mxu0  ;;  %v1132_v59 = vadd.f32 %v5377_v37, %v1026_v60 }
 0x1a1   : > { %v4772_v31 = vld [vmem:[#allocation2 + $0x24] sm:$0xff]  }
 0x1a2   : > { %v4895_v46 = vld [vmem:[#allocation2 + $0x24] sm:$0xff]   ;;  %2113 = vst.msk [vmem:[#allocation2 + $0x2c] sm:$0xf] %vm2081_vm3, %v2097_v7  ;;  %v1945_v2 = vadd.f32 %v5439_v15, %v1925_v9  ;;  %v2307_v42 = vshrl.u32 %v4772_v31, 16  ;;  %v2310_v48 = vshll.u32 %v4772_v31, 16 }
 0x1a3   : > { %v2738_v39 = vshrl.u32 %v4895_v46, 16  ;;  %v2741_v56 = vshll.u32 %v4895_v46, 16 }
 0x1a4   : > { %v1570_v13 = vpop.f32.mrf.mxu2  ;;  %v1961_v29 = vmax.f32 %v1945_v2, 0.0  ;;  %v2309_v54 = vrot.slane %v2307_v42, 3  ;;  %v2312_v17 = vrot.slane %v2310_v48, 4 }
 0x1a5   : > { %v1673_v1 = vpop.f32.mrf.mxu3  ;;  %v2740_v34 = vrot.slane %v2738_v39, 3  ;;  %v2743_v22 = vrot.slane %v2741_v56, 4 }
 0x1a6   : > { %v2073_v57 = vmul.f32 %v2028_v63, %v1961_v29  ;;  %v1700_v28 = vadd.f32 %v1673_v1, %v1594_v61  ;;  %v2313_v3 = vor.u32 %v2312_v17, %v2309_v54  ;;  %v2038_v29 = vpop.permute.xlu1 %2037 }
 0x1a7   : > { %v2744_v32 = vor.u32 %v2743_v22, %v2740_v34 }
 0x1a8   : > { %v2098_v40 = vpack.c.bf16 %v2073_v57, %v2073_v57  ;;  %v1926_v8 = vadd.f32 %v1899_v38, %v1700_v28  ;;  %v2314_v20 = vsel %vm406_vm1, %v5505_v18, %v2313_v3  ;;  %v2517_v18 = vshrl.u32 %v5517_v23, 16  ;;  %v1904_v7 = vpop.f32.mrf.mxu0  ;;  %v1337_v23 = vpop.f32.mrf.mxu1 }
 0x1a9   : > { %v5536_v41 = vld [vmem:[#allocation2 + $0x28] sm:$0xff]   ;;  %v2745_v6 = vsel %vm406_vm1, %v5507_v11, %v2744_v32  ;;  %4128 = vmatmul.msk.bf16.gmra.mxu2 %vm2182_vm5, %v2314_v20  ;;  %v1595_v38 = vadd.f32 %v1570_v13, %v1357_v36  ;;  %v1358_v13 = vadd.f32 %v1334_v44, %v1132_v59 }
 0x1aa   : > { %v5542_v35 = vld [vmem:[#allocation2 + $0x28] sm:$0xff]  ;;  %2114 = vst.msk [vmem:[#allocation2 + $0x30] sm:$0xf] %vm2081_vm3, %v2098_v40  ;;  %v1946_v16 = vadd.f32 %v5439_v15, %v1926_v8  ;;  %4121 = vmatmul.msk.bf16.gmra.mxu1 %vm2182_vm5, %v5536_v41  ;;  %4177 = vmatmul.msk.bf16.gmra.mxu0 %vm2182_vm5, %v2745_v6  ;;  %v2519_v53 = vor.u32 %v2517_v18, %v2515_v33 }
 0x1ab   : > { %v2521_v11 = vshll.u32 %v5542_v35, 16  ;;  %v1028_v18 = vadd.f32 %v5408_v30, %v790_v49 }
 0x1ac   : > { %v1572_v0 = vpop.f32.mrf.mxu2  ;;  %v1962_v50 = vmax.f32 %v1946_v16, 0.0 }
 0x1ad   : > { %v1676_v12 = vpop.f32.mrf.mxu3  ;;  %v2523_v62 = vrot.slane %v2521_v11, 1  ;;  %v1596_v63 = vadd.f32 %v1572_v0, %v1358_v13  ;;  %v1359_v0 = vadd.f32 %v1337_v23, %v5402_v25  ;;  %v2043_v11 = vpop.permute.xlu2 %2042  ;;  %v4233_v23 = vld [vmem:[%s5911_s3 + $0x18] sm:$0xf] }
 0x1ae   : > { %v2074_v26 = vmul.f32 %v2033_v27, %v1962_v50  ;;  %v1701_v24 = vadd.f32 %v1676_v12, %v1595_v38 }
 0x1af   : > { %v2524_v9 = vsel %vm629_vm2, %v2519_v53, %v2523_v62  ;;  %v1134_v53 = vadd.f32 %v5394_v58, %v1028_v18  ;;  %v4192_v58 = vld [vmem:[%s5911_s3 + $0x14] sm:$0xf] }
 0x1b0   : > { %v2099_v31 = vpack.c.bf16 %v2074_v26, %v2074_v26  ;;  %v1927_v46 = vadd.f32 %v1902_v14, %v1701_v24  ;;  %4169 = vmatmul.msk.bf16.gmra.mxu3 %vm2182_vm5, %v2524_v9  ;;  %v1907_v20 = vpop.f32.mrf.mxu0  ;;  %v1339_v21 = vpop.f32.mrf.mxu1 }
 0x1b1   : > { %v4774_v51 = vld [vmem:[#allocation2 + $0x2c] sm:$0xff]  }
 0x1b2   : > { %v4897_v2 = vld [vmem:[#allocation2 + $0x2c] sm:$0xff]   ;;  %2115 = vst.msk [vmem:[#allocation2 + $0x34] sm:$0xf] %vm2081_vm3, %v2099_v31  ;;  %v1947_v33 = vadd.f32 %v5439_v15, %v1927_v46  ;;  %v2316_v48 = vshrl.u32 %v4774_v51, 16  ;;  %v2319_v37 = vshll.u32 %v4774_v51, 16  ;;  %v1360_v46 = vadd.f32 %v1339_v21, %v1134_v53 }
 0x1b3   : > { %v2747_v39 = vshrl.u32 %v4897_v2, 16  ;;  %v2750_v56 = vshll.u32 %v4897_v2, 16 }
 0x1b4   : > { %v1575_v42 = vpop.f32.mrf.mxu2  ;;  %v1963_v61 = vmax.f32 %v1947_v33, 0.0  ;;  %v2318_v14 = vrot.slane %v2316_v48, 3  ;;  %v2321_v54 = vrot.slane %v2319_v37, 4  ;;  %v4242_v48 = vld [vmem:[%s5911_s3 + $0x1c] sm:$0xf]  ;;  %v2048_v37 = vpop.permute.xlu0 %2047 }
 0x1b5   : > { %v1678_v1 = vpop.f32.mrf.mxu3  ;;  %v2749_v17 = vrot.slane %v2747_v39, 3  ;;  %v2752_v34 = vrot.slane %v2750_v56, 4  ;;  %v1597_v25 = vadd.f32 %v1575_v42, %v1359_v0  ;;  %v3476_v49 = vsel %vm2207_vm4, %v4242_v48, 0 }
 0x1b6   : > { %v2075_v22 = vmul.f32 %v2038_v29, %v1963_v61  ;;  %v1702_v57 = vadd.f32 %v1678_v1, %v1596_v63  ;;  %v5559_v28 = vor.u32 %v2321_v54, %v2318_v14  ;;  %v3140_v63 = vsel %vm2207_vm4, %v4192_v58, 0  ;;  %3485 = vmatpush.bf16.msra.mxu0 %v3476_v49 }
 0x1b7   : > { %v5561_v44 = vor.u32 %v2752_v34, %v2749_v17  ;;  %v3374_v61 = vsel %vm2207_vm4, %v4233_v23, 0  ;;  %3149 = vmatpush.bf16.msra.mxu2 %v3140_v63 }
 0x1b8   : > { %v2100_v40 = vpack.c.bf16 %v2075_v22, %v2075_v22  ;;  %v1928_v8 = vadd.f32 %v1904_v7, %v1702_v57  ;;  %v2323_v36 = vsel %vm406_vm1, %v2313_v3, %v5559_v28  ;;  %v2525_v3 = vshrl.u32 %v5542_v35, 16  ;;  %v1909_v51 = vpop.f32.mrf.mxu0  ;;  %v1342_v29 = vpop.f32.mrf.mxu1  ;;  %3383 = vmatpush.bf16.msra.mxu3 %v3374_v61 }
 0x1b9   : > { %v5565_v6 = vld [vmem:[#allocation2 + $0x30] sm:$0xff]   ;;  %v2754_v60 = vsel %vm406_vm1, %v2744_v32, %v5561_v44  ;;  %4129 = vmatmul.msk.bf16.gmra.mxu2 %vm2182_vm5, %v2323_v36  ;;  %v792_v36 = vadd.f32 %v5419_v47, %v5281_v45  ;;  %v4251_v47 = vld [vmem:[%s5911_s3 + $0x20] sm:$0xf] }
 0x1ba   : > { %v5571_v16 = vld [vmem:[#allocation2 + $0x30] sm:$0xff]  ;;  %2116 = vst.msk [vmem:[#allocation2 + $0x38] sm:$0xf] %vm2081_vm3, %v2100_v40  ;;  %v1948_v10 = vadd.f32 %v5439_v15, %v1928_v8  ;;  %4122 = vmatmul.msk.bf16.gmra.mxu1 %vm2182_vm5, %v5565_v6  ;;  %4178 = vmatmul.msk.bf16.gmra.mxu0 %vm2182_vm5, %v2754_v60  ;;  %v2527_v27 = vor.u32 %v2525_v3, %v2523_v62 }
 0x1bb   : > { %v2529_v32 = vshll.u32 %v5571_v16, 16 }
 0x1bc   : > { %v1964_v38 = vmax.f32 %v1948_v10, 0.0  ;;  %v1577_v30 = vpop.f32.mrf.mxu2 }
 0x1bd   : > { %v1681_v50 = vpop.f32.mrf.mxu3  ;;  %v5583_v12 = vrot.slane %v2529_v32, 1  ;;  %v1598_v39 = vadd.f32 %v1577_v30, %v1360_v46  ;;  %v1361_v32 = vadd.f32 %v1342_v29, %v5423_v52  ;;  %v2533_v52 = vshrl.u32 %v5571_v16, 16  ;;  %v2053_v30 = vpop.permute.xlu1 %2052 }
 0x1be   : > { %v2076_v59 = vmul.f32 %v2043_v11, %v1964_v38  ;;  %v1703_v26 = vadd.f32 %v1681_v50, %v1597_v25  ;;  %v1030_v11 = vadd.f32 %v5433_v5, %v792_v36 }
 0x1bf   : > { %v2532_v24 = vsel %vm629_vm2, %v2527_v27, %v5583_v12  ;;  %v2535_v27 = vor.u32 %v2533_v52, %v5583_v12 }
 0x1c0   : > { %v2101_v7 = vpack.c.bf16 %v2076_v59, %v2076_v59  ;;  %v1929_v9 = vadd.f32 %v1907_v20, %v1703_v26  ;;  %4170 = vmatmul.msk.bf16.gmra.mxu3 %vm2182_vm5, %v2532_v24  ;;  %v1136_v59 = vadd.f32 %v5410_v43, %v1030_v11 }
 0x1c1   : > { %v4776_v35 = vld [vmem:[#allocation2 + $0x34] sm:$0xff]  }
 0x1c2   : > { %v4899_v31 = vld [vmem:[#allocation2 + $0x34] sm:$0xff]   ;;  %2117 = vst.msk [vmem:[#allocation2 + $0x3c] sm:$0xf] %vm2081_vm3, %v2101_v7  ;;  %v1949_v62 = vadd.f32 %v5439_v15, %v1929_v9  ;;  %v2325_v2 = vshrl.u32 %v4776_v35, 16  ;;  %v2328_v13 = vshll.u32 %v4776_v35, 16  ;;  %v1344_v7 = vpop.f32.mrf.mxu1 }
 0x1c3   : > { %v2756_v33 = vshrl.u32 %v4899_v31, 16  ;;  %v2759_v42 = vshll.u32 %v4899_v31, 16  ;;  %v1362_v58 = vadd.f32 %v1344_v7, %v1136_v59 }
 0x1c4   : > { %v1965_v56 = vmax.f32 %v1949_v62, 0.0  ;;  %v2327_v14 = vrot.slane %v2325_v2, 3  ;;  %v2330_v54 = vrot.slane %v2328_v13, 4  ;;  %v1580_v40 = vpop.f32.mrf.mxu2  ;;  %v2058_v13 = vpop.permute.xlu2 %2057 }
 0x1c5   : > { %v1683_v1 = vpop.f32.mrf.mxu3  ;;  %v2758_v17 = vrot.slane %v2756_v33, 3  ;;  %v2761_v34 = vrot.slane %v2759_v42, 4  ;;  %v1599_v25 = vadd.f32 %v1580_v40, %v1361_v32 }
 0x1c6   : > { %v2077_v22 = vmul.f32 %v2048_v37, %v1965_v56  ;;  %v1704_v57 = vadd.f32 %v1683_v1, %v1598_v39  ;;  %v5603_v8 = vor.u32 %v2330_v54, %v2327_v14 }
 0x1c7   : > { %v5605_v20 = vor.u32 %v2761_v34, %v2758_v17 }
 0x1c8   : > { %v2102_v60 = vpack.c.bf16 %v2077_v22, %v2077_v22  ;;  %v1930_v0 = vadd.f32 %v1909_v51, %v1704_v57  ;;  %v2332_v10 = vsel %vm406_vm1, %v5559_v28, %v5603_v8  ;;  %v1912_v28 = vpop.f32.mrf.mxu0 }
 0x1c9   : > { %v5609_v18 = vld [vmem:[#allocation2 + $0x38] sm:$0xff]   ;;  %v2763_v21 = vsel %vm406_vm1, %v5561_v44, %v5605_v20  ;;  %4130 = vmatmul.msk.bf16.gmra.mxu2 %vm2182_vm5, %v2332_v10  ;;  %v3698_v44 = vsel %vm2207_vm4, %v4251_v47, 0 }
 0x1ca   : > { %v5617_v3 = vld [vmem:[#allocation2 + $0x38] sm:$0xff]  ;;  %2118 = vst.msk [vmem:[#allocation2 + $0x40] sm:$0xf] %vm2081_vm3, %v2102_v60  ;;  %v1950_v45 = vadd.f32 %v5439_v15, %v1930_v0  ;;  %4123 = vmatmul.msk.bf16.gmra.mxu1 %vm2182_vm5, %v5609_v18  ;;  %4179 = vmatmul.msk.bf16.gmra.mxu0 %vm2182_vm5, %v2763_v21 }
 0x1cb   : > { %v2537_v5 = vshll.u32 %v5617_v3, 16  ;;  %3707 = vmatpush.bf16.msra.mxu1 %v3698_v44  ;;  %v2541_v0 = vshrl.u32 %v5617_v3, 16 }
 0x1cc   : > { %v1966_v38 = vmax.f32 %v1950_v45, 0.0  ;;  %v1582_v31 = vpop.f32.mrf.mxu2 }
 0x1cd   : > { %v1686_v50 = vpop.f32.mrf.mxu3  ;;  %v2539_v53 = vrot.slane %v2537_v5, 1  ;;  %v1600_v33 = vadd.f32 %v1582_v31, %v1362_v58 }
 0x1ce   : > { %v2078_v26 = vmul.f32 %v2053_v30, %v1966_v38  ;;  %v1705_v24 = vadd.f32 %v1686_v50, %v1599_v25 }
 0x1cf   : > { %v2540_v9 = vsel %vm629_vm2, %v2535_v27, %v2539_v53  ;;  %v2543_v32 = vor.u32 %v2541_v0, %v2539_v53  ;;  %v2220_v53 = vpop.f32.mrf.mxu1 }
 0x1d0   : > { %v2103_v16 = vpack.c.bf16 %v2078_v26, %v2078_v26  ;;  %v1931_v35 = vadd.f32 %v1912_v28, %v1705_v24  ;;  %4171 = vmatmul.msk.bf16.gmra.mxu3 %vm2182_vm5, %v2540_v9  ;;  %v1914_v37 = vpop.f32.mrf.mxu0 }
 0x1d1   : > { %v4777_v46 = vld [vmem:[#allocation2 + $0x3c] sm:$0xff]  }
 0x1d2   : > { %v4901_v62 = vld [vmem:[#allocation2 + $0x3c] sm:$0xff]   ;;  %2119 = vst.msk [vmem:[#allocation2 + $0x44] sm:$0xf] %vm2081_vm3, %v2103_v16  ;;  %v1951_v12 = vadd.f32 %v5439_v15, %v1931_v35  ;;  %v2334_v23 = vshrl.u32 %v4777_v46, 16  ;;  %v2337_v51 = vshll.u32 %v4777_v46, 16 }
 0x1d3   : > { %v2765_v43 = vshrl.u32 %v4901_v62, 16  ;;  %v2768_v2 = vshll.u32 %v4901_v62, 16 }
 0x1d4   : > { %v1967_v42 = vmax.f32 %v1951_v12, 0.0  ;;  %v2336_v39 = vrot.slane %v2334_v23, 3  ;;  %v2339_v56 = vrot.slane %v2337_v51, 4  ;;  %v4336_v12 = vld [vmem:[#allocation2 + $0x10] sm:$0xff] }
 0x1d5   : > { %v1688_v48 = vpop.f32.mrf.mxu3  ;;  %v2767_v63 = vrot.slane %v2765_v43, 3  ;;  %v2770_v61 = vrot.slane %v2768_v2, 4  ;;  %v4337_v43 = vld [vmem:[#allocation2 + $0x18] sm:$0xff] }
 0x1d6   : > { %v2079_v29 = vmul.f32 %v2058_v13, %v1967_v42  ;;  %v1706_v1 = vadd.f32 %v1688_v48, %v1600_v33  ;;  %v2340_v14 = vor.u32 %v2339_v56, %v2336_v39  ;;  %v4904_v33 = vld [vmem:[#allocation2 + $0x14] sm:$0xf0]   ;;  %v4819_v39 = vld [vmem:[#allocation2 + $0x14] sm:$0x8]  ;;  %v3055_v56 = vshll.u32 %v4337_v43, 16 }
 0x1d7   : > { %v2771_v54 = vor.u32 %v2770_v61, %v2767_v63  ;;  %v2222_v42 = vpop.f32.mrf.mxu1  ;;  %v4820_v63 = vor.u32 %v4904_v33, %v4819_v39 }
 0x1d8   : > { %v2104_v17 = vpack.c.bf16 %v2079_v29, %v2079_v29  ;;  %v1932_v34 = vadd.f32 %v1914_v37, %v1706_v1  ;;  %v2341_v57 = vsel %vm406_vm1, %v5603_v8, %v2340_v14  ;;  %v3050_v37 = vshll.u32 %v4336_v12, 16 }
 0x1d9   : > { %v5639_v22 = vld [vmem:[#allocation2 + $0x40] sm:$0xff]   ;;  %v2772_v49 = vsel %vm406_vm1, %v5605_v20, %v2771_v54  ;;  %4131 = vmatmul.msk.bf16.gmra.mxu2 %vm2182_vm5, %v2341_v57  ;;  %v2063_v20 = vpop.permute.xlu0 %2062  ;;  %v3270_v57 = vshrl.u32 %v4820_v63, 16 }
 0x1da   : > { %v4335_v40 = vld [vmem:[#allocation2 + $0x40] sm:$0xff]  ;;  %2120 = vst.msk [vmem:[#allocation2 + $0x48] sm:$0xf] %vm2081_vm3, %v2104_v17  ;;  %v1952_v36 = vadd.f32 %v5439_v15, %v1932_v34  ;;  %v4479_v60 = vunpack.c.h.b16 %v5639_v22  ;;  %4124 = vmatmul.msk.bf16.gmra.mxu1 %vm2182_vm5, %v5639_v22  ;;  %4180 = vmatmul.msk.bf16.gmra.mxu0 %vm2182_vm5, %v2772_v49  ;;  %v3052_v1 = vrot.slane %v3050_v37, 1  ;;  %v3048_v17 = vshrl.u32 %v4336_v12, 16 }
 0x1db   : > { %v2545_v8 = vshll.u32 %v4335_v40, 16  ;;  %v2549_v62 = vshrl.u32 %v4335_v40, 16  ;;  %v3057_v34 = vrot.slane %v3055_v56, 1  ;;  %v3273_v49 = vshll.u32 %v4820_v63, 16 }
 0x1dc   : > { %v1968_v10 = vmax.f32 %v1952_v36, 0.0  ;;  %v2270_v21 = vpack.c.b16 %v4479_v60, %v4479_v60  ;;  %v3053_v60 = vor.u32 %v3052_v1, %v3048_v17 }
 0x1dd   : > { %v2547_v11 = vrot.slane %v2545_v8, 1 }
 0x1de   : > { %v2080_v45 = vmul.f32 %v2063_v20, %v1968_v10  ;;  %v2343_v47 = vshrl.u32 %v2270_v21, 16  ;;  %v2346_v15 = vshll.u32 %v2270_v21, 16  ;;  %v3058_v10 = vsel %vm629_vm2, %v3053_v60, %v3057_v34 }
 0x1df   : > { %v2548_v28 = vsel %vm629_vm2, %v2543_v32, %v2547_v11  ;;  %v2551_v51 = vor.u32 %v2549_v62, %v2547_v11  ;;  %v3272_v21 = vrot.slane %v3270_v57, 3  ;;  %v3275_v20 = vrot.slane %v3273_v49, 4 }
 0x1e0   : > { %v2105_v52 = vpack.c.bf16 %v2080_v45, %v2080_v45  ;;  %4172 = vmatmul.msk.bf16.gmra.mxu3 %vm2182_vm5, %v2548_v28  ;;  %v2345_v5 = vrot.slane %v2343_v47, 3  ;;  %v2348_v44 = vrot.slane %v2346_v15, 4  ;;  %v4338_v15 = vld [vmem:[#allocation2 + $0x20] sm:$0xff] }
 0x1e1   : > { %v4902_v25 = vld [vmem:[#allocation2 + $0x44] sm:$0xff]   ;;  %v3276_v47 = vor.u32 %v3275_v20, %v3272_v21  ;;  %v4340_v21 = vld [vmem:[#allocation2 + $0x30] sm:$0xff] }
 0x1e2   : > { %v2443_v38 = vld [vmem:[#allocation2 + $0x48] sm:$0x1]  ;;  %2121 = vst.msk [vmem:[#allocation2 + $0x4c] sm:$0xf] %vm2081_vm3, %v2105_v52  ;;  %v2774_v30 = vshrl.u32 %v4902_v25, 16  ;;  %v2777_v50 = vshll.u32 %v4902_v25, 16  ;;  %v2349_v59 = vor.u32 %v2348_v44, %v2345_v5 }
 0x1e3   : > { %v2479_v3 = vunpack.c.l.b16 %v2443_v38  ;;  %v4908_v44 = vld [vmem:[#allocation2 + $0x24] sm:$0xff]   ;;  %v3063_v25 = vshll.u32 %v4338_v15, 16 }
 0x1e4   : > { %v2776_v26 = vrot.slane %v2774_v30, 3  ;;  %v2779_v24 = vrot.slane %v2777_v50, 4  ;;  %v2350_v16 = vsel %vm406_vm1, %v2340_v14, %v2349_v59  ;;  %v3290_v30 = vshll.u32 %v4908_v44, 16 }
 0x1e5   : > { %v2488_v27 = vpack.c.b16 %v2479_v3, %v2479_v3  ;;  %v3287_v3 = vshrl.u32 %v4908_v44, 16  ;;  %v3059_v59 = vshrl.u32 %v4337_v43, 16  ;;  %v4339_v43 = vld [vmem:[#allocation2 + $0x28] sm:$0xff] }
 0x1e6   : > { %v2780_v7 = vor.u32 %v2779_v24, %v2776_v26  ;;  %v3065_v26 = vrot.slane %v3063_v25, 1 }
 0x1e7   : > { %v2553_v9 = vshll.u32 %v2488_v27, 16 }
 0x1e8   : > { %v2781_v35 = vsel %vm406_vm1, %v2771_v54, %v2780_v7 }
 0x1e9   : > { %v5658_v31 = vld [vmem:[#allocation2 + $0x48] sm:$0xff]   ;;  %4132 = vmatmul.msk.bf16.gmra.mxu2 %vm2182_vm5, %v2350_v16  ;;  %v2555_v58 = vrot.slane %v2553_v9, 1  ;;  %v3061_v9 = vor.u32 %v3059_v59, %v3057_v34  ;;  %v3289_v16 = vrot.slane %v3287_v3, 3 }
 0x1ea   : > { %4184 = vmatmul.msk.bf16.vlgmr.msrb.gmra.mxu1 %vm2182_vm5, %v5459_v55  ;;  %v4511_v46 = vunpack.c.h.b16 %v5658_v31  ;;  %4181 = vmatmul.msk.bf16.gmra.mxu0 %vm2182_vm5, %v2781_v35  ;;  %v4906_v55 = vld [vmem:[#allocation2 + $0x1c] sm:$0xff]   ;;  %v3292_v35 = vrot.slane %v3290_v30, 4 }
 0x1eb   : > { %v2556_v48 = vsel %vm629_vm2, %v2551_v51, %v2555_v58  ;;  %v3278_v14 = vshrl.u32 %v4906_v55, 16  ;;  %v3281_v54 = vshll.u32 %v4906_v55, 16  ;;  %v3066_v62 = vsel %vm629_vm2, %v3061_v9, %v3065_v26 }
 0x1ec   : > { %v2710_v23 = vpack.c.b16 %v4511_v46, %v4511_v46  ;;  %v3293_v12 = vor.u32 %v3292_v35, %v3289_v16  ;;  %v3071_v55 = vshll.u32 %v4339_v43, 16 }
 0x1ed   : > { %v3280_v0 = vrot.slane %v3278_v14, 3  ;;  %v3283_v8 = vrot.slane %v3281_v54, 4 }
 0x1ee   : > { %v2783_v2 = vshrl.u32 %v2710_v23, 16  ;;  %v2786_v13 = vshll.u32 %v2710_v23, 16  ;;  %v3073_v1 = vrot.slane %v3071_v55, 1 }
 0x1ef   : > { %v3284_v11 = vor.u32 %v3283_v8, %v3280_v0 }
 0x1f0   : > { %4173 = vmatmul.msk.bf16.gmra.mxu3 %vm2182_vm5, %v2556_v48  ;;  %v2785_v61 = vrot.slane %v2783_v2, 3  ;;  %v2788_v29 = vrot.slane %v2786_v13, 4 }
 0x1f1   : > { %v3285_v5 = vsel %vm406_vm1, %v3276_v47, %v3284_v11  ;;  %v3294_v33 = vsel %vm406_vm1, %v3284_v11, %v3293_v12 }
 0x1f2   : > { %v2789_v40 = vor.u32 %v2788_v29, %v2785_v61  ;;  %v3067_v29 = vshrl.u32 %v4338_v15, 16 }
 0x1f4   : > { %v2790_v32 = vsel %vm406_vm1, %v2780_v7, %v2789_v40  ;;  %v3069_v17 = vor.u32 %v3067_v29, %v3065_v26 }
 0x1f7   : > { %v2225_v36 = vpop.f32.mrf.mxu1 }
 0x1f9   : > { %4225 = vmatmul.msk.bf16.vlgmr.msra.gmra.mxu2 %vm2182_vm5, %v3058_v10 }
 0x1fa   : > { %4185 = vmatmul.msk.bf16.gmra.mxu1 %vm2182_vm5, %v5482_v19  ;;  %4182 = vmatmul.msk.bf16.gmra.mxu0 %vm2182_vm5, %v2790_v32 }
 0x1fc   : > { %v2387_v45 = vpop.f32.mrf.mxu2 }
 0x1fd   : > { %v2388_v28 = vadd.f32 %v2387_v45, %v2220_v53  ;;  %v4912_v45 = vld [vmem:[#allocation2 + $0x34] sm:$0xff]  }
 0x1fe   : > { %v3308_v44 = vshll.u32 %v4912_v45, 16 }
 0x1ff   : > { %v2227_v52 = vpop.f32.mrf.mxu1 }
 0x200   : > { %4234 = vmatmul.msk.bf16.vlgmr.msra.gmra.mxu3 %vm2182_vm5, %v3285_v5  ;;  %v3305_v5 = vshrl.u32 %v4912_v45, 16  ;;  %v3310_v26 = vrot.slane %v3308_v44, 4 }
 0x202   : > { %v3307_v59 = vrot.slane %v3305_v5, 3 }
 0x203   : > { %v2593_v38 = vpop.f32.mrf.mxu3 }
 0x204   : > { %v2633_v50 = vadd.f32 %v2593_v38, %v2388_v28  ;;  %v2389_v27 = vpop.f32.mrf.mxu2  ;;  %v3079_v28 = vshll.u32 %v4340_v21, 16  ;;  %v3075_v38 = vshrl.u32 %v4339_v43, 16  ;;  %v3311_v35 = vor.u32 %v3310_v26, %v3307_v59  ;;  %v4914_v43 = vld [vmem:[#allocation2 + $0x3c] sm:$0xff]  }
 0x205   : > { %v2390_v24 = vadd.f32 %v2389_v27, %v2222_v42  ;;  %v4910_v42 = vld [vmem:[#allocation2 + $0x2c] sm:$0xff]   ;;  %v3317_v55 = vshll.u32 %v4914_v43, 16 }
 0x206   : > { %v3296_v56 = vshrl.u32 %v4910_v42, 16  ;;  %v3299_v63 = vshll.u32 %v4910_v42, 16  ;;  %v3081_v3 = vrot.slane %v3079_v28, 1  ;;  %v3077_v27 = vor.u32 %v3075_v38, %v3073_v1 }
 0x207   : > { %v2230_v7 = vpop.f32.mrf.mxu1  ;;  %v2827_v53 = vpop.f32.mrf.mxu0 }
 0x208   : > { %v5675_v46 = vadd.f32 %v2827_v53, %v2633_v50  ;;  %v3298_v34 = vrot.slane %v3296_v56, 3  ;;  %v3301_v57 = vrot.slane %v3299_v63, 4  ;;  %v3082_v9 = vsel %vm629_vm2, %v3077_v27, %v3081_v3 }
 0x209   : > { %4226 = vmatmul.msk.bf16.gmra.mxu2 %vm2182_vm5, %v3066_v62  ;;  %v3083_v56 = vshrl.u32 %v4340_v21, 16 }
 0x20a   : > { %4186 = vmatmul.msk.bf16.gmra.mxu1 %vm2182_vm5, %v5511_v4  ;;  %4243 = vmatmul.msk.bf16.vlgmr.msra.gmra.mxu0 %vm2182_vm5, %v5482_v19  ;;  %v3302_v0 = vor.u32 %v3301_v57, %v3298_v34 }
 0x20b   : > { %v2595_v58 = vpop.f32.mrf.mxu3  ;;  %v3085_v29 = vor.u32 %v3083_v56, %v3081_v3 }
 0x20c   : > { %v2634_v23 = vadd.f32 %v2595_v58, %v2390_v24  ;;  %v2392_v51 = vpop.f32.mrf.mxu2  ;;  %v3303_v11 = vsel %vm406_vm1, %v3293_v12, %v3302_v0  ;;  %v4341_v58 = vld [vmem:[#allocation2 + $0x38] sm:$0xff] }
 0x20d   : > { %v2393_v2 = vadd.f32 %v2392_v51, %v2225_v36  ;;  %v3074_v36 = vsel %vm629_vm2, %v3069_v17, %v3073_v1  ;;  %v3312_v51 = vsel %vm406_vm1, %v3302_v0, %v3311_v35  ;;  %v4342_v0 = vld [vmem:[#allocation2 + $0x40] sm:$0xff]  ;;  %v3091_v44 = vshrl.u32 %v4341_v58, 16 }
 0x20e   : > { %v3095_v45 = vshll.u32 %v4342_v0, 16 }
 0x20f   : > { %v2232_v13 = vpop.f32.mrf.mxu1  ;;  %v2829_v48 = vpop.f32.mrf.mxu0 }
 0x210   : > { %4235 = vmatmul.msk.bf16.gmra.mxu3 %vm2182_vm5, %v3294_v33  ;;  %v5685_v37 = vadd.f32 %v2829_v48, %v2634_v23  ;;  %v3087_v33 = vshll.u32 %v4341_v58, 16  ;;  %v3314_v48 = vshrl.u32 %v4914_v43, 16 }
 0x212   : > { %v3089_v63 = vrot.slane %v3087_v33, 1  ;;  %v3316_v1 = vrot.slane %v3314_v48, 3 }
 0x213   : > { %v2598_v39 = vpop.f32.mrf.mxu3 }
 0x214   : > { %v2635_v19 = vadd.f32 %v2598_v39, %v2393_v2  ;;  %v2394_v61 = vpop.f32.mrf.mxu2  ;;  %v3090_v34 = vsel %vm629_vm2, %v3085_v29, %v3089_v63  ;;  %v3093_v3 = vor.u32 %v3091_v44, %v3089_v63  ;;  %v3001_v63 = vld [vmem:[#allocation2 + $0x50] sm:$0x1] }
 0x215   : > { %v2395_v14 = vadd.f32 %v2394_v61, %v2227_v52 }
 0x217   : > { %v2235_v54 = vpop.f32.mrf.mxu1  ;;  %v2832_v49 = vpop.f32.mrf.mxu0 }
 0x218   : > { %v5687_v40 = vadd.f32 %v2832_v49, %v2635_v19 }
 0x219   : > { %4227 = vmatmul.msk.bf16.gmra.mxu2 %vm2182_vm5, %v3074_v36 }
 0x21a   : > { %4187 = vmatmul.msk.bf16.gmra.mxu1 %vm2182_vm5, %v5536_v41  ;;  %4244 = vmatmul.msk.bf16.gmra.mxu0 %vm2182_vm5, %v5511_v4 }
 0x21b   : > { %v2600_v60 = vpop.f32.mrf.mxu3 }
 0x21c   : > { %v2636_v8 = vadd.f32 %v2600_v60, %v2395_v14  ;;  %v2397_v10 = vpop.f32.mrf.mxu2  ;;  %v3319_v14 = vrot.slane %v3317_v55, 4 }
 0x21d   : > { %v2398_v20 = vadd.f32 %v2397_v10, %v2230_v7 }
 0x21e   : > { %v3320_v49 = vor.u32 %v3319_v14, %v3316_v1 }
 0x21f   : > { %v2237_v32 = vpop.f32.mrf.mxu1  ;;  %v2834_v47 = vpop.f32.mrf.mxu0 }
 0x220   : > { %4236 = vmatmul.msk.bf16.gmra.mxu3 %vm2182_vm5, %v3303_v11  ;;  %v5697_v15 = vadd.f32 %v2834_v47, %v2636_v8  ;;  %v3321_v21 = vsel %vm406_vm1, %v3311_v35, %v3320_v49 }
 0x223   : > { %v2603_v52 = vpop.f32.mrf.mxu3 }
 0x224   : > { %v2637_v4 = vadd.f32 %v2603_v52, %v2398_v20  ;;  %v2399_v25 = vpop.f32.mrf.mxu2  ;;  %v4916_v20 = vld [vmem:[#allocation2 + $0x44] sm:$0xff]  }
 0x225   : > { %v2400_v30 = vadd.f32 %v2399_v25, %v2232_v13  ;;  %v3323_v28 = vshrl.u32 %v4916_v20, 16  ;;  %v3326_v52 = vshll.u32 %v4916_v20, 16  ;;  %v4345_v20 = vld [vmem:[#allocation2 + $0x20] sm:$0xff] }
 0x227   : > { %v2240_v50 = vpop.f32.mrf.mxu1  ;;  %v2837_v24 = vpop.f32.mrf.mxu0 }
 0x228   : > { %v5699_v7 = vadd.f32 %v2837_v24, %v2637_v4  ;;  %v3097_v4 = vrot.slane %v3095_v45, 1 }
 0x229   : > { %4228 = vmatmul.msk.bf16.gmra.mxu2 %vm2182_vm5, %v3082_v9 }
 0x22a   : > { %4188 = vmatmul.msk.bf16.gmra.mxu1 %vm2182_vm5, %v5565_v6  ;;  %4245 = vmatmul.msk.bf16.gmra.mxu0 %vm2182_vm5, %v5536_v41  ;;  %v3098_v26 = vsel %vm629_vm2, %v3093_v3, %v3097_v4 }
 0x22b   : > { %v2605_v16 = vpop.f32.mrf.mxu3 }
 0x22c   : > { %v2638_v53 = vadd.f32 %v2605_v16, %v2400_v30  ;;  %v2402_v62 = vpop.f32.mrf.mxu2  ;;  %v3325_v30 = vrot.slane %v3323_v28, 3 }
 0x22d   : > { %v2403_v12 = vadd.f32 %v2402_v62, %v2235_v54 }
 0x22f   : > { %v2242_v23 = vpop.f32.mrf.mxu1  ;;  %v2839_v2 = vpop.f32.mrf.mxu0 }
 0x230   : > { %4237 = vmatmul.msk.bf16.gmra.mxu3 %vm2182_vm5, %v3312_v51  ;;  %v5709_v13 = vadd.f32 %v2839_v2, %v2638_v53  ;;  %v4343_v53 = vld [vmem:[#allocation2 + $0x48] sm:$0xff] }
 0x231   : > { %v3103_v2 = vshll.u32 %v4343_v53, 16 }
 0x233   : > { %v2608_v42 = vpop.f32.mrf.mxu3 }
 0x234   : > { %v2639_v41 = vadd.f32 %v2608_v42, %v2403_v12  ;;  %v2404_v39 = vpop.f32.mrf.mxu2 }
 0x235   : > { %v2405_v19 = vadd.f32 %v2404_v39, %v2237_v32  ;;  %v3105_v39 = vrot.slane %v3103_v2, 1 }
 0x237   : > { %v2245_v61 = vpop.f32.mrf.mxu1  ;;  %v2842_v54 = vpop.f32.mrf.mxu0 }
 0x238   : > { %v5711_v17 = vadd.f32 %v2842_v54, %v2639_v41  ;;  %v3099_v41 = vshrl.u32 %v4342_v0, 16  ;;  %v5735_v54 = vld [vmem:[#allocation2 + $0x50] sm:$0xff]   ;;  %v4344_v0 = vld [vmem:[#allocation2 + $0x18] sm:$0xff] }
 0x239   : > { %4229 = vmatmul.msk.bf16.gmra.mxu2 %vm2182_vm5, %v3090_v34 }
 0x23a   : > { %4189 = vmatmul.msk.bf16.gmra.mxu1 %vm2182_vm5, %v5609_v18  ;;  %4246 = vmatmul.msk.bf16.gmra.mxu0 %vm2182_vm5, %v5565_v6 }
 0x23b   : > { %v2610_v57 = vpop.f32.mrf.mxu3 }
 0x23c   : > { %v2640_v36 = vadd.f32 %v2610_v57, %v2405_v19  ;;  %v2407_v60 = vpop.f32.mrf.mxu2 }
 0x23d   : > { %v2408_v8 = vadd.f32 %v2407_v60, %v2240_v50  ;;  %v3328_v50 = vrot.slane %v3326_v52, 4  ;;  %v3608_v52 = vshll.u32 %v4344_v0, 16 }
 0x23f   : > { %v2247_v10 = vpop.f32.mrf.mxu1  ;;  %v2844_v32 = vpop.f32.mrf.mxu0  ;;  %v3329_v9 = vor.u32 %v3328_v50, %v3325_v30  ;;  %v3610_v3 = vrot.slane %v3608_v52, 1  ;;  %v3107_v30 = vshrl.u32 %v4343_v53, 16 }
 0x240   : > { %4238 = vmatmul.msk.bf16.gmra.mxu3 %vm2182_vm5, %v3321_v21  ;;  %v5721_v11 = vadd.f32 %v2844_v32, %v2640_v36 }
 0x241   : > { %v3330_v12 = vsel %vm406_vm1, %v3320_v49, %v3329_v9  ;;  %v3037_v49 = vunpack.c.l.b16 %v3001_v63 }
 0x243   : > { %v2613_v47 = vpop.f32.mrf.mxu3  ;;  %v3046_v32 = vpack.c.b16 %v3037_v49, %v3037_v49 }
 0x244   : > { %v2641_v6 = vadd.f32 %v2613_v47, %v2408_v8  ;;  %v2409_v5 = vpop.f32.mrf.mxu2  ;;  %v4543_v8 = vunpack.c.h.b16 %v5735_v54 }
 0x245   : > { %v2410_v25 = vadd.f32 %v2409_v5, %v2242_v23  ;;  %v4917_v23 = vld [vmem:[#allocation2 + $0x4c] sm:$0xff]  }
 0x246   : > { %v3332_v42 = vshrl.u32 %v4917_v23, 16  ;;  %v3335_v48 = vshll.u32 %v4917_v23, 16 }
 0x247   : > { %v2250_v38 = vpop.f32.mrf.mxu1  ;;  %v2847_v27 = vpop.f32.mrf.mxu0 }
 0x248   : > { %v5723_v59 = vadd.f32 %v2847_v27, %v2641_v6  ;;  %v3334_v29 = vrot.slane %v3332_v42, 3  ;;  %v3337_v1 = vrot.slane %v3335_v48, 4  ;;  %v3268_v6 = vpack.c.b16 %v4543_v8, %v4543_v8 }
 0x249   : > { %4230 = vmatmul.msk.bf16.gmra.mxu2 %vm2182_vm5, %v3098_v26 }
 0x24a   : > { %4190 = vmatmul.msk.bf16.gmra.mxu1 %vm2182_vm5, %v5639_v22  ;;  %4247 = vmatmul.msk.bf16.gmra.mxu0 %vm2182_vm5, %v5609_v18  ;;  %v3338_v60 = vor.u32 %v3337_v1, %v3334_v29  ;;  %v3341_v50 = vshrl.u32 %v3268_v6, 16  ;;  %v3344_v27 = vshll.u32 %v3268_v6, 16 }
 0x24b   : > { %v2615_v24 = vpop.f32.mrf.mxu3 }
 0x24c   : > { %v2642_v16 = vadd.f32 %v2615_v24, %v2410_v25  ;;  %v2412_v35 = vpop.f32.mrf.mxu2  ;;  %v3339_v28 = vsel %vm406_vm1, %v3329_v9, %v3338_v60  ;;  %v3346_v2 = vrot.slane %v3344_v27, 4  ;;  %v4348_v27 = vld [vmem:[#allocation2 + $0x38] sm:$0xff] }
 0x24d   : > { %v2413_v62 = vadd.f32 %v2412_v35, %v2245_v61  ;;  %v3101_v61 = vor.u32 %v3099_v41, %v3097_v4  ;;  %v3111_v4 = vshll.u32 %v3046_v32, 16  ;;  %v3109_v35 = vor.u32 %v3107_v30, %v3105_v39 }
 0x24f   : > { %v2252_v58 = vpop.f32.mrf.mxu1  ;;  %v2849_v51 = vpop.f32.mrf.mxu0  ;;  %v3106_v57 = vsel %vm629_vm2, %v3101_v61, %v3105_v39  ;;  %v3113_v9 = vrot.slane %v3111_v4, 1 }
 0x250   : > { %4239 = vmatmul.msk.bf16.gmra.mxu3 %vm2182_vm5, %v3330_v12  ;;  %v5733_v43 = vadd.f32 %v2849_v51, %v2642_v16  ;;  %v3343_v51 = vrot.slane %v3341_v50, 3 }
 0x253   : > { %v2618_v33 = vpop.f32.mrf.mxu3 }
 0x254   : > { %v2643_v18 = vadd.f32 %v2618_v33, %v2413_v62  ;;  %v2414_v55 = vpop.f32.mrf.mxu2 }
 0x255   : > { %v2415_v56 = vadd.f32 %v2414_v55, %v2247_v10  ;;  %v3347_v55 = vor.u32 %v3346_v2, %v3343_v51 }
 0x257   : > { %v2255_v19 = vpop.f32.mrf.mxu1  ;;  %v2852_v14 = vpop.f32.mrf.mxu0  ;;  %v3348_v61 = vsel %vm406_vm1, %v3338_v60, %v3347_v55  ;;  %v4350_v55 = vld [vmem:[#allocation2 + $0x48] sm:$0xff] }
 0x258   : > { %v5737_v34 = vadd.f32 %v2852_v14, %v2643_v18  ;;  %v3114_v18 = vsel %vm629_vm2, %v3109_v35, %v3113_v9 }
 0x259   : > { %4231 = vmatmul.msk.bf16.gmra.mxu2 %vm2182_vm5, %v3106_v57 }
 0x25a   : > { %4191 = vmatmul.msk.bf16.gmra.mxu1 %vm2182_vm5, %v5658_v31  ;;  %4248 = vmatmul.msk.bf16.gmra.mxu0 %vm2182_vm5, %v5639_v22  ;;  %v3613_v22 = vshll.u32 %v4345_v20, 16 }
 0x25b   : > { %v2620_v36 = vpop.f32.mrf.mxu3 }
 0x25c   : > { %v2644_v10 = vadd.f32 %v2620_v36, %v2415_v56  ;;  %v2417_v21 = vpop.f32.mrf.mxu2  ;;  %v3615_v16 = vrot.slane %v3613_v22, 1 }
 0x25d   : > { %v2418_v45 = vadd.f32 %v2417_v21, %v2250_v38  ;;  %v3606_v38 = vshrl.u32 %v4344_v0, 16  ;;  %v3617_v0 = vshrl.u32 %v4345_v20, 16  ;;  %v4347_v20 = vld [vmem:[#allocation2 + $0x30] sm:$0xff] }
 0x25e   : > { %v3629_v22 = vshll.u32 %v4347_v20, 16 }
 0x25f   : > { %v2257_v47 = vpop.f32.mrf.mxu1  ;;  %v2854_v5 = vpop.f32.mrf.mxu0  ;;  %v3611_v23 = vor.u32 %v3610_v3, %v3606_v38  ;;  %v3633_v38 = vshrl.u32 %v4347_v20, 16 }
 0x260   : > { %4240 = vmatmul.msk.bf16.gmra.mxu3 %vm2182_vm5, %v3339_v28  ;;  %v5748_v44 = vadd.f32 %v2854_v5, %v2644_v10 }
 0x261   : > { %v3616_v53 = vsel %vm629_vm2, %v3611_v23, %v3615_v16 }
 0x263   : > { %v2623_v25 = vpop.f32.mrf.mxu3 }
 0x264   : > { %v2645_v26 = vadd.f32 %v2623_v25, %v2418_v45  ;;  %v2419_v24 = vpop.f32.mrf.mxu2  ;;  %v3631_v25 = vrot.slane %v3629_v22, 1 }
 0x265   : > { %v2420_v62 = vadd.f32 %v2419_v24, %v2252_v58  ;;  %v3637_v24 = vshll.u32 %v4348_v27, 16 }
 0x266   : > { %v3635_v9 = vor.u32 %v3633_v38, %v3631_v25 }
 0x267   : > { %v2929_v12 = vpop.f32.mrf.mxu1  ;;  %v2857_v42 = vpop.f32.mrf.mxu0 }
 0x268   : > { %v5751_v33 = vadd.f32 %v2929_v12, %v5675_v46  ;;  %v5753_v48 = vadd.f32 %v2857_v42, %v2645_v26  ;;  %v4346_v46 = vld [vmem:[#allocation2 + $0x28] sm:$0xff]  ;;  %v4349_v12 = vld [vmem:[#allocation2 + $0x40] sm:$0xff] }
 0x269   : > { %4232 = vmatmul.msk.bf16.gmra.mxu2 %vm2182_vm5, %v3114_v18  ;;  %v3621_v57 = vshll.u32 %v4346_v46, 16  ;;  %v3625_v4 = vshrl.u32 %v4346_v46, 16  ;;  %v3645_v2 = vshll.u32 %v4349_v12, 16  ;;  %v3653_v46 = vshll.u32 %v4350_v55, 16 }
 0x26a   : > { %4284 = vmatmul.msk.bf16.vlgmr.msra.gmra.mxu1 %vm2182_vm5, %v3616_v53  ;;  %4249 = vmatmul.msk.bf16.gmra.mxu0 %vm2182_vm5, %v5658_v31 }
 0x26b   : > { %v2625_v58 = vpop.f32.mrf.mxu3  ;;  %v3623_v8 = vrot.slane %v3621_v57, 1  ;;  %v3647_v42 = vrot.slane %v3645_v2, 1  ;;  %v4351_v57 = vld [vmem:[#allocation2 + $0x50] sm:$0xff] }
 0x26c   : > { %v2646_v41 = vadd.f32 %v2625_v58, %v2420_v62  ;;  %v2422_v39 = vpop.f32.mrf.mxu2 }
 0x26d   : > { %v2423_v56 = vadd.f32 %v2422_v39, %v2255_v19  ;;  %v3619_v19 = vor.u32 %v3617_v0, %v3615_v16  ;;  %v3627_v30 = vor.u32 %v3625_v4, %v3623_v8  ;;  %v3639_v16 = vrot.slane %v3637_v24, 1 }
 0x26e   : > { %v3665_v4 = vshrl.u32 %v4351_v57, 16 }
 0x26f   : > { %v2931_v63 = vpop.f32.mrf.mxu1  ;;  %v2859_v1 = vpop.f32.mrf.mxu0  ;;  %v3624_v45 = vsel %vm629_vm2, %v3619_v19, %v3623_v8  ;;  %v3657_v8 = vshrl.u32 %v4350_v55, 16 }
 0x270   : > { %v5763_v29 = vadd.f32 %v2931_v63, %v5685_v37  ;;  %4241 = vmatmul.msk.bf16.gmra.mxu3 %vm2182_vm5, %v3348_v61  ;;  %v5766_v14 = vadd.f32 %v2859_v1, %v2646_v41 }
 0x273   : > { %v2628_v49 = vpop.f32.mrf.mxu3 }
 0x274   : > { %v2647_v31 = vadd.f32 %v2628_v49, %v2423_v56  ;;  %v2424_v36 = vpop.f32.mrf.mxu2  ;;  %v3655_v56 = vrot.slane %v3653_v46, 1 }
 0x275   : > { %v2425_v10 = vadd.f32 %v2424_v36, %v2257_v47 }
 0x276   : > { %v3659_v19 = vor.u32 %v3657_v8, %v3655_v56 }
 0x277   : > { %v2934_v21 = vpop.f32.mrf.mxu1  ;;  %v2862_v60 = vpop.f32.mrf.mxu0 }
 0x278   : > { %v5769_v32 = vadd.f32 %v2934_v21, %v5687_v40  ;;  %v5771_v37 = vadd.f32 %v2862_v60, %v2647_v31 }
 0x27a   : > { %4285 = vmatmul.msk.bf16.gmra.mxu1 %vm2182_vm5, %v3624_v45  ;;  %4250 = vmatmul.msk.bf16.gmra.mxu0 %vm2182_vm5, %v5735_v54  ;;  %v3632_v54 = vsel %vm629_vm2, %v3627_v30, %v3631_v25 }
 0x27b   : > { %v2630_v28 = vpop.f32.mrf.mxu3 }
 0x27c   : > { %v2648_v52 = vadd.f32 %v2630_v28, %v2425_v10  ;;  %v3151_v36 = vpop.f32.mrf.mxu2  ;;  %v3559_v10 = vld [vmem:[#allocation2 + $0x58] sm:$0x1] }
 0x27f   : > { %v2936_v6 = vpop.f32.mrf.mxu1  ;;  %v2864_v5 = vpop.f32.mrf.mxu0 }
 0x280   : > { %v5778_v47 = vadd.f32 %v2936_v6, %v5697_v15  ;;  %v5780_v40 = vadd.f32 %v2864_v5, %v2648_v52 }
 0x283   : > { %v3385_v0 = vpop.f32.mrf.mxu3 }
 0x284   : > { %v3153_v20 = vpop.f32.mrf.mxu2 }
 0x287   : > { %v2939_v3 = vpop.f32.mrf.mxu1  ;;  %v3487_v21 = vpop.f32.mrf.mxu0 }
 0x288   : > { %v5783_v50 = vadd.f32 %v2939_v3, %v5699_v7  ;;  %v3640_v7 = vsel %vm629_vm2, %v3635_v9, %v3639_v16 }
 0x28a   : > { %4286 = vmatmul.msk.bf16.gmra.mxu1 %vm2182_vm5, %v3632_v54 }
 0x28b   : > { %v3387_v6 = vpop.f32.mrf.mxu3 }
 0x28f   : > { %v2941_v26 = vpop.f32.mrf.mxu1  ;;  %v3489_v5 = vpop.f32.mrf.mxu0 }
 0x290   : > { %v5788_v15 = vadd.f32 %v2941_v26, %v5709_v13  ;;  %v3641_v13 = vshrl.u32 %v4348_v27, 16  ;;  %v3156_v27 = vpop.f32.mrf.mxu2 }
 0x292   : > { %v3643_v18 = vor.u32 %v3641_v13, %v3639_v16 }
 0x293   : > { %v3390_v26 = vpop.f32.mrf.mxu3 }
 0x297   : > { %v2944_v35 = vpop.f32.mrf.mxu1  ;;  %v3492_v16 = vpop.f32.mrf.mxu0 }
 0x298   : > { %v5791_v62 = vadd.f32 %v2944_v35, %v5711_v17  ;;  %v3648_v17 = vsel %vm629_vm2, %v3643_v18, %v3647_v42  ;;  %v3158_v35 = vpop.f32.mrf.mxu2 }
 0x29a   : > { %4287 = vmatmul.msk.bf16.gmra.mxu1 %vm2182_vm5, %v3640_v7 }
 0x29f   : > { %v2946_v23 = vpop.f32.mrf.mxu1 }
 0x2a0   : > { %v5796_v51 = vadd.f32 %v2946_v23, %v5721_v11  ;;  %v3649_v11 = vshrl.u32 %v4349_v12, 16  ;;  %v3191_v12 = vadd.f32 %v3151_v36, %v5751_v33  ;;  %v3494_v23 = vpop.f32.mrf.mxu0  ;;  %v3161_v18 = vpop.f32.mrf.mxu2 }
 0x2a2   : > { %v3651_v61 = vor.u32 %v3649_v11, %v3647_v42  ;;  %v3425_v2 = vadd.f32 %v3385_v0, %v3191_v12 }
 0x2a4   : > { %v3527_v13 = vadd.f32 %v3487_v21, %v3425_v2 }
 0x2a7   : > { %v2949_v53 = vpop.f32.mrf.mxu1 }
 0x2a8   : > { %v5799_v58 = vadd.f32 %v2949_v53, %v5723_v59  ;;  %v3656_v59 = vsel %vm629_vm2, %v3651_v61, %v3655_v56  ;;  %v3497_v33 = vpop.f32.mrf.mxu0  ;;  %v3193_v61 = vadd.f32 %v3156_v27, %v5769_v32 }
 0x2aa   : > { %4288 = vmatmul.msk.bf16.gmra.mxu1 %vm2182_vm5, %v3648_v17  ;;  %v3192_v17 = vadd.f32 %v3153_v20, %v5763_v29 }
 0x2af   : > { %v2951_v41 = vpop.f32.mrf.mxu1 }
 0x2b0   : > { %v5804_v39 = vadd.f32 %v2951_v41, %v5733_v43  ;;  %v3661_v43 = vshll.u32 %v4351_v57, 16  ;;  %v3426_v41 = vadd.f32 %v3387_v6, %v3192_v17  ;;  %v3163_v57 = vpop.f32.mrf.mxu2 }
 0x2b2   : > { %v3663_v60 = vrot.slane %v3661_v43, 1  ;;  %v3528_v11 = vadd.f32 %v3489_v5, %v3426_v41 }
 0x2b4   : > { %v3664_v52 = vsel %vm629_vm2, %v3659_v19, %v3663_v60  ;;  %v3667_v30 = vor.u32 %v3665_v4, %v3663_v60  ;;  %v3194_v60 = vadd.f32 %v3158_v35, %v5778_v47 }
 0x2b7   : > { %v2954_v63 = vpop.f32.mrf.mxu1 }
 0x2b8   : > { %v5807_v1 = vadd.f32 %v2954_v63, %v5737_v34  ;;  %v3595_v34 = vunpack.c.l.b16 %v3559_v10  ;;  %v3499_v10 = vpop.f32.mrf.mxu0 }
 0x2ba   : > { %4289 = vmatmul.msk.bf16.gmra.mxu1 %vm2182_vm5, %v3656_v59 }
 0x2bf   : > { %v2956_v49 = vpop.f32.mrf.mxu1 }
 0x2c0   : > { %v5812_v31 = vadd.f32 %v2956_v49, %v5748_v44  ;;  %v3604_v44 = vpack.c.b16 %v3595_v34, %v3595_v34  ;;  %v3427_v49 = vadd.f32 %v3390_v26, %v3193_v61  ;;  %v3502_v4 = vpop.f32.mrf.mxu0 }
 0x2c2   : > { %v3669_v25 = vshll.u32 %v3604_v44, 16  ;;  %v3529_v0 = vadd.f32 %v3492_v16, %v3427_v49 }
 0x2c4   : > { %v3671_v54 = vrot.slane %v3669_v25, 1  ;;  %v3195_v25 = vadd.f32 %v3161_v18, %v5783_v50 }
 0x2c6   : > { %v3672_v24 = vsel %vm629_vm2, %v3667_v30, %v3671_v54 }
 0x2c7   : > { %v2959_v45 = vpop.f32.mrf.mxu1 }
 0x2c8   : > { %v5815_v28 = vadd.f32 %v2959_v45, %v5753_v48  ;;  %v3504_v12 = vpop.f32.mrf.mxu0 }
 0x2ca   : > { %4290 = vmatmul.msk.bf16.gmra.mxu1 %vm2182_vm5, %v3664_v52  ;;  %v3166_v52 = vpop.f32.mrf.mxu2 }
 0x2cb   : > { %v3197_v17 = vadd.f32 %v3166_v52, %v5791_v62 }
 0x2cf   : > { %v2961_v22 = vpop.f32.mrf.mxu1 }
 0x2d0   : > { %v5820_v3 = vadd.f32 %v2961_v22, %v5766_v14  ;;  %v3392_v14 = vpop.f32.mrf.mxu3 }
 0x2d1   : > { %v3428_v34 = vadd.f32 %v3392_v14, %v3194_v60 }
 0x2d3   : > { %v3530_v20 = vadd.f32 %v3494_v23, %v3428_v34 }
 0x2d7   : > { %v2964_v48 = vpop.f32.mrf.mxu1 }
 0x2d8   : > { %v5824_v38 = vadd.f32 %v2964_v48, %v5771_v37  ;;  %v5834_v37 = vld [vmem:[%s5912_s4] ss:$0 sm:$0xff]  ;;  %v3395_v55 = vpop.f32.mrf.mxu3  ;;  %v3168_v48 = vpop.f32.mrf.mxu2 }
 0x2d9   : > { %v3429_v54 = vadd.f32 %v3395_v55, %v3195_v25 }
 0x2da   : > { %4291 = vmatmul.msk.bf16.gmra.mxu1 %vm2182_vm5, %v3672_v24 }
 0x2db   : > { %v3531_v27 = vadd.f32 %v3497_v33, %v3429_v54 }
 0x2df   : > { %v2966_v9 = vpop.f32.mrf.mxu1 }
 0x2e0   : > { %v5828_v7 = vadd.f32 %v2966_v9, %v5780_v40  ;;  %v3397_v43 = vpop.f32.mrf.mxu3  ;;  %v3196_v9 = vadd.f32 %v3163_v57, %v5788_v15  ;;  %v3171_v18 = vpop.f32.mrf.mxu2 }
 0x2e2   : > { %v3430_v23 = vadd.f32 %v3397_v43, %v3196_v9 }
 0x2e4   : > { %v3532_v2 = vadd.f32 %v3499_v10, %v3430_v23 }
 0x2e7   : > { %v3709_v42 = vpop.f32.mrf.mxu1 }
 0x2e8   : > { %v3749_v53 = vadd.f32 %v3709_v42, %v3527_v13  ;;  %v3400_v6 = vpop.f32.mrf.mxu3 }
 0x2e9   : > { %v3431_v41 = vadd.f32 %v3400_v6, %v3197_v17 }
 0x2ea   : > { %v3769_v40 = vadd.f32 %v5834_v37, %v3749_v53 }
 0x2eb   : > { %v3533_v33 = vadd.f32 %v3502_v4, %v3431_v41 }
 0x2ec   : > { %v3785_v46 = vmax.f32 %v3769_v40, 0.0 }
 0x2ee   : > { %v3801_v56 = vpack.c.bf16 %v3785_v46, %v3785_v46  ;;  %v3507_v46 = vpop.f32.mrf.mxu0 }
 0x2ef   : > { %v3711_v63 = vpop.f32.mrf.mxu1 }
 0x2f0   : > { %3817 = vst.msk [vmem:[%s5842_s13] sm:$0xf] %vm2081_vm3, %v3801_v56  ;;  %v3750_v29 = vadd.f32 %v3711_v63, %v3528_v11  ;;  %v3402_v35 = vpop.f32.mrf.mxu3 }
 0x2f2   : > { %v3770_v59 = vadd.f32 %v5834_v37, %v3750_v29  ;;  %v3198_v29 = vadd.f32 %v3168_v48, %v5796_v51 }
 0x2f4   : > { %v3786_v36 = vmax.f32 %v3770_v59, 0.0  ;;  %v3173_v59 = vpop.f32.mrf.mxu2  ;;  %v3432_v57 = vadd.f32 %v3402_v35, %v3198_v29 }
 0x2f6   : > { %v3802_v8 = vpack.c.bf16 %v3786_v36, %v3786_v36  ;;  %v3534_v36 = vadd.f32 %v3504_v12, %v3432_v57 }
 0x2f7   : > { %v3714_v21 = vpop.f32.mrf.mxu1 }
 0x2f8   : > { %3818 = vst.msk [vmem:[%s5842_s13 + $0x4] sm:$0xf] %vm2081_vm3, %v3802_v8  ;;  %v3751_v19 = vadd.f32 %v3714_v21, %v3529_v0  ;;  %v3405_v55 = vpop.f32.mrf.mxu3  ;;  %v3509_v0 = vpop.f32.mrf.mxu0  ;;  %v3199_v21 = vadd.f32 %v3171_v18, %v5799_v58 }
 0x2fa   : > { %v3771_v45 = vadd.f32 %v5834_v37, %v3751_v19  ;;  %v3433_v60 = vadd.f32 %v3405_v55, %v3199_v21 }
 0x2fc   : > { %v3787_v32 = vmax.f32 %v3771_v45, 0.0  ;;  %v3176_v45 = vpop.f32.mrf.mxu2  ;;  %v3535_v34 = vadd.f32 %v3507_v46, %v3433_v60 }
 0x2fd   : > { %v3201_v48 = vadd.f32 %v3176_v45, %v5807_v1 }
 0x2fe   : > { %v3803_v44 = vpack.c.bf16 %v3787_v32, %v3787_v32 }
 0x2ff   : > { %v3716_v5 = vpop.f32.mrf.mxu1 }
 0x300   : > { %3819 = vst.msk [vmem:[%s5842_s13 + $0x8] sm:$0xf] %vm2081_vm3, %v3803_v44  ;;  %v3752_v22 = vadd.f32 %v3716_v5, %v3530_v20  ;;  %v3407_v49 = vpop.f32.mrf.mxu3  ;;  %v3512_v6 = vpop.f32.mrf.mxu0  ;;  %v3200_v5 = vadd.f32 %v3173_v59, %v5804_v39 }
 0x302   : > { %v3772_v30 = vadd.f32 %v5834_v37, %v3752_v22  ;;  %v3434_v4 = vadd.f32 %v3407_v49, %v3200_v5 }
 0x304   : > { %v3788_v47 = vmax.f32 %v3772_v30, 0.0  ;;  %v3536_v25 = vadd.f32 %v3509_v0, %v3434_v4  ;;  %v3178_v54 = vpop.f32.mrf.mxu2 }
 0x306   : > { %v3804_v26 = vpack.c.bf16 %v3788_v47, %v3788_v47 }
 0x307   : > { %v3719_v24 = vpop.f32.mrf.mxu1 }
 0x308   : > { %3820 = vst.msk [vmem:[%s5842_s13 + $0xc] sm:$0xf] %vm2081_vm3, %v3804_v26  ;;  %v3753_v16 = vadd.f32 %v3719_v24, %v3531_v27  ;;  %v3410_v52 = vpop.f32.mrf.mxu3 }
 0x309   : > { %v3435_v35 = vadd.f32 %v3410_v52, %v3201_v48 }
 0x30a   : > { %v3773_v14 = vadd.f32 %v5834_v37, %v3753_v16  ;;  %v3514_v16 = vpop.f32.mrf.mxu0 }
 0x30b   : > { %v3537_v9 = vadd.f32 %v3512_v6, %v3435_v35 }
 0x30c   : > { %v3789_v50 = vmax.f32 %v3773_v14, 0.0 }
 0x30e   : > { %v3805_v13 = vpack.c.bf16 %v3789_v50, %v3789_v50  ;;  %v3181_v50 = vpop.f32.mrf.mxu2 }
 0x30f   : > { %v3721_v42 = vpop.f32.mrf.mxu1 }
 0x310   : > { %3821 = vst.msk [vmem:[%s5842_s13 + $0x10] sm:$0xf] %vm2081_vm3, %v3805_v13  ;;  %v3754_v53 = vadd.f32 %v3721_v42, %v3532_v2  ;;  %v3412_v26 = vpop.f32.mrf.mxu3  ;;  %v3202_v2 = vadd.f32 %v3178_v54, %v5812_v31 }
 0x312   : > { %v3774_v40 = vadd.f32 %v5834_v37, %v3754_v53  ;;  %v3436_v53 = vadd.f32 %v3412_v26, %v3202_v2  ;;  %v3517_v18 = vpop.f32.mrf.mxu0 }
 0x314   : > { %v3790_v15 = vmax.f32 %v3774_v40, 0.0  ;;  %v3538_v17 = vadd.f32 %v3514_v16, %v3436_v53 }
 0x316   : > { %v3806_v11 = vpack.c.bf16 %v3790_v15, %v3790_v15  ;;  %v3203_v15 = vadd.f32 %v3181_v50, %v5815_v28 }
 0x317   : > { %v3724_v56 = vpop.f32.mrf.mxu1 }
 0x318   : > { %3822 = vst.msk [vmem:[%s5842_s13 + $0x14] sm:$0xf] %vm2081_vm3, %v3806_v11  ;;  %v3755_v63 = vadd.f32 %v3724_v56, %v3533_v33  ;;  %v3415_v42 = vpop.f32.mrf.mxu3  ;;  %v3183_v33 = vpop.f32.mrf.mxu2 }
 0x319   : > { %v3437_v11 = vadd.f32 %v3415_v42, %v3203_v15 }
 0x31a   : > { %v3775_v61 = vadd.f32 %v5834_v37, %v3755_v63 }
 0x31b   : > { %v3539_v63 = vadd.f32 %v3517_v18, %v3437_v11 }
 0x31c   : > { %v3791_v62 = vmax.f32 %v3775_v61, 0.0  ;;  %v3519_v61 = vpop.f32.mrf.mxu0 }
 0x31e   : > { %v3807_v43 = vpack.c.bf16 %v3791_v62, %v3791_v62  ;;  %v3204_v62 = vadd.f32 %v3183_v33, %v5820_v3 }
 0x31f   : > { %v3726_v8 = vpop.f32.mrf.mxu1 }
 0x320   : > { %3823 = vst.msk [vmem:[%s5842_s13 + $0x18] sm:$0xf] %vm2081_vm3, %v3807_v43  ;;  %v3756_v10 = vadd.f32 %v3726_v8, %v3534_v36  ;;  %v3417_v56 = vpop.f32.mrf.mxu3  ;;  %v3186_v43 = vpop.f32.mrf.mxu2 }
 0x321   : > { %v3438_v36 = vadd.f32 %v3417_v56, %v3204_v62 }
 0x322   : > { %v3776_v19 = vadd.f32 %v5834_v37, %v3756_v10 }
 0x323   : > { %v3540_v0 = vadd.f32 %v3519_v61, %v3438_v36 }
 0x324   : > { %v3792_v51 = vmax.f32 %v3776_v19, 0.0  ;;  %v3522_v60 = vpop.f32.mrf.mxu0 }
 0x326   : > { %v3808_v32 = vpack.c.bf16 %v3792_v51, %v3792_v51  ;;  %v3205_v51 = vadd.f32 %v3186_v43, %v5824_v38 }
 0x327   : > { %v3729_v20 = vpop.f32.mrf.mxu1 }
 0x328   : > { %3824 = vst.msk [vmem:[%s5842_s13 + $0x1c] sm:$0xf] %vm2081_vm3, %v3808_v32  ;;  %v3757_v44 = vadd.f32 %v3729_v20, %v3535_v34  ;;  %v3420_v10 = vpop.f32.mrf.mxu3  ;;  %v3188_v20 = vpop.f32.mrf.mxu2 }
 0x329   : > { %v3439_v34 = vadd.f32 %v3420_v10, %v3205_v51 }
 0x32a   : > { %v3777_v22 = vadd.f32 %v5834_v37, %v3757_v44 }
 0x32b   : > { %v3541_v32 = vadd.f32 %v3522_v60, %v3439_v34 }
 0x32c   : > { %v3793_v58 = vmax.f32 %v3777_v22, 0.0  ;;  %v3206_v22 = vadd.f32 %v3188_v20, %v5828_v7 }
 0x32e   : > { %v3809_v30 = vpack.c.bf16 %v3793_v58, %v3793_v58  ;;  %v3524_v58 = vpop.f32.mrf.mxu0 }
 0x32f   : > { %v3731_v47 = vpop.f32.mrf.mxu1 }
 0x330   : > { %3825 = vst.msk [vmem:[%s5842_s13 + $0x20] sm:$0xf] %vm2081_vm3, %v3809_v30  ;;  %v3758_v27 = vadd.f32 %v3731_v47, %v3536_v25  ;;  %v3422_v5 = vpop.f32.mrf.mxu3 }
 0x331   : > { %v3440_v38 = vadd.f32 %v3422_v5, %v3206_v22 }
 0x332   : > { %v3778_v24 = vadd.f32 %v5834_v37, %v3758_v27 }
 0x333   : > { %v3542_v30 = vadd.f32 %v3524_v58, %v3440_v38 }
 0x334   : > { %v3794_v39 = vmax.f32 %v3778_v24, 0.0 }
 0x336   : > { %v3810_v14 = vpack.c.bf16 %v3794_v39, %v3794_v39 }
 0x337   : > { %v3734_v12 = vpop.f32.mrf.mxu1 }
 0x338   : > { %3826 = vst.msk [vmem:[%s5842_s13 + $0x24] sm:$0xf] %vm2081_vm3, %v3810_v14  ;;  %v3759_v23 = vadd.f32 %v3734_v12, %v3537_v9 }
 0x33a   : > { %v3779_v13 = vadd.f32 %v5834_v37, %v3759_v23 }
 0x33c   : > { %v3795_v1 = vmax.f32 %v3779_v13, 0.0 }
 0x33e   : > { %v3811_v40 = vpack.c.bf16 %v3795_v1, %v3795_v1 }
 0x33f   : > { %v3736_v55 = vpop.f32.mrf.mxu1 }
 0x340   : > { %3827 = vst.msk [vmem:[%s5842_s13 + $0x28] sm:$0xf] %vm2081_vm3, %v3811_v40  ;;  %v3760_v41 = vadd.f32 %v3736_v55, %v3538_v17 }
 0x342   : > { %v3780_v46 = vadd.f32 %v5834_v37, %v3760_v41 }
 0x344   : > { %v3796_v31 = vmax.f32 %v3780_v46, 0.0 }
 0x346   : > { %v3812_v29 = vpack.c.bf16 %v3796_v31, %v3796_v31 }
 0x347   : > { %v3739_v59 = vpop.f32.mrf.mxu1 }
 0x348   : > { %3828 = vst.msk [vmem:[%s5842_s13 + $0x2c] sm:$0xf] %vm2081_vm3, %v3812_v29  ;;  %v3761_v57 = vadd.f32 %v3739_v59, %v3539_v63 }
 0x34a   : > { %v3781_v49 = vadd.f32 %v5834_v37, %v3761_v57 }
 0x34c   : > { %v3797_v28 = vmax.f32 %v3781_v49, 0.0 }
 0x34e   : > { %v3813_v8 = vpack.c.bf16 %v3797_v28, %v3797_v28 }
 0x34f   : > { %v3741_v21 = vpop.f32.mrf.mxu1 }
 0x350   : > { %3829 = vst.msk [vmem:[%s5842_s13 + $0x30] sm:$0xf] %vm2081_vm3, %v3813_v8  ;;  %v3762_v19 = vadd.f32 %v3741_v21, %v3540_v0 }
 0x352   : > { %v3782_v45 = vadd.f32 %v5834_v37, %v3762_v19 }
 0x354   : > { %v3798_v3 = vmax.f32 %v3782_v45, 0.0 }
 0x356   : > { %v3814_v52 = vpack.c.bf16 %v3798_v3, %v3798_v3 }
 0x357   : > { %v3744_v44 = vpop.f32.mrf.mxu1 }
 0x358   : > { %3830 = vst.msk [vmem:[%s5842_s13 + $0x34] sm:$0xf] %vm2081_vm3, %v3814_v52  ;;  %v3763_v6 = vadd.f32 %v3744_v44, %v3541_v32 }
 0x35a   : > { %v3783_v4 = vadd.f32 %v5834_v37, %v3763_v6 }
 0x35c   : > { %v3799_v25 = vmax.f32 %v3783_v4, 0.0 }
 0x35e   : > { %v3815_v54 = vpack.c.bf16 %v3799_v25, %v3799_v25 }
 0x35f   : > { %v3746_v47 = vpop.f32.mrf.mxu1 }
 0x360   : > { %3831 = vst.msk [vmem:[%s5842_s13 + $0x38] sm:$0xf] %vm2081_vm3, %v3815_v54  ;;  %v3764_v27 = vadd.f32 %v3746_v47, %v3542_v30 }
 0x362   : > { %v3784_v26 = vadd.f32 %v5834_v37, %v3764_v27 }
 0x364   : > { %v3800_v48 = vmax.f32 %v3784_v26, 0.0 }
 0x366   : > { %v3816_v24 = vpack.c.bf16 %v3800_v48, %v3800_v48 }
 0x368   : > { %3832 = vst.msk [vmem:[%s5842_s13 + $0x3c] sm:$0xf] %vm2081_vm3, %v3816_v24 }
 0x369 PF: > { %s16_s21 = sadd.s32 1, %s4939_s21  }
 0x36a   : > { %p13_p4 = scmp.ge.s32.totalorder %s16_s21, 4  }
 0x36c   :  { %15 = sbr.rel (!%p13_p4) target bundleno = 1 (0x1), region = 90 }

// kernel: decoder_forward.7
= control target key start
LH: loop header
LB: loop body
LE: loop exit
PB: predicated region body
PF: predicated region fallthrough
CT: control target
= control target key end

     0   :  { %s13052_s21 = smov 0   ;;  %s15990_s0 = inlined_call_operand.vmem [shape: bf16[2,480,8], index: 0, kind: input, shape index: {}]   ;;  %s15991_s1 = inlined_call_operand.vmem [shape: bf16[9,8,4], index: 1, kind: input, shape index: {}]   ;;  %s15992_s2 = inlined_call_operand.vmem [shape: f32[1,4], index: 2, kind: input, shape index: {}]   ;;  %s15993_s3 = inlined_call_operand.vmem [shape: bf16[9,4,4], index: 3, kind: input, shape index: {}]   ;;  %s15994_s4 = inlined_call_operand.vmem [shape: f32[1,4], index: 4, kind: input, shape index: {}]   ;;  %s15995_s5 = inlined_call_operand.vmem [shape: f32[384,1], index: 5, kind: input, shape index: {}]   ;;  %s15996_s6 = inlined_call_operand.vmem [shape: bf16[2,384,4], index: 6, kind: output, shape index: {}]  }
   0x1 LB: > { %s10161_s22 = sadd.s32 4294967295, %s13014_s21   ;;  %p10165_p0 = scmp.ge.s32.totalorder %s13014_s21, 1  ;;  %s13014_s21 = sphi %s13052_s21, %s16_s21  }
   0x2   : > { %p212_p1 = scmp.lt.s32.totalorder %s13014_s21, 3 }
   0x4   : > { %p213_p2 = pnand %p10165_p0, %p212_p1 }
   0x6   : > { %216 = sbr.rel (%p213_p2) target bundleno = 2022 (0x7e6), region = 44 }
   0xb   : > { %v10168_v0 = vld [vmem:[%s15991_s1 + $0x4] sm:$0xf]  ;;  %vm498_vm0 = vcmask 1043456   ;;  %p242_p3 = scmp.lt.s32.totalorder %s10161_s22, 1  ;;  %v302_v2 = vld [vmem:[%s15991_s1] sm:$0xf] }
   0xc   : > { %v500_v1 = vsel %vm498_vm0, %v10168_v0, 0  ;;  %v10217_v3 = vld [vmem:[%s15991_s1 + $0x8] sm:$0xf]  ;;  %v956_v4 = vsel %vm498_vm0, %v302_v2, 0  ;;  %v10338_v6 = vld [vmem:[%s15991_s1 + $0xc] sm:$0xf] }
   0xd   : > { %12804 = vmatpush.bf16.msra.mxu2 %v500_v1  ;;  %509 = vmatpush.bf16.msra.mxu0 %v500_v1  ;;  %s16154_s22 = smov (!%p242_p3, %s10161_s22), 1  ;;  %v1531_v5 = vsel %vm498_vm0, %v10217_v3, 0  ;;  %v10363_v7 = vld [vmem:[%s15991_s1 + $0x10] sm:$0xf]  ;;  %v2181_v8 = vsel %vm498_vm0, %v10338_v6, 0  ;;  %vm425_vm1 = vcmask 64512  }
   0xe   : > { %12805 = vmatpush.bf16.msra.mxu3 %v956_v4  ;;  %s12988_s9 = smul.u32 240, %s16154_s22  ;;  %965 = vmatpush.bf16.msra.mxu1 %v956_v4  ;;  %v2459_v9 = vsel %vm498_vm0, %v10363_v7, 0  ;;  %vm658_vm2 = vsmask.f32 4352  ;;  %vm1261_vm3 = vsmask.f32 7424 }
   0xf   : > { %vm5600_vm4 = vcmask 1041408   ;;  %vm5246_vm5 = vcmask 27648   ;;  %vm5527_vm6 = vcmask 31744   ;;  %s12989_s16 = smul.u32 192, %s16154_s22 }
  0x10   : > { %s13086_s12 = scalar_lea.vmem %s15990_s0, %s12988_s9 }
  0x11   : > { %1540 = vmatpush.bf16.msrb.mxu2 %v1531_v5  ;;  %2468 = vmatpush.bf16.msrb.mxu0 %v2459_v9  ;;  %v12830_v10 = vld [vmem:[%s13086_s12 + $0x6c] sm:$0xff]   ;;  %v253_v11 = vld [vmem:[%s13086_s12 + $0x8] sm:$0x8]  ;;  %v11911_v40 = vld [vmem:[%s13086_s12 + $0x78] sm:$0xff]   ;;  %s15606_s18 = scalar_lea.vmem %s15996_s6, %s12989_s16 }
  0x12   : > { %2190 = vmatpush.bf16.msrb.mxu3 %v2181_v8  ;;  %v254_v12 = vld [vmem:[%s13086_s12 + $0xc] sm:$0xf]  ;;  %v11898_v13 = vld [vmem:[%s13086_s12 + $0x10] sm:$0xff]   ;;  %v632_v15 = vunpack.c.l.b16 %v253_v11  ;;  %10181 = vmatmul.msk.bf16.vlgmr.msra.gmra.mxu2 %vm425_vm1, %v12830_v10  ;;  %v13103_v43 = vld [vmem:[%s13086_s12 + $0x18] sm:$0xff]   ;;  %v785_v45 = vshrl.u32 %v11911_v40, 16  ;;  %v788_v46 = vshll.u32 %v11911_v40, 16 }
  0x13   : > { %v353_v14 = vunpack.c.l.b16 %v254_v12  ;;  %v11909_v16 = vld [vmem:[%s13086_s12 + $0x68] sm:$0xff]   ;;  %v11910_v17 = vld [vmem:[%s13086_s12 + $0x70] sm:$0xff]   ;;  %v11340_v18 = vunpack.c.l.b16 %v11898_v13  ;;  %v668_v24 = vshrl.u32 %v11898_v13, 16  ;;  %v671_v25 = vshll.u32 %v11898_v13, 16  ;;  %v11912_v58 = vld [vmem:[%s13086_s12 + $0x80] sm:$0xff]  }
  0x14   : > { %v767_v19 = vshrl.u32 %v11909_v16, 16  ;;  %v770_v20 = vshll.u32 %v11909_v16, 16  ;;  %v776_v21 = vshrl.u32 %v11910_v17, 16  ;;  %v779_v23 = vshll.u32 %v11910_v17, 16  ;;  %v12832_v49 = vld [vmem:[%s13086_s12 + $0x74] sm:$0xff]   ;;  %v13118_v60 = vld [vmem:[%s13086_s12 + $0x20] sm:$0xff]  }
  0x15   : > { %v633_v22 = vpack.c.b16 %v353_v14, %v632_v15  ;;  %v401_v26 = vpack.c.b16 %v11340_v18, %v353_v14  ;;  %v670_v33 = vrot.slane %v668_v24, 3  ;;  %v673_v35 = vrot.slane %v671_v25, 4  ;;  %v12808_v54 = vld [vmem:[%s13086_s12 + $0x14] sm:$0xff]   ;;  %v12834_v1 = vld [vmem:[%s13086_s12 + $0x7c] sm:$0xff]   ;;  %v11913_v10 = vld [vmem:[%s13086_s12 + $0x88] sm:$0xff]  }
  0x16   : > { %v769_v27 = vrot.slane %v767_v19, 3  ;;  %v772_v28 = vrot.slane %v770_v20, 4  ;;  %v778_v29 = vrot.slane %v776_v21, 3  ;;  %v781_v30 = vrot.slane %v779_v23, 4  ;;  %v12810_v6 = vld [vmem:[%s13086_s12 + $0x1c] sm:$0xff]   ;;  %v13132_v12 = vld [vmem:[%s13086_s12 + $0x28] sm:$0xff]  }
  0x17   : > { %v660_v31 = vshrl.u32 %v633_v22, 16  ;;  %v663_v32 = vshll.u32 %v633_v22, 16  ;;  %10169 = vmatmul.msk.bf16.vlgmr.msra.gmra.mxu0 %vm425_vm1, %v401_v26  ;;  %v674_v39 = vor.u32 %v673_v35, %v670_v33  ;;  %v677_v47 = vshrl.u32 %v13103_v43, 16  ;;  %v12836_v17 = vld [vmem:[%s13086_s12 + $0x84] sm:$0xff]   ;;  %v11914_v26 = vld [vmem:[%s13086_s12 + $0x90] sm:$0xff]  }
  0x18   : > { %v13096_v34 = vor.u32 %v772_v28, %v769_v27  ;;  %v782_v36 = vor.u32 %v781_v30, %v778_v29  ;;  %v680_v48 = vshll.u32 %v13103_v43, 16  ;;  %v787_v50 = vrot.slane %v785_v45, 3  ;;  %v12812_v22 = vld [vmem:[%s13086_s12 + $0x24] sm:$0xff]   ;;  %v13146_v28 = vld [vmem:[%s13086_s12 + $0x30] sm:$0xff]  }
  0x19   : > { %v662_v37 = vrot.slane %v660_v31, 3  ;;  %v665_v38 = vrot.slane %v663_v32, 4  ;;  %v790_v51 = vrot.slane %v788_v46, 4  ;;  %v679_v52 = vrot.slane %v677_v47, 3  ;;  %v12838_v33 = vld [vmem:[%s13086_s12 + $0x8c] sm:$0xff]   ;;  %v13160_v46 = vld [vmem:[%s13086_s12 + $0x38] sm:$0xff]  }
  0x1a   : > { %v783_v41 = vsel %vm658_vm2, %v13096_v34, %v782_v36  ;;  %v682_v53 = vrot.slane %v680_v48, 4  ;;  %v794_v61 = vshrl.u32 %v11912_v58, 16  ;;  %v797_v62 = vshll.u32 %v11912_v58, 16 }
  0x1b   : > { %v666_v42 = vor.u32 %v665_v38, %v662_v37  ;;  %10205 = vmatmul.msk.bf16.vlgmr.msra.gmra.mxu3 %vm425_vm1, %v783_v41  ;;  %v791_v55 = vor.u32 %v790_v51, %v787_v50  ;;  %v686_v63 = vshrl.u32 %v13118_v60, 16  ;;  %v689_v0 = vshll.u32 %v13118_v60, 16  ;;  %v12840_v51 = vld [vmem:[%s13086_s12 + $0x94] sm:$0xff]  }
  0x1c   : > { %v683_v56 = vor.u32 %v682_v53, %v679_v52  ;;  %v796_v2 = vrot.slane %v794_v61, 3  ;;  %v799_v3 = vrot.slane %v797_v62, 4  ;;  %v803_v13 = vshrl.u32 %v11913_v10, 16  ;;  %v11916_v61 = vld [vmem:[%s13086_s12 + $0xa0] sm:$0xff]  }
  0x1d   : > { %v675_v44 = vsel %vm658_vm2, %v666_v42, %v674_v39  ;;  %v792_v57 = vsel %vm658_vm2, %v782_v36, %v791_v55  ;;  %v688_v4 = vrot.slane %v686_v63, 3  ;;  %v691_v5 = vrot.slane %v689_v0, 4  ;;  %v13174_v63 = vld [vmem:[%s13086_s12 + $0x40] sm:$0xff]  }
  0x1e   : > { %10193 = vmatmul.msk.bf16.vlgmr.msra.gmra.mxu1 %vm425_vm1, %v675_v44  ;;  %v684_v59 = vsel %vm658_vm2, %v674_v39, %v683_v56  ;;  %v800_v7 = vor.u32 %v799_v3, %v796_v2  ;;  %v806_v14 = vshll.u32 %v11913_v10, 16  ;;  %v695_v15 = vshrl.u32 %v13132_v12, 16  ;;  %v12814_v39 = vld [vmem:[%s13086_s12 + $0x2c] sm:$0xff]   ;;  %v11915_v44 = vld [vmem:[%s13086_s12 + $0x98] sm:$0xff]  }
  0x1f   : > { %v692_v8 = vor.u32 %v691_v5, %v688_v4  ;;  %v698_v16 = vshll.u32 %v13132_v12, 16  ;;  %v805_v18 = vrot.slane %v803_v13, 3  ;;  %v812_v29 = vshrl.u32 %v11914_v26, 16  ;;  %v12842_v4 = vld [vmem:[%s13086_s12 + $0x9c] sm:$0xff]  }
  0x20   : > { %v801_v9 = vsel %vm658_vm2, %v791_v55, %v800_v7  ;;  %v808_v19 = vrot.slane %v806_v14, 4  ;;  %v697_v20 = vrot.slane %v695_v15, 3  ;;  %v815_v30 = vshll.u32 %v11914_v26, 16  ;;  %v11917_v14 = vld [vmem:[%s13086_s12 + $0xa8] sm:$0xff]  }
  0x21   : > { %v693_v11 = vsel %vm658_vm2, %v683_v56, %v692_v8  ;;  %v700_v21 = vrot.slane %v698_v16, 4  ;;  %v704_v31 = vshrl.u32 %v13146_v28, 16  ;;  %v707_v32 = vshll.u32 %v13146_v28, 16  ;;  %v12816_v56 = vld [vmem:[%s13086_s12 + $0x34] sm:$0xff]   ;;  %v13188_v16 = vld [vmem:[%s13086_s12 + $0x48] sm:$0xff]  }
  0x22   : > { %10182 = vmatmul.msk.bf16.gmra.mxu2 %vm425_vm1, %v12832_v49  ;;  %v809_v23 = vor.u32 %v808_v19, %v805_v18  ;;  %v814_v35 = vrot.slane %v812_v29, 3  ;;  %v817_v36 = vrot.slane %v815_v30, 4  ;;  %v821_v47 = vshrl.u32 %v11915_v44, 16  ;;  %v12820_v26 = vld [vmem:[%s13086_s12 + $0x44] sm:$0xff]   ;;  %v10388_v30 = vld [vmem:[%s15991_s1 + $0x14] sm:$0xf] }
  0x23   : > { %v701_v24 = vor.u32 %v700_v21, %v697_v20  ;;  %v706_v37 = vrot.slane %v704_v31, 3  ;;  %v709_v38 = vrot.slane %v707_v32, 4  ;;  %v824_v48 = vshll.u32 %v11915_v44, 16  ;;  %v12844_v21 = vld [vmem:[%s13086_s12 + $0xa4] sm:$0xff]  }
  0x24   : > { %v810_v25 = vsel %vm658_vm2, %v800_v7, %v809_v23  ;;  %v818_v40 = vor.u32 %v817_v36, %v814_v35  ;;  %v713_v49 = vshrl.u32 %v13160_v46, 16  ;;  %v716_v50 = vshll.u32 %v13160_v46, 16  ;;  %v13206_v36 = vld [vmem:[%s13086_s12 + $0x50] sm:$0xff]  }
  0x25   : > { %v702_v27 = vsel %vm658_vm2, %v692_v8, %v701_v24  ;;  %v710_v41 = vor.u32 %v709_v38, %v706_v37  ;;  %v823_v52 = vrot.slane %v821_v47, 3  ;;  %v826_v53 = vrot.slane %v824_v48, 4  ;;  %v12822_v48 = vld [vmem:[%s13086_s12 + $0x4c] sm:$0xff]  }
  0x26   : > { %v819_v42 = vsel %vm658_vm2, %v809_v23, %v818_v40  ;;  %v718_v55 = vrot.slane %v716_v50, 4  ;;  %v830_v0 = vshrl.u32 %v11916_v61, 16  ;;  %v722_v2 = vshrl.u32 %v13174_v63, 16 }
  0x27   : > { %10170 = vmatmul.msk.bf16.gmra.mxu0 %vm425_vm1, %v12808_v54  ;;  %v711_v45 = vsel %vm658_vm2, %v701_v24, %v710_v41  ;;  %v715_v54 = vrot.slane %v713_v49, 3  ;;  %v725_v3 = vshll.u32 %v13174_v63, 16  ;;  %v842_v18 = vshll.u32 %v11917_v14, 16 }
  0x28   : > { %v832_v5 = vrot.slane %v830_v0, 3  ;;  %v724_v7 = vrot.slane %v722_v2, 3  ;;  %v731_v19 = vshrl.u32 %v13188_v16, 16  ;;  %v734_v20 = vshll.u32 %v13188_v16, 16 }
  0x29   : > { %v719_v58 = vor.u32 %v718_v55, %v715_v54  ;;  %v727_v8 = vrot.slane %v725_v3, 4  ;;  %v844_v23 = vrot.slane %v842_v18, 4  ;;  %v3081_v32 = vsel %vm498_vm0, %v10388_v30, 0  ;;  %v11919_v54 = vld [vmem:[%s13086_s12 + $0xb8] sm:$0xff]  }
  0x2a   : > { %v733_v24 = vrot.slane %v731_v19, 3  ;;  %3090 = vmatpush.bf16.msrb.mxu1 %v3081_v32 }
  0x2b   : > { %10206 = vmatmul.msk.bf16.gmra.mxu3 %vm425_vm1, %v792_v57  ;;  %v827_v57 = vor.u32 %v826_v53, %v823_v52  ;;  %v720_v62 = vsel %vm658_vm2, %v710_v41, %v719_v58  ;;  %v12846_v41 = vld [vmem:[%s13086_s12 + $0xac] sm:$0xff]  }
  0x2e   : > { %10194 = vmatmul.msk.bf16.gmra.mxu1 %vm425_vm1, %v684_v59  ;;  %v828_v59 = vsel %vm658_vm2, %v818_v40, %v827_v57  ;;  %v743_v40 = vshll.u32 %v13206_v36, 16 }
  0x30   : > { %v745_v47 = vrot.slane %v743_v40, 4 }
  0x32   : > { %10183 = vmatmul.msk.bf16.gmra.mxu2 %vm425_vm1, %v12834_v1  ;;  %v833_v1 = vshll.u32 %v11916_v61, 16  ;;  %v857_v61 = vshrl.u32 %v11919_v54, 16 }
  0x37   : > { %10171 = vmatmul.msk.bf16.gmra.mxu0 %vm425_vm1, %v12810_v6  ;;  %v835_v6 = vrot.slane %v833_v1, 4 }
  0x39   : > { %v836_v10 = vor.u32 %v835_v6, %v832_v5  ;;  %v12848_v5 = vld [vmem:[%s13086_s12 + $0xb4] sm:$0xff]   ;;  %v859_v6 = vrot.slane %v857_v61, 3 }
  0x3b   : > { %10207 = vmatmul.msk.bf16.gmra.mxu3 %vm425_vm1, %v801_v9  ;;  %v12818_v9 = vld [vmem:[%s13086_s12 + $0x3c] sm:$0xff]   ;;  %v837_v13 = vsel %vm658_vm2, %v827_v57, %v836_v10 }
  0x3e   : > { %10195 = vmatmul.msk.bf16.gmra.mxu1 %vm425_vm1, %v693_v11  ;;  %v728_v11 = vor.u32 %v727_v8, %v724_v7 }
  0x40   : > { %v729_v15 = vsel %vm658_vm2, %v719_v58, %v728_v11  ;;  %v13222_v58 = vld [vmem:[%s13086_s12 + $0x58] sm:$0xff]  }
  0x41   : > { %v749_v2 = vshrl.u32 %v13222_v58, 16  ;;  %v752_v3 = vshll.u32 %v13222_v58, 16 }
  0x42   : > { %10184 = vmatmul.msk.bf16.gmra.mxu2 %vm425_vm1, %v12836_v17  ;;  %v839_v17 = vshrl.u32 %v11917_v14, 16 }
  0x47   : > { %10172 = vmatmul.msk.bf16.gmra.mxu0 %vm425_vm1, %v12812_v22  ;;  %v841_v22 = vrot.slane %v839_v17, 3 }
  0x4b   : > { %10208 = vmatmul.msk.bf16.gmra.mxu3 %vm425_vm1, %v810_v25  ;;  %v736_v25 = vrot.slane %v734_v20, 4 }
  0x4d   : > { %v737_v29 = vor.u32 %v736_v25, %v733_v24 }
  0x4e   : > { %10196 = vmatmul.msk.bf16.gmra.mxu1 %vm425_vm1, %v702_v27  ;;  %v845_v27 = vor.u32 %v844_v23, %v841_v22  ;;  %v11920_v22 = vld [vmem:[%s13086_s12 + $0xc0] sm:$0xff]  }
  0x4f   : > { %v738_v35 = vsel %vm658_vm2, %v728_v11, %v737_v29  ;;  %v869_v30 = vshll.u32 %v11920_v22, 16 }
  0x50   : > { %v846_v31 = vsel %vm658_vm2, %v836_v10, %v845_v27  ;;  %v754_v10 = vrot.slane %v752_v3, 4  ;;  %v11429_v3 = vunpack.c.h.b16 %v11920_v22 }
  0x51   : > { %v871_v40 = vrot.slane %v869_v30, 4 }
  0x52   : > { %10185 = vmatmul.msk.bf16.gmra.mxu2 %vm425_vm1, %v12838_v33  ;;  %v11918_v33 = vld [vmem:[%s13086_s12 + $0xb0] sm:$0xff]  }
  0x53   : > { %v848_v37 = vshrl.u32 %v11918_v33, 16  ;;  %v851_v38 = vshll.u32 %v11918_v33, 16 }
  0x55   : > { %v853_v44 = vrot.slane %v851_v38, 4  ;;  %v12849_v38 = vld [vmem:[%s13086_s12 + $0xbc] sm:$0xff]  }
  0x57   : > { %10173 = vmatmul.msk.bf16.gmra.mxu0 %vm425_vm1, %v12814_v39  ;;  %v740_v39 = vshrl.u32 %v13206_v36, 16 }
  0x5b   : > { %10209 = vmatmul.msk.bf16.gmra.mxu3 %vm425_vm1, %v819_v42  ;;  %v850_v42 = vrot.slane %v848_v37, 3 }
  0x5d   : > { %v854_v50 = vor.u32 %v853_v44, %v850_v42 }
  0x5e   : > { %10197 = vmatmul.msk.bf16.gmra.mxu1 %vm425_vm1, %v711_v45  ;;  %v742_v45 = vrot.slane %v740_v39, 3 }
  0x5f   : > { %v855_v53 = vsel %vm658_vm2, %v845_v27, %v854_v50 }
  0x60   : > { %v746_v52 = vor.u32 %v745_v47, %v742_v45 }
  0x62   : > { %10186 = vmatmul.msk.bf16.gmra.mxu2 %vm425_vm1, %v12840_v51 }
  0x67   : > { %10174 = vmatmul.msk.bf16.gmra.mxu0 %vm425_vm1, %v12816_v56  ;;  %v747_v56 = vsel %vm658_vm2, %v737_v29, %v746_v52  ;;  %v866_v29 = vshrl.u32 %v11920_v22, 16 }
  0x69   : > { %v868_v39 = vrot.slane %v866_v29, 3  ;;  %v13286_v29 = vld [vmem:[%s13086_s12 + $0x14] sm:$0xff] }
  0x6b   : > { %10210 = vmatmul.msk.bf16.gmra.mxu3 %vm425_vm1, %v828_v59 }
  0x6e   : > { %10198 = vmatmul.msk.bf16.gmra.mxu1 %vm425_vm1, %v720_v62  ;;  %v860_v62 = vshll.u32 %v11919_v54, 16 }
  0x70   : > { %v862_v7 = vrot.slane %v860_v62, 4 }
  0x72   : > { %10187 = vmatmul.msk.bf16.gmra.mxu2 %vm425_vm1, %v12842_v4 }
  0x77   : > { %10175 = vmatmul.msk.bf16.gmra.mxu0 %vm425_vm1, %v12818_v9  ;;  %v751_v9 = vrot.slane %v749_v2, 3 }
  0x79   : > { %v755_v19 = vor.u32 %v754_v10, %v751_v9 }
  0x7b   : > { %10211 = vmatmul.msk.bf16.gmra.mxu3 %vm425_vm1, %v837_v13  ;;  %v12824_v13 = vld [vmem:[%s13086_s12 + $0x54] sm:$0xff]   ;;  %v756_v24 = vsel %vm658_vm2, %v746_v52, %v755_v19 }
  0x7e   : > { %10199 = vmatmul.msk.bf16.gmra.mxu1 %vm425_vm1, %v729_v15  ;;  %v863_v15 = vor.u32 %v862_v7, %v859_v6 }
  0x82   : > { %10188 = vmatmul.msk.bf16.gmra.mxu2 %vm425_vm1, %v12844_v21  ;;  %v864_v21 = vsel %vm658_vm2, %v854_v50, %v863_v15  ;;  %v872_v50 = vor.u32 %v871_v40, %v868_v39 }
  0x87   : > { %10176 = vmatmul.msk.bf16.gmra.mxu0 %vm425_vm1, %v12820_v26  ;;  %v13244_v26 = vld [vmem:[%s13086_s12 + $0x60] sm:$0xff]  }
  0x88   : > { %v758_v33 = vshrl.u32 %v13244_v26, 16 }
  0x8a   : > { %v760_v44 = vrot.slane %v758_v33, 3  ;;  %v12370_v33 = vld [vmem:[%s13086_s12 + $0x14] sm:$0x8] }
  0x8b   : > { %10212 = vmatmul.msk.bf16.gmra.mxu3 %vm425_vm1, %v846_v31 }
  0x8e   : > { %10200 = vmatmul.msk.bf16.gmra.mxu1 %vm425_vm1, %v738_v35  ;;  %v761_v35 = vshll.u32 %v13244_v26, 16 }
  0x90   : > { %v763_v45 = vrot.slane %v761_v35, 4  ;;  %v12851_v35 = vld [vmem:[%s13086_s12 + $0x14] sm:$0xf0]  }
  0x92   : > { %10189 = vmatmul.msk.bf16.gmra.mxu2 %vm425_vm1, %v12846_v41  ;;  %v301_v41 = vld [vmem:[%s13086_s12 + $0xc8] sm:$0xf]  ;;  %v764_v54 = vor.u32 %v763_v45, %v760_v44  ;;  %v1270_v44 = vshll.u32 %v13286_v29, 16 }
  0x94   : > { %v511_v49 = vpop.f32.mrf.mxu0 }
  0x95   : > { %v571_v51 = vpop.f32.mrf.mxu2 }
  0x97   : > { %10177 = vmatmul.msk.bf16.gmra.mxu0 %vm425_vm1, %v12822_v48  ;;  %v12826_v48 = vld [vmem:[%s13086_s12 + $0x5c] sm:$0xff]  }
  0x9b   : > { %v967_v55 = vpop.f32.mrf.mxu1  ;;  %10213 = vmatmul.msk.bf16.gmra.mxu3 %vm425_vm1, %v855_v53 }
  0x9c   : > { %v13219_v57 = vadd.f32 %v967_v55, %v511_v49  ;;  %v513_v59 = vpop.f32.mrf.mxu0 }
  0x9d   : > { %v573_v1 = vpop.f32.mrf.mxu2 }
  0x9e   : > { %10201 = vmatmul.msk.bf16.gmra.mxu1 %vm425_vm1, %v747_v56  ;;  %v1027_v0 = vpop.f32.mrf.mxu3  ;;  %v10509_v56 = vld [vmem:[%s15991_s1 + $0x18] sm:$0xf] }
  0x9f   : > { %v13227_v4 = vadd.f32 %v1027_v0, %v571_v51  ;;  %v400_v51 = vunpack.c.l.b16 %v301_v41  ;;  %v3731_v62 = vsel %vm498_vm0, %v10509_v56, 0 }
  0xa0   : > { %3740 = vmatpush.bf16.msra.mxu2 %v3731_v62 }
  0xa1   : > { %v657_v61 = vpack.c.b16 %v400_v51, %v400_v51 }
  0xa2   : > { %10190 = vmatmul.msk.bf16.gmra.mxu2 %vm425_vm1, %v12848_v5  ;;  %v10534_v5 = vld [vmem:[%s15991_s1 + $0x1c] sm:$0xf] }
  0xa3   : > { %v969_v8 = vpop.f32.mrf.mxu1  ;;  %v875_v7 = vshrl.u32 %v657_v61, 16  ;;  %v4009_v9 = vsel %vm498_vm0, %v10534_v5, 0 }
  0xa4   : > { %v13230_v11 = vadd.f32 %v969_v8, %v513_v59  ;;  %v516_v14 = vpop.f32.mrf.mxu0  ;;  %v873_v59 = vsel %vm658_vm2, %v863_v15, %v872_v50  ;;  %v878_v8 = vshll.u32 %v657_v61, 16  ;;  %4018 = vmatpush.bf16.msra.mxu3 %v4009_v9  ;;  %v424_v15 = vpack.c.b16 %v400_v51, %v11429_v3 }
  0xa5   : > { %v576_v18 = vpop.f32.mrf.mxu2  ;;  %v1272_v61 = vrot.slane %v1270_v44, 1 }
  0xa6   : > { %v1029_v17 = vpop.f32.mrf.mxu3 }
  0xa7   : > { %v13234_v20 = vadd.f32 %v1029_v17, %v573_v1  ;;  %10178 = vmatmul.msk.bf16.gmra.mxu0 %vm425_vm1, %v12824_v13  ;;  %v765_v1 = vsel %vm658_vm2, %v755_v19, %v764_v54  ;;  %v11194_v17 = vld [vmem:[%s13086_s12 + $0xc] sm:$0xff]  ;;  %v877_v19 = vrot.slane %v875_v7, 3  ;;  %v11219_v7 = vld [vmem:[%s13086_s12 + $0x20] sm:$0xff] }
  0xa8   : > { %v1265_v30 = vshll.u32 %v11194_v17, 16  ;;  %v1263_v41 = vshrl.u32 %v11194_v17, 16 }
  0xab   : > { %v972_v23 = vpop.f32.mrf.mxu1  ;;  %10214 = vmatmul.msk.bf16.gmra.mxu3 %vm425_vm1, %v864_v21  ;;  %v880_v21 = vrot.slane %v878_v8, 4 }
  0xac   : > { %v13241_v25 = vadd.f32 %v972_v23, %v516_v14  ;;  %v518_v27 = vpop.f32.mrf.mxu0 }
  0xad   : > { %v578_v32 = vpop.f32.mrf.mxu2 }
  0xae   : > { %10202 = vmatmul.msk.bf16.gmra.mxu1 %vm425_vm1, %v756_v24  ;;  %v1032_v31 = vpop.f32.mrf.mxu3 }
  0xaf   : > { %v13249_v37 = vadd.f32 %v1032_v31, %v576_v18  ;;  %v10559_v18 = vld [vmem:[%s15991_s1 + $0x20] sm:$0xf] }
  0xb0   : > { %v4631_v22 = vsel %vm498_vm0, %v10559_v18, 0 }
  0xb1   : > { %4640 = vmatpush.bf16.msra.mxu0 %v4631_v22 }
  0xb2   : > { %10191 = vmatmul.msk.bf16.gmra.mxu2 %vm425_vm1, %v12849_v38 }
  0xb3   : > { %v974_v42 = vpop.f32.mrf.mxu1 }
  0xb4   : > { %v13253_v47 = vadd.f32 %v974_v42, %v518_v27  ;;  %v521_v49 = vpop.f32.mrf.mxu0  ;;  %v12828_v27 = vld [vmem:[%s13086_s12 + $0x64] sm:$0xff]   ;;  %v1267_v42 = vrot.slane %v1265_v30, 1 }
  0xb5   : > { %v581_v53 = vpop.f32.mrf.mxu2 }
  0xb6   : > { %v1034_v52 = vpop.f32.mrf.mxu3 }
  0xb7   : > { %v13257_v55 = vadd.f32 %v1034_v52, %v578_v32  ;;  %10179 = vmatmul.msk.bf16.gmra.mxu0 %vm425_vm1, %v12826_v48  ;;  %v881_v32 = vor.u32 %v880_v21, %v877_v19  ;;  %v12853_v48 = vld [vmem:[%s13086_s12 + $0x1c] sm:$0xff]   ;;  %v774_v52 = vsel %vm658_vm2, %v764_v54, %v13096_v34  ;;  %v2820_v21 = vshll.u32 %v11219_v7, 16 }
  0xb8   : > { %v1893_v3 = vshrl.u32 %v12853_v48, 16 }
  0xb9   : > { %v882_v45 = vsel %vm658_vm2, %v872_v50, %v881_v32  ;;  %v1896_v50 = vshll.u32 %v12853_v48, 16 }
  0xbb   : > { %v977_v0 = vpop.f32.mrf.mxu1  ;;  %10215 = vmatmul.msk.bf16.gmra.mxu3 %vm425_vm1, %v873_v59  ;;  %v1268_v59 = vor.u32 %v1267_v42, %v1263_v41  ;;  %v1274_v42 = vshrl.u32 %v13286_v29, 16  ;;  %v11220_v29 = vld [vmem:[%s13086_s12 + $0x28] sm:$0xff] }
  0xbc   : > { %v13267_v2 = vadd.f32 %v977_v0, %v521_v49  ;;  %v523_v6 = vpop.f32.mrf.mxu0  ;;  %v12371_v49 = vor.u32 %v12851_v35, %v12370_v33 }
  0xbd   : > { %v583_v13 = vpop.f32.mrf.mxu2  ;;  %v1273_v54 = vsel %vm1261_vm3, %v1268_v59, %v1272_v61 }
  0xbe   : > { %10203 = vmatmul.msk.bf16.gmra.mxu1 %vm425_vm1, %v765_v1  ;;  %v1037_v10 = vpop.f32.mrf.mxu3  ;;  %v1885_v0 = vshrl.u32 %v12371_v49, 16  ;;  %v1888_v1 = vshll.u32 %v12371_v49, 16 }
  0xbf   : > { %v13274_v14 = vadd.f32 %v1037_v10, %v581_v53  ;;  %v11218_v53 = vld [vmem:[%s13086_s12 + $0x18] sm:$0xff] }
  0xc0   : > { %v2815_v8 = vshll.u32 %v11218_v53, 16  ;;  %v1887_v9 = vrot.slane %v1885_v0, 3  ;;  %v1890_v10 = vrot.slane %v1888_v1, 4  ;;  %v2813_v18 = vshrl.u32 %v11218_v53, 16 }
  0xc1   : > { %v1276_v53 = vor.u32 %v1274_v42, %v1272_v61 }
  0xc2   : > { %10192 = vmatmul.msk.bf16.gmra.mxu2 %vm425_vm1, %v424_v15  ;;  %v1898_v15 = vrot.slane %v1896_v50, 4  ;;  %v2817_v19 = vrot.slane %v2815_v8, 1 }
  0xc3   : > { %v979_v23 = vpop.f32.mrf.mxu1 }
  0xc4   : > { %v13281_v24 = vadd.f32 %v979_v23, %v523_v6  ;;  %v526_v31 = vpop.f32.mrf.mxu0  ;;  %v2818_v35 = vor.u32 %v2817_v19, %v2813_v18 }
  0xc5   : > { %v586_v39 = vpop.f32.mrf.mxu2 }
  0xc6   : > { %v1039_v38 = vpop.f32.mrf.mxu3 }
  0xc7   : > { %v13290_v40 = vadd.f32 %v1039_v38, %v583_v13  ;;  %10180 = vmatmul.msk.bf16.gmra.mxu0 %vm425_vm1, %v12828_v27  ;;  %v1895_v13 = vrot.slane %v1893_v3, 3  ;;  %v1891_v27 = vor.u32 %v1890_v10, %v1887_v9  ;;  %v2822_v38 = vrot.slane %v2820_v21, 1 }
  0xc8   : > { %v2828_v9 = vshll.u32 %v11220_v29, 16 }
  0xc9   : > { %v1899_v30 = vor.u32 %v1898_v15, %v1895_v13  ;;  %v2823_v49 = vsel %vm1261_vm3, %v2818_v35, %v2822_v38  ;;  %v11197_v15 = vld [vmem:[%s13086_s12 + $0x24] sm:$0xff] }
  0xca   : > { %v2830_v21 = vrot.slane %v2828_v9, 1 }
  0xcb   : > { %v982_v51 = vpop.f32.mrf.mxu1  ;;  %10216 = vmatmul.msk.bf16.gmra.mxu3 %vm425_vm1, %v882_v45  ;;  %v1900_v41 = vsel %vm658_vm2, %v1891_v27, %v1899_v30  ;;  %v12855_v45 = vld [vmem:[%s13086_s12 + $0x24] sm:$0xff]  }
  0xcc   : > { %v13300_v56 = vadd.f32 %v982_v51, %v526_v31  ;;  %v528_v62 = vpop.f32.mrf.mxu0  ;;  %v11196_v31 = vld [vmem:[%s13086_s12 + $0x1c] sm:$0xff]  ;;  %v1905_v0 = vshll.u32 %v12855_v45, 16 }
  0xcd   : > { %v588_v6 = vpop.f32.mrf.mxu2  ;;  %v1278_v44 = vshll.u32 %v11196_v31, 16  ;;  %v1282_v27 = vshrl.u32 %v11196_v31, 16  ;;  %v11221_v31 = vld [vmem:[%s13086_s12 + $0x30] sm:$0xff] }
  0xce   : > { %10204 = vmatmul.msk.bf16.gmra.mxu1 %vm425_vm1, %v774_v52  ;;  %v1042_v5 = vpop.f32.mrf.mxu3 }
  0xcf   : > { %v13304_v34 = vadd.f32 %v1042_v5, %v586_v39  ;;  %v1280_v59 = vrot.slane %v1278_v44, 1 }
  0xd1   : > { %v1281_v50 = vsel %vm1261_vm3, %v1276_v53, %v1280_v59  ;;  %v1284_v44 = vor.u32 %v1282_v27, %v1280_v59  ;;  %v12859_v27 = vld [vmem:[%s13086_s12 + $0x34] sm:$0xff]  }
  0xd2   : > { %10314 = vmatmul.msk.bf16.vlgmr.msrb.gmra.mxu2 %vm425_vm1, %v1273_v54  ;;  %v2824_v54 = vshrl.u32 %v11219_v7, 16 }
  0xd3   : > { %v984_v17 = vpop.f32.mrf.mxu1 }
  0xd4   : > { %v13307_v22 = vadd.f32 %v984_v17, %v528_v62  ;;  %v531_v23 = vpop.f32.mrf.mxu0  ;;  %v1902_v62 = vshrl.u32 %v12855_v45, 16  ;;  %v2826_v19 = vor.u32 %v2824_v54, %v2822_v38 }
  0xd5   : > { %v591_v33 = vpop.f32.mrf.mxu2 }
  0xd6   : > { %v1044_v32 = vpop.f32.mrf.mxu3  ;;  %v1904_v5 = vrot.slane %v1902_v62, 3 }
  0xd7   : > { %v13311_v39 = vadd.f32 %v1044_v32, %v588_v6  ;;  %10364 = vmatmul.msk.bf16.vlgmr.msrb.gmra.mxu0 %vm425_vm1, %v13103_v43  ;;  %v1907_v6 = vrot.slane %v1905_v0, 4  ;;  %v1286_v32 = vshll.u32 %v11197_v15, 16 }
  0xd9   : > { %v1908_v13 = vor.u32 %v1907_v6, %v1904_v5  ;;  %v1288_v45 = vrot.slane %v1286_v32, 1 }
  0xdb   : > { %v987_v48 = vpop.f32.mrf.mxu1  ;;  %10339 = vmatmul.msk.bf16.vlgmr.msrb.gmra.mxu3 %vm425_vm1, %v1900_v41  ;;  %v1909_v7 = vsel %vm658_vm2, %v1899_v30, %v1908_v13  ;;  %v2831_v41 = vsel %vm1261_vm3, %v2826_v19, %v2830_v21  ;;  %v1289_v53 = vsel %vm1261_vm3, %v1284_v44, %v1288_v45  ;;  %v1290_v19 = vshrl.u32 %v11197_v15, 16  ;;  %v11222_v15 = vld [vmem:[%s13086_s12 + $0x38] sm:$0xff] }
  0xdc   : > { %v13320_v51 = vadd.f32 %v987_v48, %v531_v23  ;;  %v533_v52 = vpop.f32.mrf.mxu0  ;;  %v1920_v44 = vshrl.u32 %v12859_v27, 16 }
  0xdd   : > { %v593_v1 = vpop.f32.mrf.mxu2 }
  0xde   : > { %10485 = vmatmul.msk.bf16.vlgmr.msrb.gmra.mxu1 %vm425_vm1, %v2823_v49  ;;  %v1047_v43 = vpop.f32.mrf.mxu3 }
  0xdf   : > { %v13324_v3 = vadd.f32 %v1047_v43, %v591_v33  ;;  %v12857_v33 = vld [vmem:[%s13086_s12 + $0x2c] sm:$0xff]  }
  0xe0   : > { %v1911_v48 = vshrl.u32 %v12857_v33, 16  ;;  %v1914_v49 = vshll.u32 %v12857_v33, 16 }
  0xe2   : > { %10315 = vmatmul.msk.bf16.gmra.mxu2 %vm425_vm1, %v1281_v50  ;;  %v1913_v62 = vrot.slane %v1911_v48, 3  ;;  %v1916_v0 = vrot.slane %v1914_v49, 4  ;;  %v2836_v50 = vshll.u32 %v11221_v31, 16  ;;  %v1923_v48 = vshll.u32 %v12859_v27, 16 }
  0xe3   : > { %v989_v8 = vpop.f32.mrf.mxu1 }
  0xe4   : > { %v13327_v61 = vadd.f32 %v989_v8, %v533_v52  ;;  %v536_v10 = vpop.f32.mrf.mxu0  ;;  %v1917_v6 = vor.u32 %v1916_v0, %v1913_v62  ;;  %v11198_v8 = vld [vmem:[%s13086_s12 + $0x2c] sm:$0xff]  ;;  %v2840_v0 = vshrl.u32 %v11221_v31, 16 }
  0xe5   : > { %v596_v18 = vpop.f32.mrf.mxu2 }
  0xe6   : > { %v1049_v17 = vpop.f32.mrf.mxu3 }
  0xe7   : > { %v13331_v23 = vadd.f32 %v1049_v17, %v593_v1  ;;  %10365 = vmatmul.msk.bf16.gmra.mxu0 %vm425_vm1, %v13118_v60  ;;  %v2832_v1 = vshrl.u32 %v11220_v29, 16  ;;  %v2838_v17 = vrot.slane %v2836_v50, 1  ;;  %v1918_v29 = vsel %vm658_vm2, %v1908_v13, %v1917_v6 }
  0xeb   : > { %v992_v35 = vpop.f32.mrf.mxu1  ;;  %10340 = vmatmul.msk.bf16.gmra.mxu3 %vm425_vm1, %v1909_v7  ;;  %v1294_v7 = vshll.u32 %v11198_v8, 16 }
  0xec   : > { %v13339_v42 = vadd.f32 %v992_v35, %v536_v10  ;;  %v538_v38 = vpop.f32.mrf.mxu0  ;;  %v2834_v10 = vor.u32 %v2832_v1, %v2830_v21 }
  0xed   : > { %v598_v30 = vpop.f32.mrf.mxu2 }
  0xee   : > { %10486 = vmatmul.msk.bf16.gmra.mxu1 %vm425_vm1, %v2831_v41  ;;  %v1052_v60 = vpop.f32.mrf.mxu3  ;;  %v2839_v33 = vsel %vm1261_vm3, %v2834_v10, %v2838_v17  ;;  %v1292_v41 = vor.u32 %v1290_v19, %v1288_v45 }
  0xef   : > { %v13343_v52 = vadd.f32 %v1052_v60, %v596_v18 }
  0xf2   : > { %10316 = vmatmul.msk.bf16.gmra.mxu2 %vm425_vm1, %v1289_v53  ;;  %v1925_v53 = vrot.slane %v1923_v48, 4 }
  0xf3   : > { %v994_v43 = vpop.f32.mrf.mxu1 }
  0xf4   : > { %v13346_v59 = vadd.f32 %v994_v43, %v538_v38  ;;  %v541_v5 = vpop.f32.mrf.mxu0  ;;  %v1296_v38 = vrot.slane %v1294_v7, 1  ;;  %v2844_v43 = vshll.u32 %v11222_v15, 16  ;;  %v1298_v7 = vshrl.u32 %v11198_v8, 16  ;;  %v11223_v8 = vld [vmem:[%s13086_s12 + $0x40] sm:$0xff] }
  0xf5   : > { %v601_v9 = vpop.f32.mrf.mxu2 }
  0xf6   : > { %v1054_v54 = vpop.f32.mrf.mxu3  ;;  %v1297_v60 = vsel %vm1261_vm3, %v1292_v41, %v1296_v38 }
  0xf7   : > { %v13350_v18 = vadd.f32 %v1054_v54, %v598_v30  ;;  %10366 = vmatmul.msk.bf16.gmra.mxu0 %vm425_vm1, %v13132_v12  ;;  %v1922_v30 = vrot.slane %v1920_v44, 3  ;;  %v1300_v44 = vor.u32 %v1298_v7, %v1296_v38 }
  0xf9   : > { %15999 = vst [vmem:[#allocation3_spill] sm:$0xff] %v13350_v18  ;;  %v1926_v50 = vor.u32 %v1925_v53, %v1922_v30 }
  0xfb   : > { %v997_v32 = vpop.f32.mrf.mxu1  ;;  %10341 = vmatmul.msk.bf16.gmra.mxu3 %vm425_vm1, %v1918_v29  ;;  %v2842_v29 = vor.u32 %v2840_v0, %v2838_v17  ;;  %v1927_v31 = vsel %vm658_vm2, %v1917_v6, %v1926_v50 }
  0xfc   : > { %v13358_v35 = vadd.f32 %v997_v32, %v541_v5  ;;  %v543_v21 = vpop.f32.mrf.mxu0  ;;  %v11199_v5 = vld [vmem:[%s13086_s12 + $0x34] sm:$0xff]  ;;  %v12861_v32 = vld [vmem:[%s13086_s12 + $0x3c] sm:$0xff]  }
  0xfd   : > { %v603_v13 = vpop.f32.mrf.mxu2  ;;  %v1302_v27 = vshll.u32 %v11199_v5, 16 }
  0xfe   : > { %10487 = vmatmul.msk.bf16.gmra.mxu1 %vm425_vm1, %v2839_v33  ;;  %v1057_v12 = vpop.f32.mrf.mxu3 }
  0xff   : > { %v13362_v49 = vadd.f32 %v1057_v12, %v601_v9  ;;  %v2846_v9 = vrot.slane %v2844_v43, 1  ;;  %v1304_v48 = vrot.slane %v1302_v27, 1  ;;  %v1929_v12 = vshrl.u32 %v12861_v32, 16 }
 0x100   : > { %v2848_v43 = vshrl.u32 %v11222_v15, 16 }
 0x101   : > { %16000 = vst [vmem:[#allocation4_spill] sm:$0xff] %v13362_v49  ;;  %v1305_v30 = vsel %vm1261_vm3, %v1300_v44, %v1304_v48  ;;  %v1931_v53 = vrot.slane %v1929_v12, 3  ;;  %v12863_v44 = vld [vmem:[%s13086_s12 + $0x44] sm:$0xff]  }
 0x102   : > { %10317 = vmatmul.msk.bf16.gmra.mxu2 %vm425_vm1, %v1297_v60 }
 0x103   : > { %v999_v62 = vpop.f32.mrf.mxu1 }
 0x104   : > { %v13365_v45 = vadd.f32 %v999_v62, %v543_v21  ;;  %v546_v1 = vpop.f32.mrf.mxu0  ;;  %v2847_v21 = vsel %vm1261_vm3, %v2842_v29, %v2846_v9 }
 0x105   : > { %v606_v10 = vpop.f32.mrf.mxu2 }
 0x106   : > { %v1059_v54 = vpop.f32.mrf.mxu3 }
 0x107   : > { %v13369_v19 = vadd.f32 %v1059_v54, %v603_v13  ;;  %10367 = vmatmul.msk.bf16.gmra.mxu0 %vm425_vm1, %v13146_v28  ;;  %v1932_v13 = vshll.u32 %v12861_v32, 16  ;;  %v2850_v32 = vor.u32 %v2848_v43, %v2846_v9 }
 0x109   : > { %16001 = vst [vmem:[#allocation5_spill] sm:$0xff] %v13369_v19  ;;  %v1934_v62 = vrot.slane %v1932_v13, 4 }
 0x10b   : > { %v1002_v33 = vpop.f32.mrf.mxu1  ;;  %10342 = vmatmul.msk.bf16.gmra.mxu3 %vm425_vm1, %v1927_v31  ;;  %v1935_v29 = vor.u32 %v1934_v62, %v1931_v53  ;;  %v11200_v31 = vld [vmem:[%s13086_s12 + $0x3c] sm:$0xff]  ;;  %v1938_v53 = vshrl.u32 %v12863_v44, 16  ;;  %v1941_v62 = vshll.u32 %v12863_v44, 16  ;;  %v11201_v44 = vld [vmem:[%s13086_s12 + $0x44] sm:$0xff] }
 0x10c   : > { %v13377_v41 = vadd.f32 %v1002_v33, %v546_v1  ;;  %v548_v17 = vpop.f32.mrf.mxu0  ;;  %v2852_v1 = vshll.u32 %v11223_v8, 16 }
 0x10d   : > { %v608_v6 = vpop.f32.mrf.mxu2  ;;  %v1936_v15 = vsel %vm658_vm2, %v1926_v50, %v1935_v29 }
 0x10e   : > { %10488 = vmatmul.msk.bf16.gmra.mxu1 %vm425_vm1, %v2847_v21  ;;  %v1062_v28 = vpop.f32.mrf.mxu3  ;;  %v1306_v21 = vshrl.u32 %v11199_v5, 16  ;;  %v11224_v5 = vld [vmem:[%s13086_s12 + $0x48] sm:$0xff] }
 0x10f   : > { %v13381_v60 = vadd.f32 %v1062_v28, %v606_v10  ;;  %v2854_v10 = vrot.slane %v2852_v1, 1  ;;  %v1940_v1 = vrot.slane %v1938_v53, 3  ;;  %v12865_v53 = vld [vmem:[%s13086_s12 + $0x4c] sm:$0xff]  }
 0x111   : > { %16002 = vst [vmem:[#allocation6_spill] sm:$0xff] %v13381_v60  ;;  %v2855_v13 = vsel %vm1261_vm3, %v2850_v32, %v2854_v10 }
 0x112   : > { %10318 = vmatmul.msk.bf16.gmra.mxu2 %vm425_vm1, %v1305_v30  ;;  %v1308_v30 = vor.u32 %v1306_v21, %v1304_v48 }
 0x113   : > { %v1004_v0 = vpop.f32.mrf.mxu1 }
 0x114   : > { %v13384_v38 = vadd.f32 %v1004_v0, %v548_v17  ;;  %v551_v54 = vpop.f32.mrf.mxu0  ;;  %v1310_v17 = vshll.u32 %v11200_v31, 16 }
 0x115   : > { %v611_v27 = vpop.f32.mrf.mxu2 }
 0x116   : > { %v1064_v7 = vpop.f32.mrf.mxu3 }
 0x117   : > { %v13388_v33 = vadd.f32 %v1064_v7, %v608_v6  ;;  %10368 = vmatmul.msk.bf16.gmra.mxu0 %vm425_vm1, %v13160_v46  ;;  %v1312_v6 = vrot.slane %v1310_v17, 1  ;;  %v1943_v7 = vrot.slane %v1941_v62, 4 }
 0x119   : > { %16003 = vst [vmem:[#allocation7_spill] sm:$0xff] %v13388_v33  ;;  %v1313_v43 = vsel %vm1261_vm3, %v1308_v30, %v1312_v6  ;;  %v1944_v17 = vor.u32 %v1943_v7, %v1940_v1  ;;  %v1314_v30 = vshrl.u32 %v11200_v31, 16  ;;  %v11225_v31 = vld [vmem:[%s13086_s12 + $0x50] sm:$0xff] }
 0x11b   : > { %v1007_v12 = vpop.f32.mrf.mxu1  ;;  %10343 = vmatmul.msk.bf16.gmra.mxu3 %vm425_vm1, %v1936_v15  ;;  %v2860_v15 = vshll.u32 %v11224_v5, 16  ;;  %v1316_v7 = vor.u32 %v1314_v30, %v1312_v6 }
 0x11c   : > { %v13396_v28 = vadd.f32 %v1007_v12, %v551_v54  ;;  %v553_v9 = vpop.f32.mrf.mxu0  ;;  %v2856_v54 = vshrl.u32 %v11223_v8, 16  ;;  %v1945_v8 = vsel %vm658_vm2, %v1935_v29, %v1944_v17 }
 0x11d   : > { %v613_v50 = vpop.f32.mrf.mxu2 }
 0x11e   : > { %10489 = vmatmul.msk.bf16.gmra.mxu1 %vm425_vm1, %v2855_v13  ;;  %v1067_v46 = vpop.f32.mrf.mxu3  ;;  %v2858_v33 = vor.u32 %v2856_v54, %v2854_v10  ;;  %v1950_v54 = vshll.u32 %v12865_v53, 16 }
 0x11f   : > { %v13400_v0 = vadd.f32 %v1067_v46, %v611_v27  ;;  %v2862_v27 = vrot.slane %v2860_v15, 1 }
 0x121   : > { %16004 = vst [vmem:[#allocation8_spill] sm:$0xff] %v13400_v0 }
 0x122   : > { %10319 = vmatmul.msk.bf16.gmra.mxu2 %vm425_vm1, %v1313_v43  ;;  %v2863_v43 = vsel %vm1261_vm3, %v2858_v33, %v2862_v27 }
 0x123   : > { %v1009_v32 = vpop.f32.mrf.mxu1 }
 0x124   : > { %v13403_v48 = vadd.f32 %v1009_v32, %v553_v9  ;;  %v556_v21 = vpop.f32.mrf.mxu0  ;;  %v1318_v9 = vshll.u32 %v11201_v44, 16  ;;  %v1947_v32 = vshrl.u32 %v12865_v53, 16  ;;  %v11202_v53 = vld [vmem:[%s13086_s12 + $0x4c] sm:$0xff] }
 0x125   : > { %v616_v13 = vpop.f32.mrf.mxu2 }
 0x126   : > { %v1069_v12 = vpop.f32.mrf.mxu3  ;;  %v1949_v33 = vrot.slane %v1947_v32, 3  ;;  %v12867_v32 = vld [vmem:[%s13086_s12 + $0x54] sm:$0xff]  }
 0x127   : > { %v13407_v46 = vadd.f32 %v1069_v12, %v613_v50  ;;  %10369 = vmatmul.msk.bf16.gmra.mxu0 %vm425_vm1, %v13174_v63  ;;  %v1320_v50 = vrot.slane %v1318_v9, 1 }
 0x129   : > { %16005 = vst [vmem:[#allocation9_spill] sm:$0xff] %v13407_v46  ;;  %v1321_v12 = vsel %vm1261_vm3, %v1316_v7, %v1320_v50  ;;  %v1952_v46 = vrot.slane %v1950_v54, 4  ;;  %v1322_v7 = vshrl.u32 %v11201_v44, 16  ;;  %v11226_v44 = vld [vmem:[%s13086_s12 + $0x58] sm:$0xff] }
 0x12b   : > { %v1012_v62 = vpop.f32.mrf.mxu1  ;;  %10344 = vmatmul.msk.bf16.gmra.mxu3 %vm425_vm1, %v1945_v8  ;;  %v1953_v9 = vor.u32 %v1952_v46, %v1949_v33  ;;  %v1324_v33 = vor.u32 %v1322_v7, %v1320_v50 }
 0x12c   : > { %v13415_v1 = vadd.f32 %v1012_v62, %v556_v21  ;;  %v558_v10 = vpop.f32.mrf.mxu0  ;;  %v2864_v21 = vshrl.u32 %v11224_v5, 16  ;;  %v2868_v62 = vshll.u32 %v11225_v31, 16 }
 0x12d   : > { %v618_v29 = vpop.f32.mrf.mxu2  ;;  %v1954_v5 = vsel %vm658_vm2, %v1944_v17, %v1953_v9 }
 0x12e   : > { %10490 = vmatmul.msk.bf16.gmra.mxu1 %vm425_vm1, %v2863_v43  ;;  %v1072_v63 = vpop.f32.mrf.mxu3  ;;  %v2866_v60 = vor.u32 %v2864_v21, %v2862_v27  ;;  %v1959_v21 = vshll.u32 %v12867_v32, 16 }
 0x12f   : > { %v13419_v15 = vadd.f32 %v1072_v63, %v616_v13  ;;  %v2870_v13 = vrot.slane %v2868_v62, 1 }
 0x131   : > { %16006 = vst [vmem:[#allocation10_spill] sm:$0xff] %v13419_v15 }
 0x132   : > { %10320 = vmatmul.msk.bf16.gmra.mxu2 %vm425_vm1, %v1321_v12  ;;  %v2871_v12 = vsel %vm1261_vm3, %v2866_v60, %v2870_v13 }
 0x133   : > { %v1014_v8 = vpop.f32.mrf.mxu1 }
 0x134   : > { %v13422_v6 = vadd.f32 %v1014_v8, %v558_v10  ;;  %v561_v30 = vpop.f32.mrf.mxu0  ;;  %v1326_v10 = vshll.u32 %v11202_v53, 16  ;;  %v1956_v8 = vshrl.u32 %v12867_v32, 16 }
 0x135   : > { %v621_v0 = vpop.f32.mrf.mxu2 }
 0x136   : > { %v1074_v43 = vpop.f32.mrf.mxu3  ;;  %v1958_v60 = vrot.slane %v1956_v8, 3 }
 0x137   : > { %v13426_v63 = vadd.f32 %v1074_v43, %v618_v29  ;;  %10370 = vmatmul.msk.bf16.gmra.mxu0 %vm425_vm1, %v13188_v16  ;;  %v1328_v29 = vrot.slane %v1326_v10, 1  ;;  %v11203_v10 = vld [vmem:[%s13086_s12 + $0x54] sm:$0xff] }
 0x138   : > { %v1334_v8 = vshll.u32 %v11203_v10, 16 }
 0x139   : > { %16007 = vst [vmem:[#allocation11_spill] sm:$0xff] %v13426_v63  ;;  %v1329_v43 = vsel %vm1261_vm3, %v1324_v33, %v1328_v29  ;;  %v1961_v63 = vrot.slane %v1959_v21, 4  ;;  %v1330_v33 = vshrl.u32 %v11202_v53, 16 }
 0x13b   : > { %v1017_v54 = vpop.f32.mrf.mxu1  ;;  %10345 = vmatmul.msk.bf16.gmra.mxu3 %vm425_vm1, %v1954_v5  ;;  %v1962_v7 = vor.u32 %v1961_v63, %v1958_v60  ;;  %v12869_v63 = vld [vmem:[%s13086_s12 + $0x5c] sm:$0xff]   ;;  %v1332_v60 = vor.u32 %v1330_v33, %v1328_v29 }
 0x13c   : > { %v13434_v46 = vadd.f32 %v1017_v54, %v561_v30  ;;  %v563_v27 = vpop.f32.mrf.mxu0  ;;  %v2872_v30 = vshrl.u32 %v11225_v31, 16  ;;  %v2876_v54 = vshll.u32 %v11226_v44, 16  ;;  %v10680_v31 = vld [vmem:[%s15993_s3 + $0x2] sm:$0x3] }
 0x13d   : > { %v623_v17 = vpop.f32.mrf.mxu2  ;;  %v5602_v21 = vsel %vm5600_vm4, %v10680_v31, 0 }
 0x13e   : > { %10491 = vmatmul.msk.bf16.gmra.mxu1 %vm425_vm1, %v2871_v12  ;;  %v1077_v16 = vpop.f32.mrf.mxu3  ;;  %v2874_v19 = vor.u32 %v2872_v30, %v2870_v13  ;;  %v1965_v30 = vshrl.u32 %v12869_v63, 16 }
 0x13f   : > { %v13438_v62 = vadd.f32 %v1077_v16, %v621_v0  ;;  %v2878_v0 = vrot.slane %v2876_v54, 1  ;;  %5611 = vmatpush.bf16.msra.mxu1 %v5602_v21  ;;  %v1968_v54 = vshll.u32 %v12869_v63, 16  ;;  %v11204_v63 = vld [vmem:[%s13086_s12 + $0x5c] sm:$0xff] }
 0x141   : > { %16008 = vst [vmem:[#allocation12_spill] sm:$0xff] %v13438_v62 }
 0x142   : > { %10321 = vmatmul.msk.bf16.gmra.mxu2 %vm425_vm1, %v1329_v43 }
 0x143   : > { %v1019_v5 = vpop.f32.mrf.mxu1 }
 0x144   : > { %v13441_v15 = vadd.f32 %v1019_v5, %v563_v27  ;;  %v566_v50 = vpop.f32.mrf.mxu0  ;;  %v1963_v27 = vsel %vm658_vm2, %v1953_v9, %v1962_v7  ;;  %v1336_v5 = vrot.slane %v1334_v8, 1 }
 0x145   : > { %v626_v12 = vpop.f32.mrf.mxu2 }
 0x146   : > { %v1079_v32 = vpop.f32.mrf.mxu3  ;;  %v1337_v21 = vsel %vm1261_vm3, %v1332_v60, %v1336_v5  ;;  %v1338_v60 = vshrl.u32 %v11203_v10, 16 }
 0x147   : > { %v13445_v16 = vadd.f32 %v1079_v32, %v623_v17  ;;  %10371 = vmatmul.msk.bf16.gmra.mxu0 %vm425_vm1, %v13206_v36  ;;  %v2879_v17 = vsel %vm1261_vm3, %v2874_v19, %v2878_v0  ;;  %v11227_v32 = vld [vmem:[%s13086_s12 + $0x60] sm:$0xff]  ;;  %v1967_v19 = vrot.slane %v1965_v30, 3  ;;  %v1342_v30 = vshll.u32 %v11204_v63, 16 }
 0x149   : > { %16009 = vst [vmem:[#allocation13_spill] sm:$0xff] %v13445_v16  ;;  %v1970_v16 = vrot.slane %v1968_v54, 4  ;;  %v12871_v54 = vld [vmem:[%s13086_s12 + $0x64] sm:$0xff]  }
 0x14b   : > { %v1022_v13 = vpop.f32.mrf.mxu1  ;;  %10346 = vmatmul.msk.bf16.gmra.mxu3 %vm425_vm1, %v1963_v27  ;;  %v1971_v8 = vor.u32 %v1970_v16, %v1967_v19  ;;  %v1340_v19 = vor.u32 %v1338_v60, %v1336_v5 }
 0x14c   : > { %v13457_v36 = vadd.f32 %v1022_v13, %v566_v50  ;;  %v568_v43 = vpop.f32.mrf.mxu0  ;;  %v2880_v50 = vshrl.u32 %v11226_v44, 16  ;;  %v2884_v13 = vshll.u32 %v11227_v32, 16 }
 0x14d   : > { %v628_v53 = vpop.f32.mrf.mxu2 }
 0x14e   : > { %10492 = vmatmul.msk.bf16.gmra.mxu1 %vm425_vm1, %v2879_v17  ;;  %v1082_v9 = vpop.f32.mrf.mxu3  ;;  %v2882_v49 = vor.u32 %v2880_v50, %v2878_v0  ;;  %v1977_v50 = vshll.u32 %v12871_v54, 16 }
 0x14f   : > { %v13461_v31 = vadd.f32 %v1082_v9, %v626_v12  ;;  %v2886_v12 = vrot.slane %v2884_v13, 1 }
 0x151   : > { %16010 = vst [vmem:[#allocation14_spill] sm:$0xff] %v13461_v31  ;;  %v2887_v16 = vsel %vm1261_vm3, %v2882_v49, %v2886_v12  ;;  %v1979_v49 = vrot.slane %v1977_v50, 4  ;;  %v2888_v31 = vshrl.u32 %v11227_v32, 16 }
 0x152   : > { %10322 = vmatmul.msk.bf16.gmra.mxu2 %vm425_vm1, %v1337_v21 }
 0x153   : > { %v1024_v27 = vpop.f32.mrf.mxu1 }
 0x154   : > { %v13464_v29 = vadd.f32 %v1024_v27, %v568_v43  ;;  %v2470_v33 = vpop.f32.mrf.mxu0  ;;  %v1972_v43 = vsel %vm658_vm2, %v1962_v7, %v1971_v8  ;;  %v1974_v27 = vshrl.u32 %v12871_v54, 16 }
 0x155   : > { %v1542_v62 = vpop.f32.mrf.mxu2 }
 0x156   : > { %v1084_v17 = vpop.f32.mrf.mxu3  ;;  %v1662_v44 = vadd.f32 %v1542_v62, %v13219_v57  ;;  %v11228_v62 = vld [vmem:[%s13086_s12 + $0x68] sm:$0xff] }
 0x157   : > { %v13468_v9 = vadd.f32 %v1084_v17, %v628_v53  ;;  %10372 = vmatmul.msk.bf16.gmra.mxu0 %vm425_vm1, %v13222_v58  ;;  %v1344_v53 = vrot.slane %v1342_v30, 1  ;;  %v1976_v17 = vrot.slane %v1974_v27, 3  ;;  %v2892_v5 = vshll.u32 %v11228_v62, 16 }
 0x159   : > { %16011 = vst [vmem:[#allocation15_spill] sm:$0xff] %v13468_v9  ;;  %v1345_v13 = vsel %vm1261_vm3, %v1340_v19, %v1344_v53  ;;  %v1980_v54 = vor.u32 %v1979_v49, %v1976_v17  ;;  %v1346_v19 = vshrl.u32 %v11204_v63, 16  ;;  %v11229_v63 = vld [vmem:[%s13086_s12 + $0x70] sm:$0xff] }
 0x15b   : > { %v3092_v21 = vpop.f32.mrf.mxu1  ;;  %10347 = vmatmul.msk.bf16.gmra.mxu3 %vm425_vm1, %v1972_v43  ;;  %v1981_v32 = vsel %vm658_vm2, %v1971_v8, %v1980_v54 }
 0x15c   : > { %v2472_v0 = vpop.f32.mrf.mxu0 }
 0x15d   : > { %v1544_v57 = vpop.f32.mrf.mxu2 }
 0x15e   : > { %10493 = vmatmul.msk.bf16.gmra.mxu1 %vm425_vm1, %v2887_v16  ;;  %v2192_v58 = vpop.f32.mrf.mxu3  ;;  %v1663_v10 = vadd.f32 %v1544_v57, %v13230_v11  ;;  %v11205_v16 = vld [vmem:[%s13086_s12 + $0x64] sm:$0xff]  ;;  %v2894_v11 = vrot.slane %v2892_v5, 1 }
 0x15f   : > { %v2312_v7 = vadd.f32 %v2192_v58, %v1662_v44  ;;  %v2890_v58 = vor.u32 %v2888_v31, %v2886_v12  ;;  %v1348_v31 = vor.u32 %v1346_v19, %v1344_v53  ;;  %v2896_v53 = vshrl.u32 %v11228_v62, 16 }
 0x161   : > { %v2590_v9 = vadd.f32 %v2470_v33, %v2312_v7  ;;  %v2895_v7 = vsel %vm1261_vm3, %v2890_v58, %v2894_v11 }
 0x162   : > { %10323 = vmatmul.msk.bf16.gmra.mxu2 %vm425_vm1, %v1345_v13 }
 0x163   : > { %v3094_v43 = vpop.f32.mrf.mxu1  ;;  %v13481_v60 = vadd.f32 %v3092_v21, %v2590_v9  ;;  %v1350_v9 = vshll.u32 %v11205_v16, 16  ;;  %v12873_v21 = vld [vmem:[%s13086_s12 + $0x6c] sm:$0xff]  }
 0x164   : > { %v2475_v30 = vpop.f32.mrf.mxu0 }
 0x165   : > { %v1547_v44 = vpop.f32.mrf.mxu2  ;;  %v1352_v12 = vrot.slane %v1350_v9, 1  ;;  %v11931_v9 = vld [vmem:[%s13086_s12 + $0x68] sm:$0xff]  }
 0x166   : > { %v2194_v18 = vpop.f32.mrf.mxu3  ;;  %v1664_v33 = vadd.f32 %v1547_v44, %v13241_v25 }
 0x167   : > { %v2313_v57 = vadd.f32 %v2194_v18, %v1663_v10  ;;  %10373 = vmatmul.msk.bf16.gmra.mxu0 %vm425_vm1, %v13244_v26  ;;  %v1983_v26 = vshrl.u32 %v12873_v21, 16  ;;  %v1986_v10 = vshll.u32 %v12873_v21, 16  ;;  %v1353_v49 = vsel %vm1261_vm3, %v1348_v31, %v1352_v12 }
 0x169   : > { %v2591_v27 = vadd.f32 %v2472_v0, %v2313_v57  ;;  %v1988_v5 = vrot.slane %v1986_v10, 4  ;;  %v2900_v57 = vshll.u32 %v11229_v63, 16  ;;  %v12875_v10 = vld [vmem:[%s13086_s12 + $0x74] sm:$0xff]  }
 0x16b   : > { %v3097_v50 = vpop.f32.mrf.mxu1  ;;  %v13491_v13 = vadd.f32 %v3094_v43, %v2591_v27  ;;  %10348 = vmatmul.msk.bf16.gmra.mxu3 %vm425_vm1, %v1981_v32  ;;  %v1985_v43 = vrot.slane %v1983_v26, 3  ;;  %v11206_v27 = vld [vmem:[%s13086_s12 + $0x6c] sm:$0xff] }
 0x16c   : > { %v2477_v18 = vpop.f32.mrf.mxu0  ;;  %v1358_v26 = vshll.u32 %v11206_v27, 16 }
 0x16d   : > { %v1549_v8 = vpop.f32.mrf.mxu2  ;;  %v1989_v21 = vor.u32 %v1988_v5, %v1985_v43 }
 0x16e   : > { %10494 = vmatmul.msk.bf16.gmra.mxu1 %vm425_vm1, %v2895_v7  ;;  %v2197_v25 = vpop.f32.mrf.mxu3  ;;  %v1665_v17 = vadd.f32 %v1549_v8, %v13253_v47  ;;  %v2898_v47 = vor.u32 %v2896_v53, %v2894_v11  ;;  %v1360_v5 = vrot.slane %v1358_v26, 1  ;;  %v1995_v53 = vshll.u32 %v12875_v10, 16  ;;  %v11932_v26 = vld [vmem:[%s13086_s12 + $0x70] sm:$0xff]  }
 0x16f   : > { %v2314_v0 = vadd.f32 %v2197_v25, %v1664_v33  ;;  %v2902_v25 = vrot.slane %v2900_v57, 1  ;;  %v1990_v62 = vsel %vm658_vm2, %v1980_v54, %v1989_v21 }
 0x171   : > { %v2592_v44 = vadd.f32 %v2475_v30, %v2314_v0 }
 0x172   : > { %10324 = vmatmul.msk.bf16.gmra.mxu2 %vm425_vm1, %v1353_v49  ;;  %v2903_v49 = vsel %vm1261_vm3, %v2898_v47, %v2902_v25 }
 0x173   : > { %v3099_v58 = vpop.f32.mrf.mxu1  ;;  %v13498_v32 = vadd.f32 %v3097_v50, %v2592_v44  ;;  %v1354_v50 = vshrl.u32 %v11205_v16, 16  ;;  %v1992_v44 = vshrl.u32 %v12875_v10, 16  ;;  %v11230_v16 = vld [vmem:[%s13086_s12 + $0x78] sm:$0xff] }
 0x174   : > { %v2480_v19 = vpop.f32.mrf.mxu0 }
 0x175   : > { %v1552_v7 = vpop.f32.mrf.mxu2 }
 0x176   : > { %v2199_v33 = vpop.f32.mrf.mxu3  ;;  %v1666_v30 = vadd.f32 %v1552_v7, %v13267_v2 }
 0x177   : > { %v2315_v31 = vadd.f32 %v2199_v33, %v1665_v17  ;;  %10374 = vmatmul.msk.bf16.gmra.mxu0 %vm425_vm1, %v11931_v9  ;;  %v1356_v17 = vor.u32 %v1354_v50, %v1352_v12  ;;  %v1994_v9 = vrot.slane %v1992_v44, 3  ;;  %v1997_v33 = vrot.slane %v1995_v53, 4  ;;  %v12877_v53 = vld [vmem:[%s13086_s12 + $0x7c] sm:$0xff]  }
 0x178   : > { %v2904_v12 = vshrl.u32 %v11229_v63, 16 }
 0x179   : > { %v2593_v8 = vadd.f32 %v2477_v18, %v2315_v31  ;;  %v2908_v31 = vshll.u32 %v11230_v16, 16  ;;  %v1998_v10 = vor.u32 %v1997_v33, %v1994_v9 }
 0x17b   : > { %v3102_v0 = vpop.f32.mrf.mxu1  ;;  %v13508_v43 = vadd.f32 %v3099_v58, %v2593_v8  ;;  %10349 = vmatmul.msk.bf16.gmra.mxu3 %vm425_vm1, %v1990_v62  ;;  %v1361_v58 = vsel %vm1261_vm3, %v1356_v17, %v1360_v5  ;;  %v11207_v8 = vld [vmem:[%s13086_s12 + $0x74] sm:$0xff]  ;;  %v1999_v63 = vsel %vm658_vm2, %v1989_v21, %v1998_v10 }
 0x17c   : > { %v2482_v11 = vpop.f32.mrf.mxu0  ;;  %v1366_v44 = vshll.u32 %v11207_v8, 16 }
 0x17d   : > { %v1554_v54 = vpop.f32.mrf.mxu2 }
 0x17e   : > { %10495 = vmatmul.msk.bf16.gmra.mxu1 %vm425_vm1, %v2903_v49  ;;  %v2202_v2 = vpop.f32.mrf.mxu3  ;;  %v1667_v57 = vadd.f32 %v1554_v54, %v13281_v24  ;;  %v2906_v24 = vor.u32 %v2904_v12, %v2902_v25  ;;  %v1368_v33 = vrot.slane %v1366_v44, 1  ;;  %v2004_v12 = vshll.u32 %v12877_v53, 16  ;;  %v11933_v44 = vld [vmem:[%s13086_s12 + $0x78] sm:$0xff]  }
 0x17f   : > { %v2316_v18 = vadd.f32 %v2202_v2, %v1666_v30  ;;  %v2910_v2 = vrot.slane %v2908_v31, 1 }
 0x181   : > { %v2594_v7 = vadd.f32 %v2480_v19, %v2316_v18 }
 0x182   : > { %10325 = vmatmul.msk.bf16.gmra.mxu2 %vm425_vm1, %v1361_v58  ;;  %v2911_v58 = vsel %vm1261_vm3, %v2906_v24, %v2910_v2 }
 0x183   : > { %v3104_v47 = vpop.f32.mrf.mxu1  ;;  %v13515_v62 = vadd.f32 %v3102_v0, %v2594_v7  ;;  %v1362_v0 = vshrl.u32 %v11206_v27, 16  ;;  %v2001_v7 = vshrl.u32 %v12877_v53, 16  ;;  %v11231_v27 = vld [vmem:[%s13086_s12 + $0x80] sm:$0xff] }
 0x184   : > { %v2485_v50 = vpop.f32.mrf.mxu0 }
 0x185   : > { %v1557_v49 = vpop.f32.mrf.mxu2 }
 0x186   : > { %v2204_v30 = vpop.f32.mrf.mxu3  ;;  %v1668_v19 = vadd.f32 %v1557_v49, %v13300_v56 }
 0x187   : > { %v2317_v17 = vadd.f32 %v2204_v30, %v1667_v57  ;;  %10375 = vmatmul.msk.bf16.gmra.mxu0 %vm425_vm1, %v11932_v26  ;;  %v1364_v57 = vor.u32 %v1362_v0, %v1360_v5  ;;  %v2003_v26 = vrot.slane %v2001_v7, 3  ;;  %v2006_v30 = vrot.slane %v2004_v12, 4  ;;  %v12879_v12 = vld [vmem:[%s13086_s12 + $0x84] sm:$0xff]  }
 0x188   : > { %v2912_v5 = vshrl.u32 %v11230_v16, 16 }
 0x189   : > { %v2595_v54 = vadd.f32 %v2482_v11, %v2317_v17  ;;  %v2916_v17 = vshll.u32 %v11231_v27, 16  ;;  %v2007_v53 = vor.u32 %v2006_v30, %v2003_v26 }
 0x18b   : > { %v3107_v18 = vpop.f32.mrf.mxu1  ;;  %v13525_v9 = vadd.f32 %v3104_v47, %v2595_v54  ;;  %10350 = vmatmul.msk.bf16.gmra.mxu3 %vm425_vm1, %v1999_v63  ;;  %v1369_v47 = vsel %vm1261_vm3, %v1364_v57, %v1368_v33  ;;  %v11208_v54 = vld [vmem:[%s13086_s12 + $0x7c] sm:$0xff]  ;;  %v2008_v16 = vsel %vm658_vm2, %v1998_v10, %v2007_v53 }
 0x18c   : > { %v2487_v25 = vpop.f32.mrf.mxu0  ;;  %v1374_v7 = vshll.u32 %v11208_v54, 16 }
 0x18d   : > { %v1559_v21 = vpop.f32.mrf.mxu2 }
 0x18e   : > { %10496 = vmatmul.msk.bf16.gmra.mxu1 %vm425_vm1, %v2911_v58  ;;  %v2207_v56 = vpop.f32.mrf.mxu3  ;;  %v1669_v31 = vadd.f32 %v1559_v21, %v13307_v22  ;;  %v2914_v22 = vor.u32 %v2912_v5, %v2910_v2  ;;  %v1376_v30 = vrot.slane %v1374_v7, 1  ;;  %v2013_v5 = vshll.u32 %v12879_v12, 16  ;;  %v11934_v7 = vld [vmem:[%s13086_s12 + $0x80] sm:$0xff]  }
 0x18f   : > { %v2318_v11 = vadd.f32 %v2207_v56, %v1668_v19  ;;  %v2918_v56 = vrot.slane %v2916_v17, 1 }
 0x191   : > { %v2596_v49 = vadd.f32 %v2485_v50, %v2318_v11 }
 0x192   : > { %10326 = vmatmul.msk.bf16.gmra.mxu2 %vm425_vm1, %v1369_v47  ;;  %v2919_v47 = vsel %vm1261_vm3, %v2914_v22, %v2918_v56 }
 0x193   : > { %v3109_v24 = vpop.f32.mrf.mxu1  ;;  %v13532_v63 = vadd.f32 %v3107_v18, %v2596_v49  ;;  %v1370_v18 = vshrl.u32 %v11207_v8, 16  ;;  %v2010_v49 = vshrl.u32 %v12879_v12, 16  ;;  %v11232_v8 = vld [vmem:[%s13086_s12 + $0x88] sm:$0xff] }
 0x194   : > { %v2490_v0 = vpop.f32.mrf.mxu0 }
 0x195   : > { %v1562_v58 = vpop.f32.mrf.mxu2 }
 0x196   : > { %v2209_v19 = vpop.f32.mrf.mxu3  ;;  %v1670_v50 = vadd.f32 %v1562_v58, %v13320_v51 }
 0x197   : > { %v2319_v57 = vadd.f32 %v2209_v19, %v1669_v31  ;;  %10376 = vmatmul.msk.bf16.gmra.mxu0 %vm425_vm1, %v11933_v44  ;;  %v1372_v31 = vor.u32 %v1370_v18, %v1368_v33  ;;  %v2012_v44 = vrot.slane %v2010_v49, 3  ;;  %v2015_v19 = vrot.slane %v2013_v5, 4  ;;  %v12881_v5 = vld [vmem:[%s13086_s12 + $0x8c] sm:$0xff]  }
 0x198   : > { %v2920_v33 = vshrl.u32 %v11231_v27, 16 }
 0x199   : > { %v2597_v21 = vadd.f32 %v2487_v25, %v2319_v57  ;;  %v2924_v57 = vshll.u32 %v11232_v8, 16  ;;  %v2016_v12 = vor.u32 %v2015_v19, %v2012_v44 }
 0x19b   : > { %v3112_v11 = vpop.f32.mrf.mxu1  ;;  %v13542_v26 = vadd.f32 %v3109_v24, %v2597_v21  ;;  %10351 = vmatmul.msk.bf16.gmra.mxu3 %vm425_vm1, %v2008_v16  ;;  %v1377_v24 = vsel %vm1261_vm3, %v1372_v31, %v1376_v30  ;;  %v11209_v21 = vld [vmem:[%s13086_s12 + $0x84] sm:$0xff]  ;;  %v2017_v27 = vsel %vm658_vm2, %v2007_v53, %v2016_v12 }
 0x19c   : > { %v2492_v2 = vpop.f32.mrf.mxu0  ;;  %v1382_v49 = vshll.u32 %v11209_v21, 16 }
 0x19d   : > { %v1564_v10 = vpop.f32.mrf.mxu2 }
 0x19e   : > { %10497 = vmatmul.msk.bf16.gmra.mxu1 %vm425_vm1, %v2919_v47  ;;  %v2212_v51 = vpop.f32.mrf.mxu3  ;;  %v1671_v17 = vadd.f32 %v1564_v10, %v13327_v61  ;;  %v2922_v61 = vor.u32 %v2920_v33, %v2918_v56  ;;  %v1384_v19 = vrot.slane %v1382_v49, 1  ;;  %v2022_v33 = vshll.u32 %v12881_v5, 16  ;;  %v11935_v49 = vld [vmem:[%s13086_s12 + $0x88] sm:$0xff]  }
 0x19f   : > { %v2320_v25 = vadd.f32 %v2212_v51, %v1670_v50  ;;  %v2926_v51 = vrot.slane %v2924_v57, 1 }
 0x1a1   : > { %v2598_v58 = vadd.f32 %v2490_v0, %v2320_v25 }
 0x1a2   : > { %10327 = vmatmul.msk.bf16.gmra.mxu2 %vm425_vm1, %v1377_v24  ;;  %v2927_v24 = vsel %vm1261_vm3, %v2922_v61, %v2926_v51 }
 0x1a3   : > { %v3114_v22 = vpop.f32.mrf.mxu1  ;;  %v13549_v16 = vadd.f32 %v3112_v11, %v2598_v58  ;;  %v1378_v11 = vshrl.u32 %v11208_v54, 16  ;;  %v2019_v58 = vshrl.u32 %v12881_v5, 16  ;;  %v11233_v54 = vld [vmem:[%s13086_s12 + $0x90] sm:$0xff] }
 0x1a4   : > { %v2495_v18 = vpop.f32.mrf.mxu0 }
 0x1a5   : > { %v1567_v47 = vpop.f32.mrf.mxu2 }
 0x1a6   : > { %v2214_v50 = vpop.f32.mrf.mxu3  ;;  %v1672_v0 = vadd.f32 %v1567_v47, %v13339_v42 }
 0x1a7   : > { %v2321_v31 = vadd.f32 %v2214_v50, %v1671_v17  ;;  %10377 = vmatmul.msk.bf16.gmra.mxu0 %vm425_vm1, %v11934_v7  ;;  %v1380_v17 = vor.u32 %v1378_v11, %v1376_v30  ;;  %v2021_v7 = vrot.slane %v2019_v58, 3  ;;  %v2024_v50 = vrot.slane %v2022_v33, 4  ;;  %v12883_v33 = vld [vmem:[%s13086_s12 + $0x94] sm:$0xff]  }
 0x1a8   : > { %v2928_v30 = vshrl.u32 %v11232_v8, 16 }
 0x1a9   : > { %v2599_v10 = vadd.f32 %v2492_v2, %v2321_v31  ;;  %v2932_v31 = vshll.u32 %v11233_v54, 16  ;;  %v2025_v5 = vor.u32 %v2024_v50, %v2021_v7 }
 0x1ab   : > { %v3117_v25 = vpop.f32.mrf.mxu1  ;;  %v13559_v44 = vadd.f32 %v3114_v22, %v2599_v10  ;;  %10352 = vmatmul.msk.bf16.gmra.mxu3 %vm425_vm1, %v2017_v27  ;;  %v1385_v22 = vsel %vm1261_vm3, %v1380_v17, %v1384_v19  ;;  %v11210_v10 = vld [vmem:[%s13086_s12 + $0x8c] sm:$0xff]  ;;  %v2026_v8 = vsel %vm658_vm2, %v2016_v12, %v2025_v5 }
 0x1ac   : > { %v2497_v56 = vpop.f32.mrf.mxu0  ;;  %v1390_v58 = vshll.u32 %v11210_v10, 16 }
 0x1ad   : > { %v1569_v53 = vpop.f32.mrf.mxu2 }
 0x1ae   : > { %10498 = vmatmul.msk.bf16.gmra.mxu1 %vm425_vm1, %v2927_v24  ;;  %v2217_v42 = vpop.f32.mrf.mxu3  ;;  %v1673_v57 = vadd.f32 %v1569_v53, %v13346_v59  ;;  %v2930_v59 = vor.u32 %v2928_v30, %v2926_v51  ;;  %v1392_v50 = vrot.slane %v1390_v58, 1  ;;  %v2031_v30 = vshll.u32 %v12883_v33, 16  ;;  %v11936_v58 = vld [vmem:[%s13086_s12 + $0x90] sm:$0xff]  }
 0x1af   : > { %v2322_v2 = vadd.f32 %v2217_v42, %v1672_v0  ;;  %v2934_v42 = vrot.slane %v2932_v31, 1 }
 0x1b1   : > { %v2600_v47 = vadd.f32 %v2495_v18, %v2322_v2 }
 0x1b2   : > { %10328 = vmatmul.msk.bf16.gmra.mxu2 %vm425_vm1, %v1385_v22  ;;  %v2935_v22 = vsel %vm1261_vm3, %v2930_v59, %v2934_v42 }
 0x1b3   : > { %v3119_v61 = vpop.f32.mrf.mxu1  ;;  %v13566_v27 = vadd.f32 %v3117_v25, %v2600_v47  ;;  %v1386_v25 = vshrl.u32 %v11209_v21, 16  ;;  %v2028_v47 = vshrl.u32 %v12883_v33, 16  ;;  %v11234_v21 = vld [vmem:[%s13086_s12 + $0x98] sm:$0xff] }
 0x1b4   : > { %v2500_v11 = vpop.f32.mrf.mxu0 }
 0x1b5   : > { %v1572_v24 = vpop.f32.mrf.mxu2 }
 0x1b6   : > { %v2219_v0 = vpop.f32.mrf.mxu3  ;;  %v1674_v18 = vadd.f32 %v1572_v24, %v13358_v35 }
 0x1b7   : > { %v2323_v17 = vadd.f32 %v2219_v0, %v1673_v57  ;;  %10378 = vmatmul.msk.bf16.gmra.mxu0 %vm425_vm1, %v11935_v49  ;;  %v1388_v57 = vor.u32 %v1386_v25, %v1384_v19  ;;  %v2030_v49 = vrot.slane %v2028_v47, 3  ;;  %v2033_v0 = vrot.slane %v2031_v30, 4  ;;  %v12885_v30 = vld [vmem:[%s13086_s12 + $0x9c] sm:$0xff]  }
 0x1b8   : > { %v2936_v19 = vshrl.u32 %v11233_v54, 16 }
 0x1b9   : > { %v2601_v53 = vadd.f32 %v2497_v56, %v2323_v17  ;;  %v2940_v17 = vshll.u32 %v11234_v21, 16  ;;  %v2034_v33 = vor.u32 %v2033_v0, %v2030_v49 }
 0x1bb   : > { %v3122_v2 = vpop.f32.mrf.mxu1  ;;  %v13576_v7 = vadd.f32 %v3119_v61, %v2601_v53  ;;  %10353 = vmatmul.msk.bf16.gmra.mxu3 %vm425_vm1, %v2026_v8  ;;  %v1393_v61 = vsel %vm1261_vm3, %v1388_v57, %v1392_v50  ;;  %v11211_v53 = vld [vmem:[%s13086_s12 + $0x94] sm:$0xff]  ;;  %v2035_v54 = vsel %vm658_vm2, %v2025_v5, %v2034_v33 }
 0x1bc   : > { %v2502_v51 = vpop.f32.mrf.mxu0  ;;  %v1398_v47 = vshll.u32 %v11211_v53, 16 }
 0x1bd   : > { %v1574_v12 = vpop.f32.mrf.mxu2 }
 0x1be   : > { %10499 = vmatmul.msk.bf16.gmra.mxu1 %vm425_vm1, %v2935_v22  ;;  %v2222_v35 = vpop.f32.mrf.mxu3  ;;  %v1675_v31 = vadd.f32 %v1574_v12, %v13365_v45  ;;  %v2938_v45 = vor.u32 %v2936_v19, %v2934_v42  ;;  %v1400_v0 = vrot.slane %v1398_v47, 1  ;;  %v2040_v19 = vshll.u32 %v12885_v30, 16  ;;  %v11937_v47 = vld [vmem:[%s13086_s12 + $0x98] sm:$0xff]  }
 0x1bf   : > { %v2324_v56 = vadd.f32 %v2222_v35, %v1674_v18  ;;  %v2942_v35 = vrot.slane %v2940_v17, 1 }
 0x1c1   : > { %v2602_v24 = vadd.f32 %v2500_v11, %v2324_v56 }
 0x1c2   : > { %10329 = vmatmul.msk.bf16.gmra.mxu2 %vm425_vm1, %v1393_v61  ;;  %v2943_v61 = vsel %vm1261_vm3, %v2938_v45, %v2942_v35  ;;  %v2944_v45 = vshrl.u32 %v11234_v21, 16 }
 0x1c3   : > { %v3124_v59 = vpop.f32.mrf.mxu1  ;;  %v13583_v8 = vadd.f32 %v3122_v2, %v2602_v24  ;;  %v1394_v2 = vshrl.u32 %v11210_v10, 16  ;;  %v2037_v24 = vshrl.u32 %v12885_v30, 16  ;;  %v13598_v10 = vld [vmem:[%s13086_s12 + $0xa0] sm:$0xff] }
 0x1c4   : > { %v2505_v25 = vpop.f32.mrf.mxu0 }
 0x1c5   : > { %v1577_v22 = vpop.f32.mrf.mxu2 }
 0x1c6   : > { %v2224_v18 = vpop.f32.mrf.mxu3  ;;  %v1676_v11 = vadd.f32 %v1577_v22, %v13377_v41 }
 0x1c7   : > { %v2325_v57 = vadd.f32 %v2224_v18, %v1675_v31  ;;  %10379 = vmatmul.msk.bf16.gmra.mxu0 %vm425_vm1, %v11936_v58  ;;  %v1396_v31 = vor.u32 %v1394_v2, %v1392_v50  ;;  %v2039_v58 = vrot.slane %v2037_v24, 3  ;;  %v2042_v18 = vrot.slane %v2040_v19, 4 }
 0x1c8   : > { %v1402_v24 = vshrl.u32 %v11211_v53, 16  ;;  %v4910_v53 = vld [vmem:[%s15995_s5] sm:$0xff] }
 0x1c9   : > { %v2603_v12 = vadd.f32 %v2502_v51, %v2325_v57  ;;  %v2948_v57 = vshll.u32 %v13598_v10, 16  ;;  %v13607_v30 = vor.u32 %v2042_v18, %v2039_v58 }
 0x1cb   : > { %v3127_v56 = vpop.f32.mrf.mxu1  ;;  %v13593_v49 = vadd.f32 %v3124_v59, %v2603_v12  ;;  %10354 = vmatmul.msk.bf16.gmra.mxu3 %vm425_vm1, %v2035_v54  ;;  %v1401_v59 = vsel %vm1261_vm3, %v1396_v31, %v1400_v0  ;;  %v2950_v31 = vrot.slane %v2948_v57, 1 }
 0x1cc   : > { %v2507_v42 = vpop.f32.mrf.mxu0 }
 0x1cd   : > { %v1579_v5 = vpop.f32.mrf.mxu2 }
 0x1ce   : > { %10500 = vmatmul.msk.bf16.gmra.mxu1 %vm425_vm1, %v2943_v61  ;;  %v2227_v41 = vpop.f32.mrf.mxu3  ;;  %v1677_v17 = vadd.f32 %v1579_v5, %v13384_v38  ;;  %v2946_v61 = vor.u32 %v2944_v45, %v2942_v35  ;;  %v13627_v45 = vld [vmem:[%s13086_s12 + $0xa8] sm:$0xff] }
 0x1cf   : > { %v2326_v51 = vadd.f32 %v2227_v41, %v1676_v11  ;;  %v13610_v11 = vld [vmem:[%s13086_s12 + $0x9c] sm:$0xff]  ;;  %v12887_v41 = vld [vmem:[%s13086_s12 + $0xa4] sm:$0xff]  }
 0x1d0   : > { %v1406_v19 = vshll.u32 %v13610_v11, 16  ;;  %v2046_v18 = vshrl.u32 %v12887_v41, 16 }
 0x1d1   : > { %v2604_v22 = vadd.f32 %v2505_v25, %v2326_v51 }
 0x1d2   : > { %10330 = vmatmul.msk.bf16.gmra.mxu2 %vm425_vm1, %v1401_v59  ;;  %v2951_v59 = vsel %vm1261_vm3, %v2946_v61, %v2950_v31 }
 0x1d3   : > { %v3129_v50 = vpop.f32.mrf.mxu1  ;;  %v13603_v54 = vadd.f32 %v3127_v56, %v2604_v22  ;;  %v2044_v56 = vsel %vm658_vm2, %v2034_v33, %v13607_v30  ;;  %v2049_v22 = vshll.u32 %v12887_v41, 16  ;;  %v13016_v33 = vmov 0  }
 0x1d4   : > { %v2510_v2 = vpop.f32.mrf.mxu0  ;;  %12999 = vset.pattern.permute.xlu0 %v13016_v33  ;;  %13000 = vset.pattern.permute.xlu1 %v13016_v33  ;;  %5249 = vst.msk [vmem:[#allocation2 + $0x8] sm:$0xf] %vm5246_vm5, %v13016_v33 }
 0x1d5   : > { %v1582_v12 = vpop.f32.mrf.mxu2  ;;  %4960 = vperm.xlu0 %12999, %v4910_v53   ;;  %13001 = vset.pattern.permute.xlu2 %v13016_v33  ;;  %5250 = vst.msk [vmem:[#allocation2 + $0xc] sm:$0xf] %vm5246_vm5, %v13016_v33 }
 0x1d6   : > { %v2229_v38 = vpop.f32.mrf.mxu3  ;;  %v1678_v21 = vadd.f32 %v1582_v12, %v13396_v28  ;;  %v1408_v28 = vrot.slane %v1406_v19, 1  ;;  %v2051_v12 = vrot.slane %v2049_v22, 4  ;;  %5251 = vst.msk [vmem:[#allocation2 + $0x10] sm:$0xf] %vm5246_vm5, %v13016_v33  ;;  %v11938_v19 = vld [vmem:[%s13086_s12 + $0xa0] sm:$0xff]  }
 0x1d7   : > { %v2327_v25 = vadd.f32 %v2229_v38, %v1677_v17  ;;  %10380 = vmatmul.msk.bf16.gmra.mxu0 %vm425_vm1, %v11937_v47  ;;  %v1404_v17 = vor.u32 %v1402_v24, %v1400_v0  ;;  %v2048_v38 = vrot.slane %v2046_v18, 3  ;;  %v2956_v24 = vshll.u32 %v13627_v45, 16  ;;  %5252 = vst.msk [vmem:[#allocation2 + $0x14] sm:$0xf] %vm5246_vm5, %v13016_v33 }
 0x1d8   : > { %5253 = vst.msk [vmem:[#allocation2 + $0xd8] sm:$0xf] %vm5246_vm5, %v13016_v33 }
 0x1d9   : > { %v2605_v5 = vadd.f32 %v2507_v42, %v2327_v25  ;;  %v1409_v47 = vsel %vm1261_vm3, %v1404_v17, %v1408_v28  ;;  %v13641_v41 = vor.u32 %v2051_v12, %v2048_v38  ;;  %5254 = vst.msk [vmem:[#allocation2 + $0xdc] sm:$0xf] %vm5246_vm5, %v13016_v33  ;;  %v2958_v17 = vrot.slane %v2956_v24, 1  ;;  %v13673_v24 = vld [vmem:[%s13086_s12 + $0xb0] sm:$0xff] }
 0x1da   : > { %5255 = vst.msk [vmem:[#allocation2 + $0xe0] sm:$0xf] %vm5246_vm5, %v13016_v33 }
 0x1db   : > { %v3132_v51 = vpop.f32.mrf.mxu1  ;;  %v13619_v58 = vadd.f32 %v3129_v50, %v2605_v5  ;;  %10355 = vmatmul.msk.bf16.gmra.mxu3 %vm425_vm1, %v2044_v56  ;;  %v2952_v56 = vshrl.u32 %v13598_v10, 16  ;;  %v4911_v10 = vld [vmem:[%s15995_s5 + $0x8] sm:$0xff]  ;;  %5256 = vst.msk [vmem:[#allocation2 + $0xe4] sm:$0xf] %vm5246_vm5, %v13016_v33  ;;  %v2053_v53 = vsel %vm658_vm2, %v13607_v30, %v13641_v41  ;;  %v4912_v30 = vld [vmem:[%s15995_s5 + $0x10] sm:$0xff] }
 0x1dc   : > { %v2512_v35 = vpop.f32.mrf.mxu0  ;;  %4970 = vperm.xlu1 %13000, %v4912_v30  }
 0x1dd   : > { %v1584_v50 = vpop.f32.mrf.mxu2  ;;  %4965 = vperm.xlu0 %12999, %v4911_v10  }
 0x1de   : > { %10501 = vmatmul.msk.bf16.gmra.mxu1 %vm425_vm1, %v2951_v59  ;;  %v2232_v42 = vpop.f32.mrf.mxu3  ;;  %v1679_v0 = vadd.f32 %v1584_v50, %v13403_v48  ;;  %v2954_v59 = vor.u32 %v2952_v56, %v2950_v31 }
 0x1df   : > { %v2328_v57 = vadd.f32 %v2232_v42, %v1678_v21  ;;  %v1410_v42 = vshrl.u32 %v13610_v11, 16  ;;  %v4916_v11 = vld [vmem:[%s15995_s5 + $0x30] sm:$0xff] }
 0x1e1   : > { %v2606_v61 = vadd.f32 %v2510_v2, %v2328_v57  ;;  %v13644_v2 = vld [vmem:[%s13086_s12 + $0xa4] sm:$0xff]  ;;  %v12889_v57 = vld [vmem:[%s13086_s12 + $0xac] sm:$0xff]   ;;  %v1412_v33 = vor.u32 %v1410_v42, %v1408_v28  ;;  %v2964_v42 = vshll.u32 %v13673_v24, 16 }
 0x1e2   : > { %10331 = vmatmul.msk.bf16.gmra.mxu2 %vm425_vm1, %v1409_v47  ;;  %v1414_v50 = vshll.u32 %v13644_v2, 16  ;;  %v2058_v56 = vshll.u32 %v12889_v57, 16 }
 0x1e3   : > { %v3134_v25 = vpop.f32.mrf.mxu1  ;;  %v13636_v21 = vadd.f32 %v3132_v51, %v2606_v61  ;;  %v2055_v61 = vshrl.u32 %v12889_v57, 16  ;;  %v11939_v57 = vld [vmem:[%s13086_s12 + $0xa8] sm:$0xff]  }
 0x1e4   : > { %v2515_v48 = vpop.f32.mrf.mxu0  ;;  %v1416_v12 = vrot.slane %v1414_v50, 1 }
 0x1e5   : > { %v1587_v51 = vpop.f32.mrf.mxu2  ;;  %4990 = vperm.xlu0 %12999, %v4916_v11  }
 0x1e6   : > { %v2234_v5 = vpop.f32.mrf.mxu3  ;;  %v1680_v22 = vadd.f32 %v1587_v51, %v13415_v1  ;;  %v1417_v10 = vsel %vm1261_vm3, %v1412_v33, %v1416_v12  ;;  %v2060_v51 = vrot.slane %v2058_v56, 4 }
 0x1e7   : > { %v2329_v18 = vadd.f32 %v2234_v5, %v1679_v0  ;;  %10381 = vmatmul.msk.bf16.gmra.mxu0 %vm425_vm1, %v11938_v19  ;;  %v2959_v0 = vsel %vm1261_vm3, %v2954_v59, %v2958_v17  ;;  %v2057_v5 = vrot.slane %v2055_v61, 3  ;;  %v2966_v61 = vrot.slane %v2964_v42, 1 }
 0x1e9   : > { %v2607_v31 = vadd.f32 %v2512_v35, %v2329_v18 }
 0x1eb   : > { %v3137_v47 = vpop.f32.mrf.mxu1  ;;  %v13662_v38 = vadd.f32 %v3134_v25, %v2607_v31  ;;  %10356 = vmatmul.msk.bf16.gmra.mxu3 %vm425_vm1, %v2053_v53  ;;  %v2960_v53 = vshrl.u32 %v13627_v45, 16  ;;  %v4919_v45 = vld [vmem:[%s15995_s5 + $0x48] sm:$0xff] }
 0x1ec   : > { %v2517_v1 = vpop.f32.mrf.mxu0 }
 0x1ed   : > { %v1589_v25 = vpop.f32.mrf.mxu2  ;;  %v2962_v33 = vor.u32 %v2960_v53, %v2958_v17  ;;  %5005 = vperm.xlu0 %12999, %v4919_v45  }
 0x1ee   : > { %10502 = vmatmul.msk.bf16.gmra.mxu1 %vm425_vm1, %v2959_v0  ;;  %v2237_v35 = vpop.f32.mrf.mxu3  ;;  %v1681_v19 = vadd.f32 %v1589_v25, %v13422_v6  ;;  %v2061_v0 = vor.u32 %v2060_v51, %v2057_v5  ;;  %v4913_v6 = vld [vmem:[%s15995_s5 + $0x18] sm:$0xff] }
 0x1ef   : > { %v2330_v28 = vadd.f32 %v2237_v35, %v1680_v22  ;;  %v13684_v22 = vld [vmem:[%s13086_s12 + $0xac] sm:$0xff]  ;;  %4975 = vperm.xlu1 %13000, %v4913_v6   ;;  %v1418_v35 = vshrl.u32 %v13644_v2, 16  ;;  %v2967_v17 = vsel %vm1261_vm3, %v2962_v33, %v2966_v61  ;;  %v4922_v2 = vld [vmem:[%s15995_s5 + $0x60] sm:$0xff] }
 0x1f0   : > { %v2062_v11 = vsel %vm658_vm2, %v13641_v41, %v2061_v0  ;;  %v1422_v25 = vshll.u32 %v13684_v22, 16  ;;  %v4917_v41 = vld [vmem:[%s15995_s5 + $0x38] sm:$0xff] }
 0x1f1   : > { %v2608_v59 = vadd.f32 %v2515_v48, %v2330_v28  ;;  %v12891_v28 = vld [vmem:[%s13086_s12 + $0xb4] sm:$0xff]  }
 0x1f2   : > { %10332 = vmatmul.msk.bf16.gmra.mxu2 %vm425_vm1, %v1417_v10  ;;  %v2064_v53 = vshrl.u32 %v12891_v28, 16  ;;  %v2067_v42 = vshll.u32 %v12891_v28, 16  ;;  %v11940_v28 = vld [vmem:[%s13086_s12 + $0xb0] sm:$0xff]  }
 0x1f3   : > { %v3139_v18 = vpop.f32.mrf.mxu1  ;;  %v13679_v50 = vadd.f32 %v3137_v47, %v2608_v59  ;;  %v1420_v59 = vor.u32 %v1418_v35, %v1416_v12 }
 0x1f4   : > { %v2520_v31 = vpop.f32.mrf.mxu0 }
 0x1f5   : > { %v1592_v47 = vpop.f32.mrf.mxu2  ;;  %5020 = vperm.xlu0 %12999, %v4922_v2  }
 0x1f6   : > { %v2239_v48 = vpop.f32.mrf.mxu3  ;;  %v1682_v30 = vadd.f32 %v1592_v47, %v13434_v46  ;;  %v1424_v46 = vrot.slane %v1422_v25, 1  ;;  %v2069_v47 = vrot.slane %v2067_v42, 4 }
 0x1f7   : > { %v2331_v56 = vadd.f32 %v2239_v48, %v1681_v19  ;;  %10382 = vmatmul.msk.bf16.gmra.mxu0 %vm425_vm1, %v11939_v57  ;;  %4995 = vperm.xlu1 %13000, %v4917_v41   ;;  %v13711_v57 = vld [vmem:[%s13086_s12 + $0xb8] sm:$0xff]  ;;  %v2066_v48 = vrot.slane %v2064_v53, 3 }
 0x1f8   : > { %v1425_v45 = vsel %vm1261_vm3, %v1420_v59, %v1424_v46  ;;  %v2972_v35 = vshll.u32 %v13711_v57, 16 }
 0x1f9   : > { %v2609_v10 = vadd.f32 %v2517_v1, %v2331_v56 }
 0x1fa   : > { %v2974_v53 = vrot.slane %v2972_v35, 1 }
 0x1fb   : > { %v3142_v5 = vpop.f32.mrf.mxu1  ;;  %v13700_v51 = vadd.f32 %v3139_v18, %v2609_v10  ;;  %10357 = vmatmul.msk.bf16.gmra.mxu3 %vm425_vm1, %v2062_v11  ;;  %v2968_v11 = vshrl.u32 %v13673_v24, 16  ;;  %v4925_v24 = vld [vmem:[%s15995_s5 + $0x78] sm:$0xff] }
 0x1fc   : > { %v2522_v19 = vpop.f32.mrf.mxu0 }
 0x1fd   : > { %v1594_v18 = vpop.f32.mrf.mxu2  ;;  %v2970_v59 = vor.u32 %v2968_v11, %v2966_v61  ;;  %5035 = vperm.xlu0 %12999, %v4925_v24  }
 0x1fe   : > { %10503 = vmatmul.msk.bf16.gmra.mxu1 %vm425_vm1, %v2967_v17  ;;  %v2242_v1 = vpop.f32.mrf.mxu3  ;;  %v1683_v6 = vadd.f32 %v1594_v18, %v13441_v15  ;;  %v13721_v17 = vor.u32 %v2069_v47, %v2066_v48  ;;  %v13724_v15 = vld [vmem:[%s13086_s12 + $0xb4] sm:$0xff] }
 0x1ff   : > { %v2332_v12 = vadd.f32 %v2242_v1, %v1682_v30  ;;  %v1426_v1 = vshrl.u32 %v13684_v22, 16  ;;  %v1430_v18 = vshll.u32 %v13724_v15, 16  ;;  %v2975_v61 = vsel %vm1261_vm3, %v2970_v59, %v2974_v53  ;;  %v4928_v22 = vld [vmem:[%s15995_s5 + $0x90] sm:$0xff] }
 0x200   : > { %v2071_v2 = vsel %vm658_vm2, %v2061_v0, %v13721_v17  ;;  %v4923_v0 = vld [vmem:[%s15995_s5 + $0x68] sm:$0xff] }
 0x201   : > { %v2610_v33 = vadd.f32 %v2520_v31, %v2332_v12  ;;  %v4920_v31 = vld [vmem:[%s15995_s5 + $0x50] sm:$0xff]  ;;  %v12893_v12 = vld [vmem:[%s13086_s12 + $0xbc] sm:$0xff]  }
 0x202   : > { %10333 = vmatmul.msk.bf16.gmra.mxu2 %vm425_vm1, %v1425_v45  ;;  %5010 = vperm.xlu1 %13000, %v4920_v31   ;;  %v2073_v11 = vshrl.u32 %v12893_v12, 16  ;;  %v2076_v35 = vshll.u32 %v12893_v12, 16  ;;  %v11941_v12 = vld [vmem:[%s13086_s12 + $0xb8] sm:$0xff]  }
 0x203   : > { %v3144_v56 = vpop.f32.mrf.mxu1  ;;  %v13717_v25 = vadd.f32 %v3142_v5, %v2610_v33  ;;  %v1428_v33 = vor.u32 %v1426_v1, %v1424_v46 }
 0x204   : > { %v2525_v10 = vpop.f32.mrf.mxu0 }
 0x205   : > { %v1597_v5 = vpop.f32.mrf.mxu2  ;;  %5050 = vperm.xlu0 %12999, %v4928_v22  }
 0x206   : > { %v2244_v30 = vpop.f32.mrf.mxu3  ;;  %v1684_v41 = vadd.f32 %v1597_v5, %v13457_v36  ;;  %v1432_v36 = vrot.slane %v1430_v18, 1  ;;  %v2078_v5 = vrot.slane %v2076_v35, 4 }
 0x207   : > { %v2333_v42 = vadd.f32 %v2244_v30, %v1683_v6  ;;  %10383 = vmatmul.msk.bf16.gmra.mxu0 %vm425_vm1, %v11940_v28  ;;  %v13751_v28 = vld [vmem:[%s13086_s12 + $0xc0] sm:$0xff]  ;;  %v2075_v30 = vrot.slane %v2073_v11, 3 }
 0x208   : > { %v1433_v24 = vsel %vm1261_vm3, %v1428_v33, %v1432_v36  ;;  %v2980_v1 = vshll.u32 %v13751_v28, 16 }
 0x209   : > { %v2611_v45 = vadd.f32 %v2522_v19, %v2333_v42 }
 0x20a   : > { %5025 = vperm.xlu1 %13000, %v4923_v0   ;;  %v2982_v35 = vrot.slane %v2980_v1, 1 }
 0x20b   : > { %v3147_v48 = vpop.f32.mrf.mxu1  ;;  %v13740_v47 = vadd.f32 %v3144_v56, %v2611_v45  ;;  %10358 = vmatmul.msk.bf16.gmra.mxu3 %vm425_vm1, %v2071_v2  ;;  %v2976_v2 = vshrl.u32 %v13711_v57, 16  ;;  %v13762_v45 = vld [vmem:[%s13086_s12 + $0xbc] sm:$0xff] }
 0x20c   : > { %v2527_v6 = vpop.f32.mrf.mxu0  ;;  %v4926_v57 = vld [vmem:[%s15995_s5 + $0x80] sm:$0xff] }
 0x20d   : > { %v1599_v56 = vpop.f32.mrf.mxu2  ;;  %v2978_v11 = vor.u32 %v2976_v2, %v2974_v53 }
 0x20e   : > { %10504 = vmatmul.msk.bf16.gmra.mxu1 %vm425_vm1, %v2975_v61  ;;  %v2247_v19 = vpop.f32.mrf.mxu3  ;;  %v1685_v31 = vadd.f32 %v1599_v56, %v13464_v29  ;;  %v13764_v61 = vor.u32 %v2078_v5, %v2075_v30  ;;  %v4914_v29 = vld [vmem:[%s15995_s5 + $0x20] sm:$0xff]  ;;  %v1434_v56 = vshrl.u32 %v13724_v15, 16  ;;  %v4929_v15 = vld [vmem:[%s15995_s5 + $0x98] sm:$0xff] }
 0x20f   : > { %v2334_v46 = vadd.f32 %v2247_v19, %v1684_v41  ;;  %4980 = vperm.xlu2 %13001, %v4914_v29   ;;  %v2983_v53 = vsel %vm1261_vm3, %v2978_v11, %v2982_v35  ;;  %v13798_v29 = vld [vmem:[%s13086_s12 + $0xc8] sm:$0xff] }
 0x210   : > { %v2080_v19 = vsel %vm658_vm2, %v13721_v17, %v13764_v61  ;;  %v4915_v17 = vld [vmem:[%s15995_s5 + $0x28] sm:$0xff] }
 0x211   : > { %v2612_v59 = vadd.f32 %v2525_v10, %v2334_v46  ;;  %v4931_v10 = vld [vmem:[%s15995_s5 + $0xa8] sm:$0xff]  ;;  %v1438_v46 = vshll.u32 %v13762_v45, 16 }
 0x212   : > { %10334 = vmatmul.msk.bf16.gmra.mxu2 %vm425_vm1, %v1433_v24  ;;  %5040 = vperm.xlu1 %13000, %v4926_v57   ;;  %v12895_v24 = vld [vmem:[%s13086_s12 + $0xc4] sm:$0xff]  }
 0x213   : > { %v3149_v42 = vpop.f32.mrf.mxu1  ;;  %v13757_v18 = vadd.f32 %v3147_v48, %v2612_v59  ;;  %5065 = vperm.xlu0 %12999, %v4931_v10   ;;  %v1440_v2 = vrot.slane %v1438_v46, 1  ;;  %v2082_v1 = vshrl.u32 %v12895_v24, 16  ;;  %v2988_v46 = vshll.u32 %v13798_v29, 16 }
 0x214   : > { %v2530_v41 = vpop.f32.mrf.mxu0 }
 0x215   : > { %v1602_v33 = vpop.f32.mrf.mxu2 }
 0x216   : > { %v2249_v48 = vpop.f32.mrf.mxu3  ;;  %v1686_v22 = vadd.f32 %v1602_v33, %v13227_v4  ;;  %v1436_v4 = vor.u32 %v1434_v56, %v1432_v36  ;;  %v2084_v33 = vrot.slane %v2082_v1, 3  ;;  %v2984_v56 = vshrl.u32 %v13751_v28, 16  ;;  %v4932_v28 = vld [vmem:[%s15995_s5 + $0xb0] sm:$0xff] }
 0x217   : > { %v2335_v0 = vadd.f32 %v2249_v48, %v1685_v31  ;;  %10384 = vmatmul.msk.bf16.gmra.mxu0 %vm425_vm1, %v11941_v12  ;;  %v2085_v12 = vshll.u32 %v12895_v24, 16  ;;  %4985 = vperm.xlu2 %13001, %v4915_v17   ;;  %v2990_v17 = vrot.slane %v2988_v46, 1 }
 0x218   : > { %v1441_v48 = vsel %vm1261_vm3, %v1436_v4, %v1440_v2 }
 0x219   : > { %v2613_v30 = vadd.f32 %v2527_v6, %v2335_v0  ;;  %v4934_v6 = vld [vmem:[%s15995_s5 + $0xc0] sm:$0xff]  ;;  %v2087_v11 = vrot.slane %v2085_v12, 4  ;;  %v2986_v12 = vor.u32 %v2984_v56, %v2982_v35 }
 0x21a   : > { %5055 = vperm.xlu1 %13000, %v4929_v15  }
 0x21b   : > { %v3152_v5 = vpop.f32.mrf.mxu1  ;;  %v13784_v59 = vadd.f32 %v3149_v42, %v2613_v30  ;;  %10359 = vmatmul.msk.bf16.gmra.mxu3 %vm425_vm1, %v2080_v19  ;;  %5080 = vperm.xlu0 %12999, %v4934_v6   ;;  %v11942_v30 = vld [vmem:[%s13086_s12 + $0xc0] sm:$0xff]  }
 0x21c   : > { %v2532_v31 = vpop.f32.mrf.mxu0 }
 0x21d   : > { %v1604_v36 = vpop.f32.mrf.mxu2 }
 0x21e   : > { %10505 = vmatmul.msk.bf16.gmra.mxu1 %vm425_vm1, %v2983_v53  ;;  %v2252_v42 = vpop.f32.mrf.mxu3  ;;  %v1687_v10 = vadd.f32 %v1604_v36, %v13234_v20  ;;  %v13811_v53 = vld [vmem:[%s13086_s12 + $0xc4] sm:$0xff]  ;;  %v13813_v20 = vor.u32 %v2087_v11, %v2084_v33  ;;  %v1442_v36 = vshrl.u32 %v13762_v45, 16  ;;  %v4921_v45 = vld [vmem:[%s15995_s5 + $0x58] sm:$0xff] }
 0x21f   : > { %v2336_v57 = vadd.f32 %v2252_v42, %v1686_v22 }
 0x220   : > { %v2089_v42 = vsel %vm658_vm2, %v13764_v61, %v13813_v20  ;;  %v4935_v61 = vld [vmem:[%s15995_s5 + $0xc8] sm:$0xff] }
 0x221   : > { %v2614_v0 = vadd.f32 %v2530_v41, %v2336_v57  ;;  %v4918_v41 = vld [vmem:[%s15995_s5 + $0x40] sm:$0xff]  ;;  %v1446_v57 = vshll.u32 %v13811_v53, 16 }
 0x222   : > { %10335 = vmatmul.msk.bf16.gmra.mxu2 %vm425_vm1, %v1441_v48  ;;  %5000 = vperm.xlu2 %13001, %v4918_v41   ;;  %v12896_v48 = vld [vmem:[%s13086_s12 + $0xcc] sm:$0xff]  }
 0x223   : > { %v13802_v19 = vpop.f32.mrf.mxu1  ;;  %v13806_v24 = vadd.f32 %v3152_v5, %v2614_v0  ;;  %v4937_v5 = vld [vmem:[%s15995_s5 + $0xd8] sm:$0xff]  ;;  %5070 = vperm.xlu1 %13000, %v4932_v28   ;;  %v1448_v0 = vrot.slane %v1446_v57, 1  ;;  %v2091_v56 = vshrl.u32 %v12896_v48, 16  ;;  %v2094_v46 = vshll.u32 %v12896_v48, 16  ;;  %v13848_v28 = vld [vmem:[%s13086_s12 + $0xd0] sm:$0xff] }
 0x224   : > { %16012 = vst [vmem:[#allocation16_spill] sm:$0xff] %v13802_v19  ;;  %v2535_v22 = vpop.f32.mrf.mxu0  ;;  %5095 = vperm.xlu0 %12999, %v4937_v5   ;;  %v13853_v57 = vld [vmem:[%s13086_s12 + $0xd0] sm:$0xff]  }
 0x225   : > { %v1607_v1 = vpop.f32.mrf.mxu2 }
 0x226   : > { %v2254_v4 = vpop.f32.mrf.mxu3  ;;  %v1688_v6 = vadd.f32 %v1607_v1, %v13249_v37  ;;  %v1444_v37 = vor.u32 %v1442_v36, %v1440_v2 }
 0x227   : > { %v2337_v15 = vadd.f32 %v2254_v4, %v1687_v10  ;;  %10385 = vmatmul.msk.bf16.gmra.mxu0 %vm425_vm1, %v11942_v30  ;;  %v2991_v10 = vsel %vm1261_vm3, %v2986_v12, %v2990_v17  ;;  %v1135_v30 = vld [vmem:[%s13086_s12 + $0xcc] sm:$0x1]  ;;  %v2093_v12 = vrot.slane %v2091_v56, 3  ;;  %v4924_v56 = vld [vmem:[%s15995_s5 + $0x70] sm:$0xff] }
 0x228   : > { %v1449_v1 = vsel %vm1261_vm3, %v1444_v37, %v1448_v0 }
 0x229   : > { %v13832_v33 = vadd.f32 %v2532_v31, %v2337_v15  ;;  %v4940_v31 = vld [vmem:[%s15995_s5 + $0xf0] sm:$0xff]  ;;  %v2096_v15 = vrot.slane %v2094_v46, 4 }
 0x22a   : > { %5015 = vperm.xlu2 %13001, %v4921_v45   ;;  %v2996_v45 = vshll.u32 %v13848_v28, 16 }
 0x22b   : > { %v3157_v35 = vpop.f32.mrf.mxu1  ;;  %10360 = vmatmul.msk.bf16.gmra.mxu3 %vm425_vm1, %v2089_v42  ;;  %5085 = vperm.xlu1 %13000, %v4935_v61   ;;  %v1235_v42 = vunpack.c.l.b16 %v1135_v30  ;;  %v13863_v61 = vor.u32 %v2096_v15, %v2093_v12  ;;  %v1450_v15 = vshrl.u32 %v13811_v53, 16 }
 0x22c   : > { %v2537_v11 = vpop.f32.mrf.mxu0  ;;  %5110 = vperm.xlu0 %12999, %v4940_v31  }
 0x22d   : > { %v1609_v41 = vpop.f32.mrf.mxu2  ;;  %v1260_v37 = vpack.c.b16 %v1235_v42, %v1235_v42  ;;  %v2098_v12 = vsel %vm658_vm2, %v13813_v20, %v13863_v61  ;;  %v1452_v20 = vor.u32 %v1450_v15, %v1448_v0 }
 0x22e   : > { %10506 = vmatmul.msk.bf16.gmra.mxu1 %vm425_vm1, %v2991_v10  ;;  %v2257_v2 = vpop.f32.mrf.mxu3  ;;  %v1689_v4 = vadd.f32 %v1609_v41, %v13257_v55  ;;  %v2992_v10 = vshrl.u32 %v13798_v29, 16  ;;  %v4938_v29 = vld [vmem:[%s15995_s5 + $0xe0] sm:$0xff] }
 0x22f   : > { %v2338_v5 = vadd.f32 %v2257_v2, %v1688_v6  ;;  %v11943_v6 = vld [vmem:[%s13086_s12 + $0xc8] sm:$0xff]   ;;  %v2998_v2 = vrot.slane %v2996_v45, 1  ;;  %v1454_v42 = vshll.u32 %v1260_v37, 16 }
 0x230   : > { %v2994_v30 = vor.u32 %v2992_v10, %v2990_v17 }
 0x231   : > { %v2616_v36 = vadd.f32 %v2535_v22, %v2338_v5  ;;  %v11525_v22 = vunpack.c.h.b16 %v13853_v57 }
 0x232   : > { %10336 = vmatmul.msk.bf16.gmra.mxu2 %vm425_vm1, %v1449_v1  ;;  %5030 = vperm.xlu2 %13001, %v4924_v56   ;;  %v2686_v1 = vld [vmem:[%s13086_s12 + $0xd8] sm:$0x1]  ;;  %v3260_v56 = vld [vmem:[%s13086_s12 + $0x20] sm:$0x8] }
 0x233   : > { %v13855_v48 = vpop.f32.mrf.mxu1  ;;  %v13859_v19 = vadd.f32 %v3157_v35, %v2616_v36  ;;  %v4943_v35 = vld [vmem:[%s15995_s5 + $0x108] sm:$0xff]  ;;  %5100 = vperm.xlu1 %13000, %v4938_v29   ;;  %v1883_v36 = vpack.c.b16 %v11525_v22, %v11525_v22  ;;  %v2786_v45 = vunpack.c.l.b16 %v2686_v1 }
 0x234   : > { %16013 = vst [vmem:[#allocation17_spill] sm:$0xff] %v13855_v48  ;;  %v2540_v55 = vpop.f32.mrf.mxu0  ;;  %5125 = vperm.xlu0 %12999, %v4943_v35   ;;  %v13884_v48 = vld [vmem:[%s13086_s12 + $0x24] sm:$0xf]  ;;  %v1456_v35 = vrot.slane %v1454_v42, 1  ;;  %v4927_v22 = vld [vmem:[%s15995_s5 + $0x88] sm:$0xff] }
 0x235   : > { %v1612_v31 = vpop.f32.mrf.mxu2  ;;  %v2100_v53 = vshrl.u32 %v1883_v36, 16  ;;  %v2103_v37 = vshll.u32 %v1883_v36, 16 }
 0x236   : > { %v2259_v46 = vpop.f32.mrf.mxu3  ;;  %v1690_v5 = vadd.f32 %v1612_v31, %v13274_v14  ;;  %v3360_v14 = vunpack.c.l.b16 %v3260_v56  ;;  %v1457_v15 = vsel %vm1261_vm3, %v1452_v20, %v1456_v35  ;;  %v4930_v35 = vld [vmem:[%s15995_s5 + $0xa0] sm:$0xff] }
 0x237   : > { %v2339_v41 = vadd.f32 %v2259_v46, %v1689_v4  ;;  %10386 = vmatmul.msk.bf16.gmra.mxu0 %vm425_vm1, %v11943_v6  ;;  %v2999_v4 = vsel %vm1261_vm3, %v2994_v30, %v2998_v2  ;;  %v15997_v6 = vunpack.c.l.b16 %v13884_v48  ;;  %v4946_v46 = vld [vmem:[%s15995_s5 + $0x120] sm:$0xff]  ;;  %v2811_v30 = vpack.c.b16 %v2786_v45, %v2786_v45 }
 0x238   : > { %v2102_v42 = vrot.slane %v2100_v53, 3  ;;  %v2105_v36 = vrot.slane %v2103_v37, 4  ;;  %v3000_v45 = vshrl.u32 %v13848_v28, 16  ;;  %v4944_v28 = vld [vmem:[%s15995_s5 + $0x110] sm:$0xff] }
 0x239   : > { %v13886_v17 = vadd.f32 %v2537_v11, %v2339_v41  ;;  %v4941_v11 = vld [vmem:[%s15995_s5 + $0xf8] sm:$0xff] }
 0x23a   : > { %5045 = vperm.xlu2 %13001, %v4927_v22   ;;  %v3004_v22 = vshll.u32 %v2811_v30, 16 }
 0x23b   : > { %16014 = vst [vmem:[#allocation18_spill] sm:$0xff] %v13886_v17  ;;  %v3162_v10 = vpop.f32.mrf.mxu1  ;;  %10361 = vmatmul.msk.bf16.gmra.mxu3 %vm425_vm1, %v2098_v12  ;;  %5115 = vperm.xlu1 %13000, %v4941_v11   ;;  %v3409_v12 = vpack.c.b16 %v15997_v6, %v3360_v14  ;;  %v13906_v17 = vld [vmem:[%s13086_s12 + $0x28] sm:$0xff]  }
 0x23c   : > { %v2542_v29 = vpop.f32.mrf.mxu0  ;;  %5140 = vperm.xlu0 %12999, %v4946_v46   ;;  %v11242_v46 = vld [vmem:[%s13086_s12 + $0x24] sm:$0xff]  ;;  %v3443_v20 = vshrl.u32 %v13906_v17, 16  ;;  %v3006_v30 = vrot.slane %v3004_v22, 1 }
 0x23d   : > { %v1614_v31 = vpop.f32.mrf.mxu2 }
 0x23e   : > { %10507 = vmatmul.msk.bf16.gmra.mxu1 %vm425_vm1, %v2999_v4  ;;  %v2262_v0 = vpop.f32.mrf.mxu3  ;;  %v1691_v1 = vadd.f32 %v1614_v31, %v13290_v40  ;;  %v3435_v40 = vshrl.u32 %v3409_v12, 16  ;;  %v3002_v31 = vor.u32 %v3000_v45, %v2998_v2 }
 0x23f   : > { %v2340_v41 = vadd.f32 %v2262_v0, %v1690_v5  ;;  %v3438_v5 = vshll.u32 %v3409_v12, 16  ;;  %v2106_v0 = vor.u32 %v2105_v36, %v2102_v42 }
 0x241   : > { %v2618_v56 = vadd.f32 %v2540_v55, %v2340_v41  ;;  %v3446_v55 = vshll.u32 %v13906_v17, 16  ;;  %v3440_v42 = vrot.slane %v3438_v5, 4  ;;  %v2107_v36 = vsel %vm658_vm2, %v13863_v61, %v2106_v0  ;;  %v4933_v61 = vld [vmem:[%s15995_s5 + $0xb8] sm:$0xff]  ;;  %v4952_v0 = vld [vmem:[%s15995_s5 + $0x150] sm:$0xff] }
 0x242   : > { %10337 = vmatmul.msk.bf16.gmra.mxu2 %vm425_vm1, %v1457_v15  ;;  %5060 = vperm.xlu2 %13001, %v4930_v35   ;;  %v3437_v15 = vrot.slane %v3435_v40, 3  ;;  %v13932_v35 = vld [vmem:[%s13086_s12 + $0x2c] sm:$0xff]  ;;  %v4363_v40 = vshrl.u32 %v11242_v46, 16 }
 0x243   : > { %v13908_v4 = vpop.f32.mrf.mxu1  ;;  %v13911_v11 = vadd.f32 %v3162_v10, %v2618_v56  ;;  %v4949_v10 = vld [vmem:[%s15995_s5 + $0x138] sm:$0xff]  ;;  %5130 = vperm.xlu1 %13000, %v4944_v28   ;;  %v3445_v56 = vrot.slane %v3443_v20, 3  ;;  %v3448_v6 = vrot.slane %v3446_v55, 4  ;;  %v4370_v28 = vshll.u32 %v13932_v35, 16 }
 0x244   : > { %16015 = vst [vmem:[#allocation19_spill] sm:$0xff] %v13908_v4  ;;  %v2545_v14 = vpop.f32.mrf.mxu0  ;;  %5155 = vperm.xlu0 %12999, %v4949_v10   ;;  %v4365_v4 = vshll.u32 %v11242_v46, 16 }
 0x245   : > { %v1617_v37 = vpop.f32.mrf.mxu2 }
 0x246   : > { %v2264_v53 = vpop.f32.mrf.mxu3  ;;  %v1692_v12 = vadd.f32 %v1617_v37, %v13304_v34  ;;  %v3449_v34 = vor.u32 %v3448_v6, %v3445_v56  ;;  %v4367_v5 = vrot.slane %v4365_v4, 1  ;;  %v4936_v56 = vld [vmem:[%s15995_s5 + $0xd0] sm:$0xff] }
 0x247   : > { %v2341_v41 = vadd.f32 %v2264_v53, %v1691_v1  ;;  %10387 = vmatmul.msk.bf16.gmra.mxu0 %vm425_vm1, %v13853_v57  ;;  %v3007_v1 = vsel %vm1261_vm3, %v3002_v31, %v3006_v30  ;;  %v3441_v57 = vor.u32 %v3440_v42, %v3437_v15  ;;  %v4372_v53 = vrot.slane %v4370_v28, 1  ;;  %v11946_v31 = vld [vmem:[%s13086_s12 + $0x30] sm:$0xff]  }
 0x248   : > { %v4368_v10 = vor.u32 %v4367_v5, %v4363_v40  ;;  %v11528_v15 = vunpack.c.l.b16 %v13906_v17  ;;  %v16016_v5 = vunpack.c.l.b16 %v13884_v48  ;;  %v4953_v48 = vld [vmem:[%s15995_s5 + $0x158] sm:$0xff] }
 0x249   : > { %v13934_v2 = vadd.f32 %v2542_v29, %v2341_v41  ;;  %v4947_v29 = vld [vmem:[%s15995_s5 + $0x128] sm:$0xff]  ;;  %v3450_v55 = vsel %vm658_vm2, %v3441_v57, %v3449_v34 }
 0x24a   : > { %5075 = vperm.xlu2 %13001, %v4933_v61   ;;  %v3912_v28 = vpack.c.b16 %v11528_v15, %v16016_v5 }
 0x24b   : > { %v3167_v45 = vpop.f32.mrf.mxu1  ;;  %10362 = vmatmul.msk.bf16.gmra.mxu3 %vm425_vm1, %v2107_v36  ;;  %5145 = vperm.xlu1 %13000, %v4947_v29   ;;  %v4373_v36 = vsel %vm1261_vm3, %v4368_v10, %v4372_v53 }
 0x24c   : > { %v2547_v22 = vpop.f32.mrf.mxu0  ;;  %5170 = vperm.xlu0 %12999, %v4952_v0   ;;  %v11244_v0 = vld [vmem:[%s13086_s12 + $0x34] sm:$0xff] }
 0x24d   : > { %v1619_v4 = vpop.f32.mrf.mxu2  ;;  %v4378_v10 = vshll.u32 %v11244_v0, 16 }
 0x24e   : > { %10508 = vmatmul.msk.bf16.gmra.mxu1 %vm425_vm1, %v3007_v1  ;;  %v2267_v6 = vpop.f32.mrf.mxu3  ;;  %v1693_v20 = vadd.f32 %v1619_v4, %v13311_v39  ;;  %v3455_v39 = vshll.u32 %v11946_v31, 16 }
 0x24f   : > { %v2342_v46 = vadd.f32 %v2267_v6, %v1692_v12  ;;  %v3452_v12 = vshrl.u32 %v11946_v31, 16 }
 0x250   : > { %v3457_v29 = vrot.slane %v3455_v39, 4 }
 0x251   : > { %v2620_v37 = vadd.f32 %v2545_v14, %v2342_v46  ;;  %v4950_v14 = vld [vmem:[%s15995_s5 + $0x140] sm:$0xff]  ;;  %v3454_v61 = vrot.slane %v3452_v12, 3 }
 0x252   : > { %10510 = vmatmul.msk.bf16.vlgmr.msra.gmra.mxu2 %vm425_vm1, %v3450_v55  ;;  %5090 = vperm.xlu2 %13001, %v4936_v56   ;;  %v11947_v56 = vld [vmem:[%s13086_s12 + $0x38] sm:$0xff]  }
 0x253   : > { %v13952_v30 = vpop.f32.mrf.mxu1  ;;  %v13954_v41 = vadd.f32 %v3167_v45, %v2620_v37  ;;  %v4955_v45 = vld [vmem:[%s15995_s5 + $0x168] sm:$0xff]  ;;  %5160 = vperm.xlu1 %13000, %v4950_v14   ;;  %v3458_v55 = vor.u32 %v3457_v29, %v3454_v61 }
 0x254   : > { %v2550_v42 = vpop.f32.mrf.mxu0  ;;  %5185 = vperm.xlu0 %12999, %v4955_v45   ;;  %v12489_v61 = vld [vmem:[%s13086_s12 + $0x2c] sm:$0xff]  }
 0x255   : > { %v1622_v1 = vpop.f32.mrf.mxu2 }
 0x256   : > { %v2269_v17 = vpop.f32.mrf.mxu3  ;;  %v1694_v40 = vadd.f32 %v1622_v1, %v13324_v3  ;;  %v4939_v3 = vld [vmem:[%s15995_s5 + $0xe8] sm:$0xff] }
 0x257   : > { %v2343_v57 = vadd.f32 %v2269_v17, %v1693_v20  ;;  %10656 = vmatmul.msk.bf16.vlgmr.msra.gmra.mxu0 %vm425_vm1, %v4373_v36  ;;  %v4374_v20 = vshrl.u32 %v13932_v35, 16  ;;  %v3459_v36 = vsel %vm658_vm2, %v3449_v34, %v3458_v55  ;;  %v4380_v35 = vrot.slane %v4378_v10, 1  ;;  %v4956_v34 = vld [vmem:[%s15995_s5 + $0x170] sm:$0xff] }
 0x259   : > { %v13973_v6 = vadd.f32 %v2547_v22, %v2343_v57  ;;  %v4376_v12 = vor.u32 %v4374_v20, %v4372_v53  ;;  %v3461_v57 = vshrl.u32 %v11947_v56, 16  ;;  %v11245_v20 = vld [vmem:[%s13086_s12 + $0x3c] sm:$0xff] }
 0x25a   : > { %5105 = vperm.xlu2 %13001, %v4939_v3  }
 0x25b   : > { %v3172_v4 = vpop.f32.mrf.mxu1  ;;  %10535 = vmatmul.msk.bf16.vlgmr.msra.gmra.mxu3 %vm425_vm1, %v3912_v28  ;;  %5175 = vperm.xlu1 %13000, %v4953_v48   ;;  %v4381_v1 = vsel %vm1261_vm3, %v4376_v12, %v4380_v35  ;;  %v3463_v29 = vrot.slane %v3461_v57, 3 }
 0x25c   : > { %v2552_v46 = vpop.f32.mrf.mxu0 }
 0x25d   : > { %v1624_v37 = vpop.f32.mrf.mxu2 }
 0x25e   : > { %v2272_v22 = vpop.f32.mrf.mxu3  ;;  %v1695_v15 = vadd.f32 %v1624_v37, %v13331_v23  ;;  %v4942_v23 = vld [vmem:[%s15995_s5 + $0x100] sm:$0xff]  ;;  %v4382_v37 = vshrl.u32 %v11244_v0, 16 }
 0x25f   : > { %v2344_v31 = vadd.f32 %v2272_v22, %v1694_v40  ;;  %v3464_v40 = vshll.u32 %v11947_v56, 16 }
 0x261   : > { %v2622_v39 = vadd.f32 %v2550_v42, %v2344_v31  ;;  %v4386_v31 = vshll.u32 %v11245_v20, 16 }
 0x262   : > { %10511 = vmatmul.msk.bf16.gmra.mxu2 %vm425_vm1, %v3459_v36  ;;  %5120 = vperm.xlu2 %13001, %v4942_v23   ;;  %v11948_v23 = vld [vmem:[%s13086_s12 + $0x40] sm:$0xff]  }
 0x263   : > { %v13986_v14 = vpop.f32.mrf.mxu1  ;;  %v13988_v45 = vadd.f32 %v3172_v4, %v2622_v39  ;;  %5190 = vperm.xlu1 %13000, %v4956_v34   ;;  %v3466_v4 = vrot.slane %v3464_v40, 4  ;;  %v16017_v39 = vld [vmem:[#allocation3_spill] sm:$0xff]  ;;  %v4388_v57 = vrot.slane %v4386_v31, 1 }
 0x264   : > { %v2555_v17 = vpop.f32.mrf.mxu0 }
 0x265   : > { %v1627_v42 = vpop.f32.mrf.mxu2  ;;  %v3467_v22 = vor.u32 %v3466_v4, %v3463_v29  ;;  %v16019_v29 = vld [vmem:[#allocation4_spill] sm:$0xff] }
 0x266   : > { %v2274_v53 = vpop.f32.mrf.mxu3  ;;  %v1696_v28 = vadd.f32 %v1627_v42, %v13343_v52 }
 0x267   : > { %v2345_v5 = vadd.f32 %v2274_v53, %v1695_v15  ;;  %10657 = vmatmul.msk.bf16.gmra.mxu0 %vm425_vm1, %v4381_v1  ;;  %v4945_v15 = vld [vmem:[%s15995_s5 + $0x118] sm:$0xff]  ;;  %v4384_v1 = vor.u32 %v4382_v37, %v4380_v35 }
 0x269   : > { %v14002_v10 = vadd.f32 %v2552_v46, %v2345_v5  ;;  %v3468_v46 = vsel %vm658_vm2, %v3458_v55, %v3467_v22  ;;  %v4389_v42 = vsel %vm1261_vm3, %v4384_v1, %v4388_v57  ;;  %v3470_v5 = vshrl.u32 %v11948_v23, 16  ;;  %v4948_v55 = vld [vmem:[%s15995_s5 + $0x130] sm:$0xff] }
 0x26a   : > { %5135 = vperm.xlu2 %13001, %v4945_v15   ;;  %v11246_v15 = vld [vmem:[%s13086_s12 + $0x44] sm:$0xff] }
 0x26b   : > { %v3177_v3 = vpop.f32.mrf.mxu1  ;;  %10536 = vmatmul.msk.bf16.gmra.mxu3 %vm425_vm1, %v12489_v61  ;;  %v3472_v37 = vrot.slane %v3470_v5, 3  ;;  %v4394_v1 = vshll.u32 %v11246_v15, 16  ;;  %v16021_v5 = vld [vmem:[#allocation5_spill] sm:$0xff] }
 0x26c   : > { %v2557_v48 = vpop.f32.mrf.mxu0 }
 0x26d   : > { %v1629_v36 = vpop.f32.mrf.mxu2 }
 0x26e   : > { %v2277_v52 = vpop.f32.mrf.mxu3  ;;  %v1697_v56 = vadd.f32 %v1629_v36, %v16017_v39 }
 0x26f   : > { %v2346_v12 = vadd.f32 %v2277_v52, %v1696_v28  ;;  %v3473_v28 = vshll.u32 %v11948_v23, 16 }
 0x271   : > { %v2624_v40 = vadd.f32 %v2555_v17, %v2346_v12  ;;  %v3475_v31 = vrot.slane %v3473_v28, 4 }
 0x272   : > { %10512 = vmatmul.msk.bf16.gmra.mxu2 %vm425_vm1, %v3468_v46  ;;  %5150 = vperm.xlu2 %13001, %v4948_v55   ;;  %v4390_v46 = vshrl.u32 %v11245_v20, 16 }
 0x273   : > { %v14011_v34 = vpop.f32.mrf.mxu1  ;;  %v14013_v0 = vadd.f32 %v3177_v3, %v2624_v40  ;;  %v12491_v3 = vld [vmem:[%s13086_s12 + $0x34] sm:$0xff]   ;;  %v3476_v39 = vor.u32 %v3475_v31, %v3472_v37 }
 0x274   : > { %16018 = vst [vmem:[#allocation3_spill] sm:$0xff] %v14011_v34  ;;  %v2560_v53 = vpop.f32.mrf.mxu0  ;;  %v4392_v55 = vor.u32 %v4390_v46, %v4388_v57 }
 0x275   : > { %v1632_v17 = vpop.f32.mrf.mxu2 }
 0x276   : > { %v2279_v35 = vpop.f32.mrf.mxu3  ;;  %v1698_v4 = vadd.f32 %v1632_v17, %v16019_v29 }
 0x277   : > { %v2347_v61 = vadd.f32 %v2279_v35, %v1697_v56  ;;  %10658 = vmatmul.msk.bf16.gmra.mxu0 %vm425_vm1, %v4389_v42  ;;  %v4951_v56 = vld [vmem:[%s15995_s5 + $0x148] sm:$0xff]  ;;  %v4396_v35 = vrot.slane %v4394_v1, 1 }
 0x279   : > { %v14024_v52 = vadd.f32 %v2557_v48, %v2347_v61  ;;  %v3477_v48 = vsel %vm658_vm2, %v3467_v22, %v3476_v39  ;;  %v11949_v61 = vld [vmem:[%s13086_s12 + $0x48] sm:$0xff]   ;;  %v4397_v37 = vsel %vm1261_vm3, %v4392_v55, %v4396_v35  ;;  %v4954_v22 = vld [vmem:[%s15995_s5 + $0x160] sm:$0xff] }
 0x27a   : > { %5165 = vperm.xlu2 %13001, %v4951_v56   ;;  %v3482_v31 = vshll.u32 %v11949_v61, 16  ;;  %v12493_v56 = vld [vmem:[%s13086_s12 + $0x3c] sm:$0xff]  }
 0x27b   : > { %16020 = vst [vmem:[#allocation4_spill] sm:$0xff] %v14024_v52  ;;  %v3182_v36 = vpop.f32.mrf.mxu1  ;;  %10537 = vmatmul.msk.bf16.gmra.mxu3 %vm425_vm1, %v12491_v3  ;;  %v4971_v52 = vpop.permute.xlu1 %4970 }
 0x27c   : > { %v2562_v12 = vpop.f32.mrf.mxu0 }
 0x27d   : > { %v1634_v23 = vpop.f32.mrf.mxu2 }
 0x27e   : > { %v2282_v40 = vpop.f32.mrf.mxu3  ;;  %v1699_v28 = vadd.f32 %v1634_v23, %v16021_v5  ;;  %v3484_v23 = vrot.slane %v3482_v31, 4  ;;  %v16026_v31 = vld [vmem:[#allocation7_spill] sm:$0xff] }
 0x27f   : > { %v2348_v42 = vadd.f32 %v2282_v40, %v1698_v4  ;;  %v3479_v4 = vshrl.u32 %v11949_v61, 16  ;;  %v4398_v61 = vshrl.u32 %v11246_v15, 16 }
 0x281   : > { %v2626_v17 = vadd.f32 %v2560_v53, %v2348_v42  ;;  %v3481_v40 = vrot.slane %v3479_v4, 3  ;;  %v11247_v42 = vld [vmem:[%s13086_s12 + $0x4c] sm:$0xff] }
 0x282   : > { %10513 = vmatmul.msk.bf16.gmra.mxu2 %vm425_vm1, %v3477_v48  ;;  %5180 = vperm.xlu2 %13001, %v4954_v22   ;;  %v4402_v22 = vshll.u32 %v11247_v42, 16 }
 0x283   : > { %v14033_v29 = vpop.f32.mrf.mxu1  ;;  %v14035_v20 = vadd.f32 %v3182_v36, %v2626_v17  ;;  %v16024_v36 = vld [vmem:[#allocation6_spill] sm:$0xff]  ;;  %v3485_v17 = vor.u32 %v3484_v23, %v3481_v40 }
 0x284   : > { %16022 = vst [vmem:[#allocation5_spill] sm:$0xff] %v14033_v29  ;;  %v2565_v3 = vpop.f32.mrf.mxu0  ;;  %v11950_v29 = vld [vmem:[%s13086_s12 + $0x50] sm:$0xff]  }
 0x285   : > { %16023 = vst [vmem:[#allocation20_spill] sm:$0xff] %v14035_v20  ;;  %v1637_v53 = vpop.f32.mrf.mxu2 }
 0x286   : > { %v2284_v57 = vpop.f32.mrf.mxu3  ;;  %v1700_v1 = vadd.f32 %v1637_v53, %v16024_v36  ;;  %v4404_v36 = vrot.slane %v4402_v22, 1 }
 0x287   : > { %v2349_v46 = vadd.f32 %v2284_v57, %v1699_v28  ;;  %10659 = vmatmul.msk.bf16.gmra.mxu0 %vm425_vm1, %v4397_v37  ;;  %v4957_v28 = vld [vmem:[%s15995_s5 + $0x178] sm:$0xff] }
 0x289   : > { %v14046_v5 = vadd.f32 %v2562_v12, %v2349_v46  ;;  %v3486_v12 = vsel %vm658_vm2, %v3476_v39, %v3485_v17  ;;  %v4400_v46 = vor.u32 %v4398_v61, %v4396_v35  ;;  %v16029_v35 = vld [vmem:[#allocation8_spill] sm:$0xff]  ;;  %v12495_v61 = vld [vmem:[%s13086_s12 + $0x44] sm:$0xff]  }
 0x28a   : > { %5195 = vperm.xlu2 %13001, %v4957_v28  }
 0x28b   : > { %16025 = vst [vmem:[#allocation6_spill] sm:$0xff] %v14046_v5  ;;  %v3187_v48 = vpop.f32.mrf.mxu1  ;;  %10538 = vmatmul.msk.bf16.gmra.mxu3 %vm425_vm1, %v12493_v56  ;;  %v4405_v28 = vsel %vm1261_vm3, %v4400_v46, %v4404_v36 }
 0x28c   : > { %v2567_v55 = vpop.f32.mrf.mxu0 }
 0x28d   : > { %v1639_v57 = vpop.f32.mrf.mxu2 }
 0x28e   : > { %v2287_v37 = vpop.f32.mrf.mxu3  ;;  %v1701_v53 = vadd.f32 %v1639_v57, %v16026_v31 }
 0x28f   : > { %v2350_v4 = vadd.f32 %v2287_v37, %v1700_v1  ;;  %v3488_v1 = vshrl.u32 %v11950_v29, 16  ;;  %v3491_v37 = vshll.u32 %v11950_v29, 16  ;;  %v4406_v29 = vshrl.u32 %v11247_v42, 16 }
 0x291   : > { %v2628_v56 = vadd.f32 %v2565_v3, %v2350_v4  ;;  %v3490_v22 = vrot.slane %v3488_v1, 3  ;;  %v3493_v4 = vrot.slane %v3491_v37, 4  ;;  %v4408_v1 = vor.u32 %v4406_v29, %v4404_v36  ;;  %v16034_v36 = vld [vmem:[#allocation10_spill] sm:$0xff] }
 0x292   : > { %10514 = vmatmul.msk.bf16.gmra.mxu2 %vm425_vm1, %v3486_v12 }
 0x293   : > { %v14055_v15 = vpop.f32.mrf.mxu1  ;;  %v14057_v40 = vadd.f32 %v3187_v48, %v2628_v56  ;;  %v3494_v56 = vor.u32 %v3493_v4, %v3490_v22 }
 0x294   : > { %16027 = vst [vmem:[#allocation7_spill] sm:$0xff] %v14055_v15  ;;  %v2570_v23 = vpop.f32.mrf.mxu0  ;;  %v11248_v15 = vld [vmem:[%s13086_s12 + $0x54] sm:$0xff] }
 0x295   : > { %16028 = vst [vmem:[#allocation21_spill] sm:$0xff] %v14057_v40  ;;  %v1642_v31 = vpop.f32.mrf.mxu2  ;;  %v4410_v40 = vshll.u32 %v11248_v15, 16 }
 0x296   : > { %v2289_v57 = vpop.f32.mrf.mxu3  ;;  %v1702_v3 = vadd.f32 %v1642_v31, %v16029_v35  ;;  %v3495_v31 = vsel %vm658_vm2, %v3485_v17, %v3494_v56 }
 0x297   : > { %v2351_v39 = vadd.f32 %v2289_v57, %v1701_v53  ;;  %10660 = vmatmul.msk.bf16.gmra.mxu0 %vm425_vm1, %v4405_v28  ;;  %v16031_v28 = vld [vmem:[#allocation9_spill] sm:$0xff]  ;;  %v4412_v37 = vrot.slane %v4410_v40, 1 }
 0x299   : > { %v14065_v48 = vadd.f32 %v2567_v55, %v2351_v39  ;;  %v11951_v55 = vld [vmem:[%s13086_s12 + $0x58] sm:$0xff]   ;;  %v4413_v22 = vsel %vm1261_vm3, %v4408_v1, %v4412_v37 }
 0x29b   : > { %16030 = vst [vmem:[#allocation8_spill] sm:$0xff] %v14065_v48  ;;  %v3192_v12 = vpop.f32.mrf.mxu1  ;;  %10539 = vmatmul.msk.bf16.gmra.mxu3 %vm425_vm1, %v12495_v61 }
 0x29c   : > { %v2572_v46 = vpop.f32.mrf.mxu0 }
 0x29d   : > { %v1644_v53 = vpop.f32.mrf.mxu2 }
 0x29e   : > { %v2292_v5 = vpop.f32.mrf.mxu3  ;;  %v1703_v20 = vadd.f32 %v1644_v53, %v16031_v28  ;;  %v11249_v28 = vld [vmem:[%s13086_s12 + $0x5c] sm:$0xff] }
 0x29f   : > { %v2352_v57 = vadd.f32 %v2292_v5, %v1702_v3  ;;  %v3497_v5 = vshrl.u32 %v11951_v55, 16  ;;  %v3500_v3 = vshll.u32 %v11951_v55, 16  ;;  %v4414_v55 = vshrl.u32 %v11248_v15, 16 }
 0x2a1   : > { %v2630_v35 = vadd.f32 %v2570_v23, %v2352_v57  ;;  %v12497_v23 = vld [vmem:[%s13086_s12 + $0x4c] sm:$0xff]   ;;  %v3499_v29 = vrot.slane %v3497_v5, 3  ;;  %v3502_v57 = vrot.slane %v3500_v3, 4  ;;  %v4416_v5 = vor.u32 %v4414_v55, %v4412_v37  ;;  %v16039_v37 = vld [vmem:[#allocation12_spill] sm:$0xff] }
 0x2a2   : > { %10515 = vmatmul.msk.bf16.gmra.mxu2 %vm425_vm1, %v3495_v31 }
 0x2a3   : > { %v14071_v39 = vpop.f32.mrf.mxu1  ;;  %v14073_v61 = vadd.f32 %v3192_v12, %v2630_v35  ;;  %v3503_v35 = vor.u32 %v3502_v57, %v3499_v29 }
 0x2a4   : > { %16032 = vst [vmem:[#allocation9_spill] sm:$0xff] %v14071_v39  ;;  %v2575_v42 = vpop.f32.mrf.mxu0  ;;  %v4418_v39 = vshll.u32 %v11249_v28, 16 }
 0x2a5   : > { %16033 = vst [vmem:[#allocation22_spill] sm:$0xff] %v14073_v61  ;;  %v1647_v53 = vpop.f32.mrf.mxu2 }
 0x2a6   : > { %v2294_v4 = vpop.f32.mrf.mxu3  ;;  %v1704_v40 = vadd.f32 %v1647_v53, %v16034_v36  ;;  %v3504_v53 = vsel %vm658_vm2, %v3494_v56, %v3503_v35  ;;  %v4420_v3 = vrot.slane %v4418_v39, 1 }
 0x2a7   : > { %v2353_v17 = vadd.f32 %v2294_v4, %v1703_v20  ;;  %10661 = vmatmul.msk.bf16.gmra.mxu0 %vm425_vm1, %v4413_v22  ;;  %v16036_v22 = vld [vmem:[#allocation11_spill] sm:$0xff] }
 0x2a8   : > { %v4421_v29 = vsel %vm1261_vm3, %v4416_v5, %v4420_v3 }
 0x2a9   : > { %v14081_v12 = vadd.f32 %v2572_v46, %v2353_v17  ;;  %v11952_v46 = vld [vmem:[%s13086_s12 + $0x60] sm:$0xff]  }
 0x2ab   : > { %16035 = vst [vmem:[#allocation10_spill] sm:$0xff] %v14081_v12  ;;  %v3197_v31 = vpop.f32.mrf.mxu1  ;;  %10540 = vmatmul.msk.bf16.gmra.mxu3 %vm425_vm1, %v12497_v23  ;;  %v11953_v12 = vld [vmem:[%s13086_s12 + $0x68] sm:$0xff]  }
 0x2ac   : > { %v2577_v1 = vpop.f32.mrf.mxu0 }
 0x2ad   : > { %v1649_v20 = vpop.f32.mrf.mxu2 }
 0x2ae   : > { %v2297_v61 = vpop.f32.mrf.mxu3  ;;  %v1705_v48 = vadd.f32 %v1649_v20, %v16036_v22  ;;  %v11250_v22 = vld [vmem:[%s13086_s12 + $0x64] sm:$0xff] }
 0x2af   : > { %v2354_v4 = vadd.f32 %v2297_v61, %v1704_v40  ;;  %v3506_v61 = vshrl.u32 %v11952_v46, 16  ;;  %v3509_v40 = vshll.u32 %v11952_v46, 16 }
 0x2b1   : > { %v2632_v36 = vadd.f32 %v2575_v42, %v2354_v4  ;;  %v12499_v42 = vld [vmem:[%s13086_s12 + $0x54] sm:$0xff]   ;;  %v3508_v55 = vrot.slane %v3506_v61, 3  ;;  %v3511_v4 = vrot.slane %v3509_v40, 4  ;;  %v4422_v61 = vshrl.u32 %v11249_v28, 16  ;;  %v16041_v28 = vld [vmem:[#allocation13_spill] sm:$0xff] }
 0x2b2   : > { %10516 = vmatmul.msk.bf16.gmra.mxu2 %vm425_vm1, %v3504_v53  ;;  %v12078_v53 = vld [vmem:[#allocation2 + $0x10] sm:$0xff]   ;;  %v4426_v40 = vshll.u32 %v11250_v22, 16 }
 0x2b3   : > { %v14087_v17 = vpop.f32.mrf.mxu1  ;;  %v14089_v23 = vadd.f32 %v3197_v31, %v2632_v36  ;;  %v14099_v36 = vld [vmem:[#allocation2 + $0xc] sm:$0xf]  ;;  %v11620_v46 = vunpack.c.l.b16 %v12078_v53 }
 0x2b4   : > { %16037 = vst [vmem:[#allocation11_spill] sm:$0xff] %v14087_v17  ;;  %v2580_v15 = vpop.f32.mrf.mxu0 }
 0x2b5   : > { %16038 = vst [vmem:[#allocation23_spill] sm:$0xff] %v14089_v23  ;;  %v1652_v20 = vpop.f32.mrf.mxu2  ;;  %v4428_v23 = vrot.slane %v4426_v40, 1 }
 0x2b6   : > { %v2299_v57 = vpop.f32.mrf.mxu3  ;;  %v1706_v39 = vadd.f32 %v1652_v20, %v16039_v37  ;;  %v3512_v20 = vor.u32 %v3511_v4, %v3508_v55 }
 0x2b7   : > { %v2355_v56 = vadd.f32 %v2299_v57, %v1705_v48  ;;  %10662 = vmatmul.msk.bf16.gmra.mxu0 %vm425_vm1, %v4421_v29  ;;  %v5404_v48 = vld [vmem:[%s15993_s3] sm:$0x3]  ;;  %v15998_v29 = vunpack.c.l.b16 %v14099_v36 }
 0x2b9   : > { %v14097_v31 = vadd.f32 %v2577_v1, %v2355_v56  ;;  %v6057_v1 = vsel %vm5600_vm4, %v5404_v48, 0  ;;  %v10729_v56 = vld [vmem:[%s15993_s3 + $0x4] sm:$0x3]  ;;  %v3513_v48 = vsel %vm658_vm2, %v3503_v35, %v3512_v20 }
 0x2ba   : > { %6066 = vmatpush.bf16.msrb.mxu2 %v6057_v1  ;;  %v6631_v37 = vsel %vm5600_vm4, %v10729_v56, 0 }
 0x2bb   : > { %16040 = vst [vmem:[#allocation12_spill] sm:$0xff] %v14097_v31  ;;  %10541 = vmatmul.msk.bf16.gmra.mxu3 %vm425_vm1, %v12499_v42  ;;  %v3202_v5 = vpop.f32.mrf.mxu1  ;;  %v5503_v42 = vpack.c.b16 %v11620_v46, %v15998_v29  ;;  %v4424_v31 = vor.u32 %v4422_v61, %v4420_v3  ;;  %v16044_v3 = vld [vmem:[#allocation14_spill] sm:$0xff]  ;;  %v12501_v61 = vld [vmem:[%s13086_s12 + $0x5c] sm:$0xff]  }
 0x2bc   : > { %v2582_v57 = vpop.f32.mrf.mxu0  ;;  %6640 = vmatpush.bf16.msrb.mxu3 %v6631_v37 }
 0x2bd   : > { %v1654_v17 = vpop.f32.mrf.mxu2  ;;  %10681 = vmatmul.msk.bf16.vlgmr.msra.gmra.mxu1 %vm5527_vm6, %v5503_v42  ;;  %v4429_v37 = vsel %vm1261_vm3, %v4424_v31, %v4428_v23 }
 0x2be   : > { %v2302_v53 = vpop.f32.mrf.mxu3  ;;  %v1707_v4 = vadd.f32 %v1654_v17, %v16041_v28 }
 0x2bf   : > { %v2356_v55 = vadd.f32 %v2302_v53, %v1706_v39  ;;  %v3515_v39 = vshrl.u32 %v11953_v12, 16  ;;  %v3518_v53 = vshll.u32 %v11953_v12, 16  ;;  %v10850_v12 = vld [vmem:[%s15993_s3 + $0x6] sm:$0x3] }
 0x2c1   : > { %v2634_v1 = vadd.f32 %v2580_v15, %v2356_v55  ;;  %v3517_v40 = vrot.slane %v3515_v39, 3  ;;  %v11251_v55 = vld [vmem:[%s13086_s12 + $0x6c] sm:$0xff] }
 0x2c2   : > { %10517 = vmatmul.msk.bf16.gmra.mxu2 %vm425_vm1, %v3513_v48 }
 0x2c3   : > { %v14117_v56 = vadd.f32 %v3202_v5, %v2634_v1  ;;  %v14121_v17 = vpop.f32.mrf.mxu1  ;;  %v3520_v5 = vrot.slane %v3518_v53, 4 }
 0x2c4   : > { %v2585_v46 = vpop.f32.mrf.mxu0  ;;  %16043 = vst [vmem:[#allocation24_spill] sm:$0xff] %v14121_v17 }
 0x2c5   : > { %16042 = vst [vmem:[#allocation13_spill] sm:$0xff] %v14117_v56  ;;  %v1657_v28 = vpop.f32.mrf.mxu2  ;;  %v3521_v48 = vor.u32 %v3520_v5, %v3517_v40  ;;  %v11954_v56 = vld [vmem:[%s13086_s12 + $0x70] sm:$0xff]  }
 0x2c6   : > { %v2304_v42 = vpop.f32.mrf.mxu3  ;;  %v1708_v15 = vadd.f32 %v1657_v28, %v16044_v3  ;;  %v16046_v3 = vld [vmem:[#allocation15_spill] sm:$0xff]  ;;  %v3524_v5 = vshrl.u32 %v11954_v56, 16 }
 0x2c7   : > { %v2357_v35 = vadd.f32 %v2304_v42, %v1707_v4  ;;  %10663 = vmatmul.msk.bf16.gmra.mxu0 %vm425_vm1, %v4429_v37  ;;  %v4430_v4 = vshrl.u32 %v11250_v22, 16  ;;  %v4434_v42 = vshll.u32 %v11251_v55, 16  ;;  %v7281_v37 = vsel %vm5600_vm4, %v10850_v12, 0  ;;  %v10875_v22 = vld [vmem:[%s15993_s3 + $0x8] sm:$0x3] }
 0x2c8   : > { %7290 = vmatpush.bf16.msrb.mxu0 %v7281_v37  ;;  %v3527_v12 = vshll.u32 %v11954_v56, 16  ;;  %v4438_v56 = vshrl.u32 %v11251_v55, 16 }
 0x2c9   : > { %v14127_v1 = vadd.f32 %v2582_v57, %v2357_v35  ;;  %v4432_v29 = vor.u32 %v4430_v4, %v4428_v23  ;;  %v4436_v17 = vrot.slane %v4434_v42, 1  ;;  %v7559_v23 = vsel %vm5600_vm4, %v10875_v22, 0 }
 0x2ca   : > { %7568 = vmatpush.bf16.msrb.mxu1 %v7559_v23  ;;  %v3526_v42 = vrot.slane %v3524_v5, 3  ;;  %v3529_v37 = vrot.slane %v3527_v12, 4 }
 0x2cb   : > { %16045 = vst [vmem:[#allocation14_spill] sm:$0xff] %v14127_v1  ;;  %10542 = vmatmul.msk.bf16.gmra.mxu3 %vm425_vm1, %v12501_v61  ;;  %v3207_v35 = vpop.f32.mrf.mxu1  ;;  %v3522_v61 = vsel %vm658_vm2, %v3512_v20, %v3521_v48  ;;  %v4437_v40 = vsel %vm1261_vm3, %v4432_v29, %v4436_v17 }
 0x2cc   : > { %v2587_v31 = vpop.f32.mrf.mxu0 }
 0x2cd   : > { %v1659_v39 = vpop.f32.mrf.mxu2 }
 0x2ce   : > { %v2307_v28 = vpop.f32.mrf.mxu3  ;;  %v1709_v57 = vadd.f32 %v1659_v39, %v16046_v3 }
 0x2cf   : > { %v2358_v53 = vadd.f32 %v2307_v28, %v1708_v15  ;;  %v11252_v28 = vld [vmem:[%s13086_s12 + $0x74] sm:$0xff] }
 0x2d0   : > { %v4442_v3 = vshll.u32 %v11252_v28, 16 }
 0x2d1   : > { %v2636_v1 = vadd.f32 %v2585_v46, %v2358_v53  ;;  %v3530_v53 = vor.u32 %v3529_v37, %v3526_v42 }
 0x2d2   : > { %10518 = vmatmul.msk.bf16.gmra.mxu2 %vm425_vm1, %v3522_v61  ;;  %v4444_v12 = vrot.slane %v4442_v3, 1  ;;  %v12505_v3 = vld [vmem:[%s13086_s12 + $0x6c] sm:$0xff]  }
 0x2d3   : > { %v14137_v34 = vadd.f32 %v3207_v35, %v2636_v1  ;;  %v12503_v1 = vld [vmem:[%s13086_s12 + $0x64] sm:$0xff]   ;;  %v3531_v5 = vsel %vm658_vm2, %v3521_v48, %v3530_v53 }
 0x2d4   : > { %v4642_v15 = vpop.f32.mrf.mxu0 }
 0x2d5   : > { %16047 = vst [vmem:[#allocation15_spill] sm:$0xff] %v14137_v34  ;;  %v3742_v46 = vpop.f32.mrf.mxu2 }
 0x2d6   : > { %v2309_v20 = vpop.f32.mrf.mxu3  ;;  %v3862_v35 = vadd.f32 %v3742_v46, %v13481_v60 }
 0x2d7   : > { %v2359_v4 = vadd.f32 %v2309_v20, %v1709_v57  ;;  %10664 = vmatmul.msk.bf16.gmra.mxu0 %vm425_vm1, %v4437_v40  ;;  %v14155_v40 = vld [vmem:[%s15992_s2] ss:$0 sm:$0xff]  ;;  %v11955_v20 = vld [vmem:[%s13086_s12 + $0x78] sm:$0xff]  }
 0x2d8   : > { %v3536_v42 = vshll.u32 %v11955_v20, 16 }
 0x2d9   : > { %v14148_v39 = vadd.f32 %v2587_v31, %v2359_v4  ;;  %v4440_v31 = vor.u32 %v4438_v56, %v4436_v17  ;;  %v4961_v4 = vpop.permute.xlu0 %4960 }
 0x2db   : > { %16048 = vst [vmem:[#allocation25_spill] sm:$0xff] %v14148_v39  ;;  %10543 = vmatmul.msk.bf16.gmra.mxu3 %vm425_vm1, %v12503_v1  ;;  %v4445_v46 = vsel %vm1261_vm3, %v4440_v31, %v4444_v12  ;;  %v3533_v1 = vshrl.u32 %v11955_v20, 16 }
 0x2dc   : > { %v4644_v29 = vpop.f32.mrf.mxu0 }
 0x2dd   : > { %v3744_v22 = vpop.f32.mrf.mxu2 }
 0x2de   : > { %v4020_v61 = vpop.f32.mrf.mxu3 }
 0x2df   : > { %v4140_v57 = vadd.f32 %v4020_v61, %v3862_v35  ;;  %v3863_v35 = vadd.f32 %v3744_v22, %v13491_v13  ;;  %v3535_v61 = vrot.slane %v3533_v1, 3  ;;  %v4446_v22 = vshrl.u32 %v11252_v28, 16 }
 0x2e1   : > { %v4762_v23 = vadd.f32 %v4642_v15, %v4140_v57  ;;  %v3538_v57 = vrot.slane %v3536_v42, 4 }
 0x2e2   : > { %10519 = vmatmul.msk.bf16.gmra.mxu2 %vm425_vm1, %v3531_v5 }
 0x2e3   : > { %v4814_v55 = vadd.f32 %v14155_v40, %v4762_v23  ;;  %v11253_v23 = vld [vmem:[%s13086_s12 + $0x7c] sm:$0xff]  ;;  %v3539_v13 = vor.u32 %v3538_v57, %v3535_v61 }
 0x2e4   : > { %v4647_v60 = vpop.f32.mrf.mxu0 }
 0x2e5   : > { %v4862_v37 = vmax.f32 %v4814_v55, 0.0  ;;  %v3747_v17 = vpop.f32.mrf.mxu2  ;;  %v4966_v55 = vpop.permute.xlu0 %4965 }
 0x2e6   : > { %v4022_v48 = vpop.f32.mrf.mxu3 }
 0x2e7   : > { %v5198_v56 = vmul.f32 %v4961_v4, %v4862_v37  ;;  %v4141_v15 = vadd.f32 %v4022_v48, %v3863_v35  ;;  %10665 = vmatmul.msk.bf16.gmra.mxu0 %vm425_vm1, %v4445_v46  ;;  %v4450_v4 = vshll.u32 %v11253_v23, 16  ;;  %v3864_v46 = vadd.f32 %v3747_v17, %v13498_v32 }
 0x2e9   : > { %v5259_v39 = vpack.c.bf16 %v5198_v56, %v5198_v56  ;;  %v4763_v5 = vadd.f32 %v4644_v29, %v4141_v15  ;;  %v3540_v29 = vsel %vm658_vm2, %v3530_v53, %v3539_v13  ;;  %v4452_v56 = vrot.slane %v4450_v4, 1 }
 0x2eb   : > { %5307 = vst.msk [vmem:[#allocation2 + $0x18] sm:$0xf] %vm5246_vm5, %v5259_v39  ;;  %v4815_v31 = vadd.f32 %v14155_v40, %v4763_v5  ;;  %10544 = vmatmul.msk.bf16.gmra.mxu3 %vm425_vm1, %v12505_v3  ;;  %v4448_v39 = vor.u32 %v4446_v22, %v4444_v12  ;;  %v11956_v3 = vld [vmem:[%s13086_s12 + $0x80] sm:$0xff]  }
 0x2ec   : > { %v4649_v20 = vpop.f32.mrf.mxu0  ;;  %v3542_v12 = vshrl.u32 %v11956_v3, 16  ;;  %v3545_v17 = vshll.u32 %v11956_v3, 16 }
 0x2ed   : > { %v4863_v37 = vmax.f32 %v4815_v31, 0.0  ;;  %v3749_v42 = vpop.f32.mrf.mxu2  ;;  %v4453_v53 = vsel %vm1261_vm3, %v4448_v39, %v4452_v56  ;;  %v4976_v39 = vpop.permute.xlu1 %4975 }
 0x2ee   : > { %v4025_v1 = vpop.f32.mrf.mxu3 }
 0x2ef   : > { %v5199_v35 = vmul.f32 %v4966_v55, %v4863_v37  ;;  %v4142_v48 = vadd.f32 %v4025_v1, %v3864_v46  ;;  %v12507_v55 = vld [vmem:[%s13086_s12 + $0x74] sm:$0xff]   ;;  %v3544_v37 = vrot.slane %v3542_v12, 3  ;;  %v3547_v46 = vrot.slane %v3545_v17, 4  ;;  %v11254_v1 = vld [vmem:[%s13086_s12 + $0x84] sm:$0xff] }
 0x2f1   : > { %v5260_v15 = vpack.c.bf16 %v5199_v35, %v5199_v35  ;;  %v4764_v5 = vadd.f32 %v4647_v60, %v4142_v48  ;;  %v3865_v60 = vadd.f32 %v3749_v42, %v13508_v43  ;;  %v3548_v43 = vor.u32 %v3547_v46, %v3544_v37 }
 0x2f2   : > { %v12899_v34 = vld [vmem:[#allocation2 + $0x14] sm:$0xff]   ;;  %10520 = vmatmul.msk.bf16.gmra.mxu2 %vm425_vm1, %v3540_v29  ;;  %v4454_v42 = vshrl.u32 %v11253_v23, 16 }
 0x2f3   : > { %5308 = vst.msk [vmem:[#allocation2 + $0x1c] sm:$0xf] %vm5246_vm5, %v5260_v15  ;;  %v4816_v28 = vadd.f32 %v14155_v40, %v4764_v5  ;;  %10682 = vmatmul.msk.bf16.gmra.mxu1 %vm5527_vm6, %v12899_v34 }
 0x2f4   : > { %v4652_v32 = vpop.f32.mrf.mxu0  ;;  %v4456_v17 = vor.u32 %v4454_v42, %v4452_v56  ;;  %v12509_v42 = vld [vmem:[%s13086_s12 + $0x7c] sm:$0xff]  }
 0x2f5   : > { %v4864_v61 = vmax.f32 %v4816_v28, 0.0  ;;  %v3752_v31 = vpop.f32.mrf.mxu2 }
 0x2f6   : > { %v4027_v57 = vpop.f32.mrf.mxu3  ;;  %v3866_v5 = vadd.f32 %v3752_v31, %v13515_v62 }
 0x2f7   : > { %v5200_v22 = vmul.f32 %v4971_v52, %v4864_v61  ;;  %v4143_v4 = vadd.f32 %v4027_v57, %v3865_v60  ;;  %10666 = vmatmul.msk.bf16.gmra.mxu0 %vm425_vm1, %v4453_v53  ;;  %v4458_v52 = vshll.u32 %v11254_v1, 16 }
 0x2f9   : > { %v5261_v35 = vpack.c.bf16 %v5200_v22, %v5200_v22  ;;  %v4765_v48 = vadd.f32 %v4649_v20, %v4143_v4  ;;  %v3549_v20 = vsel %vm658_vm2, %v3539_v13, %v3548_v43  ;;  %v4460_v61 = vrot.slane %v4458_v52, 1  ;;  %v11957_v22 = vld [vmem:[%s13086_s12 + $0x88] sm:$0xff]  }
 0x2fa   : > { %v3551_v56 = vshrl.u32 %v11957_v22, 16  ;;  %v3554_v31 = vshll.u32 %v11957_v22, 16 }
 0x2fb   : > { %5309 = vst.msk [vmem:[#allocation2 + $0x20] sm:$0xf] %vm5246_vm5, %v5261_v35  ;;  %v4817_v34 = vadd.f32 %v14155_v40, %v4765_v48  ;;  %10545 = vmatmul.msk.bf16.gmra.mxu3 %vm425_vm1, %v12507_v55  ;;  %v4981_v55 = vpop.permute.xlu2 %4980  ;;  %v4461_v13 = vsel %vm1261_vm3, %v4456_v17, %v4460_v61 }
 0x2fc   : > { %v4654_v29 = vpop.f32.mrf.mxu0  ;;  %v3553_v52 = vrot.slane %v3551_v56, 3 }
 0x2fd   : > { %v4865_v15 = vmax.f32 %v4817_v34, 0.0  ;;  %v3754_v28 = vpop.f32.mrf.mxu2 }
 0x2fe   : > { %v4030_v3 = vpop.f32.mrf.mxu3 }
 0x2ff   : > { %v5201_v53 = vmul.f32 %v4976_v39, %v4865_v15  ;;  %v4144_v12 = vadd.f32 %v4030_v3, %v3866_v5  ;;  %v3556_v39 = vrot.slane %v3554_v31, 4  ;;  %v11255_v15 = vld [vmem:[%s13086_s12 + $0x8c] sm:$0xff] }
 0x301   : > { %v5262_v60 = vpack.c.bf16 %v5201_v53, %v5201_v53  ;;  %v4766_v57 = vadd.f32 %v4652_v32, %v4144_v12  ;;  %v3867_v32 = vadd.f32 %v3754_v28, %v13525_v9  ;;  %v3557_v9 = vor.u32 %v3556_v39, %v3553_v52 }
 0x302   : > { %v12901_v4 = vld [vmem:[#allocation2 + $0x1c] sm:$0xff]   ;;  %10521 = vmatmul.msk.bf16.gmra.mxu2 %vm425_vm1, %v3549_v20  ;;  %v4462_v28 = vshrl.u32 %v11254_v1, 16  ;;  %v4466_v20 = vshll.u32 %v11255_v15, 16 }
 0x303   : > { %5310 = vst.msk [vmem:[#allocation2 + $0x24] sm:$0xf] %vm5246_vm5, %v5262_v60  ;;  %v4818_v23 = vadd.f32 %v14155_v40, %v4766_v57  ;;  %10683 = vmatmul.msk.bf16.gmra.mxu1 %vm5527_vm6, %v12901_v4  ;;  %v4986_v17 = vpop.permute.xlu2 %4985 }
 0x304   : > { %v4657_v62 = vpop.f32.mrf.mxu0  ;;  %v4468_v56 = vrot.slane %v4466_v20, 1  ;;  %v11256_v20 = vld [vmem:[%s13086_s12 + $0x94] sm:$0xff] }
 0x305   : > { %v4866_v37 = vmax.f32 %v4818_v23, 0.0  ;;  %v3757_v35 = vpop.f32.mrf.mxu2 }
 0x306   : > { %v4032_v46 = vpop.f32.mrf.mxu3  ;;  %v3868_v57 = vadd.f32 %v3757_v35, %v13532_v63 }
 0x307   : > { %v5202_v48 = vmul.f32 %v4981_v55, %v4866_v37  ;;  %v4145_v34 = vadd.f32 %v4032_v46, %v3867_v32  ;;  %10667 = vmatmul.msk.bf16.gmra.mxu0 %vm425_vm1, %v4461_v13  ;;  %v4464_v13 = vor.u32 %v4462_v28, %v4460_v61  ;;  %v11958_v32 = vld [vmem:[%s13086_s12 + $0x90] sm:$0xff]  }
 0x308   : > { %v3563_v61 = vshll.u32 %v11958_v32, 16 }
 0x309   : > { %v5263_v5 = vpack.c.bf16 %v5202_v48, %v5202_v48  ;;  %v4767_v3 = vadd.f32 %v4654_v29, %v4145_v34  ;;  %v3558_v29 = vsel %vm658_vm2, %v3548_v43, %v3557_v9  ;;  %v4469_v35 = vsel %vm1261_vm3, %v4464_v13, %v4468_v56  ;;  %v4991_v48 = vpop.permute.xlu0 %4990 }
 0x30a   : > { %v3560_v43 = vshrl.u32 %v11958_v32, 16  ;;  %v3565_v28 = vrot.slane %v3563_v61, 4 }
 0x30b   : > { %5311 = vst.msk [vmem:[#allocation2 + $0x28] sm:$0xf] %vm5246_vm5, %v5263_v5  ;;  %v4819_v53 = vadd.f32 %v14155_v40, %v4767_v3  ;;  %10546 = vmatmul.msk.bf16.gmra.mxu3 %vm425_vm1, %v12509_v42  ;;  %v12511_v3 = vld [vmem:[%s13086_s12 + $0x84] sm:$0xff]  }
 0x30c   : > { %v4659_v12 = vpop.f32.mrf.mxu0 }
 0x30d   : > { %v4867_v60 = vmax.f32 %v4819_v53, 0.0  ;;  %v3759_v4 = vpop.f32.mrf.mxu2  ;;  %v3562_v53 = vrot.slane %v3560_v43, 3 }
 0x30e   : > { %v4035_v22 = vpop.f32.mrf.mxu3 }
 0x30f   : > { %v5203_v55 = vmul.f32 %v4986_v17, %v4867_v60  ;;  %v4146_v23 = vadd.f32 %v4035_v22, %v3868_v57 }
 0x311   : > { %v5264_v31 = vpack.c.bf16 %v5203_v55, %v5203_v55  ;;  %v4768_v37 = vadd.f32 %v4657_v62, %v4146_v23  ;;  %v3869_v62 = vadd.f32 %v3759_v4, %v13542_v26  ;;  %v3566_v26 = vor.u32 %v3565_v28, %v3562_v53  ;;  %v4996_v23 = vpop.permute.xlu1 %4995  ;;  %v12513_v28 = vld [vmem:[%s13086_s12 + $0x8c] sm:$0xff]  }
 0x312   : > { %v12903_v46 = vld [vmem:[#allocation2 + $0x24] sm:$0xff]   ;;  %10522 = vmatmul.msk.bf16.gmra.mxu2 %vm425_vm1, %v3558_v29  ;;  %v4470_v4 = vshrl.u32 %v11255_v15, 16  ;;  %v4474_v55 = vshll.u32 %v11256_v20, 16 }
 0x313   : > { %5312 = vst.msk [vmem:[#allocation2 + $0x2c] sm:$0xf] %vm5246_vm5, %v5264_v31  ;;  %v4820_v1 = vadd.f32 %v14155_v40, %v4768_v37  ;;  %10684 = vmatmul.msk.bf16.gmra.mxu1 %vm5527_vm6, %v12903_v46 }
 0x314   : > { %v4662_v63 = vpop.f32.mrf.mxu0 }
 0x315   : > { %v4868_v34 = vmax.f32 %v4820_v1, 0.0  ;;  %v3762_v52 = vpop.f32.mrf.mxu2  ;;  %v4472_v1 = vor.u32 %v4470_v4, %v4468_v56 }
 0x316   : > { %v4037_v42 = vpop.f32.mrf.mxu3  ;;  %v3870_v13 = vadd.f32 %v3762_v52, %v13549_v16 }
 0x317   : > { %v5204_v39 = vmul.f32 %v4991_v48, %v4868_v34  ;;  %v4147_v5 = vadd.f32 %v4037_v42, %v3869_v62  ;;  %10668 = vmatmul.msk.bf16.gmra.mxu0 %vm425_vm1, %v4469_v35  ;;  %v4476_v35 = vrot.slane %v4474_v55, 1  ;;  %v11959_v48 = vld [vmem:[%s13086_s12 + $0x98] sm:$0xff]   ;;  %v5001_v42 = vpop.permute.xlu2 %5000 }
 0x318   : > { %v3572_v56 = vshll.u32 %v11959_v48, 16 }
 0x319   : > { %v5265_v17 = vpack.c.bf16 %v5204_v39, %v5204_v39  ;;  %v4769_v60 = vadd.f32 %v4659_v12, %v4147_v5  ;;  %v3567_v12 = vsel %vm658_vm2, %v3557_v9, %v3566_v26  ;;  %v4477_v62 = vsel %vm1261_vm3, %v4472_v1, %v4476_v35 }
 0x31a   : > { %v3569_v9 = vshrl.u32 %v11959_v48, 16 }
 0x31b   : > { %5313 = vst.msk [vmem:[#allocation2 + $0x30] sm:$0xf] %vm5246_vm5, %v5265_v17  ;;  %v4821_v57 = vadd.f32 %v14155_v40, %v4769_v60  ;;  %10547 = vmatmul.msk.bf16.gmra.mxu3 %vm425_vm1, %v12511_v3  ;;  %v3574_v60 = vrot.slane %v3572_v56, 4 }
 0x31c   : > { %v4664_v22 = vpop.f32.mrf.mxu0  ;;  %v3571_v17 = vrot.slane %v3569_v9, 3  ;;  %v11960_v9 = vld [vmem:[%s13086_s12 + $0xa0] sm:$0xff]  }
 0x31d   : > { %v4869_v29 = vmax.f32 %v4821_v57, 0.0  ;;  %v3764_v37 = vpop.f32.mrf.mxu2  ;;  %v11257_v57 = vld [vmem:[%s13086_s12 + $0x9c] sm:$0xff] }
 0x31e   : > { %v4040_v31 = vpop.f32.mrf.mxu3 }
 0x31f   : > { %v5205_v32 = vmul.f32 %v4996_v23, %v4869_v29  ;;  %v4148_v46 = vadd.f32 %v4040_v31, %v3870_v13  ;;  %v4478_v13 = vshrl.u32 %v11256_v20, 16  ;;  %v4482_v31 = vshll.u32 %v11257_v57, 16 }
 0x321   : > { %v5266_v43 = vpack.c.bf16 %v5205_v32, %v5205_v32  ;;  %v4770_v61 = vadd.f32 %v4662_v63, %v4148_v46  ;;  %v3871_v63 = vadd.f32 %v3764_v37, %v13559_v44  ;;  %v3575_v44 = vor.u32 %v3574_v60, %v3571_v17  ;;  %v5006_v37 = vpop.permute.xlu0 %5005 }
 0x322   : > { %v12905_v34 = vld [vmem:[#allocation2 + $0x2c] sm:$0xff]   ;;  %10523 = vmatmul.msk.bf16.gmra.mxu2 %vm425_vm1, %v3567_v12  ;;  %v4480_v48 = vor.u32 %v4478_v13, %v4476_v35  ;;  %v3581_v35 = vshll.u32 %v11960_v9, 16 }
 0x323   : > { %5314 = vst.msk [vmem:[#allocation2 + $0x34] sm:$0xf] %vm5246_vm5, %v5266_v43  ;;  %v4822_v15 = vadd.f32 %v14155_v40, %v4770_v61  ;;  %10685 = vmatmul.msk.bf16.gmra.mxu1 %vm5527_vm6, %v12905_v34  ;;  %v4484_v34 = vrot.slane %v4482_v31, 1 }
 0x324   : > { %v4667_v16 = vpop.f32.mrf.mxu0  ;;  %v3583_v60 = vrot.slane %v3581_v35, 4 }
 0x325   : > { %v4870_v52 = vmax.f32 %v4822_v15, 0.0  ;;  %v3767_v5 = vpop.f32.mrf.mxu2 }
 0x326   : > { %v4042_v39 = vpop.f32.mrf.mxu3  ;;  %v3872_v46 = vadd.f32 %v3767_v5, %v13566_v27 }
 0x327   : > { %v5206_v3 = vmul.f32 %v5001_v42, %v4870_v52  ;;  %v4149_v53 = vadd.f32 %v4042_v39, %v3871_v63  ;;  %10669 = vmatmul.msk.bf16.gmra.mxu0 %vm425_vm1, %v4477_v62  ;;  %v4485_v42 = vsel %vm1261_vm3, %v4480_v48, %v4484_v34  ;;  %v5011_v52 = vpop.permute.xlu1 %5010 }
 0x329   : > { %v5267_v4 = vpack.c.bf16 %v5206_v3, %v5206_v3  ;;  %v4771_v55 = vadd.f32 %v4664_v22, %v4149_v53  ;;  %v3576_v22 = vsel %vm658_vm2, %v3566_v26, %v3575_v44  ;;  %v3578_v26 = vshrl.u32 %v11960_v9, 16  ;;  %v5021_v35 = vpop.permute.xlu0 %5020 }
 0x32b   : > { %5315 = vst.msk [vmem:[#allocation2 + $0x38] sm:$0xf] %vm5246_vm5, %v5267_v4  ;;  %v4823_v23 = vadd.f32 %v14155_v40, %v4771_v55  ;;  %10548 = vmatmul.msk.bf16.gmra.mxu3 %vm425_vm1, %v12513_v28  ;;  %v12515_v28 = vld [vmem:[%s13086_s12 + $0x94] sm:$0xff]   ;;  %v3580_v17 = vrot.slane %v3578_v26, 3  ;;  %v11258_v4 = vld [vmem:[%s13086_s12 + $0xa4] sm:$0xff] }
 0x32c   : > { %v4669_v29 = vpop.f32.mrf.mxu0 }
 0x32d   : > { %v4871_v32 = vmax.f32 %v4823_v23, 0.0  ;;  %v3769_v1 = vpop.f32.mrf.mxu2 }
 0x32e   : > { %v4045_v12 = vpop.f32.mrf.mxu3 }
 0x32f   : > { %v5207_v43 = vmul.f32 %v5006_v37, %v4871_v32  ;;  %v4150_v61 = vadd.f32 %v4045_v12, %v3872_v46  ;;  %v4486_v37 = vshrl.u32 %v11257_v57, 16  ;;  %v4490_v32 = vshll.u32 %v11258_v4, 16  ;;  %v5016_v46 = vpop.permute.xlu2 %5015 }
 0x331   : > { %v5268_v15 = vpack.c.bf16 %v5207_v43, %v5207_v43  ;;  %v4772_v62 = vadd.f32 %v4667_v16, %v4150_v61  ;;  %v3873_v16 = vadd.f32 %v3769_v1, %v13576_v7  ;;  %v3584_v7 = vor.u32 %v3583_v60, %v3580_v17  ;;  %v14256_v17 = vld [vmem:[%s13086_s12 + $0xac] sm:$0xff] }
 0x332   : > { %v12907_v56 = vld [vmem:[#allocation2 + $0x34] sm:$0xff]   ;;  %10524 = vmatmul.msk.bf16.gmra.mxu2 %vm425_vm1, %v3576_v22 }
 0x333   : > { %5316 = vst.msk [vmem:[#allocation2 + $0x3c] sm:$0xf] %vm5246_vm5, %v5268_v15  ;;  %v4824_v20 = vadd.f32 %v14155_v40, %v4772_v62  ;;  %10686 = vmatmul.msk.bf16.gmra.mxu1 %vm5527_vm6, %v12907_v56  ;;  %v4488_v15 = vor.u32 %v4486_v37, %v4484_v34  ;;  %v4492_v62 = vrot.slane %v4490_v32, 1  ;;  %v4494_v37 = vshrl.u32 %v11258_v4, 16 }
 0x334   : > { %v4672_v27 = vpop.f32.mrf.mxu0  ;;  %v4498_v32 = vshll.u32 %v14256_v17, 16 }
 0x335   : > { %v4872_v63 = vmax.f32 %v4824_v20, 0.0  ;;  %v3772_v5 = vpop.f32.mrf.mxu2  ;;  %v11961_v20 = vld [vmem:[%s13086_s12 + $0xa8] sm:$0xff]   ;;  %v4493_v26 = vsel %vm1261_vm3, %v4488_v15, %v4492_v62 }
 0x336   : > { %v4047_v39 = vpop.f32.mrf.mxu3  ;;  %v3874_v1 = vadd.f32 %v3772_v5, %v13583_v8  ;;  %v3590_v34 = vshll.u32 %v11961_v20, 16  ;;  %v4500_v15 = vrot.slane %v4498_v32, 1  ;;  %v5036_v32 = vpop.permute.xlu0 %5035 }
 0x337   : > { %v5208_v3 = vmul.f32 %v5011_v52, %v4872_v63  ;;  %v4151_v53 = vadd.f32 %v4047_v39, %v3873_v16  ;;  %10670 = vmatmul.msk.bf16.gmra.mxu0 %vm425_vm1, %v4485_v42 }
 0x339   : > { %v5269_v55 = vpack.c.bf16 %v5208_v3, %v5208_v3  ;;  %v4773_v23 = vadd.f32 %v4669_v29, %v4151_v53  ;;  %v3585_v29 = vsel %vm658_vm2, %v3575_v44, %v3584_v7  ;;  %v3587_v44 = vshrl.u32 %v11961_v20, 16  ;;  %v12517_v3 = vld [vmem:[%s13086_s12 + $0x9c] sm:$0xff]   ;;  %v11962_v20 = vld [vmem:[%s13086_s12 + $0xb0] sm:$0xff]  }
 0x33b   : > { %5317 = vst.msk [vmem:[#allocation2 + $0x40] sm:$0xf] %vm5246_vm5, %v5269_v55  ;;  %v4825_v13 = vadd.f32 %v14155_v40, %v4773_v23  ;;  %10549 = vmatmul.msk.bf16.gmra.mxu3 %vm425_vm1, %v12515_v28  ;;  %v3589_v53 = vrot.slane %v3587_v44, 3  ;;  %v3592_v28 = vrot.slane %v3590_v34, 4 }
 0x33c   : > { %v4674_v31 = vpop.f32.mrf.mxu0 }
 0x33d   : > { %v4873_v12 = vmax.f32 %v4825_v13, 0.0  ;;  %v3774_v61 = vpop.f32.mrf.mxu2  ;;  %v3593_v13 = vor.u32 %v3592_v28, %v3589_v53 }
 0x33e   : > { %v4050_v43 = vpop.f32.mrf.mxu3 }
 0x33f   : > { %v5209_v22 = vmul.f32 %v5016_v46, %v4873_v12  ;;  %v4152_v48 = vadd.f32 %v4050_v43, %v3874_v1  ;;  %v5026_v46 = vpop.permute.xlu1 %5025 }
 0x341   : > { %v5270_v9 = vpack.c.bf16 %v5209_v22, %v5209_v22  ;;  %v4774_v56 = vadd.f32 %v4672_v27, %v4152_v48  ;;  %v3875_v27 = vadd.f32 %v3774_v61, %v13593_v49  ;;  %v3594_v48 = vsel %vm658_vm2, %v3584_v7, %v3593_v13 }
 0x342   : > { %v12909_v42 = vld [vmem:[#allocation2 + $0x3c] sm:$0xff]   ;;  %10525 = vmatmul.msk.bf16.gmra.mxu2 %vm425_vm1, %v3585_v29  ;;  %v4496_v29 = vor.u32 %v4494_v37, %v4492_v62  ;;  %v3596_v7 = vshrl.u32 %v11962_v20, 16  ;;  %v3599_v62 = vshll.u32 %v11962_v20, 16 }
 0x343   : > { %5318 = vst.msk [vmem:[#allocation2 + $0x44] sm:$0xf] %vm5246_vm5, %v5270_v9  ;;  %v4826_v57 = vadd.f32 %v14155_v40, %v4774_v56  ;;  %10687 = vmatmul.msk.bf16.gmra.mxu1 %vm5527_vm6, %v12909_v42  ;;  %v11963_v20 = vld [vmem:[%s13086_s12 + $0xb8] sm:$0xff]  }
 0x344   : > { %v4677_v8 = vpop.f32.mrf.mxu0 }
 0x345   : > { %v4874_v52 = vmax.f32 %v4826_v57, 0.0  ;;  %v3777_v16 = vpop.f32.mrf.mxu2  ;;  %v4501_v57 = vsel %vm1261_vm3, %v4496_v29, %v4500_v15 }
 0x346   : > { %v4052_v63 = vpop.f32.mrf.mxu3  ;;  %v3876_v1 = vadd.f32 %v3777_v16, %v13603_v54  ;;  %v12519_v16 = vld [vmem:[%s13086_s12 + $0xa4] sm:$0xff]  }
 0x347   : > { %v5210_v39 = vmul.f32 %v5021_v35, %v4874_v52  ;;  %v4153_v5 = vadd.f32 %v4052_v63, %v3875_v27  ;;  %10671 = vmatmul.msk.bf16.gmra.mxu0 %vm425_vm1, %v4493_v26  ;;  %v5031_v26 = vpop.permute.xlu2 %5030  ;;  %v14271_v52 = vpop.f32.mrf.mxu1 }
 0x349   : > { %v5271_v60 = vpack.c.bf16 %v5210_v39, %v5210_v39  ;;  %v4775_v55 = vadd.f32 %v4674_v31, %v4153_v5  ;;  %v3598_v39 = vrot.slane %v3596_v7, 3  ;;  %v3601_v5 = vrot.slane %v3599_v62, 4 }
 0x34b   : > { %5319 = vst.msk [vmem:[#allocation2 + $0x48] sm:$0xf] %vm5246_vm5, %v5271_v60  ;;  %v4827_v23 = vadd.f32 %v14155_v40, %v4775_v55  ;;  %10550 = vmatmul.msk.bf16.gmra.mxu3 %vm425_vm1, %v12517_v3  ;;  %v14276_v3 = vld [vmem:[%s13086_s12 + $0xb4] sm:$0xff]  ;;  %v3602_v55 = vor.u32 %v3601_v5, %v3598_v39 }
 0x34c   : > { %v4679_v49 = vpop.f32.mrf.mxu0  ;;  %v4506_v37 = vshll.u32 %v14276_v3, 16 }
 0x34d   : > { %v4875_v12 = vmax.f32 %v4827_v23, 0.0  ;;  %v3779_v61 = vpop.f32.mrf.mxu2  ;;  %v4502_v23 = vshrl.u32 %v14256_v17, 16 }
 0x34e   : > { %v4055_v43 = vpop.f32.mrf.mxu3  ;;  %v4508_v29 = vrot.slane %v4506_v37, 1 }
 0x34f   : > { %v5211_v22 = vmul.f32 %v5026_v46, %v4875_v12  ;;  %v4154_v31 = vadd.f32 %v4055_v43, %v3876_v1  ;;  %v5046_v37 = vpop.permute.xlu2 %5045 }
 0x351   : > { %v5272_v9 = vpack.c.bf16 %v5211_v22, %v5211_v22  ;;  %v4776_v56 = vadd.f32 %v4677_v8, %v4154_v31  ;;  %v3877_v8 = vadd.f32 %v3779_v61, %v13619_v58  ;;  %v14284_v61 = vpop.f32.mrf.mxu1  ;;  %v3603_v31 = vsel %vm658_vm2, %v3593_v13, %v3602_v55 }
 0x352   : > { %v12911_v42 = vld [vmem:[#allocation2 + $0x44] sm:$0xff]   ;;  %10526 = vmatmul.msk.bf16.gmra.mxu2 %vm425_vm1, %v3594_v48  ;;  %v4504_v48 = vor.u32 %v4502_v23, %v4500_v15  ;;  %v3605_v13 = vshrl.u32 %v11963_v20, 16  ;;  %v3608_v15 = vshll.u32 %v11963_v20, 16 }
 0x353   : > { %5320 = vst.msk [vmem:[#allocation2 + $0x4c] sm:$0xf] %vm5246_vm5, %v5272_v9  ;;  %v4828_v4 = vadd.f32 %v14155_v40, %v4776_v56  ;;  %10688 = vmatmul.msk.bf16.gmra.mxu1 %vm5527_vm6, %v12911_v42  ;;  %v11964_v20 = vld [vmem:[%s13086_s12 + $0xc0] sm:$0xff]  }
 0x354   : > { %v4682_v54 = vpop.f32.mrf.mxu0 }
 0x355   : > { %v4876_v44 = vmax.f32 %v4828_v4, 0.0  ;;  %v3782_v35 = vpop.f32.mrf.mxu2  ;;  %v4509_v4 = vsel %vm1261_vm3, %v4504_v48, %v4508_v29 }
 0x356   : > { %v4057_v34 = vpop.f32.mrf.mxu3  ;;  %v3878_v12 = vadd.f32 %v3782_v35, %v13636_v21  ;;  %v3607_v35 = vrot.slane %v3605_v13, 3 }
 0x357   : > { %v5212_v27 = vmul.f32 %v5031_v26, %v4876_v44  ;;  %v4155_v63 = vadd.f32 %v4057_v34, %v3877_v8  ;;  %10672 = vmatmul.msk.bf16.gmra.mxu0 %vm425_vm1, %v4501_v57  ;;  %v5041_v57 = vpop.permute.xlu1 %5040  ;;  %v12521_v34 = vld [vmem:[%s13086_s12 + $0xac] sm:$0xff]  }
 0x359   : > { %v5273_v53 = vpack.c.bf16 %v5212_v27, %v5212_v27  ;;  %v4777_v28 = vadd.f32 %v4679_v49, %v4155_v63  ;;  %v3610_v27 = vrot.slane %v3608_v15, 4  ;;  %v14297_v63 = vld [vmem:[%s13086_s12 + $0xbc] sm:$0xff]  ;;  %v14299_v39 = vpop.f32.mrf.mxu1 }
 0x35a   : > { %v4514_v23 = vshll.u32 %v14297_v63, 16 }
 0x35b   : > { %5321 = vst.msk [vmem:[#allocation2 + $0x50] sm:$0xf] %vm5246_vm5, %v5273_v53  ;;  %v4829_v60 = vadd.f32 %v14155_v40, %v4777_v28  ;;  %10551 = vmatmul.msk.bf16.gmra.mxu3 %vm425_vm1, %v12519_v16  ;;  %v3611_v28 = vor.u32 %v3610_v27, %v3607_v35 }
 0x35c   : > { %v4684_v58 = vpop.f32.mrf.mxu0 }
 0x35d   : > { %v4877_v46 = vmax.f32 %v4829_v60, 0.0  ;;  %v3784_v43 = vpop.f32.mrf.mxu2  ;;  %v4510_v60 = vshrl.u32 %v14276_v3, 16 }
 0x35e   : > { %v4060_v1 = vpop.f32.mrf.mxu3 }
 0x35f   : > { %v5213_v49 = vmul.f32 %v5036_v32, %v4877_v46  ;;  %v4156_v22 = vadd.f32 %v4060_v1, %v3878_v12 }
 0x361   : > { %v5274_v9 = vpack.c.bf16 %v5213_v49, %v5213_v49  ;;  %v4778_v56 = vadd.f32 %v4682_v54, %v4156_v22  ;;  %v3879_v54 = vadd.f32 %v3784_v43, %v13662_v38  ;;  %v3612_v49 = vsel %vm658_vm2, %v3602_v55, %v3611_v28 }
 0x362   : > { %v12913_v17 = vld [vmem:[#allocation2 + $0x4c] sm:$0xff]   ;;  %10527 = vmatmul.msk.bf16.gmra.mxu2 %vm425_vm1, %v3603_v31  ;;  %v4512_v22 = vor.u32 %v4510_v60, %v4508_v29  ;;  %v4516_v31 = vrot.slane %v4514_v23, 1  ;;  %v3614_v29 = vshrl.u32 %v11964_v20, 16  ;;  %v5056_v23 = vpop.permute.xlu1 %5055 }
 0x363   : > { %5322 = vst.msk [vmem:[#allocation2 + $0x54] sm:$0xf] %vm5246_vm5, %v5274_v9  ;;  %v4830_v42 = vadd.f32 %v14155_v40, %v4778_v56  ;;  %10689 = vmatmul.msk.bf16.gmra.mxu1 %vm5527_vm6, %v12913_v17 }
 0x364   : > { %v4687_v21 = vpop.f32.mrf.mxu0  ;;  %v4517_v55 = vsel %vm1261_vm3, %v4512_v22, %v4516_v31 }
 0x365   : > { %v4878_v7 = vmax.f32 %v4830_v42, 0.0  ;;  %v3787_v26 = vpop.f32.mrf.mxu2  ;;  %v3617_v42 = vshll.u32 %v11964_v20, 16  ;;  %v11965_v20 = vld [vmem:[%s13086_s12 + $0xc8] sm:$0xff]  }
 0x366   : > { %v4062_v62 = vpop.f32.mrf.mxu3  ;;  %v3880_v46 = vadd.f32 %v3787_v26, %v13679_v50  ;;  %v3616_v26 = vrot.slane %v3614_v29, 3 }
 0x367   : > { %v5214_v44 = vmul.f32 %v5041_v57, %v4878_v7  ;;  %v4157_v8 = vadd.f32 %v4062_v62, %v3879_v54  ;;  %10673 = vmatmul.msk.bf16.gmra.mxu0 %vm425_vm1, %v4509_v4  ;;  %v12523_v62 = vld [vmem:[%s13086_s12 + $0xb4] sm:$0xff]  }
 0x369   : > { %v5275_v16 = vpack.c.bf16 %v5214_v44, %v5214_v44  ;;  %v4779_v5 = vadd.f32 %v4684_v58, %v4157_v8  ;;  %v3619_v44 = vrot.slane %v3617_v42, 4  ;;  %v14320_v8 = vld [vmem:[%s13086_s12 + $0xc4] sm:$0xff] }
 0x36a   : > { %v4522_v60 = vshll.u32 %v14320_v8, 16 }
 0x36b   : > { %5323 = vst.msk [vmem:[#allocation2 + $0x58] sm:$0xf] %vm5246_vm5, %v5275_v16  ;;  %v4831_v53 = vadd.f32 %v14155_v40, %v4779_v5  ;;  %10552 = vmatmul.msk.bf16.gmra.mxu3 %vm425_vm1, %v12521_v34  ;;  %v3620_v5 = vor.u32 %v3619_v44, %v3616_v26 }
 0x36c   : > { %v4689_v38 = vpop.f32.mrf.mxu0 }
 0x36d   : > { %v4879_v32 = vmax.f32 %v4831_v53, 0.0  ;;  %v3789_v1 = vpop.f32.mrf.mxu2  ;;  %v4518_v53 = vshrl.u32 %v14297_v63, 16 }
 0x36e   : > { %v4065_v12 = vpop.f32.mrf.mxu3  ;;  %v3881_v13 = vadd.f32 %v3789_v1, %v13700_v51 }
 0x36f   : > { %v5215_v58 = vmul.f32 %v5046_v37, %v4879_v32  ;;  %v4158_v43 = vadd.f32 %v4065_v12, %v3880_v46 }
 0x370   : > { %v14308_v56 = vpop.f32.mrf.mxu1 }
 0x371   : > { %v5276_v48 = vpack.c.bf16 %v5215_v58, %v5215_v58  ;;  %v4780_v9 = vadd.f32 %v4687_v21, %v4158_v43  ;;  %v5051_v21 = vpop.permute.xlu0 %5050  ;;  %v3621_v58 = vsel %vm658_vm2, %v3611_v28, %v3620_v5  ;;  %v4520_v43 = vor.u32 %v4518_v53, %v4516_v31 }
 0x372   : > { %v12915_v3 = vld [vmem:[#allocation2 + $0x54] sm:$0xff]   ;;  %10528 = vmatmul.msk.bf16.gmra.mxu2 %vm425_vm1, %v3612_v49  ;;  %v4524_v49 = vrot.slane %v4522_v60, 1  ;;  %v3623_v31 = vshrl.u32 %v11965_v20, 16 }
 0x373   : > { %5324 = vst.msk [vmem:[#allocation2 + $0x5c] sm:$0xf] %vm5246_vm5, %v5276_v48  ;;  %v4832_v17 = vadd.f32 %v14155_v40, %v4780_v9  ;;  %10690 = vmatmul.msk.bf16.gmra.mxu1 %vm5527_vm6, %v12915_v3 }
 0x374   : > { %v4692_v50 = vpop.f32.mrf.mxu0  ;;  %v4525_v28 = vsel %vm1261_vm3, %v4520_v43, %v4524_v49 }
 0x375   : > { %v4880_v4 = vmax.f32 %v4832_v17, 0.0  ;;  %v3792_v57 = vpop.f32.mrf.mxu2  ;;  %v3626_v17 = vshll.u32 %v11965_v20, 16  ;;  %v11966_v20 = vld [vmem:[%s13086_s12 + $0xd0] sm:$0xff]  }
 0x376   : > { %v4067_v15 = vpop.f32.mrf.mxu3  ;;  %v3882_v32 = vadd.f32 %v3792_v57, %v13717_v25  ;;  %v3625_v57 = vrot.slane %v3623_v31, 3 }
 0x377   : > { %v5216_v7 = vmul.f32 %v5051_v21, %v4880_v4  ;;  %v4159_v54 = vadd.f32 %v4067_v15, %v3881_v13  ;;  %10674 = vmatmul.msk.bf16.gmra.mxu0 %vm425_vm1, %v4517_v55  ;;  %v12525_v15 = vld [vmem:[%s13086_s12 + $0xbc] sm:$0xff]  }
 0x378   : > { %v14322_v27 = vpop.f32.mrf.mxu1 }
 0x379   : > { %v5277_v34 = vpack.c.bf16 %v5216_v7, %v5216_v7  ;;  %v4781_v35 = vadd.f32 %v4689_v38, %v4159_v54  ;;  %v3628_v7 = vrot.slane %v3626_v17, 4  ;;  %v14343_v54 = vld [vmem:[%s13086_s12 + $0xcc] sm:$0xff]  ;;  %v5066_v60 = vpop.permute.xlu0 %5065 }
 0x37a   : > { %v4530_v53 = vshll.u32 %v14343_v54, 16 }
 0x37b   : > { %5325 = vst.msk [vmem:[#allocation2 + $0x60] sm:$0xf] %vm5246_vm5, %v5277_v34  ;;  %v4833_v16 = vadd.f32 %v14155_v40, %v4781_v35  ;;  %10553 = vmatmul.msk.bf16.gmra.mxu3 %vm425_vm1, %v12523_v62  ;;  %v3629_v35 = vor.u32 %v3628_v7, %v3625_v57 }
 0x37c   : > { %v4694_v51 = vpop.f32.mrf.mxu0 }
 0x37d   : > { %v4881_v37 = vmax.f32 %v4833_v16, 0.0  ;;  %v3794_v46 = vpop.f32.mrf.mxu2  ;;  %v4526_v16 = vshrl.u32 %v14320_v8, 16 }
 0x37e   : > { %v4070_v38 = vpop.f32.mrf.mxu3  ;;  %v3883_v29 = vadd.f32 %v3794_v46, %v13740_v47 }
 0x37f   : > { %v5217_v12 = vmul.f32 %v5056_v23, %v4881_v37  ;;  %v4160_v1 = vadd.f32 %v4070_v38, %v3882_v32 }
 0x380   : > { %v14331_v9 = vpop.f32.mrf.mxu1 }
 0x381   : > { %v5278_v22 = vpack.c.bf16 %v5217_v12, %v5217_v12  ;;  %v4782_v48 = vadd.f32 %v4692_v50, %v4160_v1  ;;  %v5061_v50 = vpop.permute.xlu2 %5060  ;;  %v3630_v12 = vsel %vm658_vm2, %v3620_v5, %v3629_v35  ;;  %v4528_v1 = vor.u32 %v4526_v16, %v4524_v49 }
 0x382   : > { %v12917_v63 = vld [vmem:[#allocation2 + $0x5c] sm:$0xff]   ;;  %10529 = vmatmul.msk.bf16.gmra.mxu2 %vm425_vm1, %v3621_v58  ;;  %v4532_v58 = vrot.slane %v4530_v53, 1  ;;  %v3632_v49 = vshrl.u32 %v11966_v20, 16 }
 0x383   : > { %5326 = vst.msk [vmem:[#allocation2 + $0x64] sm:$0xf] %vm5246_vm5, %v5278_v22  ;;  %v4834_v3 = vadd.f32 %v14155_v40, %v4782_v48  ;;  %10691 = vmatmul.msk.bf16.gmra.mxu1 %vm5527_vm6, %v12917_v63 }
 0x384   : > { %v4697_v25 = vpop.f32.mrf.mxu0  ;;  %v4533_v5 = vsel %vm1261_vm3, %v4528_v1, %v4532_v58 }
 0x385   : > { %v4882_v55 = vmax.f32 %v4834_v3, 0.0  ;;  %v3797_v21 = vpop.f32.mrf.mxu2  ;;  %v3635_v3 = vshll.u32 %v11966_v20, 16  ;;  %v16049_v20 = vld [vmem:[#allocation16_spill] sm:$0xff] }
 0x386   : > { %v4072_v42 = vpop.f32.mrf.mxu3  ;;  %v3884_v37 = vadd.f32 %v3797_v21, %v13757_v18  ;;  %v3634_v21 = vrot.slane %v3632_v49, 3 }
 0x387   : > { %v5218_v4 = vmul.f32 %v5061_v50, %v4882_v55  ;;  %v4161_v13 = vadd.f32 %v4072_v42, %v3883_v29  ;;  %10675 = vmatmul.msk.bf16.gmra.mxu0 %vm425_vm1, %v4525_v28  ;;  %v12527_v42 = vld [vmem:[%s13086_s12 + $0xc4] sm:$0xff]  }
 0x388   : > { %v14345_v44 = vpop.f32.mrf.mxu1 }
 0x389   : > { %v5279_v62 = vpack.c.bf16 %v5218_v4, %v5218_v4  ;;  %v4783_v26 = vadd.f32 %v4694_v51, %v4161_v13  ;;  %v3637_v4 = vrot.slane %v3635_v3, 4  ;;  %v14366_v13 = vld [vmem:[%s13086_s12 + $0xd4] sm:$0xff]  ;;  %v5076_v53 = vpop.permute.xlu2 %5075 }
 0x38a   : > { %v4538_v16 = vshll.u32 %v14366_v13, 16 }
 0x38b   : > { %5327 = vst.msk [vmem:[#allocation2 + $0x68] sm:$0xf] %vm5246_vm5, %v5279_v62  ;;  %v4835_v34 = vadd.f32 %v14155_v40, %v4783_v26  ;;  %10554 = vmatmul.msk.bf16.gmra.mxu3 %vm425_vm1, %v12525_v15  ;;  %v3638_v26 = vor.u32 %v3637_v4, %v3634_v21 }
 0x38c   : > { %v4699_v47 = vpop.f32.mrf.mxu0 }
 0x38d   : > { %v4883_v23 = vmax.f32 %v4835_v34, 0.0  ;;  %v3799_v32 = vpop.f32.mrf.mxu2  ;;  %v4534_v34 = vshrl.u32 %v14343_v54, 16 }
 0x38e   : > { %v4075_v51 = vpop.f32.mrf.mxu3  ;;  %v3885_v31 = vadd.f32 %v3799_v32, %v13784_v59 }
 0x38f   : > { %v5219_v38 = vmul.f32 %v5066_v60, %v4883_v23  ;;  %v4162_v46 = vadd.f32 %v4075_v51, %v3884_v37 }
 0x390   : > { %v14354_v48 = vpop.f32.mrf.mxu1 }
 0x391   : > { %v5280_v43 = vpack.c.bf16 %v5219_v38, %v5219_v38  ;;  %v4784_v22 = vadd.f32 %v4697_v25, %v4162_v46  ;;  %v5071_v25 = vpop.permute.xlu1 %5070  ;;  %v3639_v38 = vsel %vm658_vm2, %v3629_v35, %v3638_v26  ;;  %v4540_v46 = vrot.slane %v4538_v16, 1 }
 0x392   : > { %v12919_v8 = vld [vmem:[#allocation2 + $0x64] sm:$0xff]   ;;  %10530 = vmatmul.msk.bf16.gmra.mxu2 %vm425_vm1, %v3630_v12 }
 0x393   : > { %5328 = vst.msk [vmem:[#allocation2 + $0x6c] sm:$0xf] %vm5246_vm5, %v5280_v43  ;;  %v4836_v63 = vadd.f32 %v14155_v40, %v4784_v22  ;;  %10692 = vmatmul.msk.bf16.gmra.mxu1 %vm5527_vm6, %v12919_v8  ;;  %v14380_v22 = vld [vmem:[%s13086_s12 + $0xd8] sm:$0xff]   ;;  %v3237_v8 = vadd.f32 %v16049_v20, %v13832_v33 }
 0x394   : > { %v4702_v18 = vpop.f32.mrf.mxu0  ;;  %v3641_v33 = vshrl.u32 %v14380_v22, 16 }
 0x395   : > { %v4884_v28 = vmax.f32 %v4836_v63, 0.0  ;;  %v3802_v50 = vpop.f32.mrf.mxu2 }
 0x396   : > { %v4077_v17 = vpop.f32.mrf.mxu3  ;;  %v3886_v23 = vadd.f32 %v3802_v50, %v13806_v24  ;;  %v14388_v24 = vld [vmem:[%s15992_s2] ss:$0 sm:$0xff]  ;;  %v12529_v50 = vld [vmem:[%s13086_s12 + $0xcc] sm:$0xff]  }
 0x397   : > { %v5220_v55 = vmul.f32 %v5071_v25, %v4884_v28  ;;  %v4163_v29 = vadd.f32 %v4077_v17, %v3885_v31  ;;  %10676 = vmatmul.msk.bf16.gmra.mxu0 %vm425_vm1, %v4533_v5  ;;  %v5081_v5 = vpop.permute.xlu0 %5080 }
 0x398   : > { %v14368_v7 = vpop.f32.mrf.mxu1 }
 0x399   : > { %v5281_v15 = vpack.c.bf16 %v5220_v55, %v5220_v55  ;;  %v4785_v57 = vadd.f32 %v4699_v47, %v4163_v29  ;;  %v3643_v55 = vrot.slane %v3641_v33, 3 }
 0x39b   : > { %5329 = vst.msk [vmem:[#allocation2 + $0x70] sm:$0xf] %vm5246_vm5, %v5281_v15  ;;  %v4837_v62 = vadd.f32 %v14155_v40, %v4785_v57  ;;  %10555 = vmatmul.msk.bf16.gmra.mxu3 %vm425_vm1, %v12527_v42  ;;  %v4536_v40 = vor.u32 %v4534_v34, %v4532_v58  ;;  %v14399_v42 = vld [vmem:[%s13086_s12 + $0xdc] sm:$0xff] }
 0x39c   : > { %v4704_v59 = vpop.f32.mrf.mxu0  ;;  %v3308_v57 = vld [vmem:[%s13086_s12 + $0xe0] sm:$0xf] }
 0x39d   : > { %v4885_v60 = vmax.f32 %v4837_v62, 0.0  ;;  %v3804_v37 = vpop.f32.mrf.mxu2  ;;  %v4541_v63 = vsel %vm1261_vm3, %v4536_v40, %v4540_v46 }
 0x39e   : > { %v4080_v47 = vpop.f32.mrf.mxu3  ;;  %v3887_v3 = vadd.f32 %v3804_v37, %v3237_v8 }
 0x39f   : > { %v5221_v51 = vmul.f32 %v5076_v53, %v4885_v60  ;;  %v4164_v32 = vadd.f32 %v4080_v47, %v3886_v23  ;;  %v4542_v53 = vshrl.u32 %v14366_v13, 16  ;;  %v4546_v60 = vshll.u32 %v14399_v42, 16  ;;  %v5086_v47 = vpop.permute.xlu1 %5085 }
 0x3a0   : > { %v14377_v43 = vpop.f32.mrf.mxu1  ;;  %v14409_v23 = vunpack.c.l.b16 %v3308_v57 }
 0x3a1   : > { %v5282_v12 = vpack.c.bf16 %v5221_v51, %v5221_v51  ;;  %v4786_v1 = vadd.f32 %v4702_v18, %v4164_v32  ;;  %v3644_v18 = vshll.u32 %v14380_v22, 16 }
 0x3a2   : > { %v12921_v54 = vld [vmem:[#allocation2 + $0x6c] sm:$0xff]   ;;  %10531 = vmatmul.msk.bf16.gmra.mxu2 %vm425_vm1, %v3639_v38  ;;  %v3433_v13 = vpack.c.b16 %v14409_v23, %v14409_v23 }
 0x3a3   : > { %5330 = vst.msk [vmem:[#allocation2 + $0x74] sm:$0xf] %vm5246_vm5, %v5282_v12  ;;  %v4838_v35 = vadd.f32 %v14388_v24, %v4786_v1  ;;  %10693 = vmatmul.msk.bf16.gmra.mxu1 %vm5527_vm6, %v12921_v54  ;;  %v3646_v29 = vrot.slane %v3644_v18, 4  ;;  %v4544_v1 = vor.u32 %v4542_v53, %v4540_v46  ;;  %v4548_v54 = vrot.slane %v4546_v60, 1  ;;  %v16050_v18 = vld [vmem:[#allocation18_spill] sm:$0xff] }
 0x3a4   : > { %v4707_v58 = vpop.f32.mrf.mxu0 }
 0x3a5   : > { %v4886_v49 = vmax.f32 %v4838_v35, 0.0  ;;  %v3807_v28 = vpop.f32.mrf.mxu2  ;;  %v3647_v16 = vor.u32 %v3646_v29, %v3643_v55  ;;  %v4549_v46 = vsel %vm1261_vm3, %v4544_v1, %v4548_v54 }
 0x3a6   : > { %v4082_v25 = vpop.f32.mrf.mxu3  ;;  %v3888_v37 = vadd.f32 %v3807_v28, %v13859_v19  ;;  %v5091_v28 = vpop.permute.xlu2 %5090 }
 0x3a7   : > { %v5222_v31 = vmul.f32 %v5081_v5, %v4886_v49  ;;  %v4165_v17 = vadd.f32 %v4082_v25, %v3887_v3  ;;  %10677 = vmatmul.msk.bf16.gmra.mxu0 %vm425_vm1, %v4541_v63  ;;  %v3648_v12 = vsel %vm658_vm2, %v3638_v26, %v3647_v16  ;;  %v4236_v63 = vld [vmem:[%s13086_s12 + $0xe4] sm:$0x1]  ;;  %v3653_v3 = vshll.u32 %v3433_v13, 16 }
 0x3a8   : > { %v14401_v15 = vpop.f32.mrf.mxu1  ;;  %v16051_v5 = vld [vmem:[#allocation17_spill] sm:$0xff]  ;;  %v4336_v25 = vunpack.c.l.b16 %v4236_v63 }
 0x3a9   : > { %v5283_v21 = vpack.c.bf16 %v5222_v31, %v5222_v31  ;;  %v4787_v4 = vadd.f32 %v4704_v59, %v4165_v17  ;;  %v3239_v19 = vadd.f32 %v16051_v5, %v16050_v18 }
 0x3aa   : > { %v4361_v53 = vpack.c.b16 %v4336_v25, %v4336_v25 }
 0x3ab   : > { %5331 = vst.msk [vmem:[#allocation2 + $0x78] sm:$0xf] %vm5246_vm5, %v5283_v21  ;;  %v4839_v62 = vadd.f32 %v14388_v24, %v4787_v4  ;;  %10556 = vmatmul.msk.bf16.gmra.mxu3 %vm425_vm1, %v12529_v50  ;;  %v12530_v4 = vld [vmem:[%s13086_s12 + $0xd4] sm:$0xff]  }
 0x3ac   : > { %v4709_v34 = vpop.f32.mrf.mxu0 }
 0x3ad   : > { %v4887_v59 = vmax.f32 %v4839_v62, 0.0  ;;  %v3809_v32 = vpop.f32.mrf.mxu2  ;;  %v3655_v62 = vrot.slane %v3653_v3, 4 }
 0x3ae   : > { %v4085_v51 = vpop.f32.mrf.mxu3  ;;  %v3889_v17 = vadd.f32 %v3809_v32, %v3239_v19 }
 0x3af   : > { %v5223_v38 = vmul.f32 %v5086_v47, %v4887_v59  ;;  %v4166_v40 = vadd.f32 %v4085_v51, %v3888_v37  ;;  %v5355_v37 = vld [vmem:[#allocation2 + $0x8] sm:$0x8] }
 0x3b0   : > { %v14415_v35 = vpop.f32.mrf.mxu1  ;;  %v5734_v1 = vunpack.c.l.b16 %v5355_v37  ;;  %v12944_v37 = vld [vmem:[#allocation2 + $0x1c] sm:$0xff]  }
 0x3b1   : > { %v5284_v20 = vpack.c.bf16 %v5223_v38, %v5223_v38  ;;  %v4788_v8 = vadd.f32 %v4707_v58, %v4166_v40  ;;  %v3650_v58 = vshrl.u32 %v3433_v13, 16  ;;  %v4550_v40 = vshrl.u32 %v14399_v42, 16  ;;  %v5096_v13 = vpop.permute.xlu0 %5095 }
 0x3b2   : > { %v12923_v33 = vld [vmem:[#allocation2 + $0x74] sm:$0xff]   ;;  %10532 = vmatmul.msk.bf16.gmra.mxu2 %vm425_vm1, %v3648_v12  ;;  %v4554_v12 = vshll.u32 %v4361_v53, 16 }
 0x3b3   : > { %5332 = vst.msk [vmem:[#allocation2 + $0x7c] sm:$0xf] %vm5246_vm5, %v5284_v20  ;;  %v4840_v49 = vadd.f32 %v14388_v24, %v4788_v8  ;;  %10694 = vmatmul.msk.bf16.gmra.mxu1 %vm5527_vm6, %v12923_v33  ;;  %v3652_v57 = vrot.slane %v3650_v58, 3  ;;  %v4552_v19 = vor.u32 %v4550_v40, %v4548_v54  ;;  %v13005_v53 = vld [vmem:[#allocation2 + $0x10] sm:$0xff]  }
 0x3b4   : > { %v4712_v26 = vpop.f32.mrf.mxu0 }
 0x3b5   : > { %v4888_v31 = vmax.f32 %v4840_v49, 0.0  ;;  %v3812_v55 = vpop.f32.mrf.mxu2  ;;  %v3656_v38 = vor.u32 %v3655_v62, %v3652_v57  ;;  %v4556_v49 = vrot.slane %v4554_v12, 1 }
 0x3b6   : > { %v4087_v50 = vpop.f32.mrf.mxu3  ;;  %v3890_v8 = vadd.f32 %v3812_v55, %v13911_v11  ;;  %v5101_v55 = vpop.permute.xlu1 %5100 }
 0x3b7   : > { %v5224_v29 = vmul.f32 %v5091_v28, %v4888_v31  ;;  %v4167_v21 = vadd.f32 %v4087_v50, %v3889_v17  ;;  %10678 = vmatmul.msk.bf16.gmra.mxu0 %vm425_vm1, %v4549_v46  ;;  %v3657_v5 = vsel %vm658_vm2, %v3647_v16, %v3656_v38  ;;  %v16052_v46 = vunpack.c.l.b16 %v14099_v36  ;;  %v16053_v31 = vld [vmem:[#allocation19_spill] sm:$0xff] }
 0x3b8   : > { %v14427_v59 = vpop.f32.mrf.mxu1  ;;  %v3241_v17 = vadd.f32 %v16053_v31, %v13934_v2  ;;  %v11617_v16 = vunpack.c.h.b16 %v14380_v22  ;;  %v4557_v36 = vsel %vm1261_vm3, %v4552_v19, %v4556_v49  ;;  %v12942_v2 = vld [vmem:[#allocation2 + $0x14] sm:$0xf0]  }
 0x3b9   : > { %v5285_v60 = vpack.c.bf16 %v5224_v29, %v5224_v29  ;;  %v4789_v47 = vadd.f32 %v4709_v34, %v4167_v21  ;;  %v5735_v58 = vpack.c.b16 %v16052_v46, %v5734_v1 }
 0x3ba   : > { %v3935_v38 = vpack.c.b16 %v14409_v23, %v11617_v16 }
 0x3bb   : > { %5333 = vst.msk [vmem:[#allocation2 + $0x80] sm:$0xf] %vm5246_vm5, %v5285_v60  ;;  %v4841_v51 = vadd.f32 %v14388_v24, %v4789_v47  ;;  %10557 = vmatmul.msk.bf16.gmra.mxu3 %vm425_vm1, %v12530_v4  ;;  %v5764_v50 = vshll.u32 %v5735_v58, 16  ;;  %v12643_v4 = vld [vmem:[#allocation2 + $0x14] sm:$0x8]  ;;  %v5769_v60 = vshrl.u32 %v13005_v53, 16 }
 0x3bc   : > { %v4714_v32 = vpop.f32.mrf.mxu0  ;;  %v5772_v47 = vshll.u32 %v13005_v53, 16  ;;  %v12644_v1 = vor.u32 %v12942_v2, %v12643_v4 }
 0x3bd   : > { %v4889_v20 = vmax.f32 %v4841_v51, 0.0  ;;  %v3814_v63 = vpop.f32.mrf.mxu2  ;;  %v5766_v12 = vrot.slane %v5764_v50, 4 }
 0x3be   : > { %v4090_v34 = vpop.f32.mrf.mxu3  ;;  %v3891_v21 = vadd.f32 %v3814_v63, %v3241_v17  ;;  %v5771_v63 = vrot.slane %v5769_v60, 3  ;;  %v6985_v46 = vshrl.u32 %v12644_v1, 16 }
 0x3bf   : > { %v5225_v33 = vmul.f32 %v5096_v13, %v4889_v20  ;;  %v4168_v18 = vadd.f32 %v4090_v34, %v3890_v8  ;;  %v11266_v34 = vld [vmem:[#allocation2 + $0xc] sm:$0xff] }
 0x3c0   : > { %v14437_v42 = vpop.f32.mrf.mxu1  ;;  %v6365_v31 = vshll.u32 %v11266_v34, 16  ;;  %v6363_v2 = vshrl.u32 %v11266_v34, 16 }
 0x3c1   : > { %v5286_v3 = vpack.c.bf16 %v5225_v33, %v5225_v33  ;;  %v4790_v25 = vadd.f32 %v4712_v26, %v4168_v18  ;;  %v5761_v26 = vshrl.u32 %v5735_v58, 16  ;;  %v5774_v33 = vrot.slane %v5772_v47, 4 }
 0x3c2   : > { %v12925_v28 = vld [vmem:[#allocation2 + $0x7c] sm:$0xff]   ;;  %10533 = vmatmul.msk.bf16.gmra.mxu2 %vm425_vm1, %v3657_v5  ;;  %v6993_v18 = vshrl.u32 %v12944_v37, 16  ;;  %v6996_v5 = vshll.u32 %v12944_v37, 16  ;;  %v6988_v58 = vshll.u32 %v12644_v1, 16 }
 0x3c3   : > { %5334 = vst.msk [vmem:[#allocation2 + $0x84] sm:$0xf] %vm5246_vm5, %v5286_v3  ;;  %v4842_v11 = vadd.f32 %v14388_v24, %v4790_v25  ;;  %10695 = vmatmul.msk.bf16.gmra.mxu1 %vm5527_vm6, %v12925_v28  ;;  %v5763_v40 = vrot.slane %v5761_v26, 3  ;;  %v5106_v3 = vpop.permute.xlu2 %5105  ;;  %v14455_v28 = vld [vmem:[#allocation2 + $0x14] sm:$0xff]  ;;  %v14457_v16 = vor.u32 %v5774_v33, %v5771_v63 }
 0x3c4   : > { %v4717_v54 = vpop.f32.mrf.mxu0  ;;  %v6998_v26 = vrot.slane %v6996_v5, 4  ;;  %v6990_v4 = vrot.slane %v6988_v58, 4  ;;  %v6370_v60 = vshll.u32 %v14455_v28, 16  ;;  %v12946_v5 = vld [vmem:[#allocation2 + $0x24] sm:$0xff]  }
 0x3c5   : > { %v4890_v29 = vmax.f32 %v4842_v11, 0.0  ;;  %v3817_v62 = vpop.f32.mrf.mxu2  ;;  %v5767_v23 = vor.u32 %v5766_v12, %v5763_v40  ;;  %v5111_v12 = vpop.permute.xlu0 %5110 }
 0x3c6   : > { %v4092_v57 = vpop.f32.mrf.mxu3  ;;  %v6372_v34 = vrot.slane %v6370_v60, 1 }
 0x3c7   : > { %v5226_v51 = vmul.f32 %v5101_v55, %v4890_v29  ;;  %v4169_v22 = vadd.f32 %v4092_v57, %v3891_v21  ;;  %10679 = vmatmul.msk.bf16.gmra.mxu0 %vm425_vm1, %v4557_v36  ;;  %v6995_v36 = vrot.slane %v6993_v18, 3  ;;  %v5776_v29 = vsel %vm658_vm2, %v5767_v23, %v14457_v16 }
 0x3c8   : > { %v14449_v8 = vpop.f32.mrf.mxu1  ;;  %v6987_v21 = vrot.slane %v6985_v46, 3 }
 0x3c9   : > { %v5287_v13 = vpack.c.bf16 %v5226_v51, %v5226_v51  ;;  %v4791_v20 = vadd.f32 %v4714_v32, %v4169_v22  ;;  %v3892_v32 = vadd.f32 %v3817_v62, %v13954_v41  ;;  %v6367_v62 = vrot.slane %v6365_v31, 1 }
 0x3ca   : > { %v14464_v37 = vor.u32 %v6998_v26, %v6995_v36  ;;  %v3243_v51 = vadd.f32 %v13952_v30, %v13973_v6  ;;  %v6991_v40 = vor.u32 %v6990_v4, %v6987_v21 }
 0x3cb   : > { %5335 = vst.msk [vmem:[#allocation2 + $0x88] sm:$0xf] %vm5246_vm5, %v5287_v13  ;;  %v4843_v19 = vadd.f32 %v14388_v24, %v4791_v20  ;;  %10558 = vmatmul.msk.bf16.gmra.mxu3 %vm425_vm1, %v3935_v38  ;;  %v14471_v38 = vld [vmem:[#allocation2 + $0x18] sm:$0xff]   ;;  %v6368_v20 = vor.u32 %v6367_v62, %v6363_v2 }
 0x3cc   : > { %v4719_v49 = vpop.f32.mrf.mxu0  ;;  %v7000_v30 = vsel %vm658_vm2, %v6991_v40, %v14464_v37  ;;  %v5778_v33 = vshrl.u32 %v14471_v38, 16  ;;  %v5781_v18 = vshll.u32 %v14471_v38, 16 }
 0x3cd   : > { %v4891_v25 = vmax.f32 %v4843_v19, 0.0  ;;  %v3819_v11 = vpop.f32.mrf.mxu2 }
 0x3ce   : > { %v4095_v17 = vpop.f32.mrf.mxu3  ;;  %v3893_v13 = vadd.f32 %v3819_v11, %v3243_v51  ;;  %v5783_v31 = vrot.slane %v5781_v18, 4  ;;  %v7005_v11 = vshll.u32 %v12946_v5, 16 }
 0x3cf   : > { %v5227_v50 = vmul.f32 %v5106_v3, %v4891_v25  ;;  %v4170_v55 = vadd.f32 %v4095_v17, %v3892_v32  ;;  %v6373_v25 = vsel %vm1261_vm3, %v6368_v20, %v6372_v34  ;;  %v5780_v32 = vrot.slane %v5778_v33, 3 }
 0x3d0   : > { %v14461_v41 = vpop.f32.mrf.mxu1  ;;  %v7002_v17 = vshrl.u32 %v12946_v5, 16 }
 0x3d1   : > { %v5288_v57 = vpack.c.bf16 %v5227_v50, %v5227_v50  ;;  %v4792_v53 = vadd.f32 %v4717_v54, %v4170_v55  ;;  %v5116_v50 = vpop.permute.xlu1 %5115  ;;  %v14488_v2 = vor.u32 %v5783_v31, %v5780_v32 }
 0x3d2   : > { %v12927_v47 = vld [vmem:[#allocation2 + $0x84] sm:$0xff]   ;;  %10705 = vmatmul.msk.bf16.vlgmr.msrb.gmra.mxu2 %vm5527_vm6, %v5776_v29 }
 0x3d3   : > { %5336 = vst.msk [vmem:[#allocation2 + $0x8c] sm:$0xf] %vm5246_vm5, %v5288_v57  ;;  %v4844_v22 = vadd.f32 %v14388_v24, %v4792_v53  ;;  %10696 = vmatmul.msk.bf16.gmra.mxu1 %vm5527_vm6, %v12927_v47  ;;  %v7004_v57 = vrot.slane %v7002_v17, 3  ;;  %v7007_v53 = vrot.slane %v7005_v11, 4 }
 0x3d4   : > { %v4722_v54 = vpop.f32.mrf.mxu0 }
 0x3d5   : > { %v4892_v1 = vmax.f32 %v4844_v22, 0.0  ;;  %v3822_v6 = vpop.f32.mrf.mxu2 }
 0x3d6   : > { %v4097_v63 = vpop.f32.mrf.mxu3  ;;  %v3894_v29 = vadd.f32 %v3822_v6, %v13988_v45  ;;  %v5785_v45 = vsel %vm658_vm2, %v14457_v16, %v14488_v2  ;;  %v6374_v16 = vshrl.u32 %v14455_v28, 16 }
 0x3d7   : > { %v5228_v19 = vmul.f32 %v5111_v12, %v4892_v1  ;;  %v4171_v23 = vadd.f32 %v4097_v63, %v3893_v13  ;;  %10851 = vmatmul.msk.bf16.vlgmr.msrb.gmra.mxu0 %vm5527_vm6, %v7000_v30  ;;  %v14496_v1 = vor.u32 %v7007_v53, %v7004_v57  ;;  %v3245_v13 = vadd.f32 %v13986_v14, %v14002_v10  ;;  %v5121_v30 = vpop.permute.xlu2 %5120 }
 0x3d8   : > { %v14479_v3 = vpop.f32.mrf.mxu1  ;;  %v6376_v32 = vor.u32 %v6374_v16, %v6372_v34  ;;  %v16054_v16 = vld [vmem:[#allocation4_spill] sm:$0xff] }
 0x3d9   : > { %v5289_v46 = vpack.c.bf16 %v5228_v19, %v5228_v19  ;;  %v4793_v58 = vadd.f32 %v4719_v49, %v4171_v23  ;;  %v14486_v49 = vld [vmem:[#allocation2 + $0x1c] sm:$0xff]  ;;  %v7009_v14 = vsel %vm658_vm2, %v14464_v37, %v14496_v1 }
 0x3da   : > { %v6378_v40 = vshll.u32 %v14486_v49, 16 }
 0x3db   : > { %5337 = vst.msk [vmem:[#allocation2 + $0x90] sm:$0xf] %vm5246_vm5, %v5289_v46  ;;  %v4845_v36 = vadd.f32 %v14388_v24, %v4793_v58  ;;  %10826 = vmatmul.msk.bf16.vlgmr.msrb.gmra.mxu3 %vm5527_vm6, %v6373_v25  ;;  %v12948_v46 = vld [vmem:[#allocation2 + $0x2c] sm:$0xff]  }
 0x3dc   : > { %v4724_v26 = vpop.f32.mrf.mxu0  ;;  %v6380_v18 = vrot.slane %v6378_v40, 1  ;;  %v7011_v37 = vshrl.u32 %v12948_v46, 16 }
 0x3dd   : > { %v4893_v55 = vmax.f32 %v4845_v36, 0.0  ;;  %v3824_v4 = vpop.f32.mrf.mxu2 }
 0x3de   : > { %v4100_v21 = vpop.f32.mrf.mxu3  ;;  %v3895_v33 = vadd.f32 %v3824_v4, %v3245_v13  ;;  %v6381_v11 = vsel %vm1261_vm3, %v6376_v32, %v6380_v18  ;;  %v5126_v4 = vpop.permute.xlu0 %5125 }
 0x3df   : > { %v5229_v62 = vmul.f32 %v5116_v50, %v4893_v55  ;;  %v4172_v60 = vadd.f32 %v4100_v21, %v3894_v29  ;;  %v7014_v55 = vshll.u32 %v12948_v46, 16 }
 0x3e0   : > { %v14490_v22 = vpop.f32.mrf.mxu1 }
 0x3e1   : > { %v5290_v47 = vpack.c.bf16 %v5229_v62, %v5229_v62  ;;  %v4794_v51 = vadd.f32 %v4722_v54, %v4172_v60  ;;  %v14503_v54 = vld [vmem:[#allocation2 + $0x20] sm:$0xff]  }
 0x3e2   : > { %v12929_v12 = vld [vmem:[#allocation2 + $0x8c] sm:$0xff]   ;;  %10706 = vmatmul.msk.bf16.gmra.mxu2 %vm5527_vm6, %v5785_v45  ;;  %v5787_v19 = vshrl.u32 %v14503_v54, 16  ;;  %v5790_v23 = vshll.u32 %v14503_v54, 16 }
 0x3e3   : > { %5338 = vst.msk [vmem:[#allocation2 + $0x94] sm:$0xf] %vm5246_vm5, %v5290_v47  ;;  %v4846_v20 = vadd.f32 %v14388_v24, %v4794_v51  ;;  %10697 = vmatmul.msk.bf16.gmra.mxu1 %vm5527_vm6, %v12929_v12  ;;  %v7013_v47 = vrot.slane %v7011_v37, 3  ;;  %v7016_v51 = vrot.slane %v7014_v55, 4 }
 0x3e4   : > { %v4727_v63 = vpop.f32.mrf.mxu0  ;;  %v5789_v36 = vrot.slane %v5787_v19, 3  ;;  %v5792_v50 = vrot.slane %v5790_v23, 4  ;;  %v5131_v23 = vpop.permute.xlu1 %5130 }
 0x3e5   : > { %v4894_v6 = vmax.f32 %v4846_v20, 0.0  ;;  %v3827_v10 = vpop.f32.mrf.mxu2 }
 0x3e6   : > { %v4102_v5 = vpop.f32.mrf.mxu3  ;;  %v3896_v34 = vadd.f32 %v3827_v10, %v14013_v0  ;;  %v14522_v60 = vor.u32 %v5792_v50, %v5789_v36  ;;  %v12950_v50 = vld [vmem:[#allocation2 + $0x34] sm:$0xff]  }
 0x3e7   : > { %v5230_v58 = vmul.f32 %v5121_v30, %v4894_v6  ;;  %v4173_v25 = vadd.f32 %v4102_v5, %v3895_v33  ;;  %10852 = vmatmul.msk.bf16.gmra.mxu0 %vm5527_vm6, %v7009_v14  ;;  %v14530_v33 = vor.u32 %v7016_v51, %v7013_v47  ;;  %v16055_v5 = vld [vmem:[#allocation3_spill] sm:$0xff]  ;;  %v7023_v47 = vshll.u32 %v12950_v50, 16 }
 0x3e8   : > { %v14513_v28 = vpop.f32.mrf.mxu1  ;;  %v5794_v0 = vsel %vm658_vm2, %v14488_v2, %v14522_v60  ;;  %v3247_v14 = vadd.f32 %v16055_v5, %v16054_v16  ;;  %v6382_v2 = vshrl.u32 %v14486_v49, 16 }
 0x3e9   : > { %v5291_v31 = vpack.c.bf16 %v5230_v58, %v5230_v58  ;;  %v4795_v17 = vadd.f32 %v4724_v26, %v4173_v25  ;;  %v14520_v26 = vld [vmem:[#allocation2 + $0x24] sm:$0xff]  ;;  %v7025_v5 = vrot.slane %v7023_v47, 4 }
 0x3ea   : > { %v6386_v30 = vshll.u32 %v14520_v26, 16 }
 0x3eb   : > { %5339 = vst.msk [vmem:[#allocation2 + $0x98] sm:$0xf] %vm5246_vm5, %v5291_v31  ;;  %v4847_v29 = vadd.f32 %v14388_v24, %v4795_v17  ;;  %10827 = vmatmul.msk.bf16.gmra.mxu3 %vm5527_vm6, %v6381_v11  ;;  %v7018_v31 = vsel %vm658_vm2, %v14496_v1, %v14530_v33  ;;  %v7020_v1 = vshrl.u32 %v12950_v50, 16 }
 0x3ec   : > { %v4729_v21 = vpop.f32.mrf.mxu0  ;;  %v6388_v25 = vrot.slane %v6386_v30, 1 }
 0x3ed   : > { %v4895_v57 = vmax.f32 %v4847_v29, 0.0  ;;  %v3829_v62 = vpop.f32.mrf.mxu2  ;;  %v6384_v29 = vor.u32 %v6382_v2, %v6380_v18  ;;  %v16056_v18 = vld [vmem:[#allocation20_spill] sm:$0xff]  ;;  %v7022_v16 = vrot.slane %v7020_v1, 3 }
 0x3ee   : > { %v4105_v53 = vpop.f32.mrf.mxu3  ;;  %v3897_v58 = vadd.f32 %v3829_v62, %v3247_v14 }
 0x3ef   : > { %v5231_v40 = vmul.f32 %v5126_v4, %v4895_v57  ;;  %v4174_v12 = vadd.f32 %v4105_v53, %v3896_v34  ;;  %v6389_v34 = vsel %vm1261_vm3, %v6384_v29, %v6388_v25  ;;  %v5141_v29 = vpop.permute.xlu0 %5140 }
 0x3f0   : > { %v14524_v20 = vpop.f32.mrf.mxu1 }
 0x3f1   : > { %v5292_v45 = vpack.c.bf16 %v5231_v40, %v5231_v40  ;;  %v4796_v13 = vadd.f32 %v4727_v63, %v4174_v12  ;;  %v14537_v63 = vld [vmem:[#allocation2 + $0x28] sm:$0xff]   ;;  %v5136_v12 = vpop.permute.xlu2 %5135 }
 0x3f2   : > { %v12931_v6 = vld [vmem:[#allocation2 + $0x94] sm:$0xff]   ;;  %10707 = vmatmul.msk.bf16.gmra.mxu2 %vm5527_vm6, %v5794_v0  ;;  %v5796_v11 = vshrl.u32 %v14537_v63, 16  ;;  %v5799_v36 = vshll.u32 %v14537_v63, 16 }
 0x3f3   : > { %5340 = vst.msk [vmem:[#allocation2 + $0x9c] sm:$0xf] %vm5246_vm5, %v5292_v45  ;;  %v4848_v10 = vadd.f32 %v14388_v24, %v4796_v13  ;;  %10698 = vmatmul.msk.bf16.gmra.mxu1 %vm5527_vm6, %v12931_v6 }
 0x3f4   : > { %v4732_v19 = vpop.f32.mrf.mxu0  ;;  %v5798_v53 = vrot.slane %v5796_v11, 3  ;;  %v5801_v62 = vrot.slane %v5799_v36, 4  ;;  %v16057_v11 = vld [vmem:[#allocation6_spill] sm:$0xff]  ;;  %v16058_v36 = vld [vmem:[#allocation5_spill] sm:$0xff] }
 0x3f5   : > { %v4896_v46 = vmax.f32 %v4848_v10, 0.0  ;;  %v3832_v17 = vpop.f32.mrf.mxu2  ;;  %v3249_v50 = vadd.f32 %v16058_v36, %v16057_v11 }
 0x3f6   : > { %v4107_v32 = vpop.f32.mrf.mxu3  ;;  %v3898_v13 = vadd.f32 %v3832_v17, %v16056_v18  ;;  %v14556_v0 = vor.u32 %v5801_v62, %v5798_v53  ;;  %v14564_v17 = vor.u32 %v7025_v5, %v7022_v16 }
 0x3f7   : > { %v5232_v37 = vmul.f32 %v5131_v23, %v4896_v46  ;;  %v4175_v55 = vadd.f32 %v4107_v32, %v3897_v58  ;;  %10853 = vmatmul.msk.bf16.gmra.mxu0 %vm5527_vm6, %v7018_v31 }
 0x3f8   : > { %v14547_v49 = vpop.f32.mrf.mxu1  ;;  %v5803_v31 = vsel %vm658_vm2, %v14522_v60, %v14556_v0  ;;  %v6390_v60 = vshrl.u32 %v14520_v26, 16  ;;  %v7027_v62 = vsel %vm658_vm2, %v14530_v33, %v14564_v17 }
 0x3f9   : > { %v5293_v4 = vpack.c.bf16 %v5232_v37, %v5232_v37  ;;  %v4797_v57 = vadd.f32 %v4729_v21, %v4175_v55  ;;  %v14554_v21 = vld [vmem:[#allocation2 + $0x2c] sm:$0xff] }
 0x3fa   : > { %v6394_v2 = vshll.u32 %v14554_v21, 16 }
 0x3fb   : > { %5341 = vst.msk [vmem:[#allocation2 + $0xa0] sm:$0xf] %vm5246_vm5, %v5293_v4  ;;  %v4849_v51 = vadd.f32 %v14388_v24, %v4797_v57  ;;  %10828 = vmatmul.msk.bf16.gmra.mxu3 %vm5527_vm6, %v6389_v34 }
 0x3fc   : > { %v4734_v40 = vpop.f32.mrf.mxu0  ;;  %v6396_v34 = vrot.slane %v6394_v2, 1  ;;  %v5146_v2 = vpop.permute.xlu1 %5145 }
 0x3fd   : > { %v4897_v45 = vmax.f32 %v4849_v51, 0.0  ;;  %v3834_v6 = vpop.f32.mrf.mxu2 }
 0x3fe   : > { %v4110_v30 = vpop.f32.mrf.mxu3  ;;  %v3899_v57 = vadd.f32 %v3834_v6, %v3249_v50 }
 0x3ff   : > { %v5233_v14 = vmul.f32 %v5136_v12, %v4897_v45  ;;  %v4176_v10 = vadd.f32 %v4110_v30, %v3898_v13  ;;  %v12952_v12 = vld [vmem:[#allocation2 + $0x3c] sm:$0xff]   ;;  %v6392_v13 = vor.u32 %v6390_v60, %v6388_v25 }
 0x400   : > { %v14558_v58 = vpop.f32.mrf.mxu1  ;;  %v7029_v33 = vshrl.u32 %v12952_v12, 16  ;;  %v16060_v25 = vld [vmem:[#allocation21_spill] sm:$0xff] }
 0x401   : > { %v5294_v23 = vpack.c.bf16 %v5233_v14, %v5233_v14  ;;  %v4798_v46 = vadd.f32 %v4732_v19, %v4176_v10  ;;  %v14571_v19 = vld [vmem:[#allocation2 + $0x30] sm:$0xff]   ;;  %v6397_v16 = vsel %vm1261_vm3, %v6392_v13, %v6396_v34  ;;  %v7032_v10 = vshll.u32 %v12952_v12, 16 }
 0x402   : > { %v12933_v32 = vld [vmem:[#allocation2 + $0x9c] sm:$0xff]   ;;  %10708 = vmatmul.msk.bf16.gmra.mxu2 %vm5527_vm6, %v5803_v31  ;;  %v5805_v47 = vshrl.u32 %v14571_v19, 16  ;;  %v5808_v51 = vshll.u32 %v14571_v19, 16 }
 0x403   : > { %5342 = vst.msk [vmem:[#allocation2 + $0xa4] sm:$0xf] %vm5246_vm5, %v5294_v23  ;;  %v4850_v37 = vadd.f32 %v14388_v24, %v4798_v46  ;;  %10699 = vmatmul.msk.bf16.gmra.mxu1 %vm5527_vm6, %v12933_v32 }
 0x404   : > { %v4737_v55 = vpop.f32.mrf.mxu0  ;;  %v5807_v5 = vrot.slane %v5805_v47, 3  ;;  %v5810_v14 = vrot.slane %v5808_v51, 4 }
 0x405   : > { %v4898_v4 = vmax.f32 %v4850_v37, 0.0  ;;  %v3837_v1 = vpop.f32.mrf.mxu2  ;;  %v7031_v37 = vrot.slane %v7029_v33, 3 }
 0x406   : > { %v4112_v53 = vpop.f32.mrf.mxu3  ;;  %v3900_v31 = vadd.f32 %v3837_v1, %v16060_v25  ;;  %v14590_v50 = vor.u32 %v5810_v14, %v5807_v5 }
 0x407   : > { %v5234_v45 = vmul.f32 %v5141_v29, %v4898_v4  ;;  %v4177_v18 = vadd.f32 %v4112_v53, %v3899_v57  ;;  %10854 = vmatmul.msk.bf16.gmra.mxu0 %vm5527_vm6, %v7027_v62  ;;  %v7034_v29 = vrot.slane %v7032_v10, 4 }
 0x408   : > { %v14581_v26 = vpop.f32.mrf.mxu1  ;;  %v5812_v1 = vsel %vm658_vm2, %v14556_v0, %v14590_v50  ;;  %v6398_v0 = vshrl.u32 %v14554_v21, 16 }
 0x409   : > { %v5295_v30 = vpack.c.bf16 %v5234_v45, %v5234_v45  ;;  %v4799_v6 = vadd.f32 %v4734_v40, %v4177_v18  ;;  %16059 = vst [vmem:[#allocation16_spill] sm:$0xff] %v14581_v26  ;;  %v14588_v40 = vld [vmem:[#allocation2 + $0x34] sm:$0xff]  ;;  %v14598_v12 = vor.u32 %v7034_v29, %v7031_v37 }
 0x40a   : > { %v6402_v47 = vshll.u32 %v14588_v40, 16  ;;  %v16062_v45 = vld [vmem:[#allocation8_spill] sm:$0xff]  ;;  %v16063_v18 = vld [vmem:[#allocation7_spill] sm:$0xff]  ;;  %v6400_v29 = vor.u32 %v6398_v0, %v6396_v34  ;;  %v16065_v34 = vld [vmem:[#allocation22_spill] sm:$0xff] }
 0x40b   : > { %5343 = vst.msk [vmem:[#allocation2 + $0xa8] sm:$0xf] %vm5246_vm5, %v5295_v30  ;;  %v4851_v23 = vadd.f32 %v14388_v24, %v4799_v6  ;;  %10829 = vmatmul.msk.bf16.gmra.mxu3 %vm5527_vm6, %v6397_v16  ;;  %v3251_v13 = vadd.f32 %v16063_v18, %v16062_v45  ;;  %v5151_v16 = vpop.permute.xlu2 %5150  ;;  %v5156_v45 = vpop.permute.xlu0 %5155 }
 0x40c   : > { %v4739_v46 = vpop.f32.mrf.mxu0  ;;  %v6404_v33 = vrot.slane %v6402_v47, 1 }
 0x40d   : > { %v4899_v32 = vmax.f32 %v4851_v23, 0.0  ;;  %v3839_v36 = vpop.f32.mrf.mxu2  ;;  %v7036_v23 = vsel %vm658_vm2, %v14564_v17, %v14598_v12 }
 0x40e   : > { %v4115_v11 = vpop.f32.mrf.mxu3  ;;  %v3901_v14 = vadd.f32 %v3839_v36, %v3251_v13 }
 0x40f   : > { %v5235_v4 = vmul.f32 %v5146_v2, %v4899_v32  ;;  %v4178_v57 = vadd.f32 %v4115_v11, %v3900_v31  ;;  %v12954_v31 = vld [vmem:[#allocation2 + $0x44] sm:$0xff]  }
 0x410   : > { %v14592_v62 = vpop.f32.mrf.mxu1  ;;  %v7038_v17 = vshrl.u32 %v12954_v31, 16  ;;  %v7041_v47 = vshll.u32 %v12954_v31, 16 }
 0x411   : > { %v5296_v60 = vpack.c.bf16 %v5235_v4, %v5235_v4  ;;  %v4800_v53 = vadd.f32 %v4737_v55, %v4178_v57  ;;  %16061 = vst [vmem:[#allocation18_spill] sm:$0xff] %v14592_v62  ;;  %v14605_v55 = vld [vmem:[#allocation2 + $0x38] sm:$0xff]   ;;  %v6405_v57 = vsel %vm1261_vm3, %v6400_v29, %v6404_v33 }
 0x412   : > { %v12935_v51 = vld [vmem:[#allocation2 + $0xa4] sm:$0xff]   ;;  %10709 = vmatmul.msk.bf16.gmra.mxu2 %vm5527_vm6, %v5812_v1  ;;  %v5814_v32 = vshrl.u32 %v14605_v55, 16  ;;  %v5817_v25 = vshll.u32 %v14605_v55, 16  ;;  %v7043_v0 = vrot.slane %v7041_v47, 4 }
 0x413   : > { %5344 = vst.msk [vmem:[#allocation2 + $0xac] sm:$0xf] %vm5246_vm5, %v5296_v60  ;;  %v4852_v30 = vadd.f32 %v14388_v24, %v4800_v53  ;;  %10700 = vmatmul.msk.bf16.gmra.mxu1 %vm5527_vm6, %v12935_v51 }
 0x414   : > { %v4742_v6 = vpop.f32.mrf.mxu0  ;;  %v5816_v60 = vrot.slane %v5814_v32, 3  ;;  %v5819_v53 = vrot.slane %v5817_v25, 4 }
 0x415   : > { %v4900_v5 = vmax.f32 %v4852_v30, 0.0  ;;  %v3842_v2 = vpop.f32.mrf.mxu2 }
 0x416   : > { %v4117_v10 = vpop.f32.mrf.mxu3  ;;  %v3902_v13 = vadd.f32 %v3842_v2, %v16065_v34 }
 0x417   : > { %v5236_v11 = vmul.f32 %v5151_v16, %v4900_v5  ;;  %v4179_v37 = vadd.f32 %v4117_v10, %v3901_v14  ;;  %10855 = vmatmul.msk.bf16.gmra.mxu0 %vm5527_vm6, %v7036_v23  ;;  %v14624_v5 = vor.u32 %v5819_v53, %v5816_v60  ;;  %v7040_v14 = vrot.slane %v7038_v17, 3  ;;  %v5161_v17 = vpop.permute.xlu1 %5160 }
 0x418   : > { %v14615_v21 = vpop.f32.mrf.mxu1 }
 0x419   : > { %v5297_v36 = vpack.c.bf16 %v5236_v11, %v5236_v11  ;;  %v4801_v4 = vadd.f32 %v4739_v46, %v4179_v37  ;;  %16064 = vst [vmem:[#allocation17_spill] sm:$0xff] %v14615_v21  ;;  %v14622_v46 = vld [vmem:[#allocation2 + $0x3c] sm:$0xff]  ;;  %v5821_v2 = vsel %vm658_vm2, %v14590_v50, %v14624_v5  ;;  %v14632_v29 = vor.u32 %v7043_v0, %v7040_v14  ;;  %v12956_v0 = vld [vmem:[#allocation2 + $0x4c] sm:$0xff]  }
 0x41a   : > { %v6410_v11 = vshll.u32 %v14622_v46, 16  ;;  %v6406_v50 = vshrl.u32 %v14588_v40, 16 }
 0x41b   : > { %5345 = vst.msk [vmem:[#allocation2 + $0xb0] sm:$0xf] %vm5246_vm5, %v5297_v36  ;;  %v4853_v51 = vadd.f32 %v14388_v24, %v4801_v4  ;;  %10830 = vmatmul.msk.bf16.gmra.mxu3 %vm5527_vm6, %v6405_v57  ;;  %v16067_v36 = vld [vmem:[#allocation10_spill] sm:$0xff]  ;;  %v16068_v4 = vld [vmem:[#allocation9_spill] sm:$0xff]  ;;  %v7045_v34 = vsel %vm658_vm2, %v14598_v12, %v14632_v29  ;;  %v7047_v12 = vshrl.u32 %v12956_v0, 16 }
 0x41c   : > { %v4744_v1 = vpop.f32.mrf.mxu0  ;;  %v3253_v57 = vadd.f32 %v16068_v4, %v16067_v36  ;;  %v7050_v36 = vshll.u32 %v12956_v0, 16 }
 0x41d   : > { %v4901_v18 = vmax.f32 %v4853_v51, 0.0  ;;  %v3844_v16 = vpop.f32.mrf.mxu2 }
 0x41e   : > { %v4120_v30 = vpop.f32.mrf.mxu3  ;;  %v3903_v51 = vadd.f32 %v3844_v16, %v3253_v57 }
 0x41f   : > { %v5237_v10 = vmul.f32 %v5156_v45, %v4901_v18  ;;  %v4180_v23 = vadd.f32 %v4120_v30, %v3902_v13  ;;  %v6412_v45 = vrot.slane %v6410_v11, 1 }
 0x420   : > { %v14626_v31 = vpop.f32.mrf.mxu1 }
 0x421   : > { %v5298_v32 = vpack.c.bf16 %v5237_v10, %v5237_v10  ;;  %v4802_v25 = vadd.f32 %v4742_v6, %v4180_v23  ;;  %16066 = vst [vmem:[#allocation19_spill] sm:$0xff] %v14626_v31  ;;  %v14639_v6 = vld [vmem:[#allocation2 + $0x40] sm:$0xff]   ;;  %v14759_v31 = vld [vmem:[#allocation2 + $0x58] sm:$0xff]  }
 0x422   : > { %v12937_v37 = vld [vmem:[#allocation2 + $0xac] sm:$0xff]   ;;  %10710 = vmatmul.msk.bf16.gmra.mxu2 %vm5527_vm6, %v5821_v2  ;;  %v5823_v30 = vshrl.u32 %v14639_v6, 16  ;;  %v5826_v14 = vshll.u32 %v14639_v6, 16 }
 0x423   : > { %5346 = vst.msk [vmem:[#allocation2 + $0xb4] sm:$0xf] %vm5246_vm5, %v5298_v32  ;;  %v4854_v60 = vadd.f32 %v14388_v24, %v4802_v25  ;;  %10701 = vmatmul.msk.bf16.gmra.mxu1 %vm5527_vm6, %v12937_v37  ;;  %v6408_v32 = vor.u32 %v6406_v50, %v6404_v33  ;;  %v16070_v33 = vld [vmem:[#allocation23_spill] sm:$0xff] }
 0x424   : > { %v4747_v53 = vpop.f32.mrf.mxu0  ;;  %v5825_v37 = vrot.slane %v5823_v30, 3  ;;  %v5828_v2 = vrot.slane %v5826_v14, 4  ;;  %v7052_v30 = vrot.slane %v7050_v36, 4 }
 0x425   : > { %v4902_v47 = vmax.f32 %v4854_v60, 0.0  ;;  %v3847_v13 = vpop.f32.mrf.mxu2  ;;  %v6413_v11 = vsel %vm1261_vm3, %v6408_v32, %v6412_v45  ;;  %v5166_v60 = vpop.permute.xlu2 %5165 }
 0x426   : > { %v4122_v18 = vpop.f32.mrf.mxu3 }
 0x427   : > { %v5238_v10 = vmul.f32 %v5161_v17, %v4902_v47  ;;  %v4181_v23 = vadd.f32 %v4122_v18, %v3903_v51  ;;  %10856 = vmatmul.msk.bf16.gmra.mxu0 %vm5527_vm6, %v7045_v34  ;;  %v3904_v47 = vadd.f32 %v3847_v13, %v16070_v33  ;;  %v14658_v18 = vor.u32 %v5828_v2, %v5825_v37  ;;  %v16073_v37 = vld [vmem:[#allocation11_spill] sm:$0xff] }
 0x428   : > { %v14649_v40 = vpop.f32.mrf.mxu1  ;;  %v7049_v34 = vrot.slane %v7047_v12, 3 }
 0x429   : > { %v5299_v16 = vpack.c.bf16 %v5238_v10, %v5238_v10  ;;  %v4803_v25 = vadd.f32 %v4744_v1, %v4181_v23  ;;  %16069 = vst [vmem:[#allocation4_spill] sm:$0xff] %v14649_v40  ;;  %v14656_v1 = vld [vmem:[#allocation2 + $0x44] sm:$0xff]  ;;  %v5830_v13 = vsel %vm658_vm2, %v14624_v5, %v14658_v18  ;;  %v6414_v5 = vshrl.u32 %v14622_v46, 16 }
 0x42b   : > { %5347 = vst.msk [vmem:[#allocation2 + $0xb8] sm:$0xf] %vm5246_vm5, %v5299_v16  ;;  %v4855_v4 = vadd.f32 %v14388_v24, %v4803_v25  ;;  %10831 = vmatmul.msk.bf16.gmra.mxu3 %vm5527_vm6, %v6413_v11  ;;  %v6418_v16 = vshll.u32 %v14656_v1, 16  ;;  %v14666_v11 = vor.u32 %v7052_v30, %v7049_v34 }
 0x42c   : > { %v4749_v57 = vpop.f32.mrf.mxu0 }
 0x42d   : > { %v4903_v17 = vmax.f32 %v4855_v4, 0.0  ;;  %v3849_v50 = vpop.f32.mrf.mxu2  ;;  %v16072_v4 = vld [vmem:[#allocation12_spill] sm:$0xff]  ;;  %v7054_v34 = vsel %vm658_vm2, %v14632_v29, %v14666_v11 }
 0x42e   : > { %v4125_v51 = vpop.f32.mrf.mxu3  ;;  %v3255_v2 = vadd.f32 %v16073_v37, %v16072_v4 }
 0x42f   : > { %v5239_v14 = vmul.f32 %v5166_v60, %v4903_v17  ;;  %v4182_v0 = vadd.f32 %v4125_v51, %v3904_v47  ;;  %v5171_v60 = vpop.permute.xlu0 %5170  ;;  %v14677_v47 = vrot.slane %v6418_v16, 1 }
 0x430   : > { %v14660_v32 = vpop.f32.mrf.mxu1  ;;  %v3905_v33 = vadd.f32 %v3849_v50, %v3255_v2  ;;  %v6416_v50 = vor.u32 %v6414_v5, %v6412_v45  ;;  %v14693_v5 = vld [vmem:[#allocation2 + $0x4c] sm:$0xff] }
 0x431   : > { %v5300_v10 = vpack.c.bf16 %v5239_v14, %v5239_v14  ;;  %v4804_v23 = vadd.f32 %v4747_v53, %v4182_v0  ;;  %16071 = vst [vmem:[#allocation3_spill] sm:$0xff] %v14660_v32  ;;  %v14673_v53 = vld [vmem:[#allocation2 + $0x48] sm:$0xff]  }
 0x432   : > { %v12939_v25 = vld [vmem:[#allocation2 + $0xb4] sm:$0xff]   ;;  %10711 = vmatmul.msk.bf16.gmra.mxu2 %vm5527_vm6, %v5830_v13  ;;  %v5832_v14 = vshrl.u32 %v14673_v53, 16  ;;  %v5835_v0 = vshll.u32 %v14673_v53, 16  ;;  %v6421_v4 = vsel %vm1261_vm3, %v6416_v50, %v14677_v47 }
 0x433   : > { %5348 = vst.msk [vmem:[#allocation2 + $0xbc] sm:$0xf] %vm5246_vm5, %v5300_v10  ;;  %v4856_v12 = vadd.f32 %v14388_v24, %v4804_v23  ;;  %10702 = vmatmul.msk.bf16.gmra.mxu1 %vm5527_vm6, %v12939_v25  ;;  %v12958_v10 = vld [vmem:[#allocation2 + $0x54] sm:$0xff]  }
 0x434   : > { %v4752_v36 = vpop.f32.mrf.mxu0  ;;  %v5834_v37 = vrot.slane %v5832_v14, 3  ;;  %v5837_v29 = vrot.slane %v5835_v0, 4  ;;  %v7056_v2 = vshrl.u32 %v12958_v10, 16 }
 0x435   : > { %v4904_v17 = vmax.f32 %v4856_v12, 0.0  ;;  %v3852_v30 = vpop.f32.mrf.mxu2  ;;  %v7059_v12 = vshll.u32 %v12958_v10, 16 }
 0x436   : > { %v4127_v51 = vpop.f32.mrf.mxu3  ;;  %v7058_v14 = vrot.slane %v7056_v2, 3 }
 0x437   : > { %v5240_v23 = vmul.f32 %v5171_v60, %v4904_v17  ;;  %v4183_v25 = vadd.f32 %v4127_v51, %v3905_v33  ;;  %10857 = vmatmul.msk.bf16.gmra.mxu0 %vm5527_vm6, %v7054_v34  ;;  %v5176_v17 = vpop.permute.xlu1 %5175  ;;  %v16075_v33 = vld [vmem:[#allocation13_spill] sm:$0xff]  ;;  %v7061_v0 = vrot.slane %v7059_v12, 4 }
 0x438   : > { %v14685_v16 = vpop.f32.mrf.mxu1 }
 0x439   : > { %v5301_v13 = vpack.c.bf16 %v5240_v23, %v5240_v23  ;;  %v4805_v46 = vadd.f32 %v4749_v57, %v4183_v25  ;;  %16074 = vst [vmem:[#allocation20_spill] sm:$0xff] %v14685_v16  ;;  %v3906_v57 = vadd.f32 %v3852_v30, %v16075_v33  ;;  %v14695_v23 = vor.u32 %v5837_v29, %v5834_v37  ;;  %v14705_v33 = vld [vmem:[#allocation2 + $0x50] sm:$0xff]   ;;  %v16077_v37 = vld [vmem:[#allocation14_spill] sm:$0xff]  ;;  %v16078_v29 = vld [vmem:[#allocation24_spill] sm:$0xff] }
 0x43a   : > { %v14703_v30 = vor.u32 %v7061_v0, %v7058_v14  ;;  %v3257_v2 = vadd.f32 %v16078_v29, %v16077_v37  ;;  %v11046_v0 = vld [vmem:[%s15993_s3 + $0xe] sm:$0x3]  ;;  %v5841_v29 = vshrl.u32 %v14705_v33, 16 }
 0x43b   : > { %5349 = vst.msk [vmem:[#allocation2 + $0xc0] sm:$0xf] %vm5246_vm5, %v5301_v13  ;;  %v4857_v32 = vadd.f32 %v14388_v24, %v4805_v46  ;;  %10832 = vmatmul.msk.bf16.gmra.mxu3 %vm5527_vm6, %v6421_v4  ;;  %v6426_v46 = vshll.u32 %v14693_v5, 16 }
 0x43c   : > { %v4754_v60 = vpop.f32.mrf.mxu0 }
 0x43d   : > { %v4905_v45 = vmax.f32 %v4857_v32, 0.0  ;;  %v3854_v34 = vpop.f32.mrf.mxu2  ;;  %v5839_v32 = vsel %vm658_vm2, %v14658_v18, %v14695_v23  ;;  %v10900_v18 = vld [vmem:[%s15993_s3 + $0xa] sm:$0x3] }
 0x43e   : > { %v4130_v51 = vpop.f32.mrf.mxu3 }
 0x43f   : > { %v5241_v10 = vmul.f32 %v5176_v17, %v4905_v45  ;;  %v4184_v25 = vadd.f32 %v4130_v51, %v3906_v57  ;;  %v11021_v17 = vld [vmem:[%s15993_s3 + $0xc] sm:$0x3]  ;;  %v6422_v57 = vshrl.u32 %v14656_v1, 16  ;;  %v8181_v51 = vsel %vm5600_vm4, %v10900_v18, 0 }
 0x440   : > { %v14697_v24 = vpop.f32.mrf.mxu1  ;;  %v8831_v14 = vsel %vm5600_vm4, %v11021_v17, 0  ;;  %8190 = vmatpush.bf16.msra.mxu2 %v8181_v51  ;;  %v7063_v1 = vsel %vm658_vm2, %v14666_v11, %v14703_v30  ;;  %v5844_v18 = vshll.u32 %v14705_v33, 16  ;;  %v12960_v17 = vld [vmem:[#allocation2 + $0x5c] sm:$0xff]  }
 0x441   : > { %v5302_v50 = vpack.c.bf16 %v5241_v10, %v5241_v10  ;;  %v4806_v13 = vadd.f32 %v4752_v36, %v4184_v25  ;;  %16076 = vst [vmem:[#allocation6_spill] sm:$0xff] %v14697_v24  ;;  %v14713_v36 = vld [vmem:[%s15992_s2] ss:$0 sm:$0xff]  ;;  %v5181_v10 = vpop.permute.xlu2 %5180  ;;  %8840 = vmatpush.bf16.msra.mxu3 %v8831_v14 }
 0x442   : > { %v12940_v4 = vld [vmem:[#allocation2 + $0xbc] sm:$0xff]   ;;  %10712 = vmatmul.msk.bf16.gmra.mxu2 %vm5527_vm6, %v5839_v32  ;;  %v9109_v32 = vsel %vm5600_vm4, %v11046_v0, 0 }
 0x443   : > { %5350 = vst.msk [vmem:[#allocation2 + $0xc4] sm:$0xf] %vm5246_vm5, %v5302_v50  ;;  %v4858_v12 = vadd.f32 %v14713_v36, %v4806_v13  ;;  %10703 = vmatmul.msk.bf16.gmra.mxu1 %vm5527_vm6, %v12940_v4  ;;  %v3907_v50 = vadd.f32 %v3854_v34, %v3257_v2  ;;  %v14730_v13 = vrot.slane %v6426_v46, 1  ;;  %9118 = vmatpush.bf16.msra.mxu0 %v9109_v32  ;;  %v11071_v2 = vld [vmem:[%s15993_s3 + $0x10] sm:$0x3]  ;;  %v7068_v32 = vshll.u32 %v12960_v17, 16 }
 0x444   : > { %v4757_v45 = vpop.f32.mrf.mxu0  ;;  %v6424_v46 = vor.u32 %v6422_v57, %v14677_v47  ;;  %v9731_v51 = vsel %vm5600_vm4, %v11071_v2, 0 }
 0x445   : > { %v4906_v25 = vmax.f32 %v4858_v12, 0.0  ;;  %v3857_v37 = vpop.f32.mrf.mxu2  ;;  %9740 = vmatpush.bf16.msra.mxu1 %v9731_v51 }
 0x446   : > { %v4132_v4 = vpop.f32.mrf.mxu3  ;;  %v6429_v24 = vsel %vm1261_vm3, %v6424_v46, %v14730_v13 }
 0x447   : > { %v5242_v12 = vmul.f32 %v5181_v10, %v4906_v25  ;;  %v4185_v34 = vadd.f32 %v4132_v4, %v3907_v50  ;;  %10858 = vmatmul.msk.bf16.gmra.mxu0 %vm5527_vm6, %v7063_v1  ;;  %v5843_v10 = vrot.slane %v5841_v29, 3  ;;  %v5846_v25 = vrot.slane %v5844_v18, 4  ;;  %v14751_v4 = vld [vmem:[#allocation2 + $0x54] sm:$0xff] }
 0x448   : > { %v14744_v0 = vpop.f32.mrf.mxu1  ;;  %v7065_v50 = vshrl.u32 %v12960_v17, 16  ;;  %v7070_v18 = vrot.slane %v7068_v32, 4 }
 0x449   : > { %v5303_v11 = vpack.c.bf16 %v5242_v12, %v5242_v12  ;;  %v4807_v14 = vadd.f32 %v4754_v60, %v4185_v34  ;;  %16079 = vst [vmem:[#allocation5_spill] sm:$0xff] %v14744_v0  ;;  %v5186_v60 = vpop.permute.xlu0 %5185  ;;  %v16080_v12 = vld [vmem:[#allocation15_spill] sm:$0xff]  ;;  %v14754_v51 = vor.u32 %v5846_v25, %v5843_v10 }
 0x44a   : > { %v3908_v34 = vadd.f32 %v3857_v37, %v16080_v12  ;;  %v7067_v29 = vrot.slane %v7065_v50, 3 }
 0x44b   : > { %5351 = vst.msk [vmem:[#allocation2 + $0xc8] sm:$0xf] %vm5246_vm5, %v5303_v11  ;;  %v4859_v47 = vadd.f32 %v14713_v36, %v4807_v14  ;;  %10833 = vmatmul.msk.bf16.gmra.mxu3 %vm5527_vm6, %v6429_v24  ;;  %v12100_v11 = vld [vmem:[#allocation2 + $0xc0] sm:$0xff]   ;;  %v6434_v14 = vshll.u32 %v14751_v4, 16  ;;  %v5848_v10 = vsel %vm658_vm2, %v14695_v23, %v14754_v51 }
 0x44c   : > { %v4759_v57 = vpop.f32.mrf.mxu0  ;;  %v14766_v50 = vor.u32 %v7070_v18, %v7067_v29  ;;  %v5970_v23 = vshll.u32 %v12100_v11, 16 }
 0x44d   : > { %v4907_v1 = vmax.f32 %v4859_v47, 0.0  ;;  %v3859_v46 = vpop.f32.mrf.mxu2  ;;  %v16082_v47 = vld [vmem:[#allocation25_spill] sm:$0xff]  ;;  %v14772_v12 = vrot.slane %v6434_v14, 1  ;;  %v5853_v14 = vshll.u32 %v14759_v31, 16 }
 0x44e   : > { %v4135_v2 = vpop.f32.mrf.mxu3  ;;  %v3259_v37 = vadd.f32 %v14271_v52, %v16082_v47  ;;  %v5850_v52 = vshrl.u32 %v14759_v31, 16 }
 0x44f   : > { %v5243_v17 = vmul.f32 %v5186_v60, %v4907_v1  ;;  %v4186_v0 = vadd.f32 %v4135_v2, %v3908_v34  ;;  %v6430_v60 = vshrl.u32 %v14693_v5, 16  ;;  %v5967_v34 = vshrl.u32 %v12100_v11, 16  ;;  %v5191_v2 = vpop.permute.xlu1 %5190 }
 0x450   : > { %v14757_v40 = vpop.f32.mrf.mxu1  ;;  %v3909_v18 = vadd.f32 %v3859_v46, %v3259_v37  ;;  %v5855_v26 = vrot.slane %v5853_v14, 4 }
 0x451   : > { %v5304_v16 = vpack.c.bf16 %v5243_v17, %v5243_v17  ;;  %v4808_v24 = vadd.f32 %v4757_v45, %v4186_v0  ;;  %16081 = vst [vmem:[#allocation21_spill] sm:$0xff] %v14757_v40  ;;  %v11709_v45 = vunpack.c.h.b16 %v12100_v11  ;;  %v6432_v5 = vor.u32 %v6430_v60, %v14730_v13 }
 0x452   : > { %v5403_v25 = vld [vmem:[#allocation2 + $0xc8] sm:$0xf]  ;;  %10713 = vmatmul.msk.bf16.gmra.mxu2 %vm5527_vm6, %v5848_v10  ;;  %v5969_v37 = vrot.slane %v5967_v34, 3  ;;  %v5852_v13 = vrot.slane %v5850_v52, 3  ;;  %v14792_v52 = vld [vmem:[#allocation2 + $0x5c] sm:$0xff] }
 0x453   : > { %5352 = vst.msk [vmem:[#allocation2 + $0xcc] sm:$0xf] %vm5246_vm5, %v5304_v16  ;;  %v4860_v32 = vadd.f32 %v14713_v36, %v4808_v24  ;;  %v5502_v0 = vunpack.c.l.b16 %v5403_v25  ;;  %v7072_v24 = vsel %vm658_vm2, %v14703_v30, %v14766_v50  ;;  %v12962_v25 = vld [vmem:[#allocation2 + $0x64] sm:$0xff]   ;;  %v6437_v11 = vsel %vm1261_vm3, %v6432_v5, %v14772_v12 }
 0x454   : > { %v7292_v1 = vpop.f32.mrf.mxu0  ;;  %v5856_v5 = vor.u32 %v5855_v26, %v5852_v13  ;;  %v14807_v26 = vld [vmem:[#allocation2 + $0x60] sm:$0xff]  }
 0x455   : > { %v4908_v29 = vmax.f32 %v4860_v32, 0.0  ;;  %v5526_v17 = vpack.c.b16 %v5502_v0, %v11709_v45  ;;  %v5759_v16 = vpack.c.b16 %v5502_v0, %v5502_v0  ;;  %v6068_v10 = vpop.f32.mrf.mxu2  ;;  %v5972_v32 = vrot.slane %v5970_v23, 4 }
 0x456   : > { %v4137_v47 = vpop.f32.mrf.mxu3 }
 0x457   : > { %v5244_v40 = vmul.f32 %v5191_v2, %v4908_v29  ;;  %v4187_v21 = vadd.f32 %v4137_v47, %v3909_v18  ;;  %10704 = vmatmul.msk.bf16.gmra.mxu1 %vm5527_vm6, %v5526_v17  ;;  %10859 = vmatmul.msk.bf16.gmra.mxu0 %vm5527_vm6, %v7072_v24  ;;  %v5976_v46 = vshrl.u32 %v5759_v16, 16  ;;  %v5979_v45 = vshll.u32 %v5759_v16, 16 }
 0x458   : > { %v14784_v62 = vpop.f32.mrf.mxu1  ;;  %v7074_v2 = vshrl.u32 %v12962_v25, 16  ;;  %v7077_v29 = vshll.u32 %v12962_v25, 16  ;;  %v14789_v34 = vor.u32 %v5972_v32, %v5969_v37 }
 0x459   : > { %v5305_v30 = vpack.c.bf16 %v5244_v40, %v5244_v40  ;;  %v4809_v0 = vadd.f32 %v4759_v57, %v4187_v21  ;;  %v5978_v60 = vrot.slane %v5976_v46, 3  ;;  %v5981_v18 = vrot.slane %v5979_v45, 4  ;;  %v5196_v40 = vpop.permute.xlu2 %5195 }
 0x45a   : > { %v6069_v57 = vadd.f32 %v6068_v10, %v14284_v61  ;;  %v7076_v14 = vrot.slane %v7074_v2, 3  ;;  %v7079_v25 = vrot.slane %v7077_v29, 4  ;;  %v6442_v45 = vshll.u32 %v14792_v52, 16 }
 0x45b   : > { %5353 = vst.msk [vmem:[#allocation2 + $0xd0] sm:$0xf] %vm5246_vm5, %v5305_v30  ;;  %v4861_v17 = vadd.f32 %v14713_v36, %v4809_v0  ;;  %10834 = vmatmul.msk.bf16.gmra.mxu3 %vm5527_vm6, %v6437_v11  ;;  %v5982_v23 = vor.u32 %v5981_v18, %v5978_v60  ;;  %v5857_v61 = vsel %vm658_vm2, %v14754_v51, %v5856_v5  ;;  %v6438_v60 = vshrl.u32 %v14751_v4, 16 }
 0x45c   : > { %v7294_v47 = vpop.f32.mrf.mxu0  ;;  %v7080_v10 = vor.u32 %v7079_v25, %v7076_v14  ;;  %v6444_v2 = vrot.slane %v6442_v45, 1  ;;  %v5859_v51 = vshrl.u32 %v14807_v26, 16 }
 0x45d   : > { %v4909_v21 = vmax.f32 %v4861_v17, 0.0  ;;  %v6070_v24 = vpop.f32.mrf.mxu2  ;;  %v14796_v36 = vsel %vm658_vm2, %v14789_v34, %v5982_v23  ;;  %v5862_v17 = vshll.u32 %v14807_v26, 16  ;;  %v12964_v23 = vld [vmem:[#allocation2 + $0x6c] sm:$0xff]  }
 0x45e   : > { %v6642_v16 = vpop.f32.mrf.mxu3  ;;  %v6071_v13 = vadd.f32 %v6070_v24, %v14299_v39  ;;  %v6440_v39 = vor.u32 %v6438_v60, %v14772_v12  ;;  %v7083_v24 = vshrl.u32 %v12964_v23, 16  ;;  %v7086_v14 = vshll.u32 %v12964_v23, 16 }
 0x45f   : > { %v5245_v46 = vmul.f32 %v5196_v40, %v4909_v21  ;;  %v6762_v11 = vadd.f32 %v6642_v16, %v6069_v57  ;;  %v5864_v16 = vrot.slane %v5862_v17, 4  ;;  %v6446_v23 = vshrl.u32 %v14792_v52, 16 }
 0x460   : > { %v14798_v32 = vpop.f32.mrf.mxu1  ;;  %v6445_v21 = vsel %vm1261_vm3, %v6440_v39, %v6444_v2  ;;  %v7085_v45 = vrot.slane %v7083_v24, 3 }
 0x461   : > { %v5306_v37 = vpack.c.bf16 %v5245_v46, %v5245_v46  ;;  %v14801_v30 = vadd.f32 %v7292_v1, %v6762_v11  ;;  %v7081_v1 = vsel %vm658_vm2, %v14766_v50, %v7080_v10  ;;  %v5861_v50 = vrot.slane %v5859_v51, 3 }
 0x462   : > { %10714 = vmatmul.msk.bf16.gmra.mxu2 %vm5527_vm6, %v5857_v61  ;;  %v7088_v61 = vrot.slane %v7086_v14, 4  ;;  %v6448_v14 = vor.u32 %v6446_v23, %v6444_v2 }
 0x463   : > { %5354 = vst.msk [vmem:[#allocation2 + $0xd4] sm:$0xf] %vm5246_vm5, %v5306_v37  ;;  %v5865_v12 = vor.u32 %v5864_v16, %v5861_v50 }
 0x464   : > { %v7297_v0 = vpop.f32.mrf.mxu0  ;;  %v7089_v51 = vor.u32 %v7088_v61, %v7085_v45 }
 0x465   : > { %v6073_v18 = vpop.f32.mrf.mxu2 }
 0x466   : > { %v6644_v29 = vpop.f32.mrf.mxu3  ;;  %v6074_v46 = vadd.f32 %v6073_v18, %v14308_v56  ;;  %v14835_v56 = vld [vmem:[#allocation2 + $0x68] sm:$0xff]  }
 0x467   : > { %v6763_v40 = vadd.f32 %v6644_v29, %v6071_v13  ;;  %10876 = vmatmul.msk.bf16.vlgmr.msrb.gmra.mxu1 %vm5527_vm6, %v14471_v38  ;;  %10860 = vmatmul.msk.bf16.gmra.mxu0 %vm5527_vm6, %v7081_v1  ;;  %v14826_v38 = vld [vmem:[#allocation2 + $0x64] sm:$0xff]  ;;  %v5866_v1 = vsel %vm658_vm2, %v5856_v5, %v5865_v12  ;;  %v5871_v16 = vshll.u32 %v14835_v56, 16  ;;  %v12966_v5 = vld [vmem:[#allocation2 + $0x74] sm:$0xff]  }
 0x468   : > { %v14819_v4 = vpop.f32.mrf.mxu1  ;;  %v7095_v45 = vshll.u32 %v12966_v5, 16 }
 0x469   : > { %v14822_v57 = vadd.f32 %v7294_v47, %v6763_v40  ;;  %v6450_v47 = vshll.u32 %v14826_v38, 16 }
 0x46a   : > { %v7097_v23 = vrot.slane %v7095_v45, 4 }
 0x46b   : > { %10835 = vmatmul.msk.bf16.gmra.mxu3 %vm5527_vm6, %v6445_v21  ;;  %v6452_v40 = vrot.slane %v6450_v47, 1  ;;  %v7090_v21 = vsel %vm658_vm2, %v7080_v10, %v7089_v51  ;;  %v14852_v47 = vld [vmem:[#allocation2 + $0x6c] sm:$0xff] }
 0x46c   : > { %v7299_v25 = vpop.f32.mrf.mxu0 }
 0x46d   : > { %v6075_v37 = vpop.f32.mrf.mxu2  ;;  %v6453_v52 = vsel %vm1261_vm3, %v6448_v14, %v6452_v40  ;;  %v6454_v14 = vshrl.u32 %v14826_v38, 16 }
 0x46e   : > { %v6647_v11 = vpop.f32.mrf.mxu3  ;;  %v6076_v17 = vadd.f32 %v6075_v37, %v14322_v27  ;;  %v7092_v37 = vshrl.u32 %v12966_v5, 16 }
 0x46f   : > { %v6764_v13 = vadd.f32 %v6647_v11, %v6074_v46  ;;  %v5873_v11 = vrot.slane %v5871_v16, 4 }
 0x470   : > { %v14828_v60 = vpop.f32.mrf.mxu1 }
 0x471   : > { %v14831_v29 = vadd.f32 %v7297_v0, %v6764_v13  ;;  %v5868_v0 = vshrl.u32 %v14835_v56, 16 }
 0x472   : > { %10715 = vmatmul.msk.bf16.gmra.mxu2 %vm5527_vm6, %v5866_v1 }
 0x473   : > { %v5870_v10 = vrot.slane %v5868_v0, 3 }
 0x474   : > { %v7302_v18 = vpop.f32.mrf.mxu0 }
 0x475   : > { %v6078_v50 = vpop.f32.mrf.mxu2  ;;  %v5874_v2 = vor.u32 %v5873_v11, %v5870_v10 }
 0x476   : > { %v6649_v39 = vpop.f32.mrf.mxu3  ;;  %v6079_v13 = vadd.f32 %v6078_v50, %v14331_v9  ;;  %v14861_v9 = vld [vmem:[#allocation2 + $0x70] sm:$0xff]  }
 0x477   : > { %v6765_v24 = vadd.f32 %v6649_v39, %v6076_v17  ;;  %10877 = vmatmul.msk.bf16.gmra.mxu1 %vm5527_vm6, %v14503_v54  ;;  %10861 = vmatmul.msk.bf16.gmra.mxu0 %vm5527_vm6, %v7090_v21  ;;  %v7094_v17 = vrot.slane %v7092_v37, 3  ;;  %v5875_v16 = vsel %vm658_vm2, %v5865_v12, %v5874_v2  ;;  %v5880_v45 = vshll.u32 %v14861_v9, 16  ;;  %v12968_v12 = vld [vmem:[#allocation2 + $0x7c] sm:$0xff]  }
 0x478   : > { %v14845_v27 = vpop.f32.mrf.mxu1 }
 0x479   : > { %v14848_v46 = vadd.f32 %v7299_v25, %v6765_v24  ;;  %v6458_v25 = vshll.u32 %v14852_v47, 16  ;;  %v7098_v5 = vor.u32 %v7097_v23, %v7094_v17  ;;  %v5882_v17 = vrot.slane %v5880_v45, 4 }
 0x47a   : > { %v7101_v23 = vshrl.u32 %v12968_v12, 16 }
 0x47b   : > { %10836 = vmatmul.msk.bf16.gmra.mxu3 %vm5527_vm6, %v6453_v52  ;;  %v6460_v52 = vrot.slane %v6458_v25, 1  ;;  %v7099_v11 = vsel %vm658_vm2, %v7089_v51, %v7098_v5 }
 0x47c   : > { %v7304_v61 = vpop.f32.mrf.mxu0 }
 0x47d   : > { %v6080_v1 = vpop.f32.mrf.mxu2 }
 0x47e   : > { %v6652_v54 = vpop.f32.mrf.mxu3  ;;  %v6081_v24 = vadd.f32 %v6080_v1, %v14345_v44 }
 0x47f   : > { %v6766_v39 = vadd.f32 %v6652_v54, %v6079_v13  ;;  %v6456_v54 = vor.u32 %v6454_v14, %v6452_v40  ;;  %v7103_v14 = vrot.slane %v7101_v23, 3 }
 0x480   : > { %v14854_v21 = vpop.f32.mrf.mxu1 }
 0x481   : > { %v14857_v0 = vadd.f32 %v7302_v18, %v6766_v39  ;;  %v5877_v18 = vshrl.u32 %v14861_v9, 16  ;;  %v6461_v38 = vsel %vm1261_vm3, %v6456_v54, %v6460_v52  ;;  %v7104_v39 = vshll.u32 %v12968_v12, 16 }
 0x482   : > { %10716 = vmatmul.msk.bf16.gmra.mxu2 %vm5527_vm6, %v5875_v16 }
 0x483   : > { %v5879_v51 = vrot.slane %v5877_v18, 3 }
 0x484   : > { %v7307_v50 = vpop.f32.mrf.mxu0 }
 0x485   : > { %v6083_v37 = vpop.f32.mrf.mxu2  ;;  %v5883_v40 = vor.u32 %v5882_v17, %v5879_v51 }
 0x486   : > { %v6654_v10 = vpop.f32.mrf.mxu3  ;;  %v6084_v16 = vadd.f32 %v6083_v37, %v14354_v48  ;;  %v14887_v48 = vld [vmem:[#allocation2 + $0x78] sm:$0xff]  }
 0x487   : > { %v6767_v13 = vadd.f32 %v6654_v10, %v6081_v24  ;;  %10878 = vmatmul.msk.bf16.gmra.mxu1 %vm5527_vm6, %v14537_v63  ;;  %10862 = vmatmul.msk.bf16.gmra.mxu0 %vm5527_vm6, %v7099_v11  ;;  %v14878_v24 = vld [vmem:[#allocation2 + $0x74] sm:$0xff]  ;;  %v7106_v11 = vrot.slane %v7104_v39, 4  ;;  %v5884_v45 = vsel %vm658_vm2, %v5874_v2, %v5883_v40  ;;  %v12970_v2 = vld [vmem:[#allocation2 + $0x84] sm:$0xff]  }
 0x488   : > { %v14871_v44 = vpop.f32.mrf.mxu1 }
 0x489   : > { %16083 = vst [vmem:[#allocation8_spill] sm:$0xff] %v14871_v44  ;;  %v14874_v1 = vadd.f32 %v7304_v61, %v6767_v13  ;;  %v6466_v61 = vshll.u32 %v14878_v24, 16  ;;  %v7107_v12 = vor.u32 %v7106_v11, %v7103_v14  ;;  %v7110_v11 = vshrl.u32 %v12970_v2, 16 }
 0x48b   : > { %10837 = vmatmul.msk.bf16.gmra.mxu3 %vm5527_vm6, %v6461_v38  ;;  %v6462_v38 = vshrl.u32 %v14852_v47, 16  ;;  %v6468_v51 = vrot.slane %v6466_v61, 1  ;;  %v7108_v23 = vsel %vm658_vm2, %v7098_v5, %v7107_v12  ;;  %v7113_v61 = vshll.u32 %v12970_v2, 16 }
 0x48c   : > { %v7309_v25 = vpop.f32.mrf.mxu0 }
 0x48d   : > { %v6085_v10 = vpop.f32.mrf.mxu2 }
 0x48e   : > { %v6657_v63 = vpop.f32.mrf.mxu3  ;;  %v6086_v13 = vadd.f32 %v6085_v10, %v14368_v7 }
 0x48f   : > { %v6768_v44 = vadd.f32 %v6657_v63, %v6084_v16  ;;  %v6464_v63 = vor.u32 %v6462_v38, %v6460_v52  ;;  %v7112_v38 = vrot.slane %v7110_v11, 3 }
 0x490   : > { %v14880_v54 = vpop.f32.mrf.mxu1 }
 0x491   : > { %16084 = vst [vmem:[#allocation7_spill] sm:$0xff] %v14880_v54  ;;  %v14883_v18 = vadd.f32 %v7307_v50, %v6768_v44  ;;  %v5886_v50 = vshrl.u32 %v14887_v48, 16  ;;  %v5889_v44 = vshll.u32 %v14887_v48, 16  ;;  %v6469_v47 = vsel %vm1261_vm3, %v6464_v63, %v6468_v51 }
 0x492   : > { %10717 = vmatmul.msk.bf16.gmra.mxu2 %vm5527_vm6, %v5884_v45 }
 0x493   : > { %v5888_v5 = vrot.slane %v5886_v50, 3  ;;  %v5891_v14 = vrot.slane %v5889_v44, 4 }
 0x494   : > { %v7312_v37 = vpop.f32.mrf.mxu0 }
 0x495   : > { %v6088_v39 = vpop.f32.mrf.mxu2  ;;  %v5892_v52 = vor.u32 %v5891_v14, %v5888_v5 }
 0x496   : > { %v6659_v17 = vpop.f32.mrf.mxu3 }
 0x497   : > { %v6769_v16 = vadd.f32 %v6659_v17, %v6086_v13  ;;  %10879 = vmatmul.msk.bf16.gmra.mxu1 %vm5527_vm6, %v14571_v19  ;;  %10863 = vmatmul.msk.bf16.gmra.mxu0 %vm5527_vm6, %v7108_v23  ;;  %v6089_v13 = vadd.f32 %v6088_v39, %v14377_v43  ;;  %v14904_v17 = vld [vmem:[#allocation2 + $0x7c] sm:$0xff]  ;;  %v5893_v44 = vsel %vm658_vm2, %v5883_v40, %v5892_v52  ;;  %v12972_v40 = vld [vmem:[#allocation2 + $0x8c] sm:$0xff]  }
 0x498   : > { %v14897_v7 = vpop.f32.mrf.mxu1  ;;  %v14913_v43 = vld [vmem:[#allocation2 + $0x80] sm:$0xff]  }
 0x499   : > { %16085 = vst [vmem:[#allocation22_spill] sm:$0xff] %v14897_v7  ;;  %v14900_v10 = vadd.f32 %v7309_v25, %v6769_v16  ;;  %v7115_v7 = vrot.slane %v7113_v61, 4  ;;  %v6474_v25 = vshll.u32 %v14904_v17, 16 }
 0x49b   : > { %10838 = vmatmul.msk.bf16.gmra.mxu3 %vm5527_vm6, %v6469_v47  ;;  %v7116_v2 = vor.u32 %v7115_v7, %v7112_v38  ;;  %v6470_v47 = vshrl.u32 %v14878_v24, 16  ;;  %v6476_v5 = vrot.slane %v6474_v25, 1  ;;  %v7119_v38 = vshrl.u32 %v12972_v40, 16 }
 0x49c   : > { %v7314_v45 = vpop.f32.mrf.mxu0  ;;  %v7122_v25 = vshll.u32 %v12972_v40, 16 }
 0x49d   : > { %v6090_v23 = vpop.f32.mrf.mxu2  ;;  %v7117_v11 = vsel %vm658_vm2, %v7107_v12, %v7116_v2 }
 0x49e   : > { %v6662_v19 = vpop.f32.mrf.mxu3  ;;  %v6091_v16 = vadd.f32 %v6090_v23, %v14401_v15 }
 0x49f   : > { %v6770_v54 = vadd.f32 %v6662_v19, %v6089_v13  ;;  %v6472_v13 = vor.u32 %v6470_v47, %v6468_v51  ;;  %v7121_v47 = vrot.slane %v7119_v38, 3 }
 0x4a0   : > { %v14906_v63 = vpop.f32.mrf.mxu1 }
 0x4a1   : > { %16086 = vst [vmem:[#allocation10_spill] sm:$0xff] %v14906_v63  ;;  %v14909_v50 = vadd.f32 %v7312_v37, %v6770_v54  ;;  %v5895_v54 = vshrl.u32 %v14913_v43, 16  ;;  %v5898_v37 = vshll.u32 %v14913_v43, 16  ;;  %v6477_v24 = vsel %vm1261_vm3, %v6472_v13, %v6476_v5 }
 0x4a2   : > { %10718 = vmatmul.msk.bf16.gmra.mxu2 %vm5527_vm6, %v5893_v44 }
 0x4a3   : > { %v5897_v12 = vrot.slane %v5895_v54, 3  ;;  %v5900_v23 = vrot.slane %v5898_v37, 4 }
 0x4a4   : > { %v7317_v39 = vpop.f32.mrf.mxu0 }
 0x4a5   : > { %v6093_v61 = vpop.f32.mrf.mxu2  ;;  %v5901_v51 = vor.u32 %v5900_v23, %v5897_v12 }
 0x4a6   : > { %v6664_v14 = vpop.f32.mrf.mxu3 }
 0x4a7   : > { %v6771_v7 = vadd.f32 %v6664_v14, %v6091_v16  ;;  %10880 = vmatmul.msk.bf16.gmra.mxu1 %vm5527_vm6, %v14605_v55  ;;  %10864 = vmatmul.msk.bf16.gmra.mxu0 %vm5527_vm6, %v7117_v11  ;;  %v6094_v16 = vadd.f32 %v6093_v61, %v14415_v35  ;;  %v14930_v14 = vld [vmem:[#allocation2 + $0x84] sm:$0xff]  ;;  %v5902_v37 = vsel %vm658_vm2, %v5892_v52, %v5901_v51  ;;  %v12974_v52 = vld [vmem:[#allocation2 + $0x94] sm:$0xff]  }
 0x4a8   : > { %v14923_v15 = vpop.f32.mrf.mxu1  ;;  %v14939_v35 = vld [vmem:[#allocation2 + $0x88] sm:$0xff]  }
 0x4a9   : > { %16087 = vst [vmem:[#allocation9_spill] sm:$0xff] %v14923_v15  ;;  %v14926_v19 = vadd.f32 %v7314_v45, %v6771_v7  ;;  %v7124_v15 = vrot.slane %v7122_v25, 4  ;;  %v6482_v45 = vshll.u32 %v14930_v14, 16 }
 0x4ab   : > { %10839 = vmatmul.msk.bf16.gmra.mxu3 %vm5527_vm6, %v6477_v24  ;;  %v7125_v40 = vor.u32 %v7124_v15, %v7121_v47  ;;  %v6478_v24 = vshrl.u32 %v14904_v17, 16  ;;  %v6484_v12 = vrot.slane %v6482_v45, 1  ;;  %v7128_v47 = vshrl.u32 %v12974_v52, 16 }
 0x4ac   : > { %v7319_v44 = vpop.f32.mrf.mxu0  ;;  %v7131_v45 = vshll.u32 %v12974_v52, 16 }
 0x4ad   : > { %v6095_v11 = vpop.f32.mrf.mxu2  ;;  %v7126_v38 = vsel %vm658_vm2, %v7116_v2, %v7125_v40 }
 0x4ae   : > { %v6667_v55 = vpop.f32.mrf.mxu3  ;;  %v6096_v7 = vadd.f32 %v6095_v11, %v14427_v59 }
 0x4af   : > { %v6772_v63 = vadd.f32 %v6667_v55, %v6094_v16  ;;  %v6480_v16 = vor.u32 %v6478_v24, %v6476_v5  ;;  %v7130_v24 = vrot.slane %v7128_v47, 3 }
 0x4b0   : > { %v14932_v13 = vpop.f32.mrf.mxu1 }
 0x4b1   : > { %16088 = vst [vmem:[#allocation23_spill] sm:$0xff] %v14932_v13  ;;  %v14935_v54 = vadd.f32 %v7317_v39, %v6772_v63  ;;  %v5904_v63 = vshrl.u32 %v14939_v35, 16  ;;  %v5907_v39 = vshll.u32 %v14939_v35, 16  ;;  %v6485_v17 = vsel %vm1261_vm3, %v6480_v16, %v6484_v12 }
 0x4b2   : > { %10719 = vmatmul.msk.bf16.gmra.mxu2 %vm5527_vm6, %v5902_v37 }
 0x4b3   : > { %v5906_v2 = vrot.slane %v5904_v63, 3  ;;  %v5909_v11 = vrot.slane %v5907_v39, 4 }
 0x4b4   : > { %v7322_v61 = vpop.f32.mrf.mxu0 }
 0x4b5   : > { %v6098_v25 = vpop.f32.mrf.mxu2  ;;  %v5910_v5 = vor.u32 %v5909_v11, %v5906_v2 }
 0x4b6   : > { %v6669_v23 = vpop.f32.mrf.mxu3 }
 0x4b7   : > { %v6773_v15 = vadd.f32 %v6669_v23, %v6096_v7  ;;  %10881 = vmatmul.msk.bf16.gmra.mxu1 %vm5527_vm6, %v14639_v6  ;;  %10865 = vmatmul.msk.bf16.gmra.mxu0 %vm5527_vm6, %v7126_v38  ;;  %v6099_v7 = vadd.f32 %v6098_v25, %v14437_v42  ;;  %v14956_v23 = vld [vmem:[#allocation2 + $0x8c] sm:$0xff]  ;;  %v5911_v39 = vsel %vm658_vm2, %v5901_v51, %v5910_v5  ;;  %v12976_v51 = vld [vmem:[#allocation2 + $0x9c] sm:$0xff]  }
 0x4b8   : > { %v14949_v59 = vpop.f32.mrf.mxu1  ;;  %v14965_v42 = vld [vmem:[#allocation2 + $0x90] sm:$0xff]  }
 0x4b9   : > { %16089 = vst [vmem:[#allocation12_spill] sm:$0xff] %v14949_v59  ;;  %v14952_v55 = vadd.f32 %v7319_v44, %v6773_v15  ;;  %v7133_v59 = vrot.slane %v7131_v45, 4  ;;  %v6490_v44 = vshll.u32 %v14956_v23, 16  ;;  %v5916_v45 = vshll.u32 %v14965_v42, 16 }
 0x4bb   : > { %10840 = vmatmul.msk.bf16.gmra.mxu3 %vm5527_vm6, %v6485_v17  ;;  %v7134_v52 = vor.u32 %v7133_v59, %v7130_v24  ;;  %v6486_v17 = vshrl.u32 %v14930_v14, 16  ;;  %v6492_v2 = vrot.slane %v6490_v44, 1  ;;  %v7140_v24 = vshll.u32 %v12976_v51, 16 }
 0x4bc   : > { %v7324_v37 = vpop.f32.mrf.mxu0 }
 0x4bd   : > { %v6100_v38 = vpop.f32.mrf.mxu2  ;;  %v7135_v47 = vsel %vm658_vm2, %v7125_v40, %v7134_v52  ;;  %v7137_v40 = vshrl.u32 %v12976_v51, 16 }
 0x4be   : > { %v6672_v6 = vpop.f32.mrf.mxu3  ;;  %v6101_v16 = vadd.f32 %v6100_v38, %v14449_v8  ;;  %v5918_v38 = vrot.slane %v5916_v45, 4 }
 0x4bf   : > { %v6774_v13 = vadd.f32 %v6672_v6, %v6099_v7  ;;  %v6488_v7 = vor.u32 %v6486_v17, %v6484_v12  ;;  %v7139_v17 = vrot.slane %v7137_v40, 3 }
 0x4c0   : > { %v14961_v63 = vpop.f32.mrf.mxu1 }
 0x4c1   : > { %v14959_v15 = vadd.f32 %v7322_v61, %v6774_v13  ;;  %v5913_v61 = vshrl.u32 %v14965_v42, 16  ;;  %v6493_v8 = vsel %vm1261_vm3, %v6488_v7, %v6492_v2  ;;  %v7142_v7 = vrot.slane %v7140_v24, 4 }
 0x4c2   : > { %10720 = vmatmul.msk.bf16.gmra.mxu2 %vm5527_vm6, %v5911_v39 }
 0x4c3   : > { %v5915_v6 = vrot.slane %v5913_v61, 3 }
 0x4c4   : > { %v7327_v25 = vpop.f32.mrf.mxu0 }
 0x4c5   : > { %v6103_v13 = vpop.f32.mrf.mxu2  ;;  %v5919_v12 = vor.u32 %v5918_v38, %v5915_v6  ;;  %v6494_v6 = vshrl.u32 %v14956_v23, 16 }
 0x4c6   : > { %v6674_v11 = vpop.f32.mrf.mxu3 }
 0x4c7   : > { %v6775_v59 = vadd.f32 %v6674_v11, %v6101_v16  ;;  %10882 = vmatmul.msk.bf16.gmra.mxu1 %vm5527_vm6, %v14673_v53  ;;  %10866 = vmatmul.msk.bf16.gmra.mxu0 %vm5527_vm6, %v7135_v47  ;;  %v6104_v16 = vadd.f32 %v6103_v13, %v14461_v41  ;;  %v14982_v11 = vld [vmem:[#allocation2 + $0x94] sm:$0xff]  ;;  %v5920_v51 = vsel %vm658_vm2, %v5910_v5, %v5919_v12 }
 0x4c8   : > { %v14979_v44 = vpop.f32.mrf.mxu1  ;;  %v6498_v61 = vshll.u32 %v14982_v11, 16 }
 0x4c9   : > { %v14976_v14 = vadd.f32 %v7324_v37, %v6775_v59  ;;  %16090 = vst [vmem:[#allocation11_spill] sm:$0xff] %v14979_v44  ;;  %v7143_v59 = vor.u32 %v7142_v7, %v7139_v17  ;;  %v6496_v7 = vor.u32 %v6494_v6, %v6492_v2 }
 0x4ca   : > { %v6500_v38 = vrot.slane %v6498_v61, 1 }
 0x4cb   : > { %10841 = vmatmul.msk.bf16.gmra.mxu3 %vm5527_vm6, %v6493_v8  ;;  %v14989_v8 = vld [vmem:[#allocation2 + $0x98] sm:$0xff]   ;;  %v7144_v24 = vsel %vm658_vm2, %v7134_v52, %v7143_v59 }
 0x4cc   : > { %v7329_v39 = vpop.f32.mrf.mxu0  ;;  %v5925_v5 = vshll.u32 %v14989_v8, 16 }
 0x4cd   : > { %v6105_v47 = vpop.f32.mrf.mxu2 }
 0x4ce   : > { %v6677_v53 = vpop.f32.mrf.mxu3  ;;  %v6106_v44 = vadd.f32 %v6105_v47, %v14479_v3  ;;  %v6501_v3 = vsel %vm1261_vm3, %v6496_v7, %v6500_v38 }
 0x4cf   : > { %v6776_v37 = vadd.f32 %v6677_v53, %v6104_v16  ;;  %v5922_v16 = vshrl.u32 %v14989_v8, 16  ;;  %v12978_v53 = vld [vmem:[#allocation2 + $0xa4] sm:$0xff]  }
 0x4d0   : > { %v7146_v52 = vshrl.u32 %v12978_v53, 16  ;;  %v7149_v61 = vshll.u32 %v12978_v53, 16 }
 0x4d1   : > { %v14985_v45 = vadd.f32 %v7327_v25, %v6776_v37  ;;  %v5924_v47 = vrot.slane %v5922_v16, 3  ;;  %v5927_v37 = vrot.slane %v5925_v5, 4 }
 0x4d2   : > { %10721 = vmatmul.msk.bf16.gmra.mxu2 %vm5527_vm6, %v5920_v51  ;;  %v7148_v6 = vrot.slane %v7146_v52, 3  ;;  %v7151_v7 = vrot.slane %v7149_v61, 4 }
 0x4d3   : > { %v5928_v2 = vor.u32 %v5927_v37, %v5924_v47  ;;  %v6502_v37 = vshrl.u32 %v14982_v11, 16 }
 0x4d4   : > { %v14991_v41 = vpop.f32.mrf.mxu1  ;;  %v7332_v13 = vpop.f32.mrf.mxu0 }
 0x4d5   : > { %16091 = vst [vmem:[#allocation13_spill] sm:$0xff] %v14991_v41  ;;  %v6108_v25 = vpop.f32.mrf.mxu2  ;;  %v5929_v53 = vsel %vm658_vm2, %v5919_v12, %v5928_v2 }
 0x4d6   : > { %v6679_v40 = vpop.f32.mrf.mxu3 }
 0x4d7   : > { %v6777_v17 = vadd.f32 %v6679_v40, %v6106_v44  ;;  %10883 = vmatmul.msk.bf16.gmra.mxu1 %vm5527_vm6, %v14705_v33  ;;  %10867 = vmatmul.msk.bf16.gmra.mxu0 %vm5527_vm6, %v7144_v24  ;;  %v6109_v44 = vadd.f32 %v6108_v25, %v14490_v22  ;;  %v15008_v40 = vld [vmem:[#allocation2 + $0x9c] sm:$0xff] }
 0x4d8   : > { %v6506_v16 = vshll.u32 %v15008_v40, 16 }
 0x4d9   : > { %v15002_v23 = vadd.f32 %v7329_v39, %v6777_v17  ;;  %v7152_v17 = vor.u32 %v7151_v7, %v7148_v6  ;;  %v12980_v6 = vld [vmem:[#allocation2 + $0xac] sm:$0xff]  }
 0x4da   : > { %v6508_v52 = vrot.slane %v6506_v16, 1  ;;  %v7158_v16 = vshll.u32 %v12980_v6, 16 }
 0x4db   : > { %10842 = vmatmul.msk.bf16.gmra.mxu3 %vm5527_vm6, %v6501_v3  ;;  %v15015_v3 = vld [vmem:[#allocation2 + $0xa0] sm:$0xff]  }
 0x4dc   : > { %v15005_v51 = vpop.f32.mrf.mxu1  ;;  %v7334_v41 = vpop.f32.mrf.mxu0  ;;  %v5931_v12 = vshrl.u32 %v15015_v3, 16 }
 0x4dd   : > { %16092 = vst [vmem:[#allocation14_spill] sm:$0xff] %v15005_v51  ;;  %v6110_v24 = vpop.f32.mrf.mxu2 }
 0x4de   : > { %v6682_v33 = vpop.f32.mrf.mxu3  ;;  %v6111_v51 = vadd.f32 %v6110_v24, %v14513_v28  ;;  %v6504_v28 = vor.u32 %v6502_v37, %v6500_v38  ;;  %v5933_v24 = vrot.slane %v5931_v12, 3 }
 0x4df   : > { %v6778_v39 = vadd.f32 %v6682_v33, %v6109_v44  ;;  %v5934_v33 = vshll.u32 %v15015_v3, 16 }
 0x4e1   : > { %v15011_v5 = vadd.f32 %v7332_v13, %v6778_v39  ;;  %v7153_v13 = vsel %vm658_vm2, %v7143_v59, %v7152_v17  ;;  %v5936_v39 = vrot.slane %v5934_v33, 4  ;;  %v7155_v59 = vshrl.u32 %v12980_v6, 16 }
 0x4e2   : > { %10722 = vmatmul.msk.bf16.gmra.mxu2 %vm5527_vm6, %v5929_v53 }
 0x4e4   : > { %v7570_v22 = vpop.f32.mrf.mxu1  ;;  %v7337_v25 = vpop.f32.mrf.mxu0 }
 0x4e5   : > { %v15019_v47 = vadd.f32 %v7570_v22, %v14801_v30  ;;  %v6113_v44 = vpop.f32.mrf.mxu2  ;;  %v6509_v30 = vsel %vm1261_vm3, %v6504_v28, %v6508_v52 }
 0x4e6   : > { %v6684_v61 = vpop.f32.mrf.mxu3 }
 0x4e7   : > { %v6779_v7 = vadd.f32 %v6684_v61, %v6111_v51  ;;  %10884 = vmatmul.msk.bf16.gmra.mxu1 %vm5527_vm6, %v14759_v31  ;;  %10868 = vmatmul.msk.bf16.gmra.mxu0 %vm5527_vm6, %v7153_v13  ;;  %v6114_v51 = vadd.f32 %v6113_v44, %v14524_v20  ;;  %v15036_v31 = vld [vmem:[#allocation2 + $0xa4] sm:$0xff]  ;;  %v5937_v13 = vor.u32 %v5936_v39, %v5933_v24  ;;  %v6510_v39 = vshrl.u32 %v15008_v40, 16 }
 0x4e8   : > { %v6514_v33 = vshll.u32 %v15036_v31, 16  ;;  %v15043_v20 = vld [vmem:[#allocation2 + $0xa8] sm:$0xff]  }
 0x4e9   : > { %v15029_v11 = vadd.f32 %v7334_v41, %v6779_v7  ;;  %v7157_v41 = vrot.slane %v7155_v59, 3  ;;  %v7160_v7 = vrot.slane %v7158_v16, 4  ;;  %v5938_v28 = vsel %vm658_vm2, %v5928_v2, %v5937_v13 }
 0x4ea   : > { %v6516_v59 = vrot.slane %v6514_v33, 1  ;;  %v5940_v2 = vshrl.u32 %v15043_v20, 16 }
 0x4eb   : > { %10843 = vmatmul.msk.bf16.gmra.mxu3 %vm5527_vm6, %v6509_v30  ;;  %v7161_v30 = vor.u32 %v7160_v7, %v7157_v41  ;;  %v12982_v41 = vld [vmem:[#allocation2 + $0xb4] sm:$0xff]  }
 0x4ec   : > { %v7572_v53 = vpop.f32.mrf.mxu1  ;;  %v7339_v22 = vpop.f32.mrf.mxu0  ;;  %v7167_v33 = vshll.u32 %v12982_v41, 16 }
 0x4ed   : > { %v15034_v61 = vadd.f32 %v7572_v53, %v14822_v57  ;;  %v6115_v37 = vpop.f32.mrf.mxu2 }
 0x4ee   : > { %v6687_v38 = vpop.f32.mrf.mxu3  ;;  %v6116_v53 = vadd.f32 %v6115_v37, %v14547_v49  ;;  %v6512_v49 = vor.u32 %v6510_v39, %v6508_v52  ;;  %v5942_v37 = vrot.slane %v5940_v2, 3 }
 0x4ef   : > { %v6780_v12 = vadd.f32 %v6687_v38, %v6114_v51  ;;  %v5943_v38 = vshll.u32 %v15043_v20, 16 }
 0x4f1   : > { %v15039_v6 = vadd.f32 %v7337_v25, %v6780_v12  ;;  %v7162_v25 = vsel %vm658_vm2, %v7152_v17, %v7161_v30  ;;  %v5945_v12 = vrot.slane %v5943_v38, 4  ;;  %v7164_v17 = vshrl.u32 %v12982_v41, 16 }
 0x4f2   : > { %10723 = vmatmul.msk.bf16.gmra.mxu2 %vm5527_vm6, %v5938_v28 }
 0x4f4   : > { %v7575_v57 = vpop.f32.mrf.mxu1  ;;  %v7342_v44 = vpop.f32.mrf.mxu0 }
 0x4f5   : > { %v15047_v24 = vadd.f32 %v7575_v57, %v14831_v29  ;;  %v6118_v51 = vpop.f32.mrf.mxu2  ;;  %v6517_v29 = vsel %vm1261_vm3, %v6512_v49, %v6516_v59 }
 0x4f6   : > { %v6689_v16 = vpop.f32.mrf.mxu3 }
 0x4f7   : > { %16093 = vst [vmem:[#allocation24_spill] sm:$0xff] %v15047_v24  ;;  %v6781_v7 = vadd.f32 %v6689_v16, %v6116_v53  ;;  %10885 = vmatmul.msk.bf16.gmra.mxu1 %vm5527_vm6, %v14807_v26  ;;  %10869 = vmatmul.msk.bf16.gmra.mxu0 %vm5527_vm6, %v7162_v25  ;;  %v6119_v53 = vadd.f32 %v6118_v51, %v14558_v58  ;;  %v15064_v26 = vld [vmem:[#allocation2 + $0xac] sm:$0xff] }
 0x4f8   : > { %v5946_v25 = vor.u32 %v5945_v12, %v5942_v37  ;;  %v6522_v38 = vshll.u32 %v15064_v26, 16  ;;  %v15071_v58 = vld [vmem:[#allocation2 + $0xb0] sm:$0xff]   ;;  %v6518_v12 = vshrl.u32 %v15036_v31, 16 }
 0x4f9   : > { %v15057_v40 = vadd.f32 %v7339_v22, %v6781_v7  ;;  %v7166_v22 = vrot.slane %v7164_v17, 3  ;;  %v7169_v7 = vrot.slane %v7167_v33, 4 }
 0x4fa   : > { %v5947_v49 = vsel %vm658_vm2, %v5937_v13, %v5946_v25  ;;  %v6524_v17 = vrot.slane %v6522_v38, 1  ;;  %v5949_v13 = vshrl.u32 %v15071_v58, 16 }
 0x4fb   : > { %10844 = vmatmul.msk.bf16.gmra.mxu3 %vm5527_vm6, %v6517_v29  ;;  %v7170_v29 = vor.u32 %v7169_v7, %v7166_v22  ;;  %v12984_v22 = vld [vmem:[#allocation2 + $0xbc] sm:$0xff]  }
 0x4fc   : > { %v7577_v28 = vpop.f32.mrf.mxu1  ;;  %v7344_v57 = vpop.f32.mrf.mxu0 }
 0x4fd   : > { %v15062_v16 = vadd.f32 %v7577_v28, %v14848_v46  ;;  %v6120_v39 = vpop.f32.mrf.mxu2  ;;  %v16095_v28 = vld [vmem:[#allocation16_spill] sm:$0xff] }
 0x4fe   : > { %v6692_v52 = vpop.f32.mrf.mxu3 }
 0x4ff   : > { %16094 = vst [vmem:[#allocation15_spill] sm:$0xff] %v15062_v16  ;;  %v6782_v2 = vadd.f32 %v6692_v52, %v6119_v53  ;;  %v6121_v16 = vadd.f32 %v6120_v39, %v16095_v28  ;;  %v5952_v52 = vshll.u32 %v15071_v58, 16 }
 0x501   : > { %v15067_v41 = vadd.f32 %v7342_v44, %v6782_v2  ;;  %v7171_v44 = vsel %vm658_vm2, %v7161_v30, %v7170_v29  ;;  %v5951_v2 = vrot.slane %v5949_v13, 3  ;;  %v5954_v38 = vrot.slane %v5952_v52, 4 }
 0x502   : > { %10724 = vmatmul.msk.bf16.gmra.mxu2 %vm5527_vm6, %v5947_v49  ;;  %v7173_v30 = vshrl.u32 %v12984_v22, 16  ;;  %v7176_v49 = vshll.u32 %v12984_v22, 16 }
 0x504   : > { %v7580_v46 = vpop.f32.mrf.mxu1  ;;  %v7347_v51 = vpop.f32.mrf.mxu0 }
 0x505   : > { %v15075_v37 = vadd.f32 %v7580_v46, %v14857_v0  ;;  %v6123_v53 = vpop.f32.mrf.mxu2  ;;  %v6520_v0 = vor.u32 %v6518_v12, %v6516_v59 }
 0x506   : > { %v6694_v33 = vpop.f32.mrf.mxu3 }
 0x507   : > { %16096 = vst [vmem:[#allocation25_spill] sm:$0xff] %v15075_v37  ;;  %v6783_v7 = vadd.f32 %v6694_v33, %v6121_v16  ;;  %10886 = vmatmul.msk.bf16.gmra.mxu1 %vm5527_vm6, %v14835_v56  ;;  %10870 = vmatmul.msk.bf16.gmra.mxu0 %vm5527_vm6, %v7171_v44  ;;  %v6525_v39 = vsel %vm1261_vm3, %v6520_v0, %v6524_v17  ;;  %v16097_v37 = vld [vmem:[#allocation18_spill] sm:$0xff]  ;;  %v15092_v56 = vld [vmem:[#allocation2 + $0xb4] sm:$0xff] }
 0x508   : > { %v6124_v16 = vadd.f32 %v6123_v53, %v16097_v37  ;;  %v5955_v44 = vor.u32 %v5954_v38, %v5951_v2  ;;  %v6530_v52 = vshll.u32 %v15092_v56, 16  ;;  %v15099_v37 = vld [vmem:[#allocation2 + $0xb8] sm:$0xff]   ;;  %v6526_v38 = vshrl.u32 %v15064_v26, 16 }
 0x509   : > { %v15085_v31 = vadd.f32 %v7344_v57, %v6783_v7  ;;  %v7175_v57 = vrot.slane %v7173_v30, 3  ;;  %v7178_v7 = vrot.slane %v7176_v49, 4 }
 0x50a   : > { %v5956_v0 = vsel %vm658_vm2, %v5946_v25, %v5955_v44  ;;  %v6532_v30 = vrot.slane %v6530_v52, 1  ;;  %v5958_v25 = vshrl.u32 %v15099_v37, 16 }
 0x50b   : > { %10845 = vmatmul.msk.bf16.gmra.mxu3 %vm5527_vm6, %v6525_v39  ;;  %v7179_v39 = vor.u32 %v7178_v7, %v7175_v57  ;;  %v12986_v57 = vld [vmem:[#allocation2 + $0xc4] sm:$0xff]  }
 0x50c   : > { %v7582_v46 = vpop.f32.mrf.mxu1  ;;  %v7349_v28 = vpop.f32.mrf.mxu0 }
 0x50d   : > { %v15090_v33 = vadd.f32 %v7582_v46, %v14874_v1  ;;  %v6125_v12 = vpop.f32.mrf.mxu2  ;;  %v16099_v46 = vld [vmem:[#allocation17_spill] sm:$0xff] }
 0x50e   : > { %v6697_v59 = vpop.f32.mrf.mxu3 }
 0x50f   : > { %16098 = vst [vmem:[#allocation16_spill] sm:$0xff] %v15090_v33  ;;  %v6784_v13 = vadd.f32 %v6697_v59, %v6124_v16  ;;  %v6126_v33 = vadd.f32 %v6125_v12, %v16099_v46  ;;  %v5961_v59 = vshll.u32 %v15099_v37, 16 }
 0x511   : > { %v15095_v22 = vadd.f32 %v7347_v51, %v6784_v13  ;;  %v7180_v51 = vsel %vm658_vm2, %v7170_v29, %v7179_v39  ;;  %v5960_v13 = vrot.slane %v5958_v25, 3  ;;  %v5963_v52 = vrot.slane %v5961_v59, 4 }
 0x512   : > { %10725 = vmatmul.msk.bf16.gmra.mxu2 %vm5527_vm6, %v5956_v0  ;;  %v7182_v29 = vshrl.u32 %v12986_v57, 16  ;;  %v7185_v0 = vshll.u32 %v12986_v57, 16 }
 0x514   : > { %v7585_v1 = vpop.f32.mrf.mxu1  ;;  %v7352_v53 = vpop.f32.mrf.mxu0 }
 0x515   : > { %v15103_v2 = vadd.f32 %v7585_v1, %v14883_v18  ;;  %v6128_v16 = vpop.f32.mrf.mxu2  ;;  %v6528_v18 = vor.u32 %v6526_v38, %v6524_v17  ;;  %v5964_v17 = vor.u32 %v5963_v52, %v5960_v13  ;;  %v7184_v38 = vrot.slane %v7182_v29, 3 }
 0x516   : > { %v6699_v49 = vpop.f32.mrf.mxu3 }
 0x517   : > { %16100 = vst [vmem:[#allocation18_spill] sm:$0xff] %v15103_v2  ;;  %v6785_v7 = vadd.f32 %v6699_v49, %v6126_v33  ;;  %10887 = vmatmul.msk.bf16.gmra.mxu1 %vm5527_vm6, %v14861_v9  ;;  %10871 = vmatmul.msk.bf16.gmra.mxu0 %vm5527_vm6, %v7180_v51  ;;  %v6533_v12 = vsel %vm1261_vm3, %v6528_v18, %v6532_v30  ;;  %v16101_v2 = vld [vmem:[#allocation19_spill] sm:$0xff]  ;;  %v7187_v18 = vrot.slane %v7185_v0, 4 }
 0x518   : > { %v6129_v33 = vadd.f32 %v6128_v16, %v16101_v2  ;;  %v5965_v59 = vsel %vm658_vm2, %v5955_v44, %v5964_v17  ;;  %v16102_v16 = vld [vmem:[#allocation4_spill] sm:$0xff] }
 0x519   : > { %v15113_v26 = vadd.f32 %v7349_v28, %v6785_v7  ;;  %v11288_v28 = vld [vmem:[#allocation2 + $0xbc] sm:$0xff]  ;;  %v7188_v57 = vor.u32 %v7187_v18, %v7184_v38 }
 0x51b   : > { %10846 = vmatmul.msk.bf16.gmra.mxu3 %vm5527_vm6, %v6533_v12  ;;  %v6538_v12 = vshll.u32 %v11288_v28, 16  ;;  %v7189_v52 = vsel %vm658_vm2, %v7179_v39, %v7188_v57 }
 0x51c   : > { %v7587_v1 = vpop.f32.mrf.mxu1  ;;  %v7354_v46 = vpop.f32.mrf.mxu0 }
 0x51d   : > { %v15118_v49 = vadd.f32 %v7587_v1, %v14900_v10  ;;  %v6130_v51 = vpop.f32.mrf.mxu2  ;;  %v6540_v0 = vrot.slane %v6538_v12, 1 }
 0x51e   : > { %v6702_v9 = vpop.f32.mrf.mxu3  ;;  %v6131_v10 = vadd.f32 %v6130_v51, %v16102_v16 }
 0x51f   : > { %v6786_v7 = vadd.f32 %v6702_v9, %v6129_v33  ;;  %v12987_v33 = vld [vmem:[#allocation2 + $0xcc] sm:$0xff]  }
 0x520   : > { %v7194_v51 = vshll.u32 %v12987_v33, 16 }
 0x521   : > { %v15120_v25 = vadd.f32 %v7352_v53, %v6786_v7  ;;  %v6534_v53 = vshrl.u32 %v15092_v56, 16  ;;  %v16103_v56 = vld [vmem:[#allocation3_spill] sm:$0xff] }
 0x522   : > { %10726 = vmatmul.msk.bf16.gmra.mxu2 %vm5527_vm6, %v5965_v59 }
 0x523   : > { %v6536_v9 = vor.u32 %v6534_v53, %v6532_v30  ;;  %v11289_v30 = vld [vmem:[#allocation2 + $0xc4] sm:$0xff]  ;;  %v5974_v53 = vsel %vm658_vm2, %v5964_v17, %v14789_v34 }
 0x524   : > { %v7590_v24 = vpop.f32.mrf.mxu1  ;;  %v7357_v2 = vpop.f32.mrf.mxu0 }
 0x525   : > { %v15126_v1 = vadd.f32 %v7590_v24, %v14909_v50  ;;  %v6133_v29 = vpop.f32.mrf.mxu2  ;;  %v6541_v50 = vsel %vm1261_vm3, %v6536_v9, %v6540_v0  ;;  %v7191_v24 = vshrl.u32 %v12987_v33, 16 }
 0x526   : > { %v6704_v13 = vpop.f32.mrf.mxu3  ;;  %v6134_v7 = vadd.f32 %v6133_v29, %v16103_v56 }
 0x527   : > { %v6787_v44 = vadd.f32 %v6704_v13, %v6131_v10  ;;  %10888 = vmatmul.msk.bf16.gmra.mxu1 %vm5527_vm6, %v14887_v48  ;;  %10872 = vmatmul.msk.bf16.gmra.mxu0 %vm5527_vm6, %v7189_v52  ;;  %v7193_v16 = vrot.slane %v7191_v24, 3  ;;  %v7196_v10 = vrot.slane %v7194_v51, 4  ;;  %v15141_v13 = vld [vmem:[#allocation2 + $0xd0] sm:$0xff]  }
 0x528   : > { %v11805_v29 = vunpack.c.h.b16 %v15141_v13 }
 0x529   : > { %v15133_v38 = vadd.f32 %v7354_v46, %v6787_v44  ;;  %v7197_v33 = vor.u32 %v7196_v10, %v7193_v16  ;;  %v6546_v44 = vshll.u32 %v11289_v30, 16  ;;  %v6236_v16 = vld [vmem:[#allocation2 + $0xcc] sm:$0x1] }
 0x52a   : > { %v6983_v34 = vpack.c.b16 %v11805_v29, %v11805_v29 }
 0x52b   : > { %10847 = vmatmul.msk.bf16.gmra.mxu3 %vm5527_vm6, %v6541_v50  ;;  %v16104_v50 = vld [vmem:[#allocation20_spill] sm:$0xff] }
 0x52c   : > { %v7592_v39 = vpop.f32.mrf.mxu1  ;;  %v7359_v18 = vpop.f32.mrf.mxu0 }
 0x52d   : > { %v15139_v59 = vadd.f32 %v7592_v39, %v14926_v19  ;;  %v6135_v48 = vpop.f32.mrf.mxu2 }
 0x52e   : > { %v6707_v12 = vpop.f32.mrf.mxu3  ;;  %v6136_v24 = vadd.f32 %v6135_v48, %v16104_v50  ;;  %v7200_v48 = vshrl.u32 %v6983_v34, 16 }
 0x52f   : > { %v6788_v46 = vadd.f32 %v6707_v12, %v6134_v7  ;;  %v6542_v7 = vshrl.u32 %v11288_v28, 16  ;;  %v6548_v12 = vrot.slane %v6546_v44, 1  ;;  %v16106_v44 = vld [vmem:[#allocation6_spill] sm:$0xff] }
 0x531   : > { %v15143_v52 = vadd.f32 %v7357_v2, %v6788_v46  ;;  %v7198_v2 = vsel %vm658_vm2, %v7188_v57, %v7197_v33  ;;  %v6544_v10 = vor.u32 %v6542_v7, %v6540_v0 }
 0x532   : > { %10727 = vmatmul.msk.bf16.gmra.mxu2 %vm5527_vm6, %v5974_v53  ;;  %v7203_v53 = vshll.u32 %v6983_v34, 16 }
 0x534   : > { %v7595_v19 = vpop.f32.mrf.mxu1  ;;  %v7362_v9 = vpop.f32.mrf.mxu0  ;;  %v7205_v0 = vrot.slane %v7203_v53, 4 }
 0x535   : > { %v15151_v51 = vadd.f32 %v7595_v19, %v14935_v54  ;;  %v6138_v56 = vpop.f32.mrf.mxu2  ;;  %v6549_v54 = vsel %vm1261_vm3, %v6544_v10, %v6548_v12  ;;  %v6336_v19 = vunpack.c.l.b16 %v6236_v16 }
 0x536   : > { %v6709_v39 = vpop.f32.mrf.mxu3  ;;  %v6139_v29 = vadd.f32 %v6138_v56, %v16106_v44  ;;  %v16108_v56 = vld [vmem:[#allocation5_spill] sm:$0xff] }
 0x537   : > { %16105 = vst [vmem:[#allocation17_spill] sm:$0xff] %v15151_v51  ;;  %v6789_v17 = vadd.f32 %v6709_v39, %v6136_v24  ;;  %10889 = vmatmul.msk.bf16.gmra.mxu1 %vm5527_vm6, %v14913_v43  ;;  %10873 = vmatmul.msk.bf16.gmra.mxu0 %vm5527_vm6, %v7198_v2  ;;  %v7202_v39 = vrot.slane %v7200_v48, 3 }
 0x539   : > { %v15157_v46 = vadd.f32 %v7359_v18, %v6789_v17  ;;  %v6361_v18 = vpack.c.b16 %v6336_v19, %v6336_v19  ;;  %v7206_v17 = vor.u32 %v7205_v0, %v7202_v39 }
 0x53b   : > { %10848 = vmatmul.msk.bf16.gmra.mxu3 %vm5527_vm6, %v6549_v54  ;;  %v6554_v34 = vshll.u32 %v6361_v18, 16  ;;  %v11290_v54 = vld [vmem:[#allocation2 + $0x18] sm:$0xff]  ;;  %v7207_v53 = vsel %vm658_vm2, %v7197_v33, %v7206_v17  ;;  %v12125_v17 = vld [vmem:[#allocation2 + $0x28] sm:$0xff]  }
 0x53c   : > { %v7597_v28 = vpop.f32.mrf.mxu1  ;;  %v7364_v57 = vpop.f32.mrf.mxu0  ;;  %v7915_v0 = vshll.u32 %v11290_v54, 16 }
 0x53d   : > { %v15163_v50 = vadd.f32 %v7597_v28, %v14952_v55  ;;  %v6140_v24 = vpop.f32.mrf.mxu2  ;;  %v8361_v28 = vld [vmem:[#allocation2 + $0x24] sm:$0xf] }
 0x53e   : > { %v6712_v43 = vpop.f32.mrf.mxu3  ;;  %v6141_v44 = vadd.f32 %v6140_v24, %v16108_v56  ;;  %v7917_v56 = vrot.slane %v7915_v0, 1 }
 0x53f   : > { %16107 = vst [vmem:[#allocation19_spill] sm:$0xff] %v15163_v50  ;;  %v6790_v2 = vadd.f32 %v6712_v43, %v6139_v29  ;;  %v6556_v29 = vrot.slane %v6554_v34, 1  ;;  %v15174_v43 = vld [vmem:[#allocation2 + $0x20] sm:$0xff]  ;;  %v11808_v50 = vunpack.c.l.b16 %v12125_v17 }
 0x540   : > { %v7920_v33 = vshll.u32 %v15174_v43, 16 }
 0x541   : > { %v15165_v7 = vadd.f32 %v7362_v9, %v6790_v2  ;;  %v6550_v9 = vshrl.u32 %v11289_v30, 16 }
 0x542   : > { %10728 = vmatmul.msk.bf16.gmra.mxu2 %vm5527_vm6, %v14796_v36  ;;  %v8360_v36 = vld [vmem:[#allocation2 + $0x20] sm:$0x8] }
 0x543   : > { %v6552_v24 = vor.u32 %v6550_v9, %v6548_v12  ;;  %v8460_v30 = vunpack.c.l.b16 %v8360_v36  ;;  %v7922_v9 = vrot.slane %v7920_v33, 1 }
 0x544   : > { %v7600_v16 = vpop.f32.mrf.mxu1  ;;  %v7367_v10 = vpop.f32.mrf.mxu0 }
 0x545   : > { %v15171_v55 = vadd.f32 %v7600_v16, %v14959_v15  ;;  %v6143_v19 = vpop.f32.mrf.mxu2  ;;  %v8461_v15 = vunpack.c.l.b16 %v8361_v28  ;;  %v6557_v2 = vsel %vm1261_vm3, %v6552_v24, %v6556_v29  ;;  %v8543_v29 = vshrl.u32 %v12125_v17, 16 }
 0x546   : > { %v6714_v48 = vpop.f32.mrf.mxu3 }
 0x547   : > { %16109 = vst [vmem:[#allocation4_spill] sm:$0xff] %v15171_v55  ;;  %v6791_v39 = vadd.f32 %v6714_v48, %v6141_v44  ;;  %10890 = vmatmul.msk.bf16.gmra.mxu1 %vm5527_vm6, %v14939_v35  ;;  %10874 = vmatmul.msk.bf16.gmra.mxu0 %vm5527_vm6, %v7207_v53  ;;  %v8509_v35 = vpack.c.b16 %v8461_v15, %v8460_v30  ;;  %v16110_v44 = vld [vmem:[#allocation21_spill] sm:$0xff]  ;;  %v7913_v53 = vshrl.u32 %v11290_v54, 16  ;;  %v8545_v30 = vrot.slane %v8543_v29, 3 }
 0x548   : > { %v6144_v48 = vadd.f32 %v6143_v19, %v16110_v44 }
 0x549   : > { %v15179_v18 = vadd.f32 %v7364_v57, %v6791_v39  ;;  %v8546_v39 = vshll.u32 %v12125_v17, 16  ;;  %v7918_v36 = vor.u32 %v7917_v56, %v7913_v53  ;;  %v8535_v55 = vshrl.u32 %v8509_v35, 16 }
 0x54a   : > { %v9012_v56 = vpack.c.b16 %v11808_v50, %v8461_v15 }
 0x54b   : > { %10849 = vmatmul.msk.bf16.gmra.mxu3 %vm5527_vm6, %v6557_v2  ;;  %v8538_v2 = vshll.u32 %v8509_v35, 16  ;;  %v7923_v0 = vsel %vm1261_vm3, %v7918_v36, %v7922_v9  ;;  %v8548_v19 = vrot.slane %v8546_v39, 4  ;;  %v8537_v44 = vrot.slane %v8535_v55, 3 }
 0x54c   : > { %v7602_v34 = vpop.f32.mrf.mxu1  ;;  %v7369_v16 = vpop.f32.mrf.mxu0 }
 0x54d   : > { %v15186_v12 = vadd.f32 %v7602_v34, %v14976_v14  ;;  %v6145_v57 = vpop.f32.mrf.mxu2  ;;  %v8540_v54 = vrot.slane %v8538_v2, 4  ;;  %v7924_v2 = vshrl.u32 %v15174_v43, 16  ;;  %v12762_v43 = vld [vmem:[#allocation2 + $0x2c] sm:$0xff]  }
 0x54e   : > { %v6717_v28 = vpop.f32.mrf.mxu3  ;;  %v6146_v33 = vadd.f32 %v6145_v57, %v14784_v62 }
 0x54f   : > { %v6792_v24 = vadd.f32 %v6717_v28, %v6144_v48  ;;  %v11292_v28 = vld [vmem:[#allocation2 + $0x28] sm:$0xff]  ;;  %v8541_v29 = vor.u32 %v8540_v54, %v8537_v44 }
 0x550   : > { %v7928_v62 = vshll.u32 %v11292_v28, 16 }
 0x551   : > { %v15188_v51 = vadd.f32 %v7367_v10, %v6792_v24  ;;  %v8549_v10 = vor.u32 %v8548_v19, %v8545_v30 }
 0x552   : > { %10997 = vmatmul.msk.bf16.vlgmr.msra.gmra.mxu2 %vm5527_vm6, %v7923_v0  ;;  %v7930_v0 = vrot.slane %v7928_v62, 1 }
 0x553   : > { %v8550_v55 = vsel %vm658_vm2, %v8541_v29, %v8549_v10 }
 0x554   : > { %v7605_v14 = vpop.f32.mrf.mxu1  ;;  %v7372_v34 = vpop.f32.mrf.mxu0 }
 0x555   : > { %v15194_v48 = vadd.f32 %v7605_v14, %v14985_v45  ;;  %v6148_v17 = vpop.f32.mrf.mxu2  ;;  %v12126_v45 = vld [vmem:[#allocation2 + $0x30] sm:$0xff]   ;;  %v7926_v14 = vor.u32 %v7924_v2, %v7922_v9 }
 0x556   : > { %v6719_v35 = vpop.f32.mrf.mxu3  ;;  %v6149_v57 = vadd.f32 %v6148_v17, %v14798_v32  ;;  %v8555_v30 = vshll.u32 %v12126_v45, 16  ;;  %v11293_v9 = vld [vmem:[#allocation2 + $0x30] sm:$0xff] }
 0x557   : > { %v6793_v53 = vadd.f32 %v6719_v35, %v6146_v33  ;;  %10891 = vmatmul.msk.bf16.gmra.mxu1 %vm5527_vm6, %v14965_v42  ;;  %11047 = vmatmul.msk.bf16.vlgmr.msra.gmra.mxu0 %vm5527_vm6, %v9012_v56  ;;  %v7931_v54 = vsel %vm1261_vm3, %v7926_v14, %v7930_v0 }
 0x558   : > { %v8557_v56 = vrot.slane %v8555_v30, 4 }
 0x559   : > { %v15199_v39 = vadd.f32 %v7369_v16, %v6793_v53  ;;  %v8552_v16 = vshrl.u32 %v12126_v45, 16 }
 0x55b   : > { %11022 = vmatmul.msk.bf16.vlgmr.msra.gmra.mxu3 %vm5527_vm6, %v8550_v55  ;;  %v8554_v33 = vrot.slane %v8552_v16, 3 }
 0x55c   : > { %v7607_v50 = vpop.f32.mrf.mxu1  ;;  %v7374_v15 = vpop.f32.mrf.mxu0 }
 0x55d   : > { %v15205_v24 = vadd.f32 %v7607_v50, %v15002_v23  ;;  %v6150_v42 = vpop.f32.mrf.mxu2  ;;  %v8558_v55 = vor.u32 %v8557_v56, %v8554_v33  ;;  %v7936_v50 = vshll.u32 %v11293_v9, 16 }
 0x55e   : > { %v6722_v36 = vpop.f32.mrf.mxu3  ;;  %v6151_v35 = vadd.f32 %v6150_v42, %v14819_v4  ;;  %v12127_v4 = vld [vmem:[#allocation2 + $0x38] sm:$0xff]  }
 0x55f   : > { %v6794_v19 = vadd.f32 %v6722_v36, %v6149_v57  ;;  %v8559_v45 = vsel %vm658_vm2, %v8549_v10, %v8558_v55  ;;  %v7938_v30 = vrot.slane %v7936_v50, 1 }
 0x561   : > { %v15208_v44 = vadd.f32 %v7372_v34, %v6794_v19  ;;  %v8561_v19 = vshrl.u32 %v12127_v4, 16 }
 0x562   : > { %10998 = vmatmul.msk.bf16.gmra.mxu2 %vm5527_vm6, %v7931_v54 }
 0x563   : > { %v8563_v56 = vrot.slane %v8561_v19, 3 }
 0x564   : > { %v7610_v32 = vpop.f32.mrf.mxu1  ;;  %v7377_v23 = vpop.f32.mrf.mxu0 }
 0x565   : > { %v15214_v17 = vadd.f32 %v7610_v32, %v15011_v5  ;;  %v6153_v29 = vpop.f32.mrf.mxu2 }
 0x566   : > { %v6724_v53 = vpop.f32.mrf.mxu3  ;;  %v6154_v36 = vadd.f32 %v6153_v29, %v14828_v60 }
 0x567   : > { %v6795_v34 = vadd.f32 %v6724_v53, %v6151_v35  ;;  %10892 = vmatmul.msk.bf16.gmra.mxu1 %vm5527_vm6, %v14989_v8  ;;  %11048 = vmatmul.msk.bf16.gmra.mxu0 %vm5527_vm6, %v12762_v43  ;;  %v7932_v8 = vshrl.u32 %v11292_v28, 16  ;;  %v12764_v28 = vld [vmem:[#allocation2 + $0x34] sm:$0xff]  }
 0x569   : > { %v15219_v62 = vadd.f32 %v7374_v15, %v6795_v34  ;;  %v8564_v15 = vshll.u32 %v12127_v4, 16  ;;  %v7934_v54 = vor.u32 %v7932_v8, %v7930_v0  ;;  %v11294_v0 = vld [vmem:[#allocation2 + $0x38] sm:$0xff] }
 0x56a   : > { %v7944_v4 = vshll.u32 %v11294_v0, 16 }
 0x56b   : > { %11023 = vmatmul.msk.bf16.gmra.mxu3 %vm5527_vm6, %v8559_v45  ;;  %v7939_v33 = vsel %vm1261_vm3, %v7934_v54, %v7938_v30  ;;  %v8566_v32 = vrot.slane %v8564_v15, 4 }
 0x56c   : > { %v7612_v5 = vpop.f32.mrf.mxu1  ;;  %v7379_v57 = vpop.f32.mrf.mxu0  ;;  %v7946_v19 = vrot.slane %v7944_v4, 1 }
 0x56d   : > { %v15225_v42 = vadd.f32 %v7612_v5, %v15029_v11  ;;  %v6155_v16 = vpop.f32.mrf.mxu2  ;;  %v8567_v34 = vor.u32 %v8566_v32, %v8563_v56 }
 0x56e   : > { %v6727_v2 = vpop.f32.mrf.mxu3  ;;  %v6156_v11 = vadd.f32 %v6155_v16, %v14845_v27  ;;  %v12128_v27 = vld [vmem:[#allocation2 + $0x40] sm:$0xff]  }
 0x56f   : > { %v6796_v14 = vadd.f32 %v6727_v2, %v6154_v36  ;;  %v8568_v50 = vsel %vm658_vm2, %v8558_v55, %v8567_v34  ;;  %v8570_v15 = vshrl.u32 %v12128_v27, 16 }
 0x571   : > { %v15227_v10 = vadd.f32 %v7377_v23, %v6796_v14  ;;  %v8572_v56 = vrot.slane %v8570_v15, 3 }
 0x572   : > { %10999 = vmatmul.msk.bf16.gmra.mxu2 %vm5527_vm6, %v7939_v33 }
 0x574   : > { %v7615_v60 = vpop.f32.mrf.mxu1  ;;  %v7382_v35 = vpop.f32.mrf.mxu0 }
 0x575   : > { %v15233_v43 = vadd.f32 %v7615_v60, %v15039_v6  ;;  %v6158_v29 = vpop.f32.mrf.mxu2 }
 0x576   : > { %v6729_v53 = vpop.f32.mrf.mxu3  ;;  %v6159_v36 = vadd.f32 %v6158_v29, %v14854_v21 }
 0x577   : > { %v6797_v23 = vadd.f32 %v6729_v53, %v6156_v11  ;;  %10893 = vmatmul.msk.bf16.gmra.mxu1 %vm5527_vm6, %v15015_v3  ;;  %11049 = vmatmul.msk.bf16.gmra.mxu0 %vm5527_vm6, %v12764_v28  ;;  %v7940_v3 = vshrl.u32 %v11293_v9, 16  ;;  %v12766_v9 = vld [vmem:[#allocation2 + $0x3c] sm:$0xff]  }
 0x579   : > { %v15238_v45 = vadd.f32 %v7379_v57, %v6797_v23  ;;  %v8573_v57 = vshll.u32 %v12128_v27, 16  ;;  %v7942_v54 = vor.u32 %v7940_v3, %v7938_v30  ;;  %v11295_v30 = vld [vmem:[#allocation2 + $0x40] sm:$0xff] }
 0x57a   : > { %v7952_v27 = vshll.u32 %v11295_v30, 16 }
 0x57b   : > { %11024 = vmatmul.msk.bf16.gmra.mxu3 %vm5527_vm6, %v8568_v50  ;;  %v7947_v33 = vsel %vm1261_vm3, %v7942_v54, %v7946_v19  ;;  %v8575_v32 = vrot.slane %v8573_v57, 4 }
 0x57c   : > { %v7617_v6 = vpop.f32.mrf.mxu1  ;;  %v7384_v5 = vpop.f32.mrf.mxu0 }
 0x57d   : > { %v15244_v2 = vadd.f32 %v7617_v6, %v15057_v40  ;;  %v6160_v8 = vpop.f32.mrf.mxu2  ;;  %v16111_v40 = vld [vmem:[#allocation8_spill] sm:$0xff]  ;;  %v8576_v23 = vor.u32 %v8575_v32, %v8572_v56 }
 0x57e   : > { %v6732_v16 = vpop.f32.mrf.mxu3  ;;  %v6161_v11 = vadd.f32 %v6160_v8, %v16111_v40 }
 0x57f   : > { %v6798_v14 = vadd.f32 %v6732_v16, %v6159_v36  ;;  %v8577_v4 = vsel %vm658_vm2, %v8567_v34, %v8576_v23  ;;  %v16112_v16 = vld [vmem:[#allocation7_spill] sm:$0xff] }
 0x581   : > { %v15246_v55 = vadd.f32 %v7382_v35, %v6798_v14  ;;  %v7954_v14 = vrot.slane %v7952_v27, 1 }
 0x582   : > { %11000 = vmatmul.msk.bf16.gmra.mxu2 %vm5527_vm6, %v7947_v33 }
 0x584   : > { %v7620_v21 = vpop.f32.mrf.mxu1  ;;  %v7387_v60 = vpop.f32.mrf.mxu0 }
 0x585   : > { %v15252_v28 = vadd.f32 %v7620_v21, %v15067_v41  ;;  %v6163_v29 = vpop.f32.mrf.mxu2  ;;  %v12129_v41 = vld [vmem:[#allocation2 + $0x48] sm:$0xff]  }
 0x586   : > { %v6734_v53 = vpop.f32.mrf.mxu3  ;;  %v6164_v8 = vadd.f32 %v6163_v29, %v16112_v16  ;;  %v8579_v54 = vshrl.u32 %v12129_v41, 16 }
 0x587   : > { %v6799_v35 = vadd.f32 %v6734_v53, %v6161_v11  ;;  %10894 = vmatmul.msk.bf16.gmra.mxu1 %vm5527_vm6, %v15043_v20  ;;  %11050 = vmatmul.msk.bf16.gmra.mxu0 %vm5527_vm6, %v12766_v9  ;;  %v7948_v20 = vshrl.u32 %v11294_v0, 16  ;;  %v12768_v0 = vld [vmem:[#allocation2 + $0x44] sm:$0xff]  }
 0x588   : > { %v8581_v21 = vrot.slane %v8579_v54, 3 }
 0x589   : > { %v15257_v50 = vadd.f32 %v7384_v5, %v6799_v35  ;;  %v8582_v5 = vshll.u32 %v12129_v41, 16  ;;  %v7950_v56 = vor.u32 %v7948_v20, %v7946_v19  ;;  %v11296_v19 = vld [vmem:[#allocation2 + $0x48] sm:$0xff] }
 0x58a   : > { %v7960_v16 = vshll.u32 %v11296_v19, 16 }
 0x58b   : > { %11025 = vmatmul.msk.bf16.gmra.mxu3 %vm5527_vm6, %v8577_v4  ;;  %v7955_v32 = vsel %vm1261_vm3, %v7950_v56, %v7954_v14  ;;  %v8584_v40 = vrot.slane %v8582_v5, 4 }
 0x58c   : > { %v7622_v6 = vpop.f32.mrf.mxu1  ;;  %v7389_v36 = vpop.f32.mrf.mxu0  ;;  %v7962_v56 = vrot.slane %v7960_v16, 1 }
 0x58d   : > { %v15263_v3 = vadd.f32 %v7622_v6, %v15085_v31  ;;  %v6165_v57 = vpop.f32.mrf.mxu2  ;;  %v16113_v31 = vld [vmem:[#allocation22_spill] sm:$0xff]  ;;  %v8585_v27 = vor.u32 %v8584_v40, %v8581_v21 }
 0x58e   : > { %v6737_v15 = vpop.f32.mrf.mxu3  ;;  %v6166_v53 = vadd.f32 %v6165_v57, %v16113_v31  ;;  %v16114_v57 = vld [vmem:[#allocation10_spill] sm:$0xff] }
 0x58f   : > { %v6800_v33 = vadd.f32 %v6737_v15, %v6164_v8  ;;  %v8586_v6 = vsel %vm658_vm2, %v8576_v23, %v8585_v27 }
 0x591   : > { %v15265_v34 = vadd.f32 %v7387_v60, %v6800_v33 }
 0x592   : > { %11001 = vmatmul.msk.bf16.gmra.mxu2 %vm5527_vm6, %v7955_v32 }
 0x594   : > { %v7625_v11 = vpop.f32.mrf.mxu1  ;;  %v7392_v9 = vpop.f32.mrf.mxu0 }
 0x595   : > { %v15271_v29 = vadd.f32 %v7625_v11, %v15095_v22  ;;  %v6168_v4 = vpop.f32.mrf.mxu2  ;;  %v12130_v22 = vld [vmem:[#allocation2 + $0x50] sm:$0xff]  }
 0x596   : > { %v6739_v35 = vpop.f32.mrf.mxu3  ;;  %v6169_v20 = vadd.f32 %v6168_v4, %v16114_v57  ;;  %v8588_v32 = vshrl.u32 %v12130_v22, 16 }
 0x597   : > { %v6801_v60 = vadd.f32 %v6739_v35, %v6166_v53  ;;  %10895 = vmatmul.msk.bf16.gmra.mxu1 %vm5527_vm6, %v15071_v58  ;;  %11051 = vmatmul.msk.bf16.gmra.mxu0 %vm5527_vm6, %v12768_v0  ;;  %v7956_v58 = vshrl.u32 %v11295_v30, 16  ;;  %v12770_v30 = vld [vmem:[#allocation2 + $0x4c] sm:$0xff]  }
 0x598   : > { %v8590_v31 = vrot.slane %v8588_v32, 3 }
 0x599   : > { %v15276_v41 = vadd.f32 %v7389_v36, %v6801_v60  ;;  %v8591_v36 = vshll.u32 %v12130_v22, 16  ;;  %v7958_v40 = vor.u32 %v7956_v58, %v7954_v14  ;;  %v11297_v14 = vld [vmem:[#allocation2 + $0x50] sm:$0xff] }
 0x59a   : > { %v16116_v58 = vld [vmem:[#allocation23_spill] sm:$0xff] }
 0x59b   : > { %11026 = vmatmul.msk.bf16.gmra.mxu3 %vm5527_vm6, %v8586_v6  ;;  %v7963_v11 = vsel %vm1261_vm3, %v7958_v40, %v7962_v56  ;;  %v8593_v53 = vrot.slane %v8591_v36, 4 }
 0x59c   : > { %v7627_v8 = vpop.f32.mrf.mxu1  ;;  %v7394_v15 = vpop.f32.mrf.mxu0 }
 0x59d   : > { %v15282_v54 = vadd.f32 %v7627_v8, %v15113_v26  ;;  %v6170_v33 = vpop.f32.mrf.mxu2  ;;  %v16115_v26 = vld [vmem:[#allocation9_spill] sm:$0xff]  ;;  %v8594_v22 = vor.u32 %v8593_v53, %v8590_v31 }
 0x59e   : > { %v6742_v5 = vpop.f32.mrf.mxu3  ;;  %v6171_v4 = vadd.f32 %v6170_v33, %v16115_v26 }
 0x59f   : > { %v6802_v21 = vadd.f32 %v6742_v5, %v6169_v20  ;;  %v8595_v57 = vsel %vm658_vm2, %v8585_v27, %v8594_v22  ;;  %v7968_v20 = vshll.u32 %v11297_v14, 16 }
 0x5a1   : > { %v15284_v23 = vadd.f32 %v7392_v9, %v6802_v21 }
 0x5a2   : > { %11002 = vmatmul.msk.bf16.gmra.mxu2 %vm5527_vm6, %v7963_v11  ;;  %v7970_v11 = vrot.slane %v7968_v20, 1 }
 0x5a4   : > { %v7630_v0 = vpop.f32.mrf.mxu1  ;;  %v7397_v35 = vpop.f32.mrf.mxu0 }
 0x5a5   : > { %v15290_v60 = vadd.f32 %v7630_v0, %v15120_v25  ;;  %v6173_v16 = vpop.f32.mrf.mxu2  ;;  %v12131_v25 = vld [vmem:[#allocation2 + $0x58] sm:$0xff]  }
 0x5a6   : > { %v6744_v6 = vpop.f32.mrf.mxu3  ;;  %v6174_v32 = vadd.f32 %v6173_v16, %v16116_v58  ;;  %v8597_v31 = vshrl.u32 %v12131_v25, 16 }
 0x5a7   : > { %v6803_v9 = vadd.f32 %v6744_v6, %v6171_v4  ;;  %10896 = vmatmul.msk.bf16.gmra.mxu1 %vm5527_vm6, %v15099_v37  ;;  %11052 = vmatmul.msk.bf16.gmra.mxu0 %vm5527_vm6, %v12770_v30  ;;  %v7964_v37 = vshrl.u32 %v11296_v19, 16  ;;  %v12772_v19 = vld [vmem:[#allocation2 + $0x54] sm:$0xff]  }
 0x5a8   : > { %v8599_v4 = vrot.slane %v8597_v31, 3 }
 0x5a9   : > { %v15295_v8 = vadd.f32 %v7394_v15, %v6803_v9  ;;  %v8600_v15 = vshll.u32 %v12131_v25, 16  ;;  %v7966_v0 = vor.u32 %v7964_v37, %v7962_v56  ;;  %v12122_v25 = vld [vmem:[#allocation2 + $0xc0] sm:$0xff]  }
 0x5ab   : > { %11027 = vmatmul.msk.bf16.gmra.mxu3 %vm5527_vm6, %v8595_v57  ;;  %v7971_v26 = vsel %vm1261_vm3, %v7966_v0, %v7970_v11  ;;  %v8602_v30 = vrot.slane %v8600_v15, 4 }
 0x5ac   : > { %v7632_v5 = vpop.f32.mrf.mxu1  ;;  %v7399_v33 = vpop.f32.mrf.mxu0 }
 0x5ad   : > { %v15301_v36 = vadd.f32 %v7632_v5, %v15133_v38  ;;  %v6175_v40 = vpop.f32.mrf.mxu2  ;;  %v16117_v38 = vld [vmem:[#allocation12_spill] sm:$0xff]  ;;  %v8603_v56 = vor.u32 %v8602_v30, %v8599_v4  ;;  %v7972_v4 = vshrl.u32 %v11297_v14, 16 }
 0x5ae   : > { %v6747_v21 = vpop.f32.mrf.mxu3  ;;  %v6176_v9 = vadd.f32 %v6175_v40, %v16117_v38  ;;  %v12774_v14 = vld [vmem:[#allocation2 + $0x5c] sm:$0xff]  }
 0x5af   : > { %v6804_v53 = vadd.f32 %v6747_v21, %v6174_v32  ;;  %v8604_v21 = vsel %vm658_vm2, %v8594_v22, %v8603_v56 }
 0x5b1   : > { %v15303_v27 = vadd.f32 %v7397_v35, %v6804_v53  ;;  %v11298_v35 = vld [vmem:[#allocation2 + $0x58] sm:$0xff] }
 0x5b2   : > { %11003 = vmatmul.msk.bf16.gmra.mxu2 %vm5527_vm6, %v7971_v26  ;;  %v7976_v37 = vshll.u32 %v11298_v35, 16 }
 0x5b4   : > { %v7635_v6 = vpop.f32.mrf.mxu1  ;;  %v7402_v16 = vpop.f32.mrf.mxu0  ;;  %v7978_v30 = vrot.slane %v7976_v37, 1 }
 0x5b5   : > { %v15309_v57 = vadd.f32 %v7635_v6, %v15143_v52  ;;  %v6178_v5 = vpop.f32.mrf.mxu2  ;;  %v12132_v52 = vld [vmem:[#allocation2 + $0x60] sm:$0xff]  }
 0x5b6   : > { %v6749_v20 = vpop.f32.mrf.mxu3  ;;  %v6179_v15 = vadd.f32 %v6178_v5, %v14961_v63  ;;  %v8606_v6 = vshrl.u32 %v12132_v52, 16 }
 0x5b7   : > { %v6805_v58 = vadd.f32 %v6749_v20, %v6176_v9  ;;  %10897 = vmatmul.msk.bf16.gmra.mxu1 %vm5527_vm6, %v12122_v25  ;;  %11053 = vmatmul.msk.bf16.gmra.mxu0 %vm5527_vm6, %v12772_v19  ;;  %v7974_v9 = vor.u32 %v7972_v4, %v7970_v11 }
 0x5b8   : > { %v8608_v20 = vrot.slane %v8606_v6, 3 }
 0x5b9   : > { %v15313_v32 = vadd.f32 %v7399_v33, %v6805_v58  ;;  %v8609_v33 = vshll.u32 %v12132_v52, 16  ;;  %v7979_v19 = vsel %vm1261_vm3, %v7974_v9, %v7978_v30  ;;  %v12123_v52 = vld [vmem:[#allocation2 + $0xc8] sm:$0xff]  }
 0x5bb   : > { %11028 = vmatmul.msk.bf16.gmra.mxu3 %vm5527_vm6, %v8604_v21  ;;  %v8611_v25 = vrot.slane %v8609_v33, 4 }
 0x5bc   : > { %v7637_v40 = vpop.f32.mrf.mxu1  ;;  %v7404_v31 = vpop.f32.mrf.mxu0 }
 0x5bd   : > { %v15319_v53 = vadd.f32 %v7637_v40, %v15157_v46  ;;  %v6180_v26 = vpop.f32.mrf.mxu2  ;;  %v16119_v46 = vld [vmem:[#allocation11_spill] sm:$0xff]  ;;  %v8612_v11 = vor.u32 %v8611_v25, %v8608_v20 }
 0x5be   : > { %v6752_v0 = vpop.f32.mrf.mxu3  ;;  %v6181_v58 = vadd.f32 %v6180_v26, %v16119_v46 }
 0x5bf   : > { %16118 = vst [vmem:[#allocation3_spill] sm:$0xff] %v15319_v53  ;;  %v6806_v38 = vadd.f32 %v6752_v0, %v6179_v15  ;;  %v8613_v4 = vsel %vm658_vm2, %v8603_v56, %v8612_v11 }
 0x5c1   : > { %v15321_v22 = vadd.f32 %v7402_v16, %v6806_v38  ;;  %v11299_v16 = vld [vmem:[#allocation2 + $0x60] sm:$0xff] }
 0x5c2   : > { %11004 = vmatmul.msk.bf16.gmra.mxu2 %vm5527_vm6, %v7979_v19  ;;  %v7984_v6 = vshll.u32 %v11299_v16, 16  ;;  %v16121_v38 = vld [vmem:[#allocation13_spill] sm:$0xff] }
 0x5c4   : > { %v7640_v63 = vpop.f32.mrf.mxu1  ;;  %v7407_v5 = vpop.f32.mrf.mxu0  ;;  %v7986_v46 = vrot.slane %v7984_v6, 1 }
 0x5c5   : > { %v15327_v21 = vadd.f32 %v7640_v63, %v15165_v7  ;;  %v6183_v40 = vpop.f32.mrf.mxu2  ;;  %v12133_v7 = vld [vmem:[#allocation2 + $0x68] sm:$0xff]   ;;  %v7980_v63 = vshrl.u32 %v11298_v35, 16 }
 0x5c6   : > { %v6754_v37 = vpop.f32.mrf.mxu3  ;;  %v6184_v9 = vadd.f32 %v6183_v40, %v16121_v38  ;;  %v12776_v35 = vld [vmem:[#allocation2 + $0x64] sm:$0xff]  }
 0x5c7   : > { %16120 = vst [vmem:[#allocation20_spill] sm:$0xff] %v15327_v21  ;;  %v6807_v15 = vadd.f32 %v6754_v37, %v6181_v58  ;;  %10898 = vmatmul.msk.bf16.gmra.mxu1 %vm5527_vm6, %v12123_v52  ;;  %11054 = vmatmul.msk.bf16.gmra.mxu0 %vm5527_vm6, %v12774_v14  ;;  %v8615_v58 = vshrl.u32 %v12133_v7, 16  ;;  %v7982_v37 = vor.u32 %v7980_v63, %v7978_v30  ;;  %v15347_v30 = vld [vmem:[#allocation2 + $0x68] sm:$0xff] }
 0x5c8   : > { %v11314_v63 = vld [vmem:[#allocation2 + $0x24] sm:$0xff] }
 0x5c9   : > { %v15331_v0 = vadd.f32 %v7404_v31, %v6807_v15  ;;  %v8618_v31 = vshll.u32 %v12133_v7, 16  ;;  %v7987_v52 = vsel %vm1261_vm3, %v7982_v37, %v7986_v46  ;;  %v8617_v15 = vrot.slane %v8615_v58, 3  ;;  %v15353_v58 = vld [vmem:[#allocation2 + $0x2c] sm:$0xff] }
 0x5cb   : > { %11029 = vmatmul.msk.bf16.gmra.mxu3 %vm5527_vm6, %v8613_v4  ;;  %v8620_v4 = vrot.slane %v8618_v31, 4  ;;  %v7992_v31 = vshll.u32 %v15347_v30, 16 }
 0x5cc   : > { %v7642_v26 = vpop.f32.mrf.mxu1  ;;  %v7409_v33 = vpop.f32.mrf.mxu0 }
 0x5cd   : > { %v15337_v19 = vadd.f32 %v7642_v26, %v15179_v18  ;;  %v6185_v25 = vpop.f32.mrf.mxu2  ;;  %v16123_v18 = vld [vmem:[#allocation14_spill] sm:$0xff] }
 0x5ce   : > { %v6757_v20 = vpop.f32.mrf.mxu3  ;;  %v6186_v26 = vadd.f32 %v6185_v25, %v16123_v18  ;;  %v7988_v18 = vshrl.u32 %v11299_v16, 16 }
 0x5cf   : > { %16122 = vst [vmem:[#allocation6_spill] sm:$0xff] %v15337_v19  ;;  %v6808_v14 = vadd.f32 %v6757_v20, %v6184_v9  ;;  %v8621_v9 = vor.u32 %v8620_v4, %v8617_v15  ;;  %v9465_v15 = vshll.u32 %v11314_v63, 16 }
 0x5d1   : > { %v15339_v56 = vadd.f32 %v7407_v5, %v6808_v14  ;;  %v12134_v14 = vld [vmem:[#allocation2 + $0x70] sm:$0xff]  }
 0x5d2   : > { %11005 = vmatmul.msk.bf16.gmra.mxu2 %vm5527_vm6, %v7987_v52 }
 0x5d4   : > { %v7645_v40 = vpop.f32.mrf.mxu1  ;;  %v9120_v38 = vpop.f32.mrf.mxu0 }
 0x5d5   : > { %v15345_v19 = vadd.f32 %v7645_v40, %v15188_v51  ;;  %v8192_v7 = vpop.f32.mrf.mxu2  ;;  %v8622_v51 = vsel %vm658_vm2, %v8612_v11, %v8621_v9 }
 0x5d6   : > { %v6759_v6 = vpop.f32.mrf.mxu3  ;;  %v8312_v20 = vadd.f32 %v8192_v7, %v15019_v47  ;;  %v9470_v47 = vshll.u32 %v15353_v58, 16  ;;  %v7990_v7 = vor.u32 %v7988_v18, %v7986_v46 }
 0x5d7   : > { %16124 = vst [vmem:[#allocation5_spill] sm:$0xff] %v15345_v19  ;;  %v6809_v5 = vadd.f32 %v6759_v6, %v6186_v26  ;;  %10899 = vmatmul.msk.bf16.gmra.mxu1 %vm5527_vm6, %v15141_v13  ;;  %11055 = vmatmul.msk.bf16.gmra.mxu0 %vm5527_vm6, %v12776_v35  ;;  %v8624_v26 = vshrl.u32 %v12134_v14, 16  ;;  %v8627_v35 = vshll.u32 %v12134_v14, 16 }
 0x5d9   : > { %v15355_v25 = vadd.f32 %v7409_v33, %v6809_v5  ;;  %v7994_v33 = vrot.slane %v7992_v31, 1  ;;  %v9467_v5 = vrot.slane %v9465_v15, 1  ;;  %v15373_v15 = vld [vmem:[#allocation2 + $0x70] sm:$0xff] }
 0x5db   : > { %11030 = vmatmul.msk.bf16.gmra.mxu3 %vm5527_vm6, %v8622_v51  ;;  %v9463_v51 = vshrl.u32 %v11314_v63, 16  ;;  %v7995_v21 = vsel %vm1261_vm3, %v7990_v7, %v7994_v33 }
 0x5dc   : > { %v7647_v37 = vpop.f32.mrf.mxu1  ;;  %v9122_v52 = vpop.f32.mrf.mxu0 }
 0x5dd   : > { %v15361_v13 = vadd.f32 %v7647_v37, %v15199_v39  ;;  %v8194_v40 = vpop.f32.mrf.mxu2  ;;  %v9472_v39 = vrot.slane %v9470_v47, 1  ;;  %v8626_v37 = vrot.slane %v8624_v26, 3  ;;  %v9468_v31 = vor.u32 %v9467_v5, %v9463_v51 }
 0x5de   : > { %v8842_v4 = vpop.f32.mrf.mxu3  ;;  %v8313_v6 = vadd.f32 %v8194_v40, %v15034_v61  ;;  %v15378_v40 = vld [vmem:[#allocation2 + $0x34] sm:$0xff]  ;;  %v7996_v51 = vshrl.u32 %v15347_v30, 16 }
 0x5df   : > { %16125 = vst [vmem:[#allocation21_spill] sm:$0xff] %v15361_v13  ;;  %v8962_v11 = vadd.f32 %v8842_v4, %v8312_v20  ;;  %v8629_v13 = vrot.slane %v8627_v35, 4  ;;  %v12778_v20 = vld [vmem:[#allocation2 + $0x6c] sm:$0xff]   ;;  %v9473_v46 = vsel %vm1261_vm3, %v9468_v31, %v9472_v39 }
 0x5e1   : > { %v15365_v19 = vadd.f32 %v9120_v38, %v8962_v11  ;;  %v8630_v38 = vor.u32 %v8629_v13, %v8626_v37  ;;  %v12135_v13 = vld [vmem:[#allocation2 + $0x78] sm:$0xff]  }
 0x5e2   : > { %11006 = vmatmul.msk.bf16.gmra.mxu2 %vm5527_vm6, %v7995_v21  ;;  %v16126_v21 = vld [vmem:[#allocation24_spill] sm:$0xff]  ;;  %v8633_v37 = vshrl.u32 %v12135_v13, 16  ;;  %v8636_v31 = vshll.u32 %v12135_v13, 16 }
 0x5e4   : > { %v7650_v53 = vpop.f32.mrf.mxu1  ;;  %v9125_v16 = vpop.f32.mrf.mxu0 }
 0x5e5   : > { %v15370_v14 = vadd.f32 %v7650_v53, %v15208_v44  ;;  %v8197_v63 = vpop.f32.mrf.mxu2  ;;  %v8631_v44 = vsel %vm658_vm2, %v8621_v9, %v8630_v38  ;;  %v8000_v53 = vshll.u32 %v15373_v15, 16 }
 0x5e6   : > { %v8844_v61 = vpop.f32.mrf.mxu3  ;;  %v8314_v47 = vadd.f32 %v8197_v63, %v16126_v21  ;;  %v9474_v63 = vshrl.u32 %v15353_v58, 16 }
 0x5e7   : > { %v8963_v4 = vadd.f32 %v8844_v61, %v8313_v6  ;;  %11168 = vmatmul.msk.bf16.vlgmr.msra.gmra.mxu1 %vm5527_vm6, %v9473_v46  ;;  %11056 = vmatmul.msk.bf16.gmra.mxu0 %vm5527_vm6, %v12778_v20  ;;  %v9478_v6 = vshll.u32 %v15378_v40, 16  ;;  %v16128_v20 = vld [vmem:[#allocation15_spill] sm:$0xff]  ;;  %v7998_v46 = vor.u32 %v7996_v51, %v7994_v33 }
 0x5e9   : > { %v15380_v18 = vadd.f32 %v9122_v52, %v8963_v4  ;;  %v8002_v52 = vrot.slane %v8000_v53, 1  ;;  %v9480_v21 = vrot.slane %v9478_v6, 1  ;;  %v9476_v53 = vor.u32 %v9474_v63, %v9472_v39  ;;  %v16130_v6 = vld [vmem:[#allocation25_spill] sm:$0xff] }
 0x5eb   : > { %11031 = vmatmul.msk.bf16.gmra.mxu3 %vm5527_vm6, %v8631_v44  ;;  %v8635_v44 = vrot.slane %v8633_v37, 3  ;;  %v9481_v33 = vsel %vm1261_vm3, %v9476_v53, %v9480_v21 }
 0x5ec   : > { %v7652_v26 = vpop.f32.mrf.mxu1  ;;  %v9127_v35 = vpop.f32.mrf.mxu0 }
 0x5ed   : > { %v15386_v11 = vadd.f32 %v7652_v26, %v15219_v62  ;;  %v8199_v5 = vpop.f32.mrf.mxu2  ;;  %v8003_v62 = vsel %vm1261_vm3, %v7998_v46, %v8002_v52  ;;  %v8638_v26 = vrot.slane %v8636_v31, 4  ;;  %v15405_v31 = vld [vmem:[#allocation2 + $0x3c] sm:$0xff] }
 0x5ee   : > { %v8847_v7 = vpop.f32.mrf.mxu3  ;;  %v8315_v61 = vadd.f32 %v8199_v5, %v16128_v20  ;;  %v15400_v5 = vld [vmem:[#allocation2 + $0x78] sm:$0xff]  ;;  %v9486_v63 = vshll.u32 %v15405_v31, 16 }
 0x5ef   : > { %16127 = vst [vmem:[#allocation8_spill] sm:$0xff] %v15386_v11  ;;  %v8964_v9 = vadd.f32 %v8847_v7, %v8314_v47  ;;  %v12780_v47 = vld [vmem:[#allocation2 + $0x74] sm:$0xff]  }
 0x5f1   : > { %v15392_v4 = vadd.f32 %v9125_v16, %v8964_v9  ;;  %v8639_v16 = vor.u32 %v8638_v26, %v8635_v44  ;;  %v12136_v9 = vld [vmem:[#allocation2 + $0x80] sm:$0xff]   ;;  %v8004_v26 = vshrl.u32 %v15373_v15, 16 }
 0x5f2   : > { %11007 = vmatmul.msk.bf16.gmra.mxu2 %vm5527_vm6, %v8003_v62  ;;  %v8642_v53 = vshrl.u32 %v12136_v9, 16 }
 0x5f4   : > { %v7655_v11 = vpop.f32.mrf.mxu1  ;;  %v9130_v30 = vpop.f32.mrf.mxu0 }
 0x5f5   : > { %v15397_v13 = vadd.f32 %v7655_v11, %v15227_v10  ;;  %v8202_v58 = vpop.f32.mrf.mxu2  ;;  %v8640_v10 = vsel %vm658_vm2, %v8630_v38, %v8639_v16  ;;  %v8008_v11 = vshll.u32 %v15400_v5, 16 }
 0x5f6   : > { %v8849_v7 = vpop.f32.mrf.mxu3  ;;  %v8316_v37 = vadd.f32 %v8202_v58, %v16130_v6  ;;  %v8006_v58 = vor.u32 %v8004_v26, %v8002_v52 }
 0x5f7   : > { %16129 = vst [vmem:[#allocation7_spill] sm:$0xff] %v15397_v13  ;;  %v8965_v51 = vadd.f32 %v8849_v7, %v8315_v61  ;;  %11169 = vmatmul.msk.bf16.gmra.mxu1 %vm5527_vm6, %v9481_v33  ;;  %11057 = vmatmul.msk.bf16.gmra.mxu0 %vm5527_vm6, %v12780_v47  ;;  %v8645_v47 = vshll.u32 %v12136_v9, 16  ;;  %v16132_v7 = vld [vmem:[#allocation16_spill] sm:$0xff] }
 0x5f9   : > { %v15407_v39 = vadd.f32 %v9127_v35, %v8965_v51  ;;  %v8010_v35 = vrot.slane %v8008_v11, 1  ;;  %v9482_v51 = vshrl.u32 %v15378_v40, 16 }
 0x5fb   : > { %11032 = vmatmul.msk.bf16.gmra.mxu3 %vm5527_vm6, %v8640_v10  ;;  %v9488_v10 = vrot.slane %v9486_v63, 1  ;;  %v9484_v11 = vor.u32 %v9482_v51, %v9480_v21  ;;  %v16133_v63 = vld [vmem:[#allocation18_spill] sm:$0xff] }
 0x5fc   : > { %v7657_v20 = vpop.f32.mrf.mxu1  ;;  %v9132_v46 = vpop.f32.mrf.mxu0 }
 0x5fd   : > { %v15413_v61 = vadd.f32 %v7657_v20, %v15238_v45  ;;  %v8204_v44 = vpop.f32.mrf.mxu2  ;;  %v8011_v45 = vsel %vm1261_vm3, %v8006_v58, %v8010_v35  ;;  %v8644_v20 = vrot.slane %v8642_v53, 3  ;;  %v9489_v52 = vsel %vm1261_vm3, %v9484_v11, %v9488_v10 }
 0x5fe   : > { %v8852_v62 = vpop.f32.mrf.mxu3  ;;  %v8317_v33 = vadd.f32 %v8204_v44, %v16132_v7  ;;  %v15427_v44 = vld [vmem:[#allocation2 + $0x80] sm:$0xff] }
 0x5ff   : > { %16131 = vst [vmem:[#allocation22_spill] sm:$0xff] %v15413_v61  ;;  %v8966_v38 = vadd.f32 %v8852_v62, %v8316_v37  ;;  %v8647_v61 = vrot.slane %v8645_v47, 4  ;;  %v12782_v37 = vld [vmem:[#allocation2 + $0x7c] sm:$0xff]   ;;  %v15432_v47 = vld [vmem:[#allocation2 + $0x44] sm:$0xff] }
 0x600   : > { %v9494_v58 = vshll.u32 %v15432_v47, 16 }
 0x601   : > { %v15419_v6 = vadd.f32 %v9130_v30, %v8966_v38  ;;  %v8648_v30 = vor.u32 %v8647_v61, %v8644_v20  ;;  %v12137_v61 = vld [vmem:[#allocation2 + $0x88] sm:$0xff]   ;;  %v8012_v20 = vshrl.u32 %v15400_v5, 16 }
 0x602   : > { %11008 = vmatmul.msk.bf16.gmra.mxu2 %vm5527_vm6, %v8011_v45  ;;  %v8651_v11 = vshrl.u32 %v12137_v61, 16 }
 0x604   : > { %v7660_v13 = vpop.f32.mrf.mxu1  ;;  %v9135_v15 = vpop.f32.mrf.mxu0 }
 0x605   : > { %v15424_v9 = vadd.f32 %v7660_v13, %v15246_v55  ;;  %v8207_v40 = vpop.f32.mrf.mxu2  ;;  %v8649_v55 = vsel %vm658_vm2, %v8639_v16, %v8648_v30  ;;  %v8016_v13 = vshll.u32 %v15427_v44, 16 }
 0x606   : > { %v8854_v62 = vpop.f32.mrf.mxu3  ;;  %v8318_v53 = vadd.f32 %v8207_v40, %v16133_v63  ;;  %v9490_v40 = vshrl.u32 %v15405_v31, 16  ;;  %v9496_v63 = vrot.slane %v9494_v58, 1 }
 0x607   : > { %v8967_v26 = vadd.f32 %v8854_v62, %v8317_v33  ;;  %11170 = vmatmul.msk.bf16.gmra.mxu1 %vm5527_vm6, %v9489_v52  ;;  %11058 = vmatmul.msk.bf16.gmra.mxu0 %vm5527_vm6, %v12782_v37  ;;  %v8654_v37 = vshll.u32 %v12137_v61, 16  ;;  %v8014_v52 = vor.u32 %v8012_v20, %v8010_v35  ;;  %v15459_v20 = vld [vmem:[#allocation2 + $0x4c] sm:$0xff] }
 0x609   : > { %v15434_v21 = vadd.f32 %v9132_v46, %v8967_v26  ;;  %v8018_v46 = vrot.slane %v8016_v13, 1  ;;  %v9492_v13 = vor.u32 %v9490_v40, %v9488_v10 }
 0x60b   : > { %11033 = vmatmul.msk.bf16.gmra.mxu3 %vm5527_vm6, %v8649_v55  ;;  %v8653_v55 = vrot.slane %v8651_v11, 3  ;;  %v9497_v35 = vsel %vm1261_vm3, %v9492_v13, %v9496_v63  ;;  %v12138_v11 = vld [vmem:[#allocation2 + $0x90] sm:$0xff]  }
 0x60c   : > { %v7662_v38 = vpop.f32.mrf.mxu1  ;;  %v9137_v7 = vpop.f32.mrf.mxu0 }
 0x60d   : > { %v15440_v33 = vadd.f32 %v7662_v38, %v15257_v50  ;;  %v8209_v45 = vpop.f32.mrf.mxu2  ;;  %v8019_v50 = vsel %vm1261_vm3, %v8014_v52, %v8018_v46  ;;  %v8656_v38 = vrot.slane %v8654_v37, 4  ;;  %v9502_v52 = vshll.u32 %v15459_v20, 16 }
 0x60e   : > { %v8857_v51 = vpop.f32.mrf.mxu3  ;;  %v8319_v62 = vadd.f32 %v8209_v45, %v15118_v49 }
 0x60f   : > { %16134 = vst [vmem:[#allocation10_spill] sm:$0xff] %v15440_v33  ;;  %v8968_v16 = vadd.f32 %v8857_v51, %v8318_v53  ;;  %v12784_v53 = vld [vmem:[#allocation2 + $0x84] sm:$0xff]  }
 0x610   : > { %v15454_v51 = vld [vmem:[#allocation2 + $0x88] sm:$0xff] }
 0x611   : > { %v15446_v26 = vadd.f32 %v9135_v15, %v8968_v16  ;;  %v8657_v15 = vor.u32 %v8656_v38, %v8653_v55  ;;  %v8660_v55 = vshrl.u32 %v12138_v11, 16  ;;  %v8663_v38 = vshll.u32 %v12138_v11, 16 }
 0x612   : > { %11009 = vmatmul.msk.bf16.gmra.mxu2 %vm5527_vm6, %v8019_v50  ;;  %v8020_v50 = vshrl.u32 %v15427_v44, 16 }
 0x614   : > { %v7665_v33 = vpop.f32.mrf.mxu1  ;;  %v9140_v5 = vpop.f32.mrf.mxu0 }
 0x615   : > { %v15451_v61 = vadd.f32 %v7665_v33, %v15265_v34  ;;  %v8212_v31 = vpop.f32.mrf.mxu2  ;;  %v8658_v34 = vsel %vm658_vm2, %v8648_v30, %v8657_v15  ;;  %v8024_v33 = vshll.u32 %v15454_v51, 16 }
 0x616   : > { %v8859_v49 = vpop.f32.mrf.mxu3  ;;  %v8320_v58 = vadd.f32 %v8212_v31, %v15126_v1  ;;  %v9504_v31 = vrot.slane %v9502_v52, 1  ;;  %v16136_v52 = vld [vmem:[#allocation17_spill] sm:$0xff] }
 0x617   : > { %v8969_v45 = vadd.f32 %v8859_v49, %v8319_v62  ;;  %11171 = vmatmul.msk.bf16.gmra.mxu1 %vm5527_vm6, %v9497_v35  ;;  %11059 = vmatmul.msk.bf16.gmra.mxu0 %vm5527_vm6, %v12784_v53  ;;  %v8022_v53 = vor.u32 %v8020_v50, %v8018_v46  ;;  %v9498_v49 = vshrl.u32 %v15432_v47, 16 }
 0x619   : > { %v15461_v10 = vadd.f32 %v9137_v7, %v8969_v45  ;;  %v8026_v7 = vrot.slane %v8024_v33, 1  ;;  %v8662_v45 = vrot.slane %v8660_v55, 3  ;;  %v9500_v33 = vor.u32 %v9498_v49, %v9496_v63  ;;  %v15486_v55 = vld [vmem:[#allocation2 + $0x54] sm:$0xff] }
 0x61b   : > { %11034 = vmatmul.msk.bf16.gmra.mxu3 %vm5527_vm6, %v8658_v34  ;;  %v8665_v34 = vrot.slane %v8663_v38, 4  ;;  %v9505_v46 = vsel %vm1261_vm3, %v9500_v33, %v9504_v31 }
 0x61c   : > { %v7667_v37 = vpop.f32.mrf.mxu1  ;;  %v9142_v16 = vpop.f32.mrf.mxu0 }
 0x61d   : > { %v15467_v62 = vadd.f32 %v7667_v37, %v15276_v41  ;;  %v8214_v1 = vpop.f32.mrf.mxu2  ;;  %v8027_v41 = vsel %vm1261_vm3, %v8022_v53, %v8026_v7 }
 0x61e   : > { %v8862_v40 = vpop.f32.mrf.mxu3  ;;  %v8321_v13 = vadd.f32 %v8214_v1, %v15139_v59 }
 0x61f   : > { %v8970_v30 = vadd.f32 %v8862_v40, %v8320_v58  ;;  %v12786_v58 = vld [vmem:[#allocation2 + $0x8c] sm:$0xff]  }
 0x620   : > { %v15481_v40 = vld [vmem:[#allocation2 + $0x90] sm:$0xff] }
 0x621   : > { %v15473_v35 = vadd.f32 %v9140_v5, %v8970_v30  ;;  %v8666_v5 = vor.u32 %v8665_v34, %v8662_v45  ;;  %v8032_v38 = vshll.u32 %v15481_v40, 16  ;;  %v12139_v30 = vld [vmem:[#allocation2 + $0x98] sm:$0xff]  }
 0x622   : > { %11010 = vmatmul.msk.bf16.gmra.mxu2 %vm5527_vm6, %v8027_v41  ;;  %v9510_v41 = vshll.u32 %v15486_v55, 16  ;;  %v8669_v33 = vshrl.u32 %v12139_v30, 16 }
 0x624   : > { %v7670_v37 = vpop.f32.mrf.mxu1  ;;  %v9145_v44 = vpop.f32.mrf.mxu0 }
 0x625   : > { %v15478_v11 = vadd.f32 %v7670_v37, %v15284_v23  ;;  %v8217_v47 = vpop.f32.mrf.mxu2  ;;  %v8667_v23 = vsel %vm658_vm2, %v8657_v15, %v8666_v5  ;;  %v8028_v37 = vshrl.u32 %v15454_v51, 16 }
 0x626   : > { %v8864_v59 = vpop.f32.mrf.mxu3  ;;  %v8322_v50 = vadd.f32 %v8217_v47, %v16136_v52 }
 0x627   : > { %16135 = vst [vmem:[#allocation9_spill] sm:$0xff] %v15478_v11  ;;  %v8971_v1 = vadd.f32 %v8864_v59, %v8321_v13  ;;  %11172 = vmatmul.msk.bf16.gmra.mxu1 %vm5527_vm6, %v9505_v46  ;;  %11060 = vmatmul.msk.bf16.gmra.mxu0 %vm5527_vm6, %v12786_v58  ;;  %v8672_v58 = vshll.u32 %v12139_v30, 16  ;;  %v16138_v59 = vld [vmem:[#allocation19_spill] sm:$0xff]  ;;  %v8030_v47 = vor.u32 %v8028_v37, %v8026_v7 }
 0x629   : > { %v15488_v63 = vadd.f32 %v9142_v16, %v8971_v1  ;;  %v8034_v16 = vrot.slane %v8032_v38, 1  ;;  %v9506_v1 = vshrl.u32 %v15459_v20, 16 }
 0x62b   : > { %11035 = vmatmul.msk.bf16.gmra.mxu3 %vm5527_vm6, %v8667_v23  ;;  %v9512_v23 = vrot.slane %v9510_v41, 1  ;;  %v9508_v38 = vor.u32 %v9506_v1, %v9504_v31  ;;  %v16139_v41 = vld [vmem:[#allocation4_spill] sm:$0xff] }
 0x62c   : > { %v7672_v53 = vpop.f32.mrf.mxu1  ;;  %v9147_v49 = vpop.f32.mrf.mxu0 }
 0x62d   : > { %v15494_v13 = vadd.f32 %v7672_v53, %v15295_v8  ;;  %v8219_v34 = vpop.f32.mrf.mxu2  ;;  %v8035_v8 = vsel %vm1261_vm3, %v8030_v47, %v8034_v16  ;;  %v8671_v53 = vrot.slane %v8669_v33, 3  ;;  %v9513_v7 = vsel %vm1261_vm3, %v9508_v38, %v9512_v23 }
 0x62e   : > { %v8867_v45 = vpop.f32.mrf.mxu3  ;;  %v8323_v46 = vadd.f32 %v8219_v34, %v16138_v59  ;;  %v15508_v34 = vld [vmem:[#allocation2 + $0x98] sm:$0xff] }
 0x62f   : > { %16137 = vst [vmem:[#allocation23_spill] sm:$0xff] %v15494_v13  ;;  %v8972_v15 = vadd.f32 %v8867_v45, %v8322_v50  ;;  %v8674_v13 = vrot.slane %v8672_v58, 4  ;;  %v12788_v50 = vld [vmem:[#allocation2 + $0x94] sm:$0xff]   ;;  %v15513_v58 = vld [vmem:[#allocation2 + $0x5c] sm:$0xff] }
 0x630   : > { %v9518_v47 = vshll.u32 %v15513_v58, 16 }
 0x631   : > { %v15500_v52 = vadd.f32 %v9145_v44, %v8972_v15  ;;  %v8675_v44 = vor.u32 %v8674_v13, %v8671_v53  ;;  %v12140_v13 = vld [vmem:[#allocation2 + $0xa0] sm:$0xff]   ;;  %v8036_v53 = vshrl.u32 %v15481_v40, 16 }
 0x632   : > { %11011 = vmatmul.msk.bf16.gmra.mxu2 %vm5527_vm6, %v8035_v8  ;;  %v8678_v38 = vshrl.u32 %v12140_v13, 16 }
 0x634   : > { %v7675_v11 = vpop.f32.mrf.mxu1  ;;  %v9150_v51 = vpop.f32.mrf.mxu0 }
 0x635   : > { %v15505_v30 = vadd.f32 %v7675_v11, %v15303_v27  ;;  %v8222_v20 = vpop.f32.mrf.mxu2  ;;  %v8676_v27 = vsel %vm658_vm2, %v8666_v5, %v8675_v44  ;;  %v8040_v11 = vshll.u32 %v15508_v34, 16 }
 0x636   : > { %v8869_v45 = vpop.f32.mrf.mxu3  ;;  %v8324_v33 = vadd.f32 %v8222_v20, %v16139_v41  ;;  %v9514_v20 = vshrl.u32 %v15486_v55, 16  ;;  %v9520_v41 = vrot.slane %v9518_v47, 1 }
 0x637   : > { %v8973_v37 = vadd.f32 %v8869_v45, %v8323_v46  ;;  %11173 = vmatmul.msk.bf16.gmra.mxu1 %vm5527_vm6, %v9513_v7  ;;  %11061 = vmatmul.msk.bf16.gmra.mxu0 %vm5527_vm6, %v12788_v50  ;;  %v8681_v50 = vshll.u32 %v12140_v13, 16  ;;  %v8038_v7 = vor.u32 %v8036_v53, %v8034_v16  ;;  %v15540_v53 = vld [vmem:[#allocation2 + $0x64] sm:$0xff] }
 0x639   : > { %v15515_v31 = vadd.f32 %v9147_v49, %v8973_v37  ;;  %v8042_v49 = vrot.slane %v8040_v11, 1  ;;  %v9516_v11 = vor.u32 %v9514_v20, %v9512_v23 }
 0x63b   : > { %11036 = vmatmul.msk.bf16.gmra.mxu3 %vm5527_vm6, %v8676_v27  ;;  %v8680_v27 = vrot.slane %v8678_v38, 3  ;;  %v9521_v16 = vsel %vm1261_vm3, %v9516_v11, %v9520_v41  ;;  %v12141_v38 = vld [vmem:[#allocation2 + $0xa8] sm:$0xff]  }
 0x63c   : > { %v7677_v15 = vpop.f32.mrf.mxu1  ;;  %v9152_v59 = vpop.f32.mrf.mxu0 }
 0x63d   : > { %v15521_v46 = vadd.f32 %v7677_v15, %v15313_v32  ;;  %v8224_v8 = vpop.f32.mrf.mxu2  ;;  %v8043_v32 = vsel %vm1261_vm3, %v8038_v7, %v8042_v49  ;;  %v8683_v15 = vrot.slane %v8681_v50, 4  ;;  %v9526_v7 = vshll.u32 %v15540_v53, 16 }
 0x63e   : > { %v8872_v1 = vpop.f32.mrf.mxu3  ;;  %v8325_v45 = vadd.f32 %v8224_v8, %v15186_v12 }
 0x63f   : > { %16140 = vst [vmem:[#allocation12_spill] sm:$0xff] %v15521_v46  ;;  %v8974_v5 = vadd.f32 %v8872_v1, %v8324_v33  ;;  %v12790_v33 = vld [vmem:[#allocation2 + $0x9c] sm:$0xff]  }
 0x640   : > { %v15535_v1 = vld [vmem:[#allocation2 + $0xa0] sm:$0xff] }
 0x641   : > { %v15527_v37 = vadd.f32 %v9150_v51, %v8974_v5  ;;  %v8684_v51 = vor.u32 %v8683_v15, %v8680_v27  ;;  %v8687_v27 = vshrl.u32 %v12141_v38, 16  ;;  %v8690_v15 = vshll.u32 %v12141_v38, 16 }
 0x642   : > { %11012 = vmatmul.msk.bf16.gmra.mxu2 %vm5527_vm6, %v8043_v32  ;;  %v8044_v32 = vshrl.u32 %v15508_v34, 16 }
 0x644   : > { %v7680_v46 = vpop.f32.mrf.mxu1  ;;  %v9155_v40 = vpop.f32.mrf.mxu0 }
 0x645   : > { %v15532_v13 = vadd.f32 %v7680_v46, %v15321_v22  ;;  %v8227_v55 = vpop.f32.mrf.mxu2  ;;  %v8685_v22 = vsel %vm658_vm2, %v8675_v44, %v8684_v51  ;;  %v8048_v46 = vshll.u32 %v15535_v1, 16 }
 0x646   : > { %v8874_v12 = vpop.f32.mrf.mxu3  ;;  %v8326_v47 = vadd.f32 %v8227_v55, %v15194_v48  ;;  %v9528_v55 = vrot.slane %v9526_v7, 1 }
 0x647   : > { %v8975_v8 = vadd.f32 %v8874_v12, %v8325_v45  ;;  %11174 = vmatmul.msk.bf16.gmra.mxu1 %vm5527_vm6, %v9521_v16  ;;  %11062 = vmatmul.msk.bf16.gmra.mxu0 %vm5527_vm6, %v12790_v33  ;;  %v8046_v33 = vor.u32 %v8044_v32, %v8042_v49  ;;  %v9522_v12 = vshrl.u32 %v15513_v58, 16  ;;  %v15567_v32 = vld [vmem:[#allocation2 + $0x6c] sm:$0xff] }
 0x649   : > { %v15542_v23 = vadd.f32 %v9152_v59, %v8975_v8  ;;  %v8050_v59 = vrot.slane %v8048_v46, 1  ;;  %v8689_v8 = vrot.slane %v8687_v27, 3  ;;  %v9524_v46 = vor.u32 %v9522_v12, %v9520_v41 }
 0x64a   : > { %v9534_v12 = vshll.u32 %v15567_v32, 16 }
 0x64b   : > { %11037 = vmatmul.msk.bf16.gmra.mxu3 %vm5527_vm6, %v8685_v22  ;;  %v8692_v22 = vrot.slane %v8690_v15, 4  ;;  %v9529_v49 = vsel %vm1261_vm3, %v9524_v46, %v9528_v55  ;;  %v12142_v15 = vld [vmem:[#allocation2 + $0xb0] sm:$0xff]  }
 0x64c   : > { %v7682_v50 = vpop.f32.mrf.mxu1  ;;  %v9157_v5 = vpop.f32.mrf.mxu0 }
 0x64d   : > { %v15548_v45 = vadd.f32 %v7682_v50, %v15331_v0  ;;  %v8229_v48 = vpop.f32.mrf.mxu2  ;;  %v8051_v0 = vsel %vm1261_vm3, %v8046_v33, %v8050_v59 }
 0x64e   : > { %v8877_v20 = vpop.f32.mrf.mxu3  ;;  %v8327_v11 = vadd.f32 %v8229_v48, %v15205_v24 }
 0x64f   : > { %v8976_v44 = vadd.f32 %v8877_v20, %v8326_v47  ;;  %v12792_v47 = vld [vmem:[#allocation2 + $0xa4] sm:$0xff]  }
 0x650   : > { %v15562_v20 = vld [vmem:[#allocation2 + $0xa8] sm:$0xff] }
 0x651   : > { %v15554_v16 = vadd.f32 %v9155_v40, %v8976_v44  ;;  %v8693_v40 = vor.u32 %v8692_v22, %v8689_v8  ;;  %v8056_v27 = vshll.u32 %v15562_v20, 16  ;;  %v8052_v8 = vshrl.u32 %v15535_v1, 16  ;;  %v15587_v1 = vld [vmem:[%s15994_s4] ss:$0 sm:$0xff] }
 0x652   : > { %11013 = vmatmul.msk.bf16.gmra.mxu2 %vm5527_vm6, %v8051_v0  ;;  %v8696_v22 = vshrl.u32 %v12142_v15, 16 }
 0x654   : > { %v7685_v50 = vpop.f32.mrf.mxu1  ;;  %v9160_v34 = vpop.f32.mrf.mxu0 }
 0x655   : > { %v15559_v38 = vadd.f32 %v7685_v50, %v15339_v56  ;;  %v8232_v58 = vpop.f32.mrf.mxu2  ;;  %v8694_v56 = vsel %vm658_vm2, %v8684_v51, %v8693_v40  ;;  %v8699_v50 = vshll.u32 %v12142_v15, 16 }
 0x656   : > { %v8879_v24 = vpop.f32.mrf.mxu3  ;;  %v8328_v7 = vadd.f32 %v8232_v58, %v15214_v17  ;;  %v9536_v58 = vrot.slane %v9534_v12, 1 }
 0x657   : > { %v8977_v48 = vadd.f32 %v8879_v24, %v8327_v11  ;;  %11175 = vmatmul.msk.bf16.gmra.mxu1 %vm5527_vm6, %v9529_v49  ;;  %11063 = vmatmul.msk.bf16.gmra.mxu0 %vm5527_vm6, %v12792_v47  ;;  %v8054_v47 = vor.u32 %v8052_v8, %v8050_v59  ;;  %v9530_v24 = vshrl.u32 %v15540_v53, 16  ;;  %v12794_v53 = vld [vmem:[#allocation2 + $0xac] sm:$0xff]  }
 0x659   : > { %v15569_v41 = vadd.f32 %v9157_v5, %v8977_v48  ;;  %v8058_v5 = vrot.slane %v8056_v27, 1  ;;  %v8698_v48 = vrot.slane %v8696_v22, 3  ;;  %v9532_v27 = vor.u32 %v9530_v24, %v9528_v55  ;;  %v15599_v22 = vld [vmem:[#allocation2 + $0x74] sm:$0xff] }
 0x65a   : > { %v12143_v24 = vld [vmem:[#allocation2 + $0xb8] sm:$0xff]  }
 0x65b   : > { %11038 = vmatmul.msk.bf16.gmra.mxu3 %vm5527_vm6, %v8694_v56  ;;  %v8701_v56 = vrot.slane %v8699_v50, 4  ;;  %v9537_v15 = vsel %vm1261_vm3, %v9532_v27, %v9536_v58 }
 0x65c   : > { %v7687_v44 = vpop.f32.mrf.mxu1  ;;  %v9162_v33 = vpop.f32.mrf.mxu0 }
 0x65d   : > { %v15575_v11 = vadd.f32 %v7687_v44, %v15355_v25  ;;  %v8234_v17 = vpop.f32.mrf.mxu2  ;;  %v8059_v25 = vsel %vm1261_vm3, %v8054_v47, %v8058_v5  ;;  %v8702_v12 = vor.u32 %v8701_v56, %v8698_v48 }
 0x65e   : > { %v8882_v0 = vpop.f32.mrf.mxu3  ;;  %v8329_v46 = vadd.f32 %v8234_v17, %v15225_v42 }
 0x65f   : > { %v8978_v51 = vadd.f32 %v8882_v0, %v8328_v7  ;;  %v15593_v0 = vld [vmem:[#allocation2 + $0xb0] sm:$0xff] }
 0x661   : > { %v15581_v49 = vadd.f32 %v9160_v34, %v8978_v51  ;;  %v8703_v51 = vsel %vm658_vm2, %v8693_v40, %v8702_v12  ;;  %v8708_v40 = vshll.u32 %v12143_v24, 16 }
 0x662   : > { %11014 = vmatmul.msk.bf16.gmra.mxu2 %vm5527_vm6, %v8059_v25  ;;  %v9542_v25 = vshll.u32 %v15599_v22, 16 }
 0x664   : > { %v9742_v7 = vpop.f32.mrf.mxu1  ;;  %v9165_v59 = vpop.f32.mrf.mxu0 }
 0x665   : > { %v9862_v42 = vadd.f32 %v9742_v7, %v15365_v19  ;;  %v8237_v44 = vpop.f32.mrf.mxu2  ;;  %v8060_v7 = vshrl.u32 %v15562_v20, 16 }
 0x666   : > { %v8884_v34 = vpop.f32.mrf.mxu3  ;;  %v8330_v55 = vadd.f32 %v8237_v44, %v15233_v43 }
 0x667   : > { %v9914_v17 = vadd.f32 %v15587_v1, %v9862_v42  ;;  %v8979_v8 = vadd.f32 %v8884_v34, %v8329_v46  ;;  %11176 = vmatmul.msk.bf16.gmra.mxu1 %vm5527_vm6, %v9537_v15  ;;  %11064 = vmatmul.msk.bf16.gmra.mxu0 %vm5527_vm6, %v12794_v53  ;;  %v8064_v46 = vshll.u32 %v15593_v0, 16  ;;  %v8705_v42 = vshrl.u32 %v12143_v24, 16 }
 0x669   : > { %v9962_v19 = vmax.f32 %v9914_v17, 0.0  ;;  %v15601_v50 = vadd.f32 %v9162_v33, %v8979_v8  ;;  %v8066_v27 = vrot.slane %v8064_v46, 1  ;;  %v8062_v17 = vor.u32 %v8060_v7, %v8058_v5  ;;  %v12796_v5 = vld [vmem:[#allocation2 + $0xb4] sm:$0xff]  }
 0x66a   : > { %v8707_v20 = vrot.slane %v8705_v42, 3  ;;  %v8710_v46 = vrot.slane %v8708_v40, 4  ;;  %v15633_v40 = vld [vmem:[#allocation2 + $0x7c] sm:$0xff] }
 0x66b   : > { %v10010_v47 = vpack.c.bf16 %v9962_v19, %v9962_v19  ;;  %11039 = vmatmul.msk.bf16.gmra.mxu3 %vm5527_vm6, %v8703_v51  ;;  %v8067_v51 = vsel %vm1261_vm3, %v8062_v17, %v8066_v27 }
 0x66c   : > { %v9744_v43 = vpop.f32.mrf.mxu1  ;;  %v9167_v34 = vpop.f32.mrf.mxu0 }
 0x66d   : > { %10058 = vst.msk [vmem:[%s15606_s18] sm:$0xf] %vm5246_vm5, %v10010_v47  ;;  %v9863_v33 = vadd.f32 %v9744_v43, %v15380_v18  ;;  %v8239_v56 = vpop.f32.mrf.mxu2  ;;  %v9538_v18 = vshrl.u32 %v15567_v32, 16  ;;  %v9544_v47 = vrot.slane %v9542_v25, 1 }
 0x66e   : > { %v8887_v48 = vpop.f32.mrf.mxu3  ;;  %v8331_v44 = vadd.f32 %v8239_v56, %v15244_v2  ;;  %v15627_v56 = vld [vmem:[#allocation2 + $0xb8] sm:$0xff] }
 0x66f   : > { %v9915_v53 = vadd.f32 %v15587_v1, %v9863_v33  ;;  %v8980_v15 = vadd.f32 %v8887_v48, %v8330_v55  ;;  %v9540_v33 = vor.u32 %v9538_v18, %v9536_v58  ;;  %v8711_v48 = vor.u32 %v8710_v46, %v8707_v20 }
 0x670   : > { %v8072_v17 = vshll.u32 %v15627_v56, 16 }
 0x671   : > { %v9963_v8 = vmax.f32 %v9915_v53, 0.0  ;;  %v15619_v19 = vadd.f32 %v9165_v59, %v8980_v15  ;;  %v9545_v32 = vsel %vm1261_vm3, %v9540_v33, %v9544_v47  ;;  %v8712_v15 = vsel %vm658_vm2, %v8702_v12, %v8711_v48 }
 0x672   : > { %11015 = vmatmul.msk.bf16.gmra.mxu2 %vm5527_vm6, %v8067_v51 }
 0x673   : > { %v10011_v43 = vpack.c.bf16 %v9963_v8, %v9963_v8 }
 0x674   : > { %v9747_v24 = vpop.f32.mrf.mxu1 }
 0x675   : > { %10059 = vst.msk [vmem:[%s15606_s18 + $0x4] sm:$0xf] %vm5246_vm5, %v10011_v43  ;;  %v9864_v2 = vadd.f32 %v9747_v24, %v15392_v4  ;;  %v8242_v59 = vpop.f32.mrf.mxu2  ;;  %v9170_v4 = vpop.f32.mrf.mxu0  ;;  %v8074_v43 = vrot.slane %v8072_v17, 1 }
 0x676   : > { %v8889_v55 = vpop.f32.mrf.mxu3  ;;  %v8332_v58 = vadd.f32 %v8242_v59, %v15252_v28  ;;  %v9550_v28 = vshll.u32 %v15633_v40, 16  ;;  %v9546_v59 = vshrl.u32 %v15599_v22, 16 }
 0x677   : > { %v9916_v25 = vadd.f32 %v15587_v1, %v9864_v2  ;;  %v8981_v7 = vadd.f32 %v8889_v55, %v8331_v44  ;;  %11177 = vmatmul.msk.bf16.gmra.mxu1 %vm5527_vm6, %v9545_v32  ;;  %11065 = vmatmul.msk.bf16.gmra.mxu0 %vm5527_vm6, %v12796_v5  ;;  %v12144_v44 = vld [vmem:[#allocation2 + $0xc0] sm:$0xff]  }
 0x678   : > { %v8714_v24 = vshrl.u32 %v12144_v44, 16  ;;  %v8717_v12 = vshll.u32 %v12144_v44, 16  ;;  %v9548_v44 = vor.u32 %v9546_v59, %v9544_v47 }
 0x679   : > { %v9964_v42 = vmax.f32 %v9916_v25, 0.0  ;;  %v15635_v53 = vadd.f32 %v9167_v34, %v8981_v7  ;;  %v8068_v34 = vshrl.u32 %v15593_v0, 16  ;;  %v9552_v7 = vrot.slane %v9550_v28, 1 }
 0x67a   : > { %v8719_v0 = vrot.slane %v8717_v12, 4 }
 0x67b   : > { %v10012_v8 = vpack.c.bf16 %v9964_v42, %v9964_v42  ;;  %11040 = vmatmul.msk.bf16.gmra.mxu3 %vm5527_vm6, %v8712_v15  ;;  %v8070_v55 = vor.u32 %v8068_v34, %v8066_v27  ;;  %v8716_v42 = vrot.slane %v8714_v24, 3  ;;  %v12798_v27 = vld [vmem:[#allocation2 + $0xbc] sm:$0xff]   ;;  %v9553_v22 = vsel %vm1261_vm3, %v9548_v44, %v9552_v7 }
 0x67c   : > { %v9749_v18 = vpop.f32.mrf.mxu1 }
 0x67d   : > { %10060 = vst.msk [vmem:[%s15606_s18 + $0x8] sm:$0xf] %vm5246_vm5, %v10012_v8  ;;  %v9865_v51 = vadd.f32 %v9749_v18, %v15407_v39  ;;  %v8244_v46 = vpop.f32.mrf.mxu2  ;;  %v8075_v25 = vsel %vm1261_vm3, %v8070_v55, %v8074_v43  ;;  %v9172_v17 = vpop.f32.mrf.mxu0  ;;  %v8720_v18 = vor.u32 %v8719_v0, %v8716_v42  ;;  %v8076_v42 = vshrl.u32 %v15627_v56, 16 }
 0x67e   : > { %v8892_v20 = vpop.f32.mrf.mxu3  ;;  %v8333_v5 = vadd.f32 %v8244_v46, %v15263_v3 }
 0x67f   : > { %v9917_v33 = vadd.f32 %v15587_v1, %v9865_v51  ;;  %v8982_v2 = vadd.f32 %v8892_v20, %v8332_v58  ;;  %v15656_v51 = vld [vmem:[#allocation2 + $0xc0] sm:$0xff]  ;;  %v8721_v24 = vsel %vm658_vm2, %v8711_v48, %v8720_v18 }
 0x680   : > { %v8080_v12 = vshll.u32 %v15656_v51, 16 }
 0x681   : > { %v9965_v32 = vmax.f32 %v9917_v33, 0.0  ;;  %v15648_v39 = vadd.f32 %v9170_v4, %v8982_v2  ;;  %v12145_v2 = vld [vmem:[#allocation2 + $0xc8] sm:$0xff]  }
 0x682   : > { %11016 = vmatmul.msk.bf16.gmra.mxu2 %vm5527_vm6, %v8075_v25  ;;  %v8082_v0 = vrot.slane %v8080_v12, 1  ;;  %v8723_v48 = vshrl.u32 %v12145_v2, 16 }
 0x683   : > { %v10013_v15 = vpack.c.bf16 %v9965_v32, %v9965_v32 }
 0x684   : > { %v9752_v8 = vpop.f32.mrf.mxu1 }
 0x685   : > { %10061 = vst.msk [vmem:[%s15606_s18 + $0xc] sm:$0xf] %vm5246_vm5, %v10013_v15  ;;  %v9866_v3 = vadd.f32 %v9752_v8, %v15419_v6  ;;  %v8247_v4 = vpop.f32.mrf.mxu2  ;;  %v15662_v6 = vld [vmem:[#allocation2 + $0x84] sm:$0xff]  ;;  %v9175_v55 = vpop.f32.mrf.mxu0  ;;  %v8726_v15 = vshll.u32 %v12145_v2, 16 }
 0x686   : > { %v8894_v58 = vpop.f32.mrf.mxu3  ;;  %v8334_v47 = vadd.f32 %v8247_v4, %v15271_v29  ;;  %v9558_v29 = vshll.u32 %v15662_v6, 16 }
 0x687   : > { %v9918_v28 = vadd.f32 %v15587_v1, %v9866_v3  ;;  %v8983_v20 = vadd.f32 %v8894_v58, %v8333_v5  ;;  %11178 = vmatmul.msk.bf16.gmra.mxu1 %vm5527_vm6, %v9553_v22  ;;  %11066 = vmatmul.msk.bf16.gmra.mxu0 %vm5527_vm6, %v12798_v27  ;;  %v8078_v3 = vor.u32 %v8076_v42, %v8074_v43  ;;  %v9554_v58 = vshrl.u32 %v15633_v40, 16  ;;  %v12800_v43 = vld [vmem:[#allocation2 + $0xc4] sm:$0xff]   ;;  %v12146_v42 = vld [vmem:[#allocation2 + $0xd0] sm:$0xff]  }
 0x688   : > { %v9560_v4 = vrot.slane %v9558_v29, 1  ;;  %v8728_v56 = vrot.slane %v8726_v15, 4 }
 0x689   : > { %v9966_v46 = vmax.f32 %v9918_v28, 0.0  ;;  %v15664_v34 = vadd.f32 %v9172_v17, %v8983_v20  ;;  %v8083_v22 = vsel %vm1261_vm3, %v8078_v3, %v8082_v0  ;;  %v8725_v28 = vrot.slane %v8723_v48, 3 }
 0x68a   : > { %v8732_v3 = vshrl.u32 %v12146_v42, 16 }
 0x68b   : > { %v10014_v33 = vpack.c.bf16 %v9966_v46, %v9966_v46  ;;  %11041 = vmatmul.msk.bf16.gmra.mxu3 %vm5527_vm6, %v8721_v24  ;;  %v9556_v24 = vor.u32 %v9554_v58, %v9552_v7  ;;  %v8729_v12 = vor.u32 %v8728_v56, %v8725_v28  ;;  %v9562_v28 = vshrl.u32 %v15662_v6, 16  ;;  %v11313_v6 = vld [vmem:[#allocation2 + $0xd0] sm:$0xff] }
 0x68c   : > { %v9754_v5 = vpop.f32.mrf.mxu1 }
 0x68d   : > { %10062 = vst.msk [vmem:[%s15606_s18 + $0x10] sm:$0xf] %vm5246_vm5, %v10014_v33  ;;  %v9867_v32 = vadd.f32 %v9754_v5, %v15434_v21  ;;  %v8249_v25 = vpop.f32.mrf.mxu2  ;;  %v9561_v40 = vsel %vm1261_vm3, %v9556_v24, %v9560_v4  ;;  %v11312_v33 = vld [vmem:[#allocation2 + $0xc8] sm:$0xff] }
 0x68e   : > { %v8897_v59 = vpop.f32.mrf.mxu3  ;;  %v8335_v44 = vadd.f32 %v8249_v25, %v15282_v54 }
 0x68f   : > { %v9919_v17 = vadd.f32 %v15587_v1, %v9867_v32  ;;  %v8984_v8 = vadd.f32 %v8897_v59, %v8334_v47  ;;  %v15688_v32 = vld [vmem:[#allocation2 + $0x8c] sm:$0xff]  ;;  %v8088_v59 = vshll.u32 %v11312_v33, 16 }
 0x691   : > { %v9967_v27 = vmax.f32 %v9919_v17, 0.0  ;;  %v15677_v21 = vadd.f32 %v9175_v55, %v8984_v8  ;;  %v9177_v55 = vpop.f32.mrf.mxu0  ;;  %v9566_v17 = vshll.u32 %v15688_v32, 16  ;;  %v8084_v8 = vshrl.u32 %v15656_v51, 16 }
 0x692   : > { %11017 = vmatmul.msk.bf16.gmra.mxu2 %vm5527_vm6, %v8083_v22  ;;  %v9564_v51 = vor.u32 %v9562_v28, %v9560_v4  ;;  %v8408_v28 = vld [vmem:[#allocation2 + $0xe0] sm:$0xf] }
 0x693   : > { %v10015_v20 = vpack.c.bf16 %v9967_v27, %v9967_v27  ;;  %v8735_v27 = vshll.u32 %v12146_v42, 16  ;;  %v8086_v58 = vor.u32 %v8084_v8, %v8082_v0 }
 0x694   : > { %v9757_v46 = vpop.f32.mrf.mxu1 }
 0x695   : > { %10063 = vst.msk [vmem:[%s15606_s18 + $0x14] sm:$0xf] %vm5246_vm5, %v10015_v20  ;;  %v9868_v54 = vadd.f32 %v9757_v46, %v15446_v26  ;;  %v8730_v26 = vsel %vm658_vm2, %v8720_v18, %v8729_v12  ;;  %v9568_v20 = vrot.slane %v9566_v17, 1  ;;  %v8734_v46 = vrot.slane %v8732_v3, 3 }
 0x696   : > { %v8899_v47 = vpop.f32.mrf.mxu3  ;;  %v8737_v24 = vrot.slane %v8735_v27, 4 }
 0x697   : > { %v9920_v2 = vadd.f32 %v15587_v1, %v9868_v54  ;;  %v8985_v5 = vadd.f32 %v8899_v47, %v8335_v44  ;;  %11179 = vmatmul.msk.bf16.gmra.mxu1 %vm5527_vm6, %v9561_v40  ;;  %11067 = vmatmul.msk.bf16.gmra.mxu0 %vm5527_vm6, %v12800_v43  ;;  %v8090_v44 = vrot.slane %v8088_v59, 1  ;;  %v12802_v47 = vld [vmem:[#allocation2 + $0xcc] sm:$0xff]   ;;  %v9569_v0 = vsel %vm1261_vm3, %v9564_v51, %v9568_v20 }
 0x698   : > { %v8738_v40 = vor.u32 %v8737_v24, %v8734_v46  ;;  %v8508_v51 = vunpack.c.l.b16 %v8408_v28 }
 0x699   : > { %v9968_v7 = vmax.f32 %v9920_v2, 0.0  ;;  %v15690_v29 = vadd.f32 %v9177_v55, %v8985_v5  ;;  %v8091_v56 = vsel %vm1261_vm3, %v8086_v58, %v8090_v44  ;;  %v15710_v55 = vld [vmem:[#allocation2 + $0x94] sm:$0xff]  ;;  %v9570_v58 = vshrl.u32 %v15688_v32, 16 }
 0x69a   : > { %v8739_v4 = vsel %vm658_vm2, %v8729_v12, %v8738_v40  ;;  %v9574_v42 = vshll.u32 %v15710_v55, 16  ;;  %v7786_v12 = vld [vmem:[#allocation2 + $0xd8] sm:$0x1] }
 0x69b   : > { %v10016_v25 = vpack.c.bf16 %v9968_v7, %v9968_v7  ;;  %11042 = vmatmul.msk.bf16.gmra.mxu3 %vm5527_vm6, %v8730_v26  ;;  %v8096_v7 = vshll.u32 %v11313_v6, 16  ;;  %v7886_v24 = vunpack.c.l.b16 %v7786_v12 }
 0x69c   : > { %v9759_v48 = vpop.f32.mrf.mxu1 }
 0x69d   : > { %10064 = vst.msk [vmem:[%s15606_s18 + $0x18] sm:$0xf] %vm5246_vm5, %v10016_v25  ;;  %v9869_v15 = vadd.f32 %v9759_v48, %v15461_v10  ;;  %v8092_v48 = vshrl.u32 %v11312_v33, 16 }
 0x69f   : > { %v9921_v18 = vadd.f32 %v15587_v1, %v9869_v15  ;;  %v8098_v15 = vrot.slane %v8096_v7, 1  ;;  %v8094_v27 = vor.u32 %v8092_v48, %v8090_v44 }
 0x6a1   : > { %v9969_v22 = vmax.f32 %v9921_v18, 0.0 }
 0x6a2   : > { %11018 = vmatmul.msk.bf16.gmra.mxu2 %vm5527_vm6, %v8091_v56  ;;  %v8099_v56 = vsel %vm1261_vm3, %v8094_v27, %v8098_v15 }
 0x6a3   : > { %v10017_v10 = vpack.c.bf16 %v9969_v22, %v9969_v22  ;;  %v9576_v22 = vrot.slane %v9574_v42, 1 }
 0x6a4   : > { %v9762_v54 = vpop.f32.mrf.mxu1 }
 0x6a5   : > { %10065 = vst.msk [vmem:[%s15606_s18 + $0x1c] sm:$0xf] %vm5246_vm5, %v10017_v10  ;;  %v9870_v43 = vadd.f32 %v9762_v54, %v15473_v35  ;;  %v12147_v35 = vld [vmem:[#allocation2 + $0xd8] sm:$0xff]   ;;  %v9572_v54 = vor.u32 %v9570_v58, %v9568_v20 }
 0x6a6   : > { %v8741_v17 = vshrl.u32 %v12147_v35, 16  ;;  %v8744_v8 = vshll.u32 %v12147_v35, 16 }
 0x6a7   : > { %v9922_v2 = vadd.f32 %v15587_v1, %v9870_v43  ;;  %11180 = vmatmul.msk.bf16.gmra.mxu1 %vm5527_vm6, %v9569_v0  ;;  %11068 = vmatmul.msk.bf16.gmra.mxu0 %vm5527_vm6, %v12802_v47  ;;  %v12803_v43 = vld [vmem:[#allocation2 + $0xd4] sm:$0xff]   ;;  %v9577_v32 = vsel %vm1261_vm3, %v9572_v54, %v9576_v22  ;;  %v7911_v0 = vpack.c.b16 %v7886_v24, %v7886_v24 }
 0x6a8   : > { %v8743_v46 = vrot.slane %v8741_v17, 3 }
 0x6a9   : > { %v9970_v5 = vmax.f32 %v9922_v2, 0.0  ;;  %v8104_v7 = vshll.u32 %v7911_v0, 16 }
 0x6ab   : > { %v10018_v26 = vpack.c.bf16 %v9970_v5, %v9970_v5  ;;  %11043 = vmatmul.msk.bf16.gmra.mxu3 %vm5527_vm6, %v8739_v4  ;;  %v8533_v5 = vpack.c.b16 %v8508_v51, %v8508_v51 }
 0x6ac   : > { %v9764_v59 = vpop.f32.mrf.mxu1 }
 0x6ad   : > { %10066 = vst.msk [vmem:[%s15606_s18 + $0x20] sm:$0xf] %vm5246_vm5, %v10018_v26  ;;  %v9871_v25 = vadd.f32 %v9764_v59, %v15488_v63  ;;  %v8746_v63 = vrot.slane %v8744_v8, 4  ;;  %v11329_v26 = vld [vmem:[#allocation2 + $0x9c] sm:$0xff]  ;;  %v8750_v42 = vshrl.u32 %v8533_v5, 16  ;;  %v8753_v48 = vshll.u32 %v8533_v5, 16 }
 0x6ae   : > { %v9582_v12 = vshll.u32 %v11329_v26, 16  ;;  %v9586_v5 = vshrl.u32 %v11329_v26, 16 }
 0x6af   : > { %v9923_v3 = vadd.f32 %v15587_v1, %v9871_v25  ;;  %v8747_v47 = vor.u32 %v8746_v63, %v8743_v46  ;;  %v8100_v25 = vshrl.u32 %v11313_v6, 16  ;;  %v8755_v58 = vrot.slane %v8753_v48, 4 }
 0x6b0   : > { %v9578_v6 = vshrl.u32 %v15710_v55, 16  ;;  %v9584_v46 = vrot.slane %v9582_v12, 1 }
 0x6b1   : > { %v9971_v18 = vmax.f32 %v9923_v3, 0.0  ;;  %v8748_v20 = vsel %vm658_vm2, %v8738_v40, %v8747_v47  ;;  %v8102_v8 = vor.u32 %v8100_v25, %v8098_v15  ;;  %v8106_v3 = vrot.slane %v8104_v7, 1 }
 0x6b2   : > { %11019 = vmatmul.msk.bf16.gmra.mxu2 %vm5527_vm6, %v8099_v56  ;;  %v11897_v40 = vunpack.c.h.b16 %v12147_v35  ;;  %v9580_v15 = vor.u32 %v9578_v6, %v9576_v22  ;;  %v9588_v7 = vor.u32 %v9586_v5, %v9584_v46 }
 0x6b3   : > { %v10019_v10 = vpack.c.bf16 %v9971_v18, %v9971_v18  ;;  %v8752_v18 = vrot.slane %v8750_v42, 3  ;;  %v8107_v56 = vsel %vm1261_vm3, %v8102_v8, %v8106_v3  ;;  %v11331_v42 = vld [vmem:[#allocation2 + $0xac] sm:$0xff] }
 0x6b4   : > { %v9767_v33 = vpop.f32.mrf.mxu1  ;;  %v9035_v24 = vpack.c.b16 %v8508_v51, %v11897_v40  ;;  %v9598_v8 = vshll.u32 %v11331_v42, 16 }
 0x6b5   : > { %10067 = vst.msk [vmem:[%s15606_s18 + $0x24] sm:$0xf] %vm5246_vm5, %v10019_v10  ;;  %v9872_v44 = vadd.f32 %v9767_v33, %v15500_v52  ;;  %v8756_v10 = vor.u32 %v8755_v58, %v8752_v18  ;;  %v9585_v33 = vsel %vm1261_vm3, %v9580_v15, %v9584_v46  ;;  %v11332_v46 = vld [vmem:[#allocation2 + $0xb4] sm:$0xff] }
 0x6b7   : > { %v9924_v2 = vadd.f32 %v15587_v1, %v9872_v44  ;;  %11181 = vmatmul.msk.bf16.gmra.mxu1 %vm5527_vm6, %v9577_v32  ;;  %11069 = vmatmul.msk.bf16.gmra.mxu0 %vm5527_vm6, %v12803_v43  ;;  %v8757_v55 = vsel %vm658_vm2, %v8747_v47, %v8756_v10  ;;  %v11330_v44 = vld [vmem:[#allocation2 + $0xa4] sm:$0xff]  ;;  %v15772_v10 = vpop.f32.mrf.mxu3 }
 0x6b8   : > { %v9590_v32 = vshll.u32 %v11330_v44, 16 }
 0x6b9   : > { %v9972_v4 = vmax.f32 %v9924_v2, 0.0 }
 0x6bb   : > { %v10020_v59 = vpack.c.bf16 %v9972_v4, %v9972_v4  ;;  %11044 = vmatmul.msk.bf16.gmra.mxu3 %vm5527_vm6, %v8748_v20  ;;  %v9592_v4 = vrot.slane %v9590_v32, 1 }
 0x6bc   : > { %v9769_v52 = vpop.f32.mrf.mxu1 }
 0x6bd   : > { %10068 = vst.msk [vmem:[%s15606_s18 + $0x28] sm:$0xf] %vm5246_vm5, %v10020_v59  ;;  %v9873_v17 = vadd.f32 %v9769_v52, %v15515_v31  ;;  %v9593_v52 = vsel %vm1261_vm3, %v9588_v7, %v9592_v4 }
 0x6bf   : > { %v9925_v27 = vadd.f32 %v15587_v1, %v9873_v17 }
 0x6c1   : > { %v9973_v28 = vmax.f32 %v9925_v27, 0.0  ;;  %v9600_v27 = vrot.slane %v9598_v8, 1 }
 0x6c2   : > { %11020 = vmatmul.msk.bf16.gmra.mxu2 %vm5527_vm6, %v8107_v56 }
 0x6c3   : > { %v10021_v63 = vpack.c.bf16 %v9973_v28, %v9973_v28 }
 0x6c4   : > { %v9772_v31 = vpop.f32.mrf.mxu1 }
 0x6c5   : > { %10069 = vst.msk [vmem:[%s15606_s18 + $0x2c] sm:$0xf] %vm5246_vm5, %v10021_v63  ;;  %v9874_v35 = vadd.f32 %v9772_v31, %v15527_v37 }
 0x6c7   : > { %v9926_v54 = vadd.f32 %v15587_v1, %v9874_v35  ;;  %11182 = vmatmul.msk.bf16.gmra.mxu1 %vm5527_vm6, %v9585_v33  ;;  %11070 = vmatmul.msk.bf16.gmra.mxu0 %vm5527_vm6, %v9035_v24  ;;  %v15767_v24 = vpop.f32.mrf.mxu2 }
 0x6c9   : > { %v9974_v51 = vmax.f32 %v9926_v54, 0.0  ;;  %v9602_v54 = vshrl.u32 %v11331_v42, 16 }
 0x6cb   : > { %v10022_v43 = vpack.c.bf16 %v9974_v51, %v9974_v51  ;;  %11045 = vmatmul.msk.bf16.gmra.mxu3 %vm5527_vm6, %v8757_v55 }
 0x6cc   : > { %v9774_v22 = vpop.f32.mrf.mxu1 }
 0x6cd   : > { %10070 = vst.msk [vmem:[%s15606_s18 + $0x30] sm:$0xf] %vm5246_vm5, %v10022_v43  ;;  %v9875_v37 = vadd.f32 %v9774_v22, %v15542_v23  ;;  %v9604_v22 = vor.u32 %v9602_v54, %v9600_v27 }
 0x6cf   : > { %v9927_v0 = vadd.f32 %v15587_v1, %v9875_v37  ;;  %v15780_v32 = vpop.f32.mrf.mxu2 }
 0x6d1   : > { %v9975_v2 = vmax.f32 %v9927_v0, 0.0 }
 0x6d3   : > { %v10023_v20 = vpack.c.bf16 %v9975_v2, %v9975_v2  ;;  %v15785_v2 = vpop.f32.mrf.mxu3 }
 0x6d4   : > { %v9777_v47 = vpop.f32.mrf.mxu1 }
 0x6d5   : > { %10071 = vst.msk [vmem:[%s15606_s18 + $0x34] sm:$0xf] %vm5246_vm5, %v10023_v20  ;;  %v9876_v59 = vadd.f32 %v9777_v47, %v15554_v16  ;;  %v9594_v16 = vshrl.u32 %v11330_v44, 16  ;;  %v15775_v44 = vpop.f32.mrf.mxu0 }
 0x6d7   : > { %v9928_v25 = vadd.f32 %v15587_v1, %v9876_v59  ;;  %11183 = vmatmul.msk.bf16.gmra.mxu1 %vm5527_vm6, %v9593_v52  ;;  %v9596_v58 = vor.u32 %v9594_v16, %v9592_v4  ;;  %v11333_v4 = vld [vmem:[#allocation2 + $0xbc] sm:$0xff] }
 0x6d8   : > { %v9614_v59 = vshll.u32 %v11333_v4, 16 }
 0x6d9   : > { %v9976_v23 = vmax.f32 %v9928_v25, 0.0  ;;  %v9601_v56 = vsel %vm1261_vm3, %v9596_v58, %v9600_v27  ;;  %v15793_v25 = vpop.f32.mrf.mxu2  ;;  %v11334_v58 = vld [vmem:[#allocation2 + $0xc4] sm:$0xff] }
 0x6db   : > { %v10024_v48 = vpack.c.bf16 %v9976_v23, %v9976_v23  ;;  %v15795_v42 = vpop.f32.mrf.mxu3 }
 0x6dc   : > { %v9779_v17 = vpop.f32.mrf.mxu1 }
 0x6dd   : > { %10072 = vst.msk [vmem:[%s15606_s18 + $0x38] sm:$0xf] %vm5246_vm5, %v10024_v48  ;;  %v9877_v26 = vadd.f32 %v9779_v17, %v15569_v41  ;;  %v9610_v48 = vshrl.u32 %v11332_v46, 16  ;;  %v9616_v17 = vrot.slane %v9614_v59, 1 }
 0x6df   : > { %v9929_v3 = vadd.f32 %v15587_v1, %v9877_v26 }
 0x6e1   : > { %v9977_v12 = vmax.f32 %v9929_v3, 0.0 }
 0x6e3   : > { %v10025_v40 = vpack.c.bf16 %v9977_v12, %v9977_v12 }
 0x6e4   : > { %v9782_v18 = vpop.f32.mrf.mxu1 }
 0x6e5   : > { %10073 = vst.msk [vmem:[%s15606_s18 + $0x3c] sm:$0xf] %vm5246_vm5, %v10025_v40  ;;  %v9878_v28 = vadd.f32 %v9782_v18, %v15581_v49  ;;  %v9606_v49 = vshll.u32 %v11332_v46, 16  ;;  %v15805_v18 = vpop.f32.mrf.mxu2 }
 0x6e7   : > { %v9930_v6 = vadd.f32 %v15587_v1, %v9878_v28  ;;  %11184 = vmatmul.msk.bf16.gmra.mxu1 %vm5527_vm6, %v9601_v56  ;;  %v9608_v55 = vrot.slane %v9606_v49, 1  ;;  %v15807_v56 = vpop.f32.mrf.mxu3 }
 0x6e9   : > { %v9978_v41 = vmax.f32 %v9930_v6, 0.0  ;;  %v9612_v3 = vor.u32 %v9610_v48, %v9608_v55 }
 0x6eb   : > { %v10026_v63 = vpack.c.bf16 %v9978_v41, %v9978_v41  ;;  %v9617_v12 = vsel %vm1261_vm3, %v9612_v3, %v9616_v17  ;;  %v9622_v41 = vshll.u32 %v11334_v58, 16 }
 0x6ec   : > { %v9784_v31 = vpop.f32.mrf.mxu1 }
 0x6ed   : > { %10074 = vst.msk [vmem:[%s15606_s18 + $0x40] sm:$0xf] %vm5246_vm5, %v10026_v63  ;;  %v9879_v15 = vadd.f32 %v9784_v31, %v15601_v50  ;;  %v9609_v50 = vsel %vm1261_vm3, %v9604_v22, %v9608_v55  ;;  %v9624_v49 = vrot.slane %v9622_v41, 1  ;;  %v8338_v41 = vadd.f32 %v15793_v25, %v15309_v57 }
 0x6ef   : > { %v9931_v35 = vadd.f32 %v15587_v1, %v9879_v15  ;;  %v9618_v15 = vshrl.u32 %v11333_v4, 16 }
 0x6f1   : > { %v9979_v33 = vmax.f32 %v9931_v35, 0.0  ;;  %v9620_v55 = vor.u32 %v9618_v15, %v9616_v17  ;;  %v9626_v17 = vshrl.u32 %v11334_v58, 16 }
 0x6f3   : > { %v10027_v51 = vpack.c.bf16 %v9979_v33, %v9979_v33  ;;  %v15815_v33 = vpop.f32.mrf.mxu2  ;;  %v9628_v3 = vor.u32 %v9626_v17, %v9624_v49  ;;  %v16142_v17 = vld [vmem:[#allocation20_spill] sm:$0xff] }
 0x6f4   : > { %v9787_v43 = vpop.f32.mrf.mxu1 }
 0x6f5   : > { %10075 = vst.msk [vmem:[%s15606_s18 + $0x44] sm:$0xf] %vm5246_vm5, %v10027_v51  ;;  %v9880_v37 = vadd.f32 %v9787_v43, %v15619_v19  ;;  %v15790_v19 = vpop.f32.mrf.mxu0  ;;  %v15820_v43 = vpop.f32.mrf.mxu3 }
 0x6f7   : > { %v9932_v0 = vadd.f32 %v15587_v1, %v9880_v37  ;;  %11185 = vmatmul.msk.bf16.gmra.mxu1 %vm5527_vm6, %v9609_v50  ;;  %v11335_v50 = vld [vmem:[#allocation2 + $0xcc] sm:$0xff] }
 0x6f9   : > { %v9980_v5 = vmax.f32 %v9932_v0, 0.0 }
 0x6fb   : > { %v10028_v20 = vpack.c.bf16 %v9980_v5, %v9980_v5 }
 0x6fc   : > { %v9789_v47 = vpop.f32.mrf.mxu1 }
 0x6fd   : > { %10076 = vst.msk [vmem:[%s15606_s18 + $0x48] sm:$0xf] %vm5246_vm5, %v10028_v20  ;;  %v9881_v7 = vadd.f32 %v9789_v47, %v15635_v53  ;;  %v15803_v27 = vpop.f32.mrf.mxu0  ;;  %v8336_v20 = vadd.f32 %v15767_v24, %v15290_v60  ;;  %v15832_v47 = vpop.f32.mrf.mxu2 }
 0x6ff   : > { %v9933_v52 = vadd.f32 %v15587_v1, %v9881_v7  ;;  %v9630_v7 = vshll.u32 %v11335_v50, 16  ;;  %v8986_v59 = vadd.f32 %v15772_v10, %v8336_v20 }
 0x701   : > { %v9981_v23 = vmax.f32 %v9933_v52, 0.0  ;;  %v9264_v60 = vadd.f32 %v15775_v44, %v8986_v59 }
 0x703   : > { %v10029_v26 = vpack.c.bf16 %v9981_v23, %v9981_v23  ;;  %v15836_v23 = vpop.f32.mrf.mxu3 }
 0x704   : > { %v9792_v8 = vpop.f32.mrf.mxu1 }
 0x705   : > { %10077 = vst.msk [vmem:[%s15606_s18 + $0x4c] sm:$0xf] %vm5246_vm5, %v10029_v26  ;;  %v9882_v53 = vadd.f32 %v9792_v8, %v15648_v39  ;;  %v15813_v31 = vpop.f32.mrf.mxu0  ;;  %v9632_v26 = vrot.slane %v9630_v7, 1  ;;  %v15849_v44 = vpop.f32.mrf.mxu2  ;;  %v11337_v7 = vld [vmem:[#allocation2 + $0xdc] sm:$0xff] }
 0x707   : > { %v9934_v16 = vadd.f32 %v15587_v1, %v9882_v53  ;;  %11186 = vmatmul.msk.bf16.gmra.mxu1 %vm5527_vm6, %v9617_v12  ;;  %v9633_v12 = vsel %vm1261_vm3, %v9628_v3, %v9632_v26 }
 0x709   : > { %v9982_v40 = vmax.f32 %v9934_v16, 0.0 }
 0x70b   : > { %v10030_v28 = vpack.c.bf16 %v9982_v40, %v9982_v40 }
 0x70c   : > { %v9794_v6 = vpop.f32.mrf.mxu1 }
 0x70d   : > { %10078 = vst.msk [vmem:[%s15606_s18 + $0x50] sm:$0xf] %vm5246_vm5, %v10030_v28  ;;  %v9883_v39 = vadd.f32 %v9794_v6, %v15664_v34  ;;  %v9625_v34 = vsel %vm1261_vm3, %v9620_v55, %v9624_v49  ;;  %v15825_v5 = vpop.f32.mrf.mxu0  ;;  %v15851_v28 = vpop.f32.mrf.mxu3  ;;  %v9634_v55 = vshrl.u32 %v11335_v50, 16 }
 0x70f   : > { %v9935_v46 = vadd.f32 %v15587_v1, %v9883_v39 }
 0x711   : > { %v9983_v63 = vmax.f32 %v9935_v46, 0.0 }
 0x713   : > { %v10031_v35 = vpack.c.bf16 %v9983_v63, %v9983_v63  ;;  %v8988_v63 = vadd.f32 %v15795_v42, %v8338_v41 }
 0x714   : > { %v9797_v54 = vpop.f32.mrf.mxu1 }
 0x715   : > { %10079 = vst.msk [vmem:[%s15606_s18 + $0x54] sm:$0xf] %vm5246_vm5, %v10031_v35  ;;  %v9884_v51 = vadd.f32 %v9797_v54, %v15677_v21  ;;  %v15843_v10 = vpop.f32.mrf.mxu0  ;;  %v15862_v54 = vpop.f32.mrf.mxu2 }
 0x716   : > { %v15865_v57 = vpop.f32.mrf.mxu3 }
 0x717   : > { %v9936_v22 = vadd.f32 %v15587_v1, %v9884_v51  ;;  %11187 = vmatmul.msk.bf16.gmra.mxu1 %vm5527_vm6, %v9625_v34  ;;  %v9266_v34 = vadd.f32 %v15803_v27, %v8988_v63 }
 0x719   : > { %v9984_v37 = vmax.f32 %v9936_v22, 0.0  ;;  %v9636_v22 = vor.u32 %v9634_v55, %v9632_v26  ;;  %v8340_v26 = vadd.f32 %v15815_v33, %v16142_v17 }
 0x71b   : > { %v10032_v0 = vpack.c.bf16 %v9984_v37, %v9984_v37  ;;  %v16141_v37 = vld [vmem:[#allocation3_spill] sm:$0xff] }
 0x71c   : > { %v9799_v4 = vpop.f32.mrf.mxu1  ;;  %v8339_v42 = vadd.f32 %v15805_v18, %v16141_v37 }
 0x71d   : > { %10080 = vst.msk [vmem:[%s15606_s18 + $0x58] sm:$0xf] %vm5246_vm5, %v10032_v0  ;;  %v9885_v21 = vadd.f32 %v9799_v4, %v15690_v29  ;;  %v8337_v29 = vadd.f32 %v15780_v32, %v15301_v36  ;;  %v11336_v36 = vld [vmem:[#allocation2 + $0xd4] sm:$0xff]  ;;  %v15860_v49 = vpop.f32.mrf.mxu0 }
 0x71e   : > { %v9638_v46 = vshll.u32 %v11336_v36, 16  ;;  %v8989_v20 = vadd.f32 %v15807_v56, %v8339_v42 }
 0x71f   : > { %v9937_v52 = vadd.f32 %v15587_v1, %v9885_v21  ;;  %v8987_v16 = vadd.f32 %v15785_v2, %v8337_v29  ;;  %v9642_v29 = vshrl.u32 %v11336_v36, 16 }
 0x721   : > { %v9985_v48 = vmax.f32 %v9937_v52, 0.0  ;;  %v9265_v6 = vadd.f32 %v15790_v19, %v8987_v16  ;;  %v9640_v19 = vrot.slane %v9638_v46, 1  ;;  %v9267_v52 = vadd.f32 %v15813_v31, %v8989_v20 }
 0x723   : > { %v10033_v8 = vpack.c.bf16 %v9985_v48, %v9985_v48  ;;  %v9641_v4 = vsel %vm1261_vm3, %v9636_v22, %v9640_v19  ;;  %v15878_v48 = vpop.f32.mrf.mxu2  ;;  %v9644_v31 = vor.u32 %v9642_v29, %v9640_v19 }
 0x724   : > { %v9802_v24 = vpop.f32.mrf.mxu1 }
 0x725   : > { %10081 = vst.msk [vmem:[%s15606_s18 + $0x5c] sm:$0xf] %vm5246_vm5, %v10033_v8  ;;  %v9886_v53 = vadd.f32 %v9802_v24, %v9264_v60  ;;  %v15875_v21 = vpop.f32.mrf.mxu0  ;;  %v8922_v8 = vpop.f32.mrf.mxu3  ;;  %v9646_v60 = vshll.u32 %v11337_v7, 16  ;;  %v8990_v24 = vadd.f32 %v15820_v43, %v8340_v26 }
 0x727   : > { %v9938_v40 = vadd.f32 %v15587_v1, %v9886_v53  ;;  %11188 = vmatmul.msk.bf16.gmra.mxu1 %vm5527_vm6, %v9633_v12  ;;  %v9336_v12 = vld [vmem:[#allocation2 + $0xe4] sm:$0x1]  ;;  %v9648_v16 = vrot.slane %v9646_v60, 1 }
 0x729   : > { %v9986_v58 = vmax.f32 %v9938_v40, 0.0  ;;  %v9649_v36 = vsel %vm1261_vm3, %v9644_v31, %v9648_v16 }
 0x72b   : > { %v10034_v32 = vpack.c.bf16 %v9986_v58, %v9986_v58  ;;  %v9268_v58 = vadd.f32 %v15825_v5, %v8990_v24 }
 0x72c   : > { %v9804_v39 = vpop.f32.mrf.mxu1 }
 0x72d   : > { %10082 = vst.msk [vmem:[%s15606_s18 + $0x60] sm:$0xf] %vm5246_vm5, %v10034_v32  ;;  %v9887_v2 = vadd.f32 %v9804_v39, %v9265_v6  ;;  %v9200_v32 = vpop.f32.mrf.mxu0  ;;  %v9436_v6 = vunpack.c.l.b16 %v9336_v12  ;;  %v16143_v39 = vld [vmem:[#allocation6_spill] sm:$0xff]  ;;  %v8924_v5 = vpop.f32.mrf.mxu3 }
 0x72e   : > { %v8341_v41 = vadd.f32 %v15832_v47, %v16143_v39 }
 0x72f   : > { %v9939_v15 = vadd.f32 %v15587_v1, %v9887_v2  ;;  %v8274_v2 = vpop.f32.mrf.mxu2 }
 0x730   : > { %v8991_v46 = vadd.f32 %v15836_v23, %v8341_v41  ;;  %v16146_v41 = vld [vmem:[#allocation8_spill] sm:$0xff] }
 0x731   : > { %v9987_v35 = vmax.f32 %v9939_v15, 0.0  ;;  %v9461_v15 = vpack.c.b16 %v9436_v6, %v9436_v6 }
 0x732   : > { %v9269_v19 = vadd.f32 %v15843_v10, %v8991_v46 }
 0x733   : > { %v10035_v51 = vpack.c.bf16 %v9987_v35, %v9987_v35 }
 0x734   : > { %v9807_v25 = vpop.f32.mrf.mxu1 }
 0x735   : > { %10083 = vst.msk [vmem:[%s15606_s18 + $0x64] sm:$0xf] %vm5246_vm5, %v10035_v51  ;;  %v9888_v0 = vadd.f32 %v9807_v25, %v9266_v34  ;;  %v9650_v51 = vshrl.u32 %v11337_v7, 16  ;;  %v9654_v34 = vshll.u32 %v9461_v15, 16  ;;  %v16144_v25 = vld [vmem:[#allocation5_spill] sm:$0xff]  ;;  %v9202_v37 = vpop.f32.mrf.mxu0  ;;  %v8927_v10 = vpop.f32.mrf.mxu3 }
 0x736   : > { %v8342_v22 = vadd.f32 %v15849_v44, %v16144_v25 }
 0x737   : > { %v9940_v50 = vadd.f32 %v15587_v1, %v9888_v0  ;;  %11189 = vmatmul.msk.bf16.gmra.mxu1 %vm5527_vm6, %v9641_v4  ;;  %v8277_v4 = vpop.f32.mrf.mxu2  ;;  %v9652_v20 = vor.u32 %v9650_v51, %v9648_v16 }
 0x738   : > { %v8992_v42 = vadd.f32 %v15851_v28, %v8342_v22 }
 0x739   : > { %v9988_v27 = vmax.f32 %v9940_v50, 0.0  ;;  %v9656_v50 = vrot.slane %v9654_v34, 1 }
 0x73a   : > { %v9270_v7 = vadd.f32 %v15860_v49, %v8992_v42 }
 0x73b   : > { %v10036_v59 = vpack.c.bf16 %v9988_v27, %v9988_v27  ;;  %v9657_v44 = vsel %vm1261_vm3, %v9652_v20, %v9656_v50 }
 0x73c   : > { %v9809_v18 = vpop.f32.mrf.mxu1 }
 0x73d   : > { %10084 = vst.msk [vmem:[%s15606_s18 + $0x68] sm:$0xf] %vm5246_vm5, %v10036_v59  ;;  %v9889_v56 = vadd.f32 %v9809_v18, %v9267_v52  ;;  %v16145_v18 = vld [vmem:[#allocation21_spill] sm:$0xff]  ;;  %v9205_v60 = vpop.f32.mrf.mxu0 }
 0x73e   : > { %v8343_v17 = vadd.f32 %v15862_v54, %v16145_v18  ;;  %v8344_v54 = vadd.f32 %v15878_v48, %v15370_v14  ;;  %v8345_v14 = vadd.f32 %v8274_v2, %v16146_v41 }
 0x73f   : > { %v9941_v3 = vadd.f32 %v15587_v1, %v9889_v56 }
 0x740   : > { %v8993_v26 = vadd.f32 %v15865_v57, %v8343_v17  ;;  %v8994_v57 = vadd.f32 %v8922_v8, %v8344_v54  ;;  %v16149_v54 = vld [vmem:[#allocation10_spill] sm:$0xff] }
 0x741   : > { %v9989_v53 = vmax.f32 %v9941_v3, 0.0  ;;  %v8279_v3 = vpop.f32.mrf.mxu2 }
 0x742   : > { %v9271_v29 = vadd.f32 %v15875_v21, %v8993_v26 }
 0x743   : > { %v10037_v40 = vpack.c.bf16 %v9989_v53, %v9989_v53  ;;  %v8929_v53 = vpop.f32.mrf.mxu3 }
 0x744   : > { %v9812_v33 = vpop.f32.mrf.mxu1 }
 0x745   : > { %10085 = vst.msk [vmem:[%s15606_s18 + $0x6c] sm:$0xf] %vm5246_vm5, %v10037_v40  ;;  %v9890_v43 = vadd.f32 %v9812_v33, %v9268_v58  ;;  %v9207_v58 = vpop.f32.mrf.mxu0  ;;  %v9272_v33 = vadd.f32 %v9200_v32, %v8994_v57 }
 0x747   : > { %v9942_v63 = vadd.f32 %v15587_v1, %v9890_v43  ;;  %11190 = vmatmul.msk.bf16.gmra.mxu1 %vm5527_vm6, %v9649_v36  ;;  %v8995_v43 = vadd.f32 %v8924_v5, %v8345_v14 }
 0x749   : > { %v9990_v35 = vmax.f32 %v9942_v63, 0.0  ;;  %v8282_v6 = vpop.f32.mrf.mxu2  ;;  %v9273_v15 = vadd.f32 %v9202_v37, %v8995_v43 }
 0x74a   : > { %v8348_v17 = vadd.f32 %v8282_v6, %v15424_v9 }
 0x74b   : > { %v10038_v55 = vpack.c.bf16 %v9990_v35, %v9990_v35  ;;  %v8932_v8 = vpop.f32.mrf.mxu3 }
 0x74c   : > { %v9814_v47 = vpop.f32.mrf.mxu1  ;;  %v8998_v26 = vadd.f32 %v8932_v8, %v8348_v17 }
 0x74d   : > { %10086 = vst.msk [vmem:[%s15606_s18 + $0x70] sm:$0xf] %vm5246_vm5, %v10038_v55  ;;  %v9891_v23 = vadd.f32 %v9814_v47, %v9269_v19  ;;  %v9210_v35 = vpop.f32.mrf.mxu0  ;;  %v16147_v19 = vld [vmem:[#allocation7_spill] sm:$0xff] }
 0x74e   : > { %v8346_v47 = vadd.f32 %v8277_v4, %v16147_v19 }
 0x74f   : > { %v9943_v0 = vadd.f32 %v15587_v1, %v9891_v23 }
 0x750   : > { %v8996_v2 = vadd.f32 %v8927_v10, %v8346_v47 }
 0x751   : > { %v9991_v27 = vmax.f32 %v9943_v0, 0.0  ;;  %v8284_v51 = vpop.f32.mrf.mxu2  ;;  %v16148_v0 = vld [vmem:[#allocation22_spill] sm:$0xff] }
 0x752   : > { %v9274_v23 = vadd.f32 %v9205_v60, %v8996_v2  ;;  %v8347_v20 = vadd.f32 %v8279_v3, %v16148_v0 }
 0x753   : > { %v10039_v59 = vpack.c.bf16 %v9991_v27, %v9991_v27  ;;  %v8934_v25 = vpop.f32.mrf.mxu3 }
 0x754   : > { %v9817_v52 = vpop.f32.mrf.mxu1  ;;  %v8997_v4 = vadd.f32 %v8929_v53, %v8347_v20 }
 0x755   : > { %10087 = vst.msk [vmem:[%s15606_s18 + $0x74] sm:$0xf] %vm5246_vm5, %v10039_v59  ;;  %v9892_v28 = vadd.f32 %v9817_v52, %v9270_v7  ;;  %v9212_v50 = vpop.f32.mrf.mxu0 }
 0x757   : > { %v9944_v56 = vadd.f32 %v15587_v1, %v9892_v28  ;;  %11191 = vmatmul.msk.bf16.gmra.mxu1 %vm5527_vm6, %v9657_v44  ;;  %v15919_v1 = vld [vmem:[%s15994_s4] ss:$0 sm:$0xff]  ;;  %v9275_v44 = vadd.f32 %v9207_v58, %v8997_v4 }
 0x759   : > { %v9992_v24 = vmax.f32 %v9944_v56, 0.0  ;;  %v8287_v59 = vpop.f32.mrf.mxu2 }
 0x75a   : > { %v8350_v41 = vadd.f32 %v8287_v59, %v15451_v61 }
 0x75b   : > { %v10040_v49 = vpack.c.bf16 %v9992_v24, %v9992_v24  ;;  %v8937_v10 = vpop.f32.mrf.mxu3 }
 0x75c   : > { %v9819_v12 = vpop.f32.mrf.mxu1  ;;  %v9000_v8 = vadd.f32 %v8937_v10, %v8350_v41  ;;  %v16151_v10 = vld [vmem:[#allocation23_spill] sm:$0xff] }
 0x75d   : > { %10088 = vst.msk [vmem:[%s15606_s18 + $0x78] sm:$0xf] %vm5246_vm5, %v10040_v49  ;;  %v9893_v31 = vadd.f32 %v9819_v12, %v9271_v29  ;;  %v9215_v60 = vpop.f32.mrf.mxu0  ;;  %v9276_v29 = vadd.f32 %v9210_v35, %v8998_v26 }
 0x75f   : > { %v9945_v16 = vadd.f32 %v15919_v1, %v9893_v31  ;;  %v8349_v31 = vadd.f32 %v8284_v51, %v16149_v54 }
 0x761   : > { %v9993_v40 = vmax.f32 %v9945_v16, 0.0  ;;  %v8289_v3 = vpop.f32.mrf.mxu2  ;;  %v8999_v9 = vadd.f32 %v8934_v25, %v8349_v31 }
 0x763   : > { %v10041_v21 = vpack.c.bf16 %v9993_v40, %v9993_v40  ;;  %v8939_v53 = vpop.f32.mrf.mxu3 }
 0x764   : > { %v9822_v39 = vpop.f32.mrf.mxu1 }
 0x765   : > { %10089 = vst.msk [vmem:[%s15606_s18 + $0x7c] sm:$0xf] %vm5246_vm5, %v10041_v21  ;;  %v9894_v48 = vadd.f32 %v9822_v39, %v9272_v33  ;;  %v9217_v58 = vpop.f32.mrf.mxu0  ;;  %v9277_v33 = vadd.f32 %v9212_v50, %v8999_v9 }
 0x767   : > { %v9946_v36 = vadd.f32 %v15919_v1, %v9894_v48 }
 0x769   : > { %v9994_v46 = vmax.f32 %v9946_v36, 0.0  ;;  %v8292_v6 = vpop.f32.mrf.mxu2 }
 0x76b   : > { %v10042_v63 = vpack.c.bf16 %v9994_v46, %v9994_v46  ;;  %v8942_v48 = vpop.f32.mrf.mxu3 }
 0x76c   : > { %v9824_v55 = vpop.f32.mrf.mxu1 }
 0x76d   : > { %10090 = vst.msk [vmem:[%s15606_s18 + $0x80] sm:$0xf] %vm5246_vm5, %v10042_v63  ;;  %v9895_v32 = vadd.f32 %v9824_v55, %v9273_v15  ;;  %v9278_v63 = vadd.f32 %v9215_v60, %v9000_v8  ;;  %v9220_v15 = vpop.f32.mrf.mxu0  ;;  %v8351_v55 = vadd.f32 %v8289_v3, %v15467_v62 }
 0x76f   : > { %v9947_v34 = vadd.f32 %v15919_v1, %v9895_v32  ;;  %v9001_v61 = vadd.f32 %v8939_v53, %v8351_v55 }
 0x771   : > { %v9995_v22 = vmax.f32 %v9947_v34, 0.0  ;;  %v8294_v47 = vpop.f32.mrf.mxu2  ;;  %v9279_v25 = vadd.f32 %v9217_v58, %v9001_v61 }
 0x773   : > { %v10043_v5 = vpack.c.bf16 %v9995_v22, %v9995_v22  ;;  %v8944_v51 = vpop.f32.mrf.mxu3 }
 0x774   : > { %v9827_v42 = vpop.f32.mrf.mxu1 }
 0x775   : > { %10091 = vst.msk [vmem:[%s15606_s18 + $0x84] sm:$0xf] %vm5246_vm5, %v10043_v5  ;;  %v9896_v37 = vadd.f32 %v9827_v42, %v9274_v23  ;;  %v16150_v5 = vld [vmem:[#allocation9_spill] sm:$0xff]  ;;  %v9222_v0 = vpop.f32.mrf.mxu0 }
 0x776   : > { %v8352_v23 = vadd.f32 %v8292_v6, %v16150_v5 }
 0x777   : > { %v9948_v27 = vadd.f32 %v15919_v1, %v9896_v37 }
 0x778   : > { %v9002_v62 = vadd.f32 %v8942_v48, %v8352_v23 }
 0x779   : > { %v9996_v7 = vmax.f32 %v9948_v27, 0.0  ;;  %v8297_v37 = vpop.f32.mrf.mxu2 }
 0x77a   : > { %v9280_v59 = vadd.f32 %v9220_v15, %v9002_v62 }
 0x77b   : > { %v10044_v52 = vpack.c.bf16 %v9996_v7, %v9996_v7  ;;  %v8947_v4 = vpop.f32.mrf.mxu3 }
 0x77c   : > { %v9829_v18 = vpop.f32.mrf.mxu1 }
 0x77d   : > { %10092 = vst.msk [vmem:[%s15606_s18 + $0x88] sm:$0xf] %vm5246_vm5, %v10044_v52  ;;  %v9897_v28 = vadd.f32 %v9829_v18, %v9275_v44  ;;  %v8353_v52 = vadd.f32 %v8294_v47, %v16151_v10 }
 0x77f   : > { %v9949_v56 = vadd.f32 %v15919_v1, %v9897_v28  ;;  %v9003_v18 = vadd.f32 %v8944_v51, %v8353_v52  ;;  %v9225_v28 = vpop.f32.mrf.mxu0 }
 0x781   : > { %v9997_v24 = vmax.f32 %v9949_v56, 0.0  ;;  %v8299_v56 = vpop.f32.mrf.mxu2 }
 0x783   : > { %v10045_v49 = vpack.c.bf16 %v9997_v24, %v9997_v24  ;;  %v9281_v24 = vadd.f32 %v9222_v0, %v9003_v18  ;;  %v8949_v3 = vpop.f32.mrf.mxu3 }
 0x784   : > { %v9832_v12 = vpop.f32.mrf.mxu1 }
 0x785   : > { %10093 = vst.msk [vmem:[%s15606_s18 + $0x8c] sm:$0xf] %vm5246_vm5, %v10045_v49  ;;  %v9898_v57 = vadd.f32 %v9832_v12, %v9276_v29  ;;  %v8354_v29 = vadd.f32 %v8297_v37, %v15505_v30 }
 0x787   : > { %v9950_v16 = vadd.f32 %v15919_v1, %v9898_v57  ;;  %v9004_v12 = vadd.f32 %v8947_v4, %v8354_v29  ;;  %v9227_v57 = vpop.f32.mrf.mxu0 }
 0x789   : > { %v9998_v40 = vmax.f32 %v9950_v16, 0.0  ;;  %v9282_v16 = vadd.f32 %v9225_v28, %v9004_v12 }
 0x78b   : > { %v10046_v21 = vpack.c.bf16 %v9998_v40, %v9998_v40  ;;  %v8302_v40 = vpop.f32.mrf.mxu2 }
 0x78c   : > { %v9834_v39 = vpop.f32.mrf.mxu1 }
 0x78d   : > { %10094 = vst.msk [vmem:[%s15606_s18 + $0x90] sm:$0xf] %vm5246_vm5, %v10046_v21  ;;  %v9899_v14 = vadd.f32 %v9834_v39, %v9277_v33  ;;  %v16152_v21 = vld [vmem:[#allocation12_spill] sm:$0xff]  ;;  %v8952_v39 = vpop.f32.mrf.mxu3 }
 0x78e   : > { %v8355_v33 = vadd.f32 %v8299_v56, %v16152_v21 }
 0x78f   : > { %v9951_v43 = vadd.f32 %v15919_v1, %v9899_v14 }
 0x790   : > { %v9005_v30 = vadd.f32 %v8949_v3, %v8355_v33 }
 0x791   : > { %v9999_v36 = vmax.f32 %v9951_v43, 0.0  ;;  %v9230_v43 = vpop.f32.mrf.mxu0 }
 0x792   : > { %v9283_v8 = vadd.f32 %v9227_v57, %v9005_v30 }
 0x793   : > { %v10047_v46 = vpack.c.bf16 %v9999_v36, %v9999_v36  ;;  %v8304_v15 = vpop.f32.mrf.mxu2 }
 0x794   : > { %v9837_v35 = vpop.f32.mrf.mxu1 }
 0x795   : > { %10095 = vst.msk [vmem:[%s15606_s18 + $0x94] sm:$0xf] %vm5246_vm5, %v10047_v46  ;;  %v9900_v19 = vadd.f32 %v9837_v35, %v9278_v63  ;;  %v8356_v46 = vadd.f32 %v8302_v40, %v15532_v13 }
 0x797   : > { %v9952_v32 = vadd.f32 %v15919_v1, %v9900_v19  ;;  %v9006_v35 = vadd.f32 %v8952_v39, %v8356_v46  ;;  %v8954_v19 = vpop.f32.mrf.mxu3 }
 0x799   : > { %v10000_v2 = vmax.f32 %v9952_v32, 0.0  ;;  %v9284_v32 = vadd.f32 %v9230_v43, %v9006_v35 }
 0x79b   : > { %v10048_v34 = vpack.c.bf16 %v10000_v2, %v10000_v2  ;;  %v8357_v2 = vadd.f32 %v8304_v15, %v15548_v45  ;;  %v8307_v5 = vpop.f32.mrf.mxu2 }
 0x79c   : > { %v9839_v22 = vpop.f32.mrf.mxu1  ;;  %v8358_v37 = vadd.f32 %v8307_v5, %v15559_v38 }
 0x79d   : > { %10096 = vst.msk [vmem:[%s15606_s18 + $0x98] sm:$0xf] %vm5246_vm5, %v10048_v34  ;;  %v9901_v42 = vadd.f32 %v9839_v22, %v9279_v25  ;;  %v9232_v25 = vpop.f32.mrf.mxu0  ;;  %v9007_v13 = vadd.f32 %v8954_v19, %v8357_v2 }
 0x79f   : > { %v9953_v20 = vadd.f32 %v15919_v1, %v9901_v42  ;;  %v8957_v42 = vpop.f32.mrf.mxu3  ;;  %v9285_v62 = vadd.f32 %v9232_v25, %v9007_v13 }
 0x7a0   : > { %v9008_v4 = vadd.f32 %v8957_v42, %v8358_v37 }
 0x7a1   : > { %v10001_v50 = vmax.f32 %v9953_v20, 0.0 }
 0x7a3   : > { %v10049_v27 = vpack.c.bf16 %v10001_v50, %v10001_v50 }
 0x7a4   : > { %v9842_v7 = vpop.f32.mrf.mxu1 }
 0x7a5   : > { %10097 = vst.msk [vmem:[%s15606_s18 + $0x9c] sm:$0xf] %vm5246_vm5, %v10049_v27  ;;  %v9902_v44 = vadd.f32 %v9842_v7, %v9280_v59  ;;  %v9235_v45 = vpop.f32.mrf.mxu0  ;;  %v8309_v7 = vpop.f32.mrf.mxu2 }
 0x7a6   : > { %v9286_v10 = vadd.f32 %v9235_v45, %v9008_v4 }
 0x7a7   : > { %v9954_v17 = vadd.f32 %v15919_v1, %v9902_v44  ;;  %v8959_v44 = vpop.f32.mrf.mxu3 }
 0x7a9   : > { %v10002_v26 = vmax.f32 %v9954_v17, 0.0  ;;  %v8359_v17 = vadd.f32 %v8309_v7, %v15575_v11 }
 0x7ab   : > { %v10050_v60 = vpack.c.bf16 %v10002_v26, %v10002_v26  ;;  %v9009_v28 = vadd.f32 %v8959_v44, %v8359_v17 }
 0x7ac   : > { %v9844_v49 = vpop.f32.mrf.mxu1 }
 0x7ad   : > { %10098 = vst.msk [vmem:[%s15606_s18 + $0xa0] sm:$0xf] %vm5246_vm5, %v10050_v60  ;;  %v9903_v53 = vadd.f32 %v9844_v49, %v9281_v24  ;;  %v9237_v56 = vpop.f32.mrf.mxu0 }
 0x7ae   : > { %v9287_v24 = vadd.f32 %v9237_v56, %v9009_v28 }
 0x7af   : > { %v9955_v54 = vadd.f32 %v15919_v1, %v9903_v53 }
 0x7b1   : > { %v10003_v31 = vmax.f32 %v9955_v54, 0.0 }
 0x7b3   : > { %v10051_v9 = vpack.c.bf16 %v10003_v31, %v10003_v31 }
 0x7b4   : > { %v9847_v58 = vpop.f32.mrf.mxu1 }
 0x7b5   : > { %10099 = vst.msk [vmem:[%s15606_s18 + $0xa4] sm:$0xf] %vm5246_vm5, %v10051_v9  ;;  %v9904_v6 = vadd.f32 %v9847_v58, %v9282_v16 }
 0x7b7   : > { %v9956_v41 = vadd.f32 %v15919_v1, %v9904_v6 }
 0x7b9   : > { %v10004_v14 = vmax.f32 %v9956_v41, 0.0 }
 0x7bb   : > { %v10052_v48 = vpack.c.bf16 %v10004_v14, %v10004_v14 }
 0x7bc   : > { %v9849_v36 = vpop.f32.mrf.mxu1 }
 0x7bd   : > { %10100 = vst.msk [vmem:[%s15606_s18 + $0xa8] sm:$0xf] %vm5246_vm5, %v10052_v48  ;;  %v9905_v63 = vadd.f32 %v9849_v36, %v9283_v8 }
 0x7bf   : > { %v9957_v55 = vadd.f32 %v15919_v1, %v9905_v63 }
 0x7c1   : > { %v10005_v47 = vmax.f32 %v9957_v55, 0.0 }
 0x7c3   : > { %v10053_v61 = vpack.c.bf16 %v10005_v47, %v10005_v47 }
 0x7c4   : > { %v9852_v51 = vpop.f32.mrf.mxu1 }
 0x7c5   : > { %10101 = vst.msk [vmem:[%s15606_s18 + $0xac] sm:$0xf] %vm5246_vm5, %v10053_v61  ;;  %v9906_v34 = vadd.f32 %v9852_v51, %v9284_v32 }
 0x7c7   : > { %v9958_v22 = vadd.f32 %v15919_v1, %v9906_v34 }
 0x7c9   : > { %v10006_v23 = vmax.f32 %v9958_v22, 0.0 }
 0x7cb   : > { %v10054_v0 = vpack.c.bf16 %v10006_v23, %v10006_v23 }
 0x7cc   : > { %v9854_v20 = vpop.f32.mrf.mxu1 }
 0x7cd   : > { %10102 = vst.msk [vmem:[%s15606_s18 + $0xb0] sm:$0xf] %vm5246_vm5, %v10054_v0  ;;  %v9907_v50 = vadd.f32 %v9854_v20, %v9285_v62 }
 0x7cf   : > { %v9959_v27 = vadd.f32 %v15919_v1, %v9907_v50 }
 0x7d1   : > { %v10007_v59 = vmax.f32 %v9959_v27, 0.0 }
 0x7d3   : > { %v10055_v52 = vpack.c.bf16 %v10007_v59, %v10007_v59 }
 0x7d4   : > { %v9857_v18 = vpop.f32.mrf.mxu1 }
 0x7d5   : > { %10103 = vst.msk [vmem:[%s15606_s18 + $0xb4] sm:$0xf] %vm5246_vm5, %v10055_v52  ;;  %v9908_v38 = vadd.f32 %v9857_v18, %v9286_v10 }
 0x7d7   : > { %v9960_v26 = vadd.f32 %v15919_v1, %v9908_v38 }
 0x7d9   : > { %v10008_v60 = vmax.f32 %v9960_v26, 0.0 }
 0x7db   : > { %v10056_v3 = vpack.c.bf16 %v10008_v60, %v10008_v60 }
 0x7dc   : > { %v9859_v49 = vpop.f32.mrf.mxu1 }
 0x7dd   : > { %10104 = vst.msk [vmem:[%s15606_s18 + $0xb8] sm:$0xf] %vm5246_vm5, %v10056_v3  ;;  %v9909_v29 = vadd.f32 %v9859_v49, %v9287_v24 }
 0x7df   : > { %v9961_v53 = vadd.f32 %v15919_v1, %v9909_v29 }
 0x7e1   : > { %v10009_v12 = vmax.f32 %v9961_v53, 0.0 }
 0x7e3   : > { %v10057_v54 = vpack.c.bf16 %v10009_v12, %v10009_v12 }
 0x7e5   : > { %10105 = vst.msk [vmem:[%s15606_s18 + $0xbc] sm:$0xf] %vm5246_vm5, %v10057_v54 }
 0x7e6 PF: > { %s16_s21 = sadd.s32 1, %s13014_s21  }
 0x7e7   : > { %p13_p4 = scmp.ge.s32.totalorder %s16_s21, 4  }
 0x7e9   :  { %15 = sbr.rel (!%p13_p4) target bundleno = 1 (0x1), region = 90 }

</bundles_post_ra>
